<compile_context>
chip_gen: v7x
topology: tpu7x:2x2x1
jax: 0.10.0
libtpu: 0.0.40
codegen_flags: <defaults>
</compile_context>

<pallas_src>
import functools

import jax
import jax.numpy as jnp
from jax.experimental import pallas as pl
from jax.experimental.pallas import tpu as pltpu

DEPTH = 12     # module default depth
FEATS = 2      # module default feats
UNITS = 32     # module default units
EPS = 1e-5     # BatchNorm eps (training-mode batch statistics, default affine init)


def _batchnorm_ref(h, gamma, beta):
    """Training-mode batch norm over axis 0 (biased variance), like nn.BatchNorm1d."""
    mu = jnp.mean(h, axis=0, keepdims=True)
    var = jnp.mean((h - mu) ** 2, axis=0, keepdims=True)
    return (h - mu) * jax.lax.rsqrt(var + EPS) * gamma + beta


def node_embed_gnn_kernel(x_ref, ea_ref, g_ref, s_mean_ref,
                          head_ref, wstk_ref, vstk_ref, out_ref):
    U = UNITS
    n = x_ref.shape[0]
    e = ea_ref.shape[0]
    act = jax.nn.silu
    dotf = functools.partial(jnp.dot, preferred_element_type=jnp.float32)

    g_all = g_ref[...]          # [2E, N] one-hot rows: [:E] = src gather, [E:] = dst gather
    s_mean = s_mean_ref[...]    # [N, E] scatter matrix with 1/deg pre-folded

    # MXU mean-row operators: BN statistics become tiny matmuls instead of
    # cross-sublane XLU reductions.
    mean_n = jnp.full((1, n), 1.0 / n, dtype=jnp.float32)
    mean_e = jnp.full((1, e), 1.0 / e, dtype=jnp.float32)

    def bn(h, gamma, beta, mean_row):
        # two-pass batch statistics (no E[h^2]-mu^2 cancellation), gamma folded
        # into the rsqrt scale; both reductions run on the MXU.
        mu = dotf(mean_row, h)                        # [1, U]
        d = h - mu
        var = dotf(mean_row, d * d)                   # [1, U]
        return d * (gamma * jax.lax.rsqrt(var + EPS)) + beta

    # --- head: v_lin0 (K=FEATS=2) as VPU broadcast-FMA, e_lin0 (K=1) as broadcast mul
    xin = x_ref[...]                                   # [N, FEATS]
    wv0 = head_ref[0:FEATS, :]                         # [FEATS, U]
    h0 = xin[:, 0:1] * wv0[0:1, :] + head_ref[FEATS:FEATS + 1, :]
    for f in range(1, FEATS):
        h0 = h0 + xin[:, f:f + 1] * wv0[f:f + 1, :]
    x = act(h0)                                        # [N, U]
    w = act(ea_ref[...] * head_ref[FEATS + 1:FEATS + 2, :]
            + head_ref[FEATS + 2:FEATS + 3, :])        # [E, U]

    def layer(i, x0, w0):
        w_all = wstk_ref[i]                            # [U, 5U]: [wv1|wv3|wv2|wv4|we]
        v_all = vstk_ref[i]                            # [7, U] sublane rows (see _pack_params)
        bv1 = v_all[0:1, :]
        bv2 = v_all[1:2, :]
        beg = v_all[2:3, :]                            # be + bv3 + bv4 (pre-folded)
        gv, bev = v_all[3:4, :], v_all[4:5, :]
        ge, bee = v_all[5:6, :], v_all[6:7, :]

        # one lane-dense [N,U]x[U,4U] matmul for all four node linears (bias deferred)
        x_all = dotf(x0, w_all[:, :4 * U])             # [N, 4U] = [x1|x3|x2|x4] (no bias)
        w1 = dotf(w0, w_all[:, 4 * U:5 * U])           # [E, U]  (no bias)

        # merged src + dst gather: one [2E,N]x[N,4U] matmul, then cheap row slices
        gat = dotf(g_all, x_all)                       # [2E, 4U]
        src_x3 = gat[:e, 1 * U:2 * U]                  # x3[src]  (no bias)
        dst_x2 = gat[e:, 2 * U:3 * U]                  # x2[dst]  (no bias)
        dst_x4 = gat[e:, 3 * U:4 * U]                  # x4[dst]  (no bias)

        # mean-pool of (sigmoid(w0) * x2[dst]) over edges grouped by src (deg pre-folded)
        msg = jax.nn.sigmoid(w0) * (dst_x2 + bv2)      # [E, U]
        agg = dotf(s_mean, msg)                        # [N, U]

        x1 = x_all[:, 0:U] + bv1
        x_new = x0 + act(bn(x1 + agg, gv, bev, mean_n))
        g_feat = w1 + src_x3 + dst_x4 + beg            # w1 + x3[src] + x4[dst] (+ biases)
        w_new = w0 + act(bn(g_feat, ge, bee, mean_e))
        return x_new, w_new

    # Depth loop fully unrolled (perf-review item): DEPTH=12 is short and fixed,
    # trace-time unroll gives static per-layer stack slices and lets the scheduler
    # overlap layer i's EUP/XLU tail with layer i+1's MXU pushes.
    for i in range(DEPTH):
        x, w = layer(i, x, w)

    out_ref[...] = x


def _pack_params(params):
    """Host-side packing into three buffers (cuts input DMA count, sublane-row biases)."""
    # node weight column order [x1 | x3 | x2 | x4]; e-linear weight appended.
    w_node = jnp.concatenate(
        [params["wv1"], params["wv3"], params["wv2"], params["wv4"]], axis=2)  # [D,U,4U]
    w_stack = jnp.concatenate([w_node, params["we"]], axis=2)                  # [D,U,5U]
    # per-layer vectors, one per SUBLANE row: [bv1, bv2, be+bv3+bv4, gv, bev, ge, bee]
    beg = params["be"] + params["bv3"] + params["bv4"]                         # [D,1,U]
    v_stack = jnp.concatenate(
        [params["bv1"], params["bv2"], beg,
         params["gv"], params["bev"], params["ge"], params["bee"]], axis=1)    # [D,7,U]
    head = jnp.concatenate(
        [params["wv0"], params["bv0"], params["we0"], params["be0"]], axis=0)  # [FEATS+3,U]
    return head, w_stack, v_stack


@jax.jit
def node_embed_gnn(x, edge_index, edge_attr, params):
    n = x.shape[0]
    e = edge_attr.shape[0]
    src, dst = edge_index[0], edge_index[1]

    # Glue: dense one-hot gather operators (stacked [src; dst]) + degree-folded
    # scatter-mean operator.  Kept f32 so the gathered path is bit-faithful.
    g_src = jax.nn.one_hot(src, n, dtype=jnp.float32)        # [E, N]
    g_dst = jax.nn.one_hot(dst, n, dtype=jnp.float32)        # [E, N]
    g_all = jnp.concatenate([g_src, g_dst], axis=0)          # [2E, N]
    deg = jnp.maximum(jnp.sum(g_src, axis=0), 1.0)           # [N]
    s_mean = g_src.T / deg[:, None]                          # [N, E]

    head, w_stack, v_stack = _pack_params(params)
    args = (x, edge_attr, g_all, s_mean, head, w_stack, v_stack)

    # Scoped-VMEM limit sized to the actual resident footprint (+ activation /
    # matmul-temp headroom), clamped to the smallest physical VMEM (v7x: 64 MiB).
    resident = sum(int(a.size) * a.dtype.itemsize for a in args) + n * UNITS * 4
    temps = 16 * (n + 2 * e) * (4 * UNITS) * 4
    vmem_limit = int(min(64 << 20, max(2 * resident + temps, 16 << 20)))

    vmem = pl.BlockSpec(memory_space=pltpu.MemorySpace.VMEM)
    return pl.pallas_call(
        node_embed_gnn_kernel,
        out_shape=jax.ShapeDtypeStruct((n, UNITS), jnp.float32),
        in_specs=[vmem] * len(args),
        out_specs=vmem,
        compiler_params=pltpu.CompilerParams(vmem_limit_bytes=vmem_limit),
    )(*args)


def init_params(key):
    """Deterministic PyTorch-Linear-style init (uniform +-1/sqrt(fan_in))."""
    def linear(k, fan_in, fan_out):
        k1, k2 = jax.random.split(k)
        bound = 1.0 / jnp.sqrt(jnp.float32(fan_in))
        w = jax.random.uniform(k1, (fan_in, fan_out), jnp.float32, -bound, bound)
        b = jax.random.uniform(k2, (1, fan_out), jnp.float32, -bound, bound)
        return w, b

    def stacked(k):
        ks = jax.random.split(k, DEPTH)
        ws, bs = zip(*(linear(kk, UNITS, UNITS) for kk in ks))
        return jnp.stack(ws), jnp.stack(bs)   # [D, U, U], [D, 1, U]

    keys = jax.random.split(key, 7)
    wv0, bv0 = linear(keys[0], FEATS, UNITS)
    we0, be0 = linear(keys[1], 1, UNITS)
    wv1, bv1 = stacked(keys[2])
    wv2, bv2 = stacked(keys[3])
    wv3, bv3 = stacked(keys[4])
    wv4, bv4 = stacked(keys[5])
    we, be = stacked(keys[6])
    ones = jnp.ones((DEPTH, 1, UNITS), jnp.float32)
    zeros = jnp.zeros((DEPTH, 1, UNITS), jnp.float32)
    return dict(
        wv0=wv0, bv0=bv0, we0=we0, be0=be0,
        wv1=wv1, wv2=wv2, wv3=wv3, wv4=wv4,
        bv1=bv1, bv2=bv2, bv3=bv3, bv4=bv4,
        we=we, be=be,
        gv=ones, bev=zeros, ge=ones, bee=zeros,   # BatchNorm affine defaults
    )


def reference(x, edge_index, edge_attr, p):
    """Pure-JAX reference mirroring the PyTorch forward."""
    act = jax.nn.silu
    src, dst = edge_index[0], edge_index[1]
    n = x.shape[0]
    x = act(x @ p["wv0"] + p["bv0"])
    w = act(edge_attr @ p["we0"] + p["be0"])
    for i in range(DEPTH):
        x0, w0 = x, w
        x1 = x0 @ p["wv1"][i] + p["bv1"][i]
        x2 = x0 @ p["wv2"][i] + p["bv2"][i]
        x3 = x0 @ p["wv3"][i] + p["bv3"][i]
        x4 = x0 @ p["wv4"][i] + p["bv4"][i]
        w1 = w0 @ p["we"][i] + p["be"][i]
        w2 = jax.nn.sigmoid(w0)
        msg = w2 * x2[dst]
        seg = jax.ops.segment_sum(msg, src, num_segments=n)
        cnt = jnp.maximum(
            jax.ops.segment_sum(jnp.ones(src.shape, jnp.float32), src, num_segments=n), 1.0)
        agg = seg / cnt[:, None]
        x = x0 + act(_batchnorm_ref(x1 + agg, p["gv"][i], p["bev"][i]))
        g_feat = w1 + x3[src] + x4[dst]
        w = w0 + act(_batchnorm_ref(g_feat, p["ge"][i], p["bee"][i]))
    return x


if __name__ == "__main__":
    key = jax.random.PRNGKey(0)
    kx, ke, ka, kp = jax.random.split(key, 4)

    N, E = 16, 32
    x = jax.random.normal(kx, (N, FEATS), jnp.float32)

    # Ring edges (so every node has an outgoing edge) + random extra edges.
    ring_src = jnp.arange(N, dtype=jnp.int32)
    ring_dst = (ring_src + 1) % N
    rand_src = jax.random.randint(ke, (E - N,), 0, N, dtype=jnp.int32)
    rand_dst = jax.random.randint(jax.random.fold_in(ke, 1), (E - N,), 0, N, dtype=jnp.int32)
    edge_index = jnp.stack([jnp.concatenate([ring_src, rand_src]),
                            jnp.concatenate([ring_dst, rand_dst])])
    edge_attr = jax.random.normal(ka, (E, 1), jnp.float32)

    params = init_params(kp)

    out = node_embed_gnn(x, edge_index, edge_attr, params)
    out = jax.block_until_ready(out)

    ref = reference(x, edge_index, edge_attr, params)
    assert out.shape == (N, UNITS), out.shape
    assert jnp.allclose(out, ref, atol=2e-3, rtol=2e-3), float(jnp.max(jnp.abs(out - ref)))
    print("KERNEL_OK")
</pallas_src>

<mosaic_0001>
module attributes {stable_mosaic.version = 11 : i64} {
  func.func @node_embed_gnn_kernel(%arg0: memref<16x2xf32, #tpu.memory_space<vmem>>, %arg1: memref<32x1xf32, #tpu.memory_space<vmem>>, %arg2: memref<64x16xf32, #tpu.memory_space<vmem>>, %arg3: memref<16x32xf32, #tpu.memory_space<vmem>>, %arg4: memref<5x32xf32, #tpu.memory_space<vmem>>, %arg5: memref<12x32x160xf32, #tpu.memory_space<vmem>>, %arg6: memref<12x7x32xf32, #tpu.memory_space<vmem>>, %arg7: memref<16x32xf32, #tpu.memory_space<vmem>>) attributes {dimension_semantics = [], scalar_prefetch = 0 : i64, scratch_operands = 0 : i64, tpu.core_type = #tpu.core_type<tc>} {
    %c0 = arith.constant 0 : index
    %c0_0 = arith.constant 0 : index
    %0 = vector.load %arg2[%c0, %c0_0] : memref<64x16xf32, #tpu.memory_space<vmem>>, vector<64x16xf32>
    %c0_1 = arith.constant 0 : index
    %c0_2 = arith.constant 0 : index
    %1 = vector.load %arg3[%c0_1, %c0_2] : memref<16x32xf32, #tpu.memory_space<vmem>>, vector<16x32xf32>
    %cst = arith.constant 6.250000e-02 : f32
    %2 = vector.broadcast %cst : f32 to vector<1x16xf32>
    %cst_3 = arith.constant 3.125000e-02 : f32
    %3 = vector.broadcast %cst_3 : f32 to vector<1x32xf32>
    %c0_4 = arith.constant 0 : index
    %c0_5 = arith.constant 0 : index
    %4 = vector.load %arg0[%c0_4, %c0_5] : memref<16x2xf32, #tpu.memory_space<vmem>>, vector<16x2xf32>
    %c0_6 = arith.constant 0 : index
    %c0_7 = arith.constant 0 : index
    %5 = vector.load %arg4[%c0_6, %c0_7] : memref<5x32xf32, #tpu.memory_space<vmem>>, vector<2x32xf32>
    %6 = vector.extract_strided_slice %4 {offsets = [0, 0], sizes = [16, 1], strides = [1, 1]} : vector<16x2xf32> to vector<16x1xf32>
    %7 = vector.extract_strided_slice %5 {offsets = [0, 0], sizes = [1, 32], strides = [1, 1]} : vector<2x32xf32> to vector<1x32xf32>
    %8 = vector.broadcast %6 : vector<16x1xf32> to vector<16x32xf32>
    %9 = vector.broadcast %7 : vector<1x32xf32> to vector<16x32xf32>
    %10 = arith.mulf %8, %9 : vector<16x32xf32>
    %c2 = arith.constant 2 : index
    %c0_8 = arith.constant 0 : index
    %11 = vector.load %arg4[%c2, %c0_8] : memref<5x32xf32, #tpu.memory_space<vmem>>, vector<1x32xf32>
    %12 = vector.broadcast %11 : vector<1x32xf32> to vector<16x32xf32>
    %13 = arith.addf %10, %12 : vector<16x32xf32>
    %14 = vector.extract_strided_slice %4 {offsets = [0, 1], sizes = [16, 1], strides = [1, 1]} : vector<16x2xf32> to vector<16x1xf32>
    %15 = vector.extract_strided_slice %5 {offsets = [1, 0], sizes = [1, 32], strides = [1, 1]} : vector<2x32xf32> to vector<1x32xf32>
    %16 = vector.broadcast %14 : vector<16x1xf32> to vector<16x32xf32>
    %17 = vector.broadcast %15 : vector<1x32xf32> to vector<16x32xf32>
    %18 = arith.mulf %16, %17 : vector<16x32xf32>
    %19 = arith.addf %13, %18 : vector<16x32xf32>
    %20 = arith.negf %19 : vector<16x32xf32>
    %21 = math.exp %20 : vector<16x32xf32>
    %cst_9 = arith.constant 1.000000e+00 : f32
    %22 = vector.broadcast %cst_9 : f32 to vector<16x32xf32>
    %23 = arith.addf %22, %21 : vector<16x32xf32>
    %24 = arith.divf %22, %23 : vector<16x32xf32>
    %25 = arith.mulf %19, %24 : vector<16x32xf32>
    %c0_10 = arith.constant 0 : index
    %c0_11 = arith.constant 0 : index
    %26 = vector.load %arg1[%c0_10, %c0_11] : memref<32x1xf32, #tpu.memory_space<vmem>>, vector<32x1xf32>
    %c3 = arith.constant 3 : index
    %c0_12 = arith.constant 0 : index
    %27 = vector.load %arg4[%c3, %c0_12] : memref<5x32xf32, #tpu.memory_space<vmem>>, vector<1x32xf32>
    %28 = vector.broadcast %26 : vector<32x1xf32> to vector<32x32xf32>
    %29 = vector.broadcast %27 : vector<1x32xf32> to vector<32x32xf32>
    %30 = arith.mulf %28, %29 : vector<32x32xf32>
    %c4 = arith.constant 4 : index
    %c0_13 = arith.constant 0 : index
    %31 = vector.load %arg4[%c4, %c0_13] : memref<5x32xf32, #tpu.memory_space<vmem>>, vector<1x32xf32>
    %32 = vector.broadcast %31 : vector<1x32xf32> to vector<32x32xf32>
    %33 = arith.addf %30, %32 : vector<32x32xf32>
    %34 = arith.negf %33 : vector<32x32xf32>
    %35 = math.exp %34 : vector<32x32xf32>
    %cst_14 = arith.constant 1.000000e+00 : f32
    %36 = vector.broadcast %cst_14 : f32 to vector<32x32xf32>
    %37 = arith.addf %36, %35 : vector<32x32xf32>
    %38 = arith.divf %36, %37 : vector<32x32xf32>
    %39 = arith.mulf %33, %38 : vector<32x32xf32>
    %c0_15 = arith.constant 0 : index
    %c0_16 = arith.constant 0 : index
    %c0_17 = arith.constant 0 : index
    %40 = vector.load %arg5[%c0_15, %c0_16, %c0_17] : memref<12x32x160xf32, #tpu.memory_space<vmem>>, vector<1x32x160xf32>
    %41 = vector.shape_cast %40 : vector<1x32x160xf32> to vector<32x160xf32>
    %c0_18 = arith.constant 0 : index
    %c0_19 = arith.constant 0 : index
    %c0_20 = arith.constant 0 : index
    %42 = vector.load %arg6[%c0_18, %c0_19, %c0_20] : memref<12x7x32xf32, #tpu.memory_space<vmem>>, vector<1x7x32xf32>
    %43 = vector.shape_cast %42 : vector<1x7x32xf32> to vector<7x32xf32>
    %44 = vector.extract_strided_slice %43 {offsets = [0, 0], sizes = [1, 32], strides = [1, 1]} : vector<7x32xf32> to vector<1x32xf32>
    %45 = vector.extract_strided_slice %43 {offsets = [1, 0], sizes = [1, 32], strides = [1, 1]} : vector<7x32xf32> to vector<1x32xf32>
    %46 = vector.extract_strided_slice %43 {offsets = [2, 0], sizes = [1, 32], strides = [1, 1]} : vector<7x32xf32> to vector<1x32xf32>
    %47 = vector.extract_strided_slice %43 {offsets = [3, 0], sizes = [1, 32], strides = [1, 1]} : vector<7x32xf32> to vector<1x32xf32>
    %48 = vector.extract_strided_slice %43 {offsets = [4, 0], sizes = [1, 32], strides = [1, 1]} : vector<7x32xf32> to vector<1x32xf32>
    %49 = vector.extract_strided_slice %43 {offsets = [5, 0], sizes = [1, 32], strides = [1, 1]} : vector<7x32xf32> to vector<1x32xf32>
    %50 = vector.extract_strided_slice %43 {offsets = [6, 0], sizes = [1, 32], strides = [1, 1]} : vector<7x32xf32> to vector<1x32xf32>
    %51 = vector.extract_strided_slice %41 {offsets = [0, 0], sizes = [32, 128], strides = [1, 1]} : vector<32x160xf32> to vector<32x128xf32>
    %cst_21 = arith.constant dense<0.000000e+00> : vector<16x128xf32>
    %52 = tpu.matmul %25, %51, %cst_21 {dimension_numbers = #tpu.dot_dimension_numbers<[1], [0], [0], [1], [0, 0, 1, 1], [], []>} : vector<16x32xf32>, vector<32x128xf32>, vector<16x128xf32> -> vector<16x128xf32>
    %53 = vector.extract_strided_slice %41 {offsets = [0, 128], sizes = [32, 32], strides = [1, 1]} : vector<32x160xf32> to vector<32x32xf32>
    %cst_22 = arith.constant dense<0.000000e+00> : vector<32x32xf32>
    %54 = tpu.matmul %39, %53, %cst_22 {dimension_numbers = #tpu.dot_dimension_numbers<[1], [0], [0], [1], [0, 0, 1, 1], [], []>} : vector<32x32xf32>, vector<32x32xf32>, vector<32x32xf32> -> vector<32x32xf32>
    %cst_23 = arith.constant dense<0.000000e+00> : vector<64x128xf32>
    %55 = tpu.matmul %0, %52, %cst_23 {dimension_numbers = #tpu.dot_dimension_numbers<[1], [0], [0], [1], [0, 0, 1, 1], [], []>} : vector<64x16xf32>, vector<16x128xf32>, vector<64x128xf32> -> vector<64x128xf32>
    %56 = vector.extract_strided_slice %55 {offsets = [0, 32], sizes = [32, 32], strides = [1, 1]} : vector<64x128xf32> to vector<32x32xf32>
    %57 = vector.extract_strided_slice %55 {offsets = [32, 64], sizes = [32, 32], strides = [1, 1]} : vector<64x128xf32> to vector<32x32xf32>
    %58 = vector.extract_strided_slice %55 {offsets = [32, 96], sizes = [32, 32], strides = [1, 1]} : vector<64x128xf32> to vector<32x32xf32>
    %59 = arith.negf %39 : vector<32x32xf32>
    %60 = math.exp %59 : vector<32x32xf32>
    %cst_24 = arith.constant 1.000000e+00 : f32
    %61 = vector.broadcast %cst_24 : f32 to vector<32x32xf32>
    %62 = arith.addf %61, %60 : vector<32x32xf32>
    %63 = arith.divf %61, %62 : vector<32x32xf32>
    %64 = vector.broadcast %45 : vector<1x32xf32> to vector<32x32xf32>
    %65 = arith.addf %57, %64 : vector<32x32xf32>
    %66 = arith.mulf %63, %65 : vector<32x32xf32>
    %cst_25 = arith.constant dense<0.000000e+00> : vector<16x32xf32>
    %67 = tpu.matmul %1, %66, %cst_25 {dimension_numbers = #tpu.dot_dimension_numbers<[1], [0], [0], [1], [0, 0, 1, 1], [], []>} : vector<16x32xf32>, vector<32x32xf32>, vector<16x32xf32> -> vector<16x32xf32>
    %68 = vector.extract_strided_slice %52 {offsets = [0, 0], sizes = [16, 32], strides = [1, 1]} : vector<16x128xf32> to vector<16x32xf32>
    %69 = vector.broadcast %44 : vector<1x32xf32> to vector<16x32xf32>
    %70 = arith.addf %68, %69 : vector<16x32xf32>
    %71 = arith.addf %70, %67 : vector<16x32xf32>
    %cst_26 = arith.constant dense<0.000000e+00> : vector<1x32xf32>
    %72 = tpu.matmul %2, %71, %cst_26 {dimension_numbers = #tpu.dot_dimension_numbers<[1], [0], [0], [1], [0, 0, 1, 1], [], []>} : vector<1x16xf32>, vector<16x32xf32>, vector<1x32xf32> -> vector<1x32xf32>
    %73 = vector.broadcast %72 : vector<1x32xf32> to vector<16x32xf32>
    %74 = arith.subf %71, %73 : vector<16x32xf32>
    %75 = arith.mulf %74, %74 : vector<16x32xf32>
    %cst_27 = arith.constant dense<0.000000e+00> : vector<1x32xf32>
    %76 = tpu.matmul %2, %75, %cst_27 {dimension_numbers = #tpu.dot_dimension_numbers<[1], [0], [0], [1], [0, 0, 1, 1], [], []>} : vector<1x16xf32>, vector<16x32xf32>, vector<1x32xf32> -> vector<1x32xf32>
    %cst_28 = arith.constant 9.99999974E-6 : f32
    %77 = vector.broadcast %cst_28 : f32 to vector<1x32xf32>
    %78 = arith.addf %76, %77 : vector<1x32xf32>
    %79 = math.rsqrt %78 : vector<1x32xf32>
    %80 = arith.mulf %47, %79 : vector<1x32xf32>
    %81 = vector.broadcast %80 : vector<1x32xf32> to vector<16x32xf32>
    %82 = arith.mulf %74, %81 : vector<16x32xf32>
    %83 = vector.broadcast %48 : vector<1x32xf32> to vector<16x32xf32>
    %84 = arith.addf %82, %83 : vector<16x32xf32>
    %85 = arith.negf %84 : vector<16x32xf32>
    %86 = math.exp %85 : vector<16x32xf32>
    %cst_29 = arith.constant 1.000000e+00 : f32
    %87 = vector.broadcast %cst_29 : f32 to vector<16x32xf32>
    %88 = arith.addf %87, %86 : vector<16x32xf32>
    %89 = arith.divf %87, %88 : vector<16x32xf32>
    %90 = arith.mulf %84, %89 : vector<16x32xf32>
    %91 = arith.addf %25, %90 : vector<16x32xf32>
    %92 = arith.addf %54, %56 : vector<32x32xf32>
    %93 = arith.addf %92, %58 : vector<32x32xf32>
    %94 = vector.broadcast %46 : vector<1x32xf32> to vector<32x32xf32>
    %95 = arith.addf %93, %94 : vector<32x32xf32>
    %cst_30 = arith.constant dense<0.000000e+00> : vector<1x32xf32>
    %96 = tpu.matmul %3, %95, %cst_30 {dimension_numbers = #tpu.dot_dimension_numbers<[1], [0], [0], [1], [0, 0, 1, 1], [], []>} : vector<1x32xf32>, vector<32x32xf32>, vector<1x32xf32> -> vector<1x32xf32>
    %97 = vector.broadcast %96 : vector<1x32xf32> to vector<32x32xf32>
    %98 = arith.subf %95, %97 : vector<32x32xf32>
    %99 = arith.mulf %98, %98 : vector<32x32xf32>
    %cst_31 = arith.constant dense<0.000000e+00> : vector<1x32xf32>
    %100 = tpu.matmul %3, %99, %cst_31 {dimension_numbers = #tpu.dot_dimension_numbers<[1], [0], [0], [1], [0, 0, 1, 1], [], []>} : vector<1x32xf32>, vector<32x32xf32>, vector<1x32xf32> -> vector<1x32xf32>
    %cst_32 = arith.constant 9.99999974E-6 : f32
    %101 = vector.broadcast %cst_32 : f32 to vector<1x32xf32>
    %102 = arith.addf %100, %101 : vector<1x32xf32>
    %103 = math.rsqrt %102 : vector<1x32xf32>
    %104 = arith.mulf %49, %103 : vector<1x32xf32>
    %105 = vector.broadcast %104 : vector<1x32xf32> to vector<32x32xf32>
    %106 = arith.mulf %98, %105 : vector<32x32xf32>
    %107 = vector.broadcast %50 : vector<1x32xf32> to vector<32x32xf32>
    %108 = arith.addf %106, %107 : vector<32x32xf32>
    %109 = arith.negf %108 : vector<32x32xf32>
    %110 = math.exp %109 : vector<32x32xf32>
    %cst_33 = arith.constant 1.000000e+00 : f32
    %111 = vector.broadcast %cst_33 : f32 to vector<32x32xf32>
    %112 = arith.addf %111, %110 : vector<32x32xf32>
    %113 = arith.divf %111, %112 : vector<32x32xf32>
    %114 = arith.mulf %108, %113 : vector<32x32xf32>
    %115 = arith.addf %39, %114 : vector<32x32xf32>
    %c1 = arith.constant 1 : index
    %c0_34 = arith.constant 0 : index
    %c0_35 = arith.constant 0 : index
    %116 = vector.load %arg5[%c1, %c0_34, %c0_35] : memref<12x32x160xf32, #tpu.memory_space<vmem>>, vector<1x32x160xf32>
    %117 = vector.shape_cast %116 : vector<1x32x160xf32> to vector<32x160xf32>
    %c1_36 = arith.constant 1 : index
    %c0_37 = arith.constant 0 : index
    %c0_38 = arith.constant 0 : index
    %118 = vector.load %arg6[%c1_36, %c0_37, %c0_38] : memref<12x7x32xf32, #tpu.memory_space<vmem>>, vector<1x7x32xf32>
    %119 = vector.shape_cast %118 : vector<1x7x32xf32> to vector<7x32xf32>
    %120 = vector.extract_strided_slice %119 {offsets = [0, 0], sizes = [1, 32], strides = [1, 1]} : vector<7x32xf32> to vector<1x32xf32>
    %121 = vector.extract_strided_slice %119 {offsets = [1, 0], sizes = [1, 32], strides = [1, 1]} : vector<7x32xf32> to vector<1x32xf32>
    %122 = vector.extract_strided_slice %119 {offsets = [2, 0], sizes = [1, 32], strides = [1, 1]} : vector<7x32xf32> to vector<1x32xf32>
    %123 = vector.extract_strided_slice %119 {offsets = [3, 0], sizes = [1, 32], strides = [1, 1]} : vector<7x32xf32> to vector<1x32xf32>
    %124 = vector.extract_strided_slice %119 {offsets = [4, 0], sizes = [1, 32], strides = [1, 1]} : vector<7x32xf32> to vector<1x32xf32>
    %125 = vector.extract_strided_slice %119 {offsets = [5, 0], sizes = [1, 32], strides = [1, 1]} : vector<7x32xf32> to vector<1x32xf32>
    %126 = vector.extract_strided_slice %119 {offsets = [6, 0], sizes = [1, 32], strides = [1, 1]} : vector<7x32xf32> to vector<1x32xf32>
    %127 = vector.extract_strided_slice %117 {offsets = [0, 0], sizes = [32, 128], strides = [1, 1]} : vector<32x160xf32> to vector<32x128xf32>
    %cst_39 = arith.constant dense<0.000000e+00> : vector<16x128xf32>
    %128 = tpu.matmul %91, %127, %cst_39 {dimension_numbers = #tpu.dot_dimension_numbers<[1], [0], [0], [1], [0, 0, 1, 1], [], []>} : vector<16x32xf32>, vector<32x128xf32>, vector<16x128xf32> -> vector<16x128xf32>
    %129 = vector.extract_strided_slice %117 {offsets = [0, 128], sizes = [32, 32], strides = [1, 1]} : vector<32x160xf32> to vector<32x32xf32>
    %cst_40 = arith.constant dense<0.000000e+00> : vector<32x32xf32>
    %130 = tpu.matmul %115, %129, %cst_40 {dimension_numbers = #tpu.dot_dimension_numbers<[1], [0], [0], [1], [0, 0, 1, 1], [], []>} : vector<32x32xf32>, vector<32x32xf32>, vector<32x32xf32> -> vector<32x32xf32>
    %cst_41 = arith.constant dense<0.000000e+00> : vector<64x128xf32>
    %131 = tpu.matmul %0, %128, %cst_41 {dimension_numbers = #tpu.dot_dimension_numbers<[1], [0], [0], [1], [0, 0, 1, 1], [], []>} : vector<64x16xf32>, vector<16x128xf32>, vector<64x128xf32> -> vector<64x128xf32>
    %132 = vector.extract_strided_slice %131 {offsets = [0, 32], sizes = [32, 32], strides = [1, 1]} : vector<64x128xf32> to vector<32x32xf32>
    %133 = vector.extract_strided_slice %131 {offsets = [32, 64], sizes = [32, 32], strides = [1, 1]} : vector<64x128xf32> to vector<32x32xf32>
    %134 = vector.extract_strided_slice %131 {offsets = [32, 96], sizes = [32, 32], strides = [1, 1]} : vector<64x128xf32> to vector<32x32xf32>
    %135 = arith.negf %115 : vector<32x32xf32>
    %136 = math.exp %135 : vector<32x32xf32>
    %cst_42 = arith.constant 1.000000e+00 : f32
    %137 = vector.broadcast %cst_42 : f32 to vector<32x32xf32>
    %138 = arith.addf %137, %136 : vector<32x32xf32>
    %139 = arith.divf %137, %138 : vector<32x32xf32>
    %140 = vector.broadcast %121 : vector<1x32xf32> to vector<32x32xf32>
    %141 = arith.addf %133, %140 : vector<32x32xf32>
    %142 = arith.mulf %139, %141 : vector<32x32xf32>
    %cst_43 = arith.constant dense<0.000000e+00> : vector<16x32xf32>
    %143 = tpu.matmul %1, %142, %cst_43 {dimension_numbers = #tpu.dot_dimension_numbers<[1], [0], [0], [1], [0, 0, 1, 1], [], []>} : vector<16x32xf32>, vector<32x32xf32>, vector<16x32xf32> -> vector<16x32xf32>
    %144 = vector.extract_strided_slice %128 {offsets = [0, 0], sizes = [16, 32], strides = [1, 1]} : vector<16x128xf32> to vector<16x32xf32>
    %145 = vector.broadcast %120 : vector<1x32xf32> to vector<16x32xf32>
    %146 = arith.addf %144, %145 : vector<16x32xf32>
    %147 = arith.addf %146, %143 : vector<16x32xf32>
    %cst_44 = arith.constant dense<0.000000e+00> : vector<1x32xf32>
    %148 = tpu.matmul %2, %147, %cst_44 {dimension_numbers = #tpu.dot_dimension_numbers<[1], [0], [0], [1], [0, 0, 1, 1], [], []>} : vector<1x16xf32>, vector<16x32xf32>, vector<1x32xf32> -> vector<1x32xf32>
    %149 = vector.broadcast %148 : vector<1x32xf32> to vector<16x32xf32>
    %150 = arith.subf %147, %149 : vector<16x32xf32>
    %151 = arith.mulf %150, %150 : vector<16x32xf32>
    %cst_45 = arith.constant dense<0.000000e+00> : vector<1x32xf32>
    %152 = tpu.matmul %2, %151, %cst_45 {dimension_numbers = #tpu.dot_dimension_numbers<[1], [0], [0], [1], [0, 0, 1, 1], [], []>} : vector<1x16xf32>, vector<16x32xf32>, vector<1x32xf32> -> vector<1x32xf32>
    %cst_46 = arith.constant 9.99999974E-6 : f32
    %153 = vector.broadcast %cst_46 : f32 to vector<1x32xf32>
    %154 = arith.addf %152, %153 : vector<1x32xf32>
    %155 = math.rsqrt %154 : vector<1x32xf32>
    %156 = arith.mulf %123, %155 : vector<1x32xf32>
    %157 = vector.broadcast %156 : vector<1x32xf32> to vector<16x32xf32>
    %158 = arith.mulf %150, %157 : vector<16x32xf32>
    %159 = vector.broadcast %124 : vector<1x32xf32> to vector<16x32xf32>
    %160 = arith.addf %158, %159 : vector<16x32xf32>
    %161 = arith.negf %160 : vector<16x32xf32>
    %162 = math.exp %161 : vector<16x32xf32>
    %cst_47 = arith.constant 1.000000e+00 : f32
    %163 = vector.broadcast %cst_47 : f32 to vector<16x32xf32>
    %164 = arith.addf %163, %162 : vector<16x32xf32>
    %165 = arith.divf %163, %164 : vector<16x32xf32>
    %166 = arith.mulf %160, %165 : vector<16x32xf32>
    %167 = arith.addf %91, %166 : vector<16x32xf32>
    %168 = arith.addf %130, %132 : vector<32x32xf32>
    %169 = arith.addf %168, %134 : vector<32x32xf32>
    %170 = vector.broadcast %122 : vector<1x32xf32> to vector<32x32xf32>
    %171 = arith.addf %169, %170 : vector<32x32xf32>
    %cst_48 = arith.constant dense<0.000000e+00> : vector<1x32xf32>
    %172 = tpu.matmul %3, %171, %cst_48 {dimension_numbers = #tpu.dot_dimension_numbers<[1], [0], [0], [1], [0, 0, 1, 1], [], []>} : vector<1x32xf32>, vector<32x32xf32>, vector<1x32xf32> -> vector<1x32xf32>
    %173 = vector.broadcast %172 : vector<1x32xf32> to vector<32x32xf32>
    %174 = arith.subf %171, %173 : vector<32x32xf32>
    %175 = arith.mulf %174, %174 : vector<32x32xf32>
    %cst_49 = arith.constant dense<0.000000e+00> : vector<1x32xf32>
    %176 = tpu.matmul %3, %175, %cst_49 {dimension_numbers = #tpu.dot_dimension_numbers<[1], [0], [0], [1], [0, 0, 1, 1], [], []>} : vector<1x32xf32>, vector<32x32xf32>, vector<1x32xf32> -> vector<1x32xf32>
    %cst_50 = arith.constant 9.99999974E-6 : f32
    %177 = vector.broadcast %cst_50 : f32 to vector<1x32xf32>
    %178 = arith.addf %176, %177 : vector<1x32xf32>
    %179 = math.rsqrt %178 : vector<1x32xf32>
    %180 = arith.mulf %125, %179 : vector<1x32xf32>
    %181 = vector.broadcast %180 : vector<1x32xf32> to vector<32x32xf32>
    %182 = arith.mulf %174, %181 : vector<32x32xf32>
    %183 = vector.broadcast %126 : vector<1x32xf32> to vector<32x32xf32>
    %184 = arith.addf %182, %183 : vector<32x32xf32>
    %185 = arith.negf %184 : vector<32x32xf32>
    %186 = math.exp %185 : vector<32x32xf32>
    %cst_51 = arith.constant 1.000000e+00 : f32
    %187 = vector.broadcast %cst_51 : f32 to vector<32x32xf32>
    %188 = arith.addf %187, %186 : vector<32x32xf32>
    %189 = arith.divf %187, %188 : vector<32x32xf32>
    %190 = arith.mulf %184, %189 : vector<32x32xf32>
    %191 = arith.addf %115, %190 : vector<32x32xf32>
    %c2_52 = arith.constant 2 : index
    %c0_53 = arith.constant 0 : index
    %c0_54 = arith.constant 0 : index
    %192 = vector.load %arg5[%c2_52, %c0_53, %c0_54] : memref<12x32x160xf32, #tpu.memory_space<vmem>>, vector<1x32x160xf32>
    %193 = vector.shape_cast %192 : vector<1x32x160xf32> to vector<32x160xf32>
    %c2_55 = arith.constant 2 : index
    %c0_56 = arith.constant 0 : index
    %c0_57 = arith.constant 0 : index
    %194 = vector.load %arg6[%c2_55, %c0_56, %c0_57] : memref<12x7x32xf32, #tpu.memory_space<vmem>>, vector<1x7x32xf32>
    %195 = vector.shape_cast %194 : vector<1x7x32xf32> to vector<7x32xf32>
    %196 = vector.extract_strided_slice %195 {offsets = [0, 0], sizes = [1, 32], strides = [1, 1]} : vector<7x32xf32> to vector<1x32xf32>
    %197 = vector.extract_strided_slice %195 {offsets = [1, 0], sizes = [1, 32], strides = [1, 1]} : vector<7x32xf32> to vector<1x32xf32>
    %198 = vector.extract_strided_slice %195 {offsets = [2, 0], sizes = [1, 32], strides = [1, 1]} : vector<7x32xf32> to vector<1x32xf32>
    %199 = vector.extract_strided_slice %195 {offsets = [3, 0], sizes = [1, 32], strides = [1, 1]} : vector<7x32xf32> to vector<1x32xf32>
    %200 = vector.extract_strided_slice %195 {offsets = [4, 0], sizes = [1, 32], strides = [1, 1]} : vector<7x32xf32> to vector<1x32xf32>
    %201 = vector.extract_strided_slice %195 {offsets = [5, 0], sizes = [1, 32], strides = [1, 1]} : vector<7x32xf32> to vector<1x32xf32>
    %202 = vector.extract_strided_slice %195 {offsets = [6, 0], sizes = [1, 32], strides = [1, 1]} : vector<7x32xf32> to vector<1x32xf32>
    %203 = vector.extract_strided_slice %193 {offsets = [0, 0], sizes = [32, 128], strides = [1, 1]} : vector<32x160xf32> to vector<32x128xf32>
    %cst_58 = arith.constant dense<0.000000e+00> : vector<16x128xf32>
    %204 = tpu.matmul %167, %203, %cst_58 {dimension_numbers = #tpu.dot_dimension_numbers<[1], [0], [0], [1], [0, 0, 1, 1], [], []>} : vector<16x32xf32>, vector<32x128xf32>, vector<16x128xf32> -> vector<16x128xf32>
    %205 = vector.extract_strided_slice %193 {offsets = [0, 128], sizes = [32, 32], strides = [1, 1]} : vector<32x160xf32> to vector<32x32xf32>
    %cst_59 = arith.constant dense<0.000000e+00> : vector<32x32xf32>
    %206 = tpu.matmul %191, %205, %cst_59 {dimension_numbers = #tpu.dot_dimension_numbers<[1], [0], [0], [1], [0, 0, 1, 1], [], []>} : vector<32x32xf32>, vector<32x32xf32>, vector<32x32xf32> -> vector<32x32xf32>
    %cst_60 = arith.constant dense<0.000000e+00> : vector<64x128xf32>
    %207 = tpu.matmul %0, %204, %cst_60 {dimension_numbers = #tpu.dot_dimension_numbers<[1], [0], [0], [1], [0, 0, 1, 1], [], []>} : vector<64x16xf32>, vector<16x128xf32>, vector<64x128xf32> -> vector<64x128xf32>
    %208 = vector.extract_strided_slice %207 {offsets = [0, 32], sizes = [32, 32], strides = [1, 1]} : vector<64x128xf32> to vector<32x32xf32>
    %209 = vector.extract_strided_slice %207 {offsets = [32, 64], sizes = [32, 32], strides = [1, 1]} : vector<64x128xf32> to vector<32x32xf32>
    %210 = vector.extract_strided_slice %207 {offsets = [32, 96], sizes = [32, 32], strides = [1, 1]} : vector<64x128xf32> to vector<32x32xf32>
    %211 = arith.negf %191 : vector<32x32xf32>
    %212 = math.exp %211 : vector<32x32xf32>
    %cst_61 = arith.constant 1.000000e+00 : f32
    %213 = vector.broadcast %cst_61 : f32 to vector<32x32xf32>
    %214 = arith.addf %213, %212 : vector<32x32xf32>
    %215 = arith.divf %213, %214 : vector<32x32xf32>
    %216 = vector.broadcast %197 : vector<1x32xf32> to vector<32x32xf32>
    %217 = arith.addf %209, %216 : vector<32x32xf32>
    %218 = arith.mulf %215, %217 : vector<32x32xf32>
    %cst_62 = arith.constant dense<0.000000e+00> : vector<16x32xf32>
    %219 = tpu.matmul %1, %218, %cst_62 {dimension_numbers = #tpu.dot_dimension_numbers<[1], [0], [0], [1], [0, 0, 1, 1], [], []>} : vector<16x32xf32>, vector<32x32xf32>, vector<16x32xf32> -> vector<16x32xf32>
    %220 = vector.extract_strided_slice %204 {offsets = [0, 0], sizes = [16, 32], strides = [1, 1]} : vector<16x128xf32> to vector<16x32xf32>
    %221 = vector.broadcast %196 : vector<1x32xf32> to vector<16x32xf32>
    %222 = arith.addf %220, %221 : vector<16x32xf32>
    %223 = arith.addf %222, %219 : vector<16x32xf32>
    %cst_63 = arith.constant dense<0.000000e+00> : vector<1x32xf32>
    %224 = tpu.matmul %2, %223, %cst_63 {dimension_numbers = #tpu.dot_dimension_numbers<[1], [0], [0], [1], [0, 0, 1, 1], [], []>} : vector<1x16xf32>, vector<16x32xf32>, vector<1x32xf32> -> vector<1x32xf32>
    %225 = vector.broadcast %224 : vector<1x32xf32> to vector<16x32xf32>
    %226 = arith.subf %223, %225 : vector<16x32xf32>
    %227 = arith.mulf %226, %226 : vector<16x32xf32>
    %cst_64 = arith.constant dense<0.000000e+00> : vector<1x32xf32>
    %228 = tpu.matmul %2, %227, %cst_64 {dimension_numbers = #tpu.dot_dimension_numbers<[1], [0], [0], [1], [0, 0, 1, 1], [], []>} : vector<1x16xf32>, vector<16x32xf32>, vector<1x32xf32> -> vector<1x32xf32>
    %cst_65 = arith.constant 9.99999974E-6 : f32
    %229 = vector.broadcast %cst_65 : f32 to vector<1x32xf32>
    %230 = arith.addf %228, %229 : vector<1x32xf32>
    %231 = math.rsqrt %230 : vector<1x32xf32>
    %232 = arith.mulf %199, %231 : vector<1x32xf32>
    %233 = vector.broadcast %232 : vector<1x32xf32> to vector<16x32xf32>
    %234 = arith.mulf %226, %233 : vector<16x32xf32>
    %235 = vector.broadcast %200 : vector<1x32xf32> to vector<16x32xf32>
    %236 = arith.addf %234, %235 : vector<16x32xf32>
    %237 = arith.negf %236 : vector<16x32xf32>
    %238 = math.exp %237 : vector<16x32xf32>
    %cst_66 = arith.constant 1.000000e+00 : f32
    %239 = vector.broadcast %cst_66 : f32 to vector<16x32xf32>
    %240 = arith.addf %239, %238 : vector<16x32xf32>
    %241 = arith.divf %239, %240 : vector<16x32xf32>
    %242 = arith.mulf %236, %241 : vector<16x32xf32>
    %243 = arith.addf %167, %242 : vector<16x32xf32>
    %244 = arith.addf %206, %208 : vector<32x32xf32>
    %245 = arith.addf %244, %210 : vector<32x32xf32>
    %246 = vector.broadcast %198 : vector<1x32xf32> to vector<32x32xf32>
    %247 = arith.addf %245, %246 : vector<32x32xf32>
    %cst_67 = arith.constant dense<0.000000e+00> : vector<1x32xf32>
    %248 = tpu.matmul %3, %247, %cst_67 {dimension_numbers = #tpu.dot_dimension_numbers<[1], [0], [0], [1], [0, 0, 1, 1], [], []>} : vector<1x32xf32>, vector<32x32xf32>, vector<1x32xf32> -> vector<1x32xf32>
    %249 = vector.broadcast %248 : vector<1x32xf32> to vector<32x32xf32>
    %250 = arith.subf %247, %249 : vector<32x32xf32>
    %251 = arith.mulf %250, %250 : vector<32x32xf32>
    %cst_68 = arith.constant dense<0.000000e+00> : vector<1x32xf32>
    %252 = tpu.matmul %3, %251, %cst_68 {dimension_numbers = #tpu.dot_dimension_numbers<[1], [0], [0], [1], [0, 0, 1, 1], [], []>} : vector<1x32xf32>, vector<32x32xf32>, vector<1x32xf32> -> vector<1x32xf32>
    %cst_69 = arith.constant 9.99999974E-6 : f32
    %253 = vector.broadcast %cst_69 : f32 to vector<1x32xf32>
    %254 = arith.addf %252, %253 : vector<1x32xf32>
    %255 = math.rsqrt %254 : vector<1x32xf32>
    %256 = arith.mulf %201, %255 : vector<1x32xf32>
    %257 = vector.broadcast %256 : vector<1x32xf32> to vector<32x32xf32>
    %258 = arith.mulf %250, %257 : vector<32x32xf32>
    %259 = vector.broadcast %202 : vector<1x32xf32> to vector<32x32xf32>
    %260 = arith.addf %258, %259 : vector<32x32xf32>
    %261 = arith.negf %260 : vector<32x32xf32>
    %262 = math.exp %261 : vector<32x32xf32>
    %cst_70 = arith.constant 1.000000e+00 : f32
    %263 = vector.broadcast %cst_70 : f32 to vector<32x32xf32>
    %264 = arith.addf %263, %262 : vector<32x32xf32>
    %265 = arith.divf %263, %264 : vector<32x32xf32>
    %266 = arith.mulf %260, %265 : vector<32x32xf32>
    %267 = arith.addf %191, %266 : vector<32x32xf32>
    %c3_71 = arith.constant 3 : index
    %c0_72 = arith.constant 0 : index
    %c0_73 = arith.constant 0 : index
    %268 = vector.load %arg5[%c3_71, %c0_72, %c0_73] : memref<12x32x160xf32, #tpu.memory_space<vmem>>, vector<1x32x160xf32>
    %269 = vector.shape_cast %268 : vector<1x32x160xf32> to vector<32x160xf32>
    %c3_74 = arith.constant 3 : index
    %c0_75 = arith.constant 0 : index
    %c0_76 = arith.constant 0 : index
    %270 = vector.load %arg6[%c3_74, %c0_75, %c0_76] : memref<12x7x32xf32, #tpu.memory_space<vmem>>, vector<1x7x32xf32>
    %271 = vector.shape_cast %270 : vector<1x7x32xf32> to vector<7x32xf32>
    %272 = vector.extract_strided_slice %271 {offsets = [0, 0], sizes = [1, 32], strides = [1, 1]} : vector<7x32xf32> to vector<1x32xf32>
    %273 = vector.extract_strided_slice %271 {offsets = [1, 0], sizes = [1, 32], strides = [1, 1]} : vector<7x32xf32> to vector<1x32xf32>
    %274 = vector.extract_strided_slice %271 {offsets = [2, 0], sizes = [1, 32], strides = [1, 1]} : vector<7x32xf32> to vector<1x32xf32>
    %275 = vector.extract_strided_slice %271 {offsets = [3, 0], sizes = [1, 32], strides = [1, 1]} : vector<7x32xf32> to vector<1x32xf32>
    %276 = vector.extract_strided_slice %271 {offsets = [4, 0], sizes = [1, 32], strides = [1, 1]} : vector<7x32xf32> to vector<1x32xf32>
    %277 = vector.extract_strided_slice %271 {offsets = [5, 0], sizes = [1, 32], strides = [1, 1]} : vector<7x32xf32> to vector<1x32xf32>
    %278 = vector.extract_strided_slice %271 {offsets = [6, 0], sizes = [1, 32], strides = [1, 1]} : vector<7x32xf32> to vector<1x32xf32>
    %279 = vector.extract_strided_slice %269 {offsets = [0, 0], sizes = [32, 128], strides = [1, 1]} : vector<32x160xf32> to vector<32x128xf32>
    %cst_77 = arith.constant dense<0.000000e+00> : vector<16x128xf32>
    %280 = tpu.matmul %243, %279, %cst_77 {dimension_numbers = #tpu.dot_dimension_numbers<[1], [0], [0], [1], [0, 0, 1, 1], [], []>} : vector<16x32xf32>, vector<32x128xf32>, vector<16x128xf32> -> vector<16x128xf32>
    %281 = vector.extract_strided_slice %269 {offsets = [0, 128], sizes = [32, 32], strides = [1, 1]} : vector<32x160xf32> to vector<32x32xf32>
    %cst_78 = arith.constant dense<0.000000e+00> : vector<32x32xf32>
    %282 = tpu.matmul %267, %281, %cst_78 {dimension_numbers = #tpu.dot_dimension_numbers<[1], [0], [0], [1], [0, 0, 1, 1], [], []>} : vector<32x32xf32>, vector<32x32xf32>, vector<32x32xf32> -> vector<32x32xf32>
    %cst_79 = arith.constant dense<0.000000e+00> : vector<64x128xf32>
    %283 = tpu.matmul %0, %280, %cst_79 {dimension_numbers = #tpu.dot_dimension_numbers<[1], [0], [0], [1], [0, 0, 1, 1], [], []>} : vector<64x16xf32>, vector<16x128xf32>, vector<64x128xf32> -> vector<64x128xf32>
    %284 = vector.extract_strided_slice %283 {offsets = [0, 32], sizes = [32, 32], strides = [1, 1]} : vector<64x128xf32> to vector<32x32xf32>
    %285 = vector.extract_strided_slice %283 {offsets = [32, 64], sizes = [32, 32], strides = [1, 1]} : vector<64x128xf32> to vector<32x32xf32>
    %286 = vector.extract_strided_slice %283 {offsets = [32, 96], sizes = [32, 32], strides = [1, 1]} : vector<64x128xf32> to vector<32x32xf32>
    %287 = arith.negf %267 : vector<32x32xf32>
    %288 = math.exp %287 : vector<32x32xf32>
    %cst_80 = arith.constant 1.000000e+00 : f32
    %289 = vector.broadcast %cst_80 : f32 to vector<32x32xf32>
    %290 = arith.addf %289, %288 : vector<32x32xf32>
    %291 = arith.divf %289, %290 : vector<32x32xf32>
    %292 = vector.broadcast %273 : vector<1x32xf32> to vector<32x32xf32>
    %293 = arith.addf %285, %292 : vector<32x32xf32>
    %294 = arith.mulf %291, %293 : vector<32x32xf32>
    %cst_81 = arith.constant dense<0.000000e+00> : vector<16x32xf32>
    %295 = tpu.matmul %1, %294, %cst_81 {dimension_numbers = #tpu.dot_dimension_numbers<[1], [0], [0], [1], [0, 0, 1, 1], [], []>} : vector<16x32xf32>, vector<32x32xf32>, vector<16x32xf32> -> vector<16x32xf32>
    %296 = vector.extract_strided_slice %280 {offsets = [0, 0], sizes = [16, 32], strides = [1, 1]} : vector<16x128xf32> to vector<16x32xf32>
    %297 = vector.broadcast %272 : vector<1x32xf32> to vector<16x32xf32>
    %298 = arith.addf %296, %297 : vector<16x32xf32>
    %299 = arith.addf %298, %295 : vector<16x32xf32>
    %cst_82 = arith.constant dense<0.000000e+00> : vector<1x32xf32>
    %300 = tpu.matmul %2, %299, %cst_82 {dimension_numbers = #tpu.dot_dimension_numbers<[1], [0], [0], [1], [0, 0, 1, 1], [], []>} : vector<1x16xf32>, vector<16x32xf32>, vector<1x32xf32> -> vector<1x32xf32>
    %301 = vector.broadcast %300 : vector<1x32xf32> to vector<16x32xf32>
    %302 = arith.subf %299, %301 : vector<16x32xf32>
    %303 = arith.mulf %302, %302 : vector<16x32xf32>
    %cst_83 = arith.constant dense<0.000000e+00> : vector<1x32xf32>
    %304 = tpu.matmul %2, %303, %cst_83 {dimension_numbers = #tpu.dot_dimension_numbers<[1], [0], [0], [1], [0, 0, 1, 1], [], []>} : vector<1x16xf32>, vector<16x32xf32>, vector<1x32xf32> -> vector<1x32xf32>
    %cst_84 = arith.constant 9.99999974E-6 : f32
    %305 = vector.broadcast %cst_84 : f32 to vector<1x32xf32>
    %306 = arith.addf %304, %305 : vector<1x32xf32>
    %307 = math.rsqrt %306 : vector<1x32xf32>
    %308 = arith.mulf %275, %307 : vector<1x32xf32>
    %309 = vector.broadcast %308 : vector<1x32xf32> to vector<16x32xf32>
    %310 = arith.mulf %302, %309 : vector<16x32xf32>
    %311 = vector.broadcast %276 : vector<1x32xf32> to vector<16x32xf32>
    %312 = arith.addf %310, %311 : vector<16x32xf32>
    %313 = arith.negf %312 : vector<16x32xf32>
    %314 = math.exp %313 : vector<16x32xf32>
    %cst_85 = arith.constant 1.000000e+00 : f32
    %315 = vector.broadcast %cst_85 : f32 to vector<16x32xf32>
    %316 = arith.addf %315, %314 : vector<16x32xf32>
    %317 = arith.divf %315, %316 : vector<16x32xf32>
    %318 = arith.mulf %312, %317 : vector<16x32xf32>
    %319 = arith.addf %243, %318 : vector<16x32xf32>
    %320 = arith.addf %282, %284 : vector<32x32xf32>
    %321 = arith.addf %320, %286 : vector<32x32xf32>
    %322 = vector.broadcast %274 : vector<1x32xf32> to vector<32x32xf32>
    %323 = arith.addf %321, %322 : vector<32x32xf32>
    %cst_86 = arith.constant dense<0.000000e+00> : vector<1x32xf32>
    %324 = tpu.matmul %3, %323, %cst_86 {dimension_numbers = #tpu.dot_dimension_numbers<[1], [0], [0], [1], [0, 0, 1, 1], [], []>} : vector<1x32xf32>, vector<32x32xf32>, vector<1x32xf32> -> vector<1x32xf32>
    %325 = vector.broadcast %324 : vector<1x32xf32> to vector<32x32xf32>
    %326 = arith.subf %323, %325 : vector<32x32xf32>
    %327 = arith.mulf %326, %326 : vector<32x32xf32>
    %cst_87 = arith.constant dense<0.000000e+00> : vector<1x32xf32>
    %328 = tpu.matmul %3, %327, %cst_87 {dimension_numbers = #tpu.dot_dimension_numbers<[1], [0], [0], [1], [0, 0, 1, 1], [], []>} : vector<1x32xf32>, vector<32x32xf32>, vector<1x32xf32> -> vector<1x32xf32>
    %cst_88 = arith.constant 9.99999974E-6 : f32
    %329 = vector.broadcast %cst_88 : f32 to vector<1x32xf32>
    %330 = arith.addf %328, %329 : vector<1x32xf32>
    %331 = math.rsqrt %330 : vector<1x32xf32>
    %332 = arith.mulf %277, %331 : vector<1x32xf32>
    %333 = vector.broadcast %332 : vector<1x32xf32> to vector<32x32xf32>
    %334 = arith.mulf %326, %333 : vector<32x32xf32>
    %335 = vector.broadcast %278 : vector<1x32xf32> to vector<32x32xf32>
    %336 = arith.addf %334, %335 : vector<32x32xf32>
    %337 = arith.negf %336 : vector<32x32xf32>
    %338 = math.exp %337 : vector<32x32xf32>
    %cst_89 = arith.constant 1.000000e+00 : f32
    %339 = vector.broadcast %cst_89 : f32 to vector<32x32xf32>
    %340 = arith.addf %339, %338 : vector<32x32xf32>
    %341 = arith.divf %339, %340 : vector<32x32xf32>
    %342 = arith.mulf %336, %341 : vector<32x32xf32>
    %343 = arith.addf %267, %342 : vector<32x32xf32>
    %c4_90 = arith.constant 4 : index
    %c0_91 = arith.constant 0 : index
    %c0_92 = arith.constant 0 : index
    %344 = vector.load %arg5[%c4_90, %c0_91, %c0_92] : memref<12x32x160xf32, #tpu.memory_space<vmem>>, vector<1x32x160xf32>
    %345 = vector.shape_cast %344 : vector<1x32x160xf32> to vector<32x160xf32>
    %c4_93 = arith.constant 4 : index
    %c0_94 = arith.constant 0 : index
    %c0_95 = arith.constant 0 : index
    %346 = vector.load %arg6[%c4_93, %c0_94, %c0_95] : memref<12x7x32xf32, #tpu.memory_space<vmem>>, vector<1x7x32xf32>
    %347 = vector.shape_cast %346 : vector<1x7x32xf32> to vector<7x32xf32>
    %348 = vector.extract_strided_slice %347 {offsets = [0, 0], sizes = [1, 32], strides = [1, 1]} : vector<7x32xf32> to vector<1x32xf32>
    %349 = vector.extract_strided_slice %347 {offsets = [1, 0], sizes = [1, 32], strides = [1, 1]} : vector<7x32xf32> to vector<1x32xf32>
    %350 = vector.extract_strided_slice %347 {offsets = [2, 0], sizes = [1, 32], strides = [1, 1]} : vector<7x32xf32> to vector<1x32xf32>
    %351 = vector.extract_strided_slice %347 {offsets = [3, 0], sizes = [1, 32], strides = [1, 1]} : vector<7x32xf32> to vector<1x32xf32>
    %352 = vector.extract_strided_slice %347 {offsets = [4, 0], sizes = [1, 32], strides = [1, 1]} : vector<7x32xf32> to vector<1x32xf32>
    %353 = vector.extract_strided_slice %347 {offsets = [5, 0], sizes = [1, 32], strides = [1, 1]} : vector<7x32xf32> to vector<1x32xf32>
    %354 = vector.extract_strided_slice %347 {offsets = [6, 0], sizes = [1, 32], strides = [1, 1]} : vector<7x32xf32> to vector<1x32xf32>
    %355 = vector.extract_strided_slice %345 {offsets = [0, 0], sizes = [32, 128], strides = [1, 1]} : vector<32x160xf32> to vector<32x128xf32>
    %cst_96 = arith.constant dense<0.000000e+00> : vector<16x128xf32>
    %356 = tpu.matmul %319, %355, %cst_96 {dimension_numbers = #tpu.dot_dimension_numbers<[1], [0], [0], [1], [0, 0, 1, 1], [], []>} : vector<16x32xf32>, vector<32x128xf32>, vector<16x128xf32> -> vector<16x128xf32>
    %357 = vector.extract_strided_slice %345 {offsets = [0, 128], sizes = [32, 32], strides = [1, 1]} : vector<32x160xf32> to vector<32x32xf32>
    %cst_97 = arith.constant dense<0.000000e+00> : vector<32x32xf32>
    %358 = tpu.matmul %343, %357, %cst_97 {dimension_numbers = #tpu.dot_dimension_numbers<[1], [0], [0], [1], [0, 0, 1, 1], [], []>} : vector<32x32xf32>, vector<32x32xf32>, vector<32x32xf32> -> vector<32x32xf32>
    %cst_98 = arith.constant dense<0.000000e+00> : vector<64x128xf32>
    %359 = tpu.matmul %0, %356, %cst_98 {dimension_numbers = #tpu.dot_dimension_numbers<[1], [0], [0], [1], [0, 0, 1, 1], [], []>} : vector<64x16xf32>, vector<16x128xf32>, vector<64x128xf32> -> vector<64x128xf32>
    %360 = vector.extract_strided_slice %359 {offsets = [0, 32], sizes = [32, 32], strides = [1, 1]} : vector<64x128xf32> to vector<32x32xf32>
    %361 = vector.extract_strided_slice %359 {offsets = [32, 64], sizes = [32, 32], strides = [1, 1]} : vector<64x128xf32> to vector<32x32xf32>
    %362 = vector.extract_strided_slice %359 {offsets = [32, 96], sizes = [32, 32], strides = [1, 1]} : vector<64x128xf32> to vector<32x32xf32>
    %363 = arith.negf %343 : vector<32x32xf32>
    %364 = math.exp %363 : vector<32x32xf32>
    %cst_99 = arith.constant 1.000000e+00 : f32
    %365 = vector.broadcast %cst_99 : f32 to vector<32x32xf32>
    %366 = arith.addf %365, %364 : vector<32x32xf32>
    %367 = arith.divf %365, %366 : vector<32x32xf32>
    %368 = vector.broadcast %349 : vector<1x32xf32> to vector<32x32xf32>
    %369 = arith.addf %361, %368 : vector<32x32xf32>
    %370 = arith.mulf %367, %369 : vector<32x32xf32>
    %cst_100 = arith.constant dense<0.000000e+00> : vector<16x32xf32>
    %371 = tpu.matmul %1, %370, %cst_100 {dimension_numbers = #tpu.dot_dimension_numbers<[1], [0], [0], [1], [0, 0, 1, 1], [], []>} : vector<16x32xf32>, vector<32x32xf32>, vector<16x32xf32> -> vector<16x32xf32>
    %372 = vector.extract_strided_slice %356 {offsets = [0, 0], sizes = [16, 32], strides = [1, 1]} : vector<16x128xf32> to vector<16x32xf32>
    %373 = vector.broadcast %348 : vector<1x32xf32> to vector<16x32xf32>
    %374 = arith.addf %372, %373 : vector<16x32xf32>
    %375 = arith.addf %374, %371 : vector<16x32xf32>
    %cst_101 = arith.constant dense<0.000000e+00> : vector<1x32xf32>
    %376 = tpu.matmul %2, %375, %cst_101 {dimension_numbers = #tpu.dot_dimension_numbers<[1], [0], [0], [1], [0, 0, 1, 1], [], []>} : vector<1x16xf32>, vector<16x32xf32>, vector<1x32xf32> -> vector<1x32xf32>
    %377 = vector.broadcast %376 : vector<1x32xf32> to vector<16x32xf32>
    %378 = arith.subf %375, %377 : vector<16x32xf32>
    %379 = arith.mulf %378, %378 : vector<16x32xf32>
    %cst_102 = arith.constant dense<0.000000e+00> : vector<1x32xf32>
    %380 = tpu.matmul %2, %379, %cst_102 {dimension_numbers = #tpu.dot_dimension_numbers<[1], [0], [0], [1], [0, 0, 1, 1], [], []>} : vector<1x16xf32>, vector<16x32xf32>, vector<1x32xf32> -> vector<1x32xf32>
    %cst_103 = arith.constant 9.99999974E-6 : f32
    %381 = vector.broadcast %cst_103 : f32 to vector<1x32xf32>
    %382 = arith.addf %380, %381 : vector<1x32xf32>
    %383 = math.rsqrt %382 : vector<1x32xf32>
    %384 = arith.mulf %351, %383 : vector<1x32xf32>
    %385 = vector.broadcast %384 : vector<1x32xf32> to vector<16x32xf32>
    %386 = arith.mulf %378, %385 : vector<16x32xf32>
    %387 = vector.broadcast %352 : vector<1x32xf32> to vector<16x32xf32>
    %388 = arith.addf %386, %387 : vector<16x32xf32>
    %389 = arith.negf %388 : vector<16x32xf32>
    %390 = math.exp %389 : vector<16x32xf32>
    %cst_104 = arith.constant 1.000000e+00 : f32
    %391 = vector.broadcast %cst_104 : f32 to vector<16x32xf32>
    %392 = arith.addf %391, %390 : vector<16x32xf32>
    %393 = arith.divf %391, %392 : vector<16x32xf32>
    %394 = arith.mulf %388, %393 : vector<16x32xf32>
    %395 = arith.addf %319, %394 : vector<16x32xf32>
    %396 = arith.addf %358, %360 : vector<32x32xf32>
    %397 = arith.addf %396, %362 : vector<32x32xf32>
    %398 = vector.broadcast %350 : vector<1x32xf32> to vector<32x32xf32>
    %399 = arith.addf %397, %398 : vector<32x32xf32>
    %cst_105 = arith.constant dense<0.000000e+00> : vector<1x32xf32>
    %400 = tpu.matmul %3, %399, %cst_105 {dimension_numbers = #tpu.dot_dimension_numbers<[1], [0], [0], [1], [0, 0, 1, 1], [], []>} : vector<1x32xf32>, vector<32x32xf32>, vector<1x32xf32> -> vector<1x32xf32>
    %401 = vector.broadcast %400 : vector<1x32xf32> to vector<32x32xf32>
    %402 = arith.subf %399, %401 : vector<32x32xf32>
    %403 = arith.mulf %402, %402 : vector<32x32xf32>
    %cst_106 = arith.constant dense<0.000000e+00> : vector<1x32xf32>
    %404 = tpu.matmul %3, %403, %cst_106 {dimension_numbers = #tpu.dot_dimension_numbers<[1], [0], [0], [1], [0, 0, 1, 1], [], []>} : vector<1x32xf32>, vector<32x32xf32>, vector<1x32xf32> -> vector<1x32xf32>
    %cst_107 = arith.constant 9.99999974E-6 : f32
    %405 = vector.broadcast %cst_107 : f32 to vector<1x32xf32>
    %406 = arith.addf %404, %405 : vector<1x32xf32>
    %407 = math.rsqrt %406 : vector<1x32xf32>
    %408 = arith.mulf %353, %407 : vector<1x32xf32>
    %409 = vector.broadcast %408 : vector<1x32xf32> to vector<32x32xf32>
    %410 = arith.mulf %402, %409 : vector<32x32xf32>
    %411 = vector.broadcast %354 : vector<1x32xf32> to vector<32x32xf32>
    %412 = arith.addf %410, %411 : vector<32x32xf32>
    %413 = arith.negf %412 : vector<32x32xf32>
    %414 = math.exp %413 : vector<32x32xf32>
    %cst_108 = arith.constant 1.000000e+00 : f32
    %415 = vector.broadcast %cst_108 : f32 to vector<32x32xf32>
    %416 = arith.addf %415, %414 : vector<32x32xf32>
    %417 = arith.divf %415, %416 : vector<32x32xf32>
    %418 = arith.mulf %412, %417 : vector<32x32xf32>
    %419 = arith.addf %343, %418 : vector<32x32xf32>
    %c5 = arith.constant 5 : index
    %c0_109 = arith.constant 0 : index
    %c0_110 = arith.constant 0 : index
    %420 = vector.load %arg5[%c5, %c0_109, %c0_110] : memref<12x32x160xf32, #tpu.memory_space<vmem>>, vector<1x32x160xf32>
    %421 = vector.shape_cast %420 : vector<1x32x160xf32> to vector<32x160xf32>
    %c5_111 = arith.constant 5 : index
    %c0_112 = arith.constant 0 : index
    %c0_113 = arith.constant 0 : index
    %422 = vector.load %arg6[%c5_111, %c0_112, %c0_113] : memref<12x7x32xf32, #tpu.memory_space<vmem>>, vector<1x7x32xf32>
    %423 = vector.shape_cast %422 : vector<1x7x32xf32> to vector<7x32xf32>
    %424 = vector.extract_strided_slice %423 {offsets = [0, 0], sizes = [1, 32], strides = [1, 1]} : vector<7x32xf32> to vector<1x32xf32>
    %425 = vector.extract_strided_slice %423 {offsets = [1, 0], sizes = [1, 32], strides = [1, 1]} : vector<7x32xf32> to vector<1x32xf32>
    %426 = vector.extract_strided_slice %423 {offsets = [2, 0], sizes = [1, 32], strides = [1, 1]} : vector<7x32xf32> to vector<1x32xf32>
    %427 = vector.extract_strided_slice %423 {offsets = [3, 0], sizes = [1, 32], strides = [1, 1]} : vector<7x32xf32> to vector<1x32xf32>
    %428 = vector.extract_strided_slice %423 {offsets = [4, 0], sizes = [1, 32], strides = [1, 1]} : vector<7x32xf32> to vector<1x32xf32>
    %429 = vector.extract_strided_slice %423 {offsets = [5, 0], sizes = [1, 32], strides = [1, 1]} : vector<7x32xf32> to vector<1x32xf32>
    %430 = vector.extract_strided_slice %423 {offsets = [6, 0], sizes = [1, 32], strides = [1, 1]} : vector<7x32xf32> to vector<1x32xf32>
    %431 = vector.extract_strided_slice %421 {offsets = [0, 0], sizes = [32, 128], strides = [1, 1]} : vector<32x160xf32> to vector<32x128xf32>
    %cst_114 = arith.constant dense<0.000000e+00> : vector<16x128xf32>
    %432 = tpu.matmul %395, %431, %cst_114 {dimension_numbers = #tpu.dot_dimension_numbers<[1], [0], [0], [1], [0, 0, 1, 1], [], []>} : vector<16x32xf32>, vector<32x128xf32>, vector<16x128xf32> -> vector<16x128xf32>
    %433 = vector.extract_strided_slice %421 {offsets = [0, 128], sizes = [32, 32], strides = [1, 1]} : vector<32x160xf32> to vector<32x32xf32>
    %cst_115 = arith.constant dense<0.000000e+00> : vector<32x32xf32>
    %434 = tpu.matmul %419, %433, %cst_115 {dimension_numbers = #tpu.dot_dimension_numbers<[1], [0], [0], [1], [0, 0, 1, 1], [], []>} : vector<32x32xf32>, vector<32x32xf32>, vector<32x32xf32> -> vector<32x32xf32>
    %cst_116 = arith.constant dense<0.000000e+00> : vector<64x128xf32>
    %435 = tpu.matmul %0, %432, %cst_116 {dimension_numbers = #tpu.dot_dimension_numbers<[1], [0], [0], [1], [0, 0, 1, 1], [], []>} : vector<64x16xf32>, vector<16x128xf32>, vector<64x128xf32> -> vector<64x128xf32>
    %436 = vector.extract_strided_slice %435 {offsets = [0, 32], sizes = [32, 32], strides = [1, 1]} : vector<64x128xf32> to vector<32x32xf32>
    %437 = vector.extract_strided_slice %435 {offsets = [32, 64], sizes = [32, 32], strides = [1, 1]} : vector<64x128xf32> to vector<32x32xf32>
    %438 = vector.extract_strided_slice %435 {offsets = [32, 96], sizes = [32, 32], strides = [1, 1]} : vector<64x128xf32> to vector<32x32xf32>
    %439 = arith.negf %419 : vector<32x32xf32>
    %440 = math.exp %439 : vector<32x32xf32>
    %cst_117 = arith.constant 1.000000e+00 : f32
    %441 = vector.broadcast %cst_117 : f32 to vector<32x32xf32>
    %442 = arith.addf %441, %440 : vector<32x32xf32>
    %443 = arith.divf %441, %442 : vector<32x32xf32>
    %444 = vector.broadcast %425 : vector<1x32xf32> to vector<32x32xf32>
    %445 = arith.addf %437, %444 : vector<32x32xf32>
    %446 = arith.mulf %443, %445 : vector<32x32xf32>
    %cst_118 = arith.constant dense<0.000000e+00> : vector<16x32xf32>
    %447 = tpu.matmul %1, %446, %cst_118 {dimension_numbers = #tpu.dot_dimension_numbers<[1], [0], [0], [1], [0, 0, 1, 1], [], []>} : vector<16x32xf32>, vector<32x32xf32>, vector<16x32xf32> -> vector<16x32xf32>
    %448 = vector.extract_strided_slice %432 {offsets = [0, 0], sizes = [16, 32], strides = [1, 1]} : vector<16x128xf32> to vector<16x32xf32>
    %449 = vector.broadcast %424 : vector<1x32xf32> to vector<16x32xf32>
    %450 = arith.addf %448, %449 : vector<16x32xf32>
    %451 = arith.addf %450, %447 : vector<16x32xf32>
    %cst_119 = arith.constant dense<0.000000e+00> : vector<1x32xf32>
    %452 = tpu.matmul %2, %451, %cst_119 {dimension_numbers = #tpu.dot_dimension_numbers<[1], [0], [0], [1], [0, 0, 1, 1], [], []>} : vector<1x16xf32>, vector<16x32xf32>, vector<1x32xf32> -> vector<1x32xf32>
    %453 = vector.broadcast %452 : vector<1x32xf32> to vector<16x32xf32>
    %454 = arith.subf %451, %453 : vector<16x32xf32>
    %455 = arith.mulf %454, %454 : vector<16x32xf32>
    %cst_120 = arith.constant dense<0.000000e+00> : vector<1x32xf32>
    %456 = tpu.matmul %2, %455, %cst_120 {dimension_numbers = #tpu.dot_dimension_numbers<[1], [0], [0], [1], [0, 0, 1, 1], [], []>} : vector<1x16xf32>, vector<16x32xf32>, vector<1x32xf32> -> vector<1x32xf32>
    %cst_121 = arith.constant 9.99999974E-6 : f32
    %457 = vector.broadcast %cst_121 : f32 to vector<1x32xf32>
    %458 = arith.addf %456, %457 : vector<1x32xf32>
    %459 = math.rsqrt %458 : vector<1x32xf32>
    %460 = arith.mulf %427, %459 : vector<1x32xf32>
    %461 = vector.broadcast %460 : vector<1x32xf32> to vector<16x32xf32>
    %462 = arith.mulf %454, %461 : vector<16x32xf32>
    %463 = vector.broadcast %428 : vector<1x32xf32> to vector<16x32xf32>
    %464 = arith.addf %462, %463 : vector<16x32xf32>
    %465 = arith.negf %464 : vector<16x32xf32>
    %466 = math.exp %465 : vector<16x32xf32>
    %cst_122 = arith.constant 1.000000e+00 : f32
    %467 = vector.broadcast %cst_122 : f32 to vector<16x32xf32>
    %468 = arith.addf %467, %466 : vector<16x32xf32>
    %469 = arith.divf %467, %468 : vector<16x32xf32>
    %470 = arith.mulf %464, %469 : vector<16x32xf32>
    %471 = arith.addf %395, %470 : vector<16x32xf32>
    %472 = arith.addf %434, %436 : vector<32x32xf32>
    %473 = arith.addf %472, %438 : vector<32x32xf32>
    %474 = vector.broadcast %426 : vector<1x32xf32> to vector<32x32xf32>
    %475 = arith.addf %473, %474 : vector<32x32xf32>
    %cst_123 = arith.constant dense<0.000000e+00> : vector<1x32xf32>
    %476 = tpu.matmul %3, %475, %cst_123 {dimension_numbers = #tpu.dot_dimension_numbers<[1], [0], [0], [1], [0, 0, 1, 1], [], []>} : vector<1x32xf32>, vector<32x32xf32>, vector<1x32xf32> -> vector<1x32xf32>
    %477 = vector.broadcast %476 : vector<1x32xf32> to vector<32x32xf32>
    %478 = arith.subf %475, %477 : vector<32x32xf32>
    %479 = arith.mulf %478, %478 : vector<32x32xf32>
    %cst_124 = arith.constant dense<0.000000e+00> : vector<1x32xf32>
    %480 = tpu.matmul %3, %479, %cst_124 {dimension_numbers = #tpu.dot_dimension_numbers<[1], [0], [0], [1], [0, 0, 1, 1], [], []>} : vector<1x32xf32>, vector<32x32xf32>, vector<1x32xf32> -> vector<1x32xf32>
    %cst_125 = arith.constant 9.99999974E-6 : f32
    %481 = vector.broadcast %cst_125 : f32 to vector<1x32xf32>
    %482 = arith.addf %480, %481 : vector<1x32xf32>
    %483 = math.rsqrt %482 : vector<1x32xf32>
    %484 = arith.mulf %429, %483 : vector<1x32xf32>
    %485 = vector.broadcast %484 : vector<1x32xf32> to vector<32x32xf32>
    %486 = arith.mulf %478, %485 : vector<32x32xf32>
    %487 = vector.broadcast %430 : vector<1x32xf32> to vector<32x32xf32>
    %488 = arith.addf %486, %487 : vector<32x32xf32>
    %489 = arith.negf %488 : vector<32x32xf32>
    %490 = math.exp %489 : vector<32x32xf32>
    %cst_126 = arith.constant 1.000000e+00 : f32
    %491 = vector.broadcast %cst_126 : f32 to vector<32x32xf32>
    %492 = arith.addf %491, %490 : vector<32x32xf32>
    %493 = arith.divf %491, %492 : vector<32x32xf32>
    %494 = arith.mulf %488, %493 : vector<32x32xf32>
    %495 = arith.addf %419, %494 : vector<32x32xf32>
    %c6 = arith.constant 6 : index
    %c0_127 = arith.constant 0 : index
    %c0_128 = arith.constant 0 : index
    %496 = vector.load %arg5[%c6, %c0_127, %c0_128] : memref<12x32x160xf32, #tpu.memory_space<vmem>>, vector<1x32x160xf32>
    %497 = vector.shape_cast %496 : vector<1x32x160xf32> to vector<32x160xf32>
    %c6_129 = arith.constant 6 : index
    %c0_130 = arith.constant 0 : index
    %c0_131 = arith.constant 0 : index
    %498 = vector.load %arg6[%c6_129, %c0_130, %c0_131] : memref<12x7x32xf32, #tpu.memory_space<vmem>>, vector<1x7x32xf32>
    %499 = vector.shape_cast %498 : vector<1x7x32xf32> to vector<7x32xf32>
    %500 = vector.extract_strided_slice %499 {offsets = [0, 0], sizes = [1, 32], strides = [1, 1]} : vector<7x32xf32> to vector<1x32xf32>
    %501 = vector.extract_strided_slice %499 {offsets = [1, 0], sizes = [1, 32], strides = [1, 1]} : vector<7x32xf32> to vector<1x32xf32>
    %502 = vector.extract_strided_slice %499 {offsets = [2, 0], sizes = [1, 32], strides = [1, 1]} : vector<7x32xf32> to vector<1x32xf32>
    %503 = vector.extract_strided_slice %499 {offsets = [3, 0], sizes = [1, 32], strides = [1, 1]} : vector<7x32xf32> to vector<1x32xf32>
    %504 = vector.extract_strided_slice %499 {offsets = [4, 0], sizes = [1, 32], strides = [1, 1]} : vector<7x32xf32> to vector<1x32xf32>
    %505 = vector.extract_strided_slice %499 {offsets = [5, 0], sizes = [1, 32], strides = [1, 1]} : vector<7x32xf32> to vector<1x32xf32>
    %506 = vector.extract_strided_slice %499 {offsets = [6, 0], sizes = [1, 32], strides = [1, 1]} : vector<7x32xf32> to vector<1x32xf32>
    %507 = vector.extract_strided_slice %497 {offsets = [0, 0], sizes = [32, 128], strides = [1, 1]} : vector<32x160xf32> to vector<32x128xf32>
    %cst_132 = arith.constant dense<0.000000e+00> : vector<16x128xf32>
    %508 = tpu.matmul %471, %507, %cst_132 {dimension_numbers = #tpu.dot_dimension_numbers<[1], [0], [0], [1], [0, 0, 1, 1], [], []>} : vector<16x32xf32>, vector<32x128xf32>, vector<16x128xf32> -> vector<16x128xf32>
    %509 = vector.extract_strided_slice %497 {offsets = [0, 128], sizes = [32, 32], strides = [1, 1]} : vector<32x160xf32> to vector<32x32xf32>
    %cst_133 = arith.constant dense<0.000000e+00> : vector<32x32xf32>
    %510 = tpu.matmul %495, %509, %cst_133 {dimension_numbers = #tpu.dot_dimension_numbers<[1], [0], [0], [1], [0, 0, 1, 1], [], []>} : vector<32x32xf32>, vector<32x32xf32>, vector<32x32xf32> -> vector<32x32xf32>
    %cst_134 = arith.constant dense<0.000000e+00> : vector<64x128xf32>
    %511 = tpu.matmul %0, %508, %cst_134 {dimension_numbers = #tpu.dot_dimension_numbers<[1], [0], [0], [1], [0, 0, 1, 1], [], []>} : vector<64x16xf32>, vector<16x128xf32>, vector<64x128xf32> -> vector<64x128xf32>
    %512 = vector.extract_strided_slice %511 {offsets = [0, 32], sizes = [32, 32], strides = [1, 1]} : vector<64x128xf32> to vector<32x32xf32>
    %513 = vector.extract_strided_slice %511 {offsets = [32, 64], sizes = [32, 32], strides = [1, 1]} : vector<64x128xf32> to vector<32x32xf32>
    %514 = vector.extract_strided_slice %511 {offsets = [32, 96], sizes = [32, 32], strides = [1, 1]} : vector<64x128xf32> to vector<32x32xf32>
    %515 = arith.negf %495 : vector<32x32xf32>
    %516 = math.exp %515 : vector<32x32xf32>
    %cst_135 = arith.constant 1.000000e+00 : f32
    %517 = vector.broadcast %cst_135 : f32 to vector<32x32xf32>
    %518 = arith.addf %517, %516 : vector<32x32xf32>
    %519 = arith.divf %517, %518 : vector<32x32xf32>
    %520 = vector.broadcast %501 : vector<1x32xf32> to vector<32x32xf32>
    %521 = arith.addf %513, %520 : vector<32x32xf32>
    %522 = arith.mulf %519, %521 : vector<32x32xf32>
    %cst_136 = arith.constant dense<0.000000e+00> : vector<16x32xf32>
    %523 = tpu.matmul %1, %522, %cst_136 {dimension_numbers = #tpu.dot_dimension_numbers<[1], [0], [0], [1], [0, 0, 1, 1], [], []>} : vector<16x32xf32>, vector<32x32xf32>, vector<16x32xf32> -> vector<16x32xf32>
    %524 = vector.extract_strided_slice %508 {offsets = [0, 0], sizes = [16, 32], strides = [1, 1]} : vector<16x128xf32> to vector<16x32xf32>
    %525 = vector.broadcast %500 : vector<1x32xf32> to vector<16x32xf32>
    %526 = arith.addf %524, %525 : vector<16x32xf32>
    %527 = arith.addf %526, %523 : vector<16x32xf32>
    %cst_137 = arith.constant dense<0.000000e+00> : vector<1x32xf32>
    %528 = tpu.matmul %2, %527, %cst_137 {dimension_numbers = #tpu.dot_dimension_numbers<[1], [0], [0], [1], [0, 0, 1, 1], [], []>} : vector<1x16xf32>, vector<16x32xf32>, vector<1x32xf32> -> vector<1x32xf32>
    %529 = vector.broadcast %528 : vector<1x32xf32> to vector<16x32xf32>
    %530 = arith.subf %527, %529 : vector<16x32xf32>
    %531 = arith.mulf %530, %530 : vector<16x32xf32>
    %cst_138 = arith.constant dense<0.000000e+00> : vector<1x32xf32>
    %532 = tpu.matmul %2, %531, %cst_138 {dimension_numbers = #tpu.dot_dimension_numbers<[1], [0], [0], [1], [0, 0, 1, 1], [], []>} : vector<1x16xf32>, vector<16x32xf32>, vector<1x32xf32> -> vector<1x32xf32>
    %cst_139 = arith.constant 9.99999974E-6 : f32
    %533 = vector.broadcast %cst_139 : f32 to vector<1x32xf32>
    %534 = arith.addf %532, %533 : vector<1x32xf32>
    %535 = math.rsqrt %534 : vector<1x32xf32>
    %536 = arith.mulf %503, %535 : vector<1x32xf32>
    %537 = vector.broadcast %536 : vector<1x32xf32> to vector<16x32xf32>
    %538 = arith.mulf %530, %537 : vector<16x32xf32>
    %539 = vector.broadcast %504 : vector<1x32xf32> to vector<16x32xf32>
    %540 = arith.addf %538, %539 : vector<16x32xf32>
    %541 = arith.negf %540 : vector<16x32xf32>
    %542 = math.exp %541 : vector<16x32xf32>
    %cst_140 = arith.constant 1.000000e+00 : f32
    %543 = vector.broadcast %cst_140 : f32 to vector<16x32xf32>
    %544 = arith.addf %543, %542 : vector<16x32xf32>
    %545 = arith.divf %543, %544 : vector<16x32xf32>
    %546 = arith.mulf %540, %545 : vector<16x32xf32>
    %547 = arith.addf %471, %546 : vector<16x32xf32>
    %548 = arith.addf %510, %512 : vector<32x32xf32>
    %549 = arith.addf %548, %514 : vector<32x32xf32>
    %550 = vector.broadcast %502 : vector<1x32xf32> to vector<32x32xf32>
    %551 = arith.addf %549, %550 : vector<32x32xf32>
    %cst_141 = arith.constant dense<0.000000e+00> : vector<1x32xf32>
    %552 = tpu.matmul %3, %551, %cst_141 {dimension_numbers = #tpu.dot_dimension_numbers<[1], [0], [0], [1], [0, 0, 1, 1], [], []>} : vector<1x32xf32>, vector<32x32xf32>, vector<1x32xf32> -> vector<1x32xf32>
    %553 = vector.broadcast %552 : vector<1x32xf32> to vector<32x32xf32>
    %554 = arith.subf %551, %553 : vector<32x32xf32>
    %555 = arith.mulf %554, %554 : vector<32x32xf32>
    %cst_142 = arith.constant dense<0.000000e+00> : vector<1x32xf32>
    %556 = tpu.matmul %3, %555, %cst_142 {dimension_numbers = #tpu.dot_dimension_numbers<[1], [0], [0], [1], [0, 0, 1, 1], [], []>} : vector<1x32xf32>, vector<32x32xf32>, vector<1x32xf32> -> vector<1x32xf32>
    %cst_143 = arith.constant 9.99999974E-6 : f32
    %557 = vector.broadcast %cst_143 : f32 to vector<1x32xf32>
    %558 = arith.addf %556, %557 : vector<1x32xf32>
    %559 = math.rsqrt %558 : vector<1x32xf32>
    %560 = arith.mulf %505, %559 : vector<1x32xf32>
    %561 = vector.broadcast %560 : vector<1x32xf32> to vector<32x32xf32>
    %562 = arith.mulf %554, %561 : vector<32x32xf32>
    %563 = vector.broadcast %506 : vector<1x32xf32> to vector<32x32xf32>
    %564 = arith.addf %562, %563 : vector<32x32xf32>
    %565 = arith.negf %564 : vector<32x32xf32>
    %566 = math.exp %565 : vector<32x32xf32>
    %cst_144 = arith.constant 1.000000e+00 : f32
    %567 = vector.broadcast %cst_144 : f32 to vector<32x32xf32>
    %568 = arith.addf %567, %566 : vector<32x32xf32>
    %569 = arith.divf %567, %568 : vector<32x32xf32>
    %570 = arith.mulf %564, %569 : vector<32x32xf32>
    %571 = arith.addf %495, %570 : vector<32x32xf32>
    %c7 = arith.constant 7 : index
    %c0_145 = arith.constant 0 : index
    %c0_146 = arith.constant 0 : index
    %572 = vector.load %arg5[%c7, %c0_145, %c0_146] : memref<12x32x160xf32, #tpu.memory_space<vmem>>, vector<1x32x160xf32>
    %573 = vector.shape_cast %572 : vector<1x32x160xf32> to vector<32x160xf32>
    %c7_147 = arith.constant 7 : index
    %c0_148 = arith.constant 0 : index
    %c0_149 = arith.constant 0 : index
    %574 = vector.load %arg6[%c7_147, %c0_148, %c0_149] : memref<12x7x32xf32, #tpu.memory_space<vmem>>, vector<1x7x32xf32>
    %575 = vector.shape_cast %574 : vector<1x7x32xf32> to vector<7x32xf32>
    %576 = vector.extract_strided_slice %575 {offsets = [0, 0], sizes = [1, 32], strides = [1, 1]} : vector<7x32xf32> to vector<1x32xf32>
    %577 = vector.extract_strided_slice %575 {offsets = [1, 0], sizes = [1, 32], strides = [1, 1]} : vector<7x32xf32> to vector<1x32xf32>
    %578 = vector.extract_strided_slice %575 {offsets = [2, 0], sizes = [1, 32], strides = [1, 1]} : vector<7x32xf32> to vector<1x32xf32>
    %579 = vector.extract_strided_slice %575 {offsets = [3, 0], sizes = [1, 32], strides = [1, 1]} : vector<7x32xf32> to vector<1x32xf32>
    %580 = vector.extract_strided_slice %575 {offsets = [4, 0], sizes = [1, 32], strides = [1, 1]} : vector<7x32xf32> to vector<1x32xf32>
    %581 = vector.extract_strided_slice %575 {offsets = [5, 0], sizes = [1, 32], strides = [1, 1]} : vector<7x32xf32> to vector<1x32xf32>
    %582 = vector.extract_strided_slice %575 {offsets = [6, 0], sizes = [1, 32], strides = [1, 1]} : vector<7x32xf32> to vector<1x32xf32>
    %583 = vector.extract_strided_slice %573 {offsets = [0, 0], sizes = [32, 128], strides = [1, 1]} : vector<32x160xf32> to vector<32x128xf32>
    %cst_150 = arith.constant dense<0.000000e+00> : vector<16x128xf32>
    %584 = tpu.matmul %547, %583, %cst_150 {dimension_numbers = #tpu.dot_dimension_numbers<[1], [0], [0], [1], [0, 0, 1, 1], [], []>} : vector<16x32xf32>, vector<32x128xf32>, vector<16x128xf32> -> vector<16x128xf32>
    %585 = vector.extract_strided_slice %573 {offsets = [0, 128], sizes = [32, 32], strides = [1, 1]} : vector<32x160xf32> to vector<32x32xf32>
    %cst_151 = arith.constant dense<0.000000e+00> : vector<32x32xf32>
    %586 = tpu.matmul %571, %585, %cst_151 {dimension_numbers = #tpu.dot_dimension_numbers<[1], [0], [0], [1], [0, 0, 1, 1], [], []>} : vector<32x32xf32>, vector<32x32xf32>, vector<32x32xf32> -> vector<32x32xf32>
    %cst_152 = arith.constant dense<0.000000e+00> : vector<64x128xf32>
    %587 = tpu.matmul %0, %584, %cst_152 {dimension_numbers = #tpu.dot_dimension_numbers<[1], [0], [0], [1], [0, 0, 1, 1], [], []>} : vector<64x16xf32>, vector<16x128xf32>, vector<64x128xf32> -> vector<64x128xf32>
    %588 = vector.extract_strided_slice %587 {offsets = [0, 32], sizes = [32, 32], strides = [1, 1]} : vector<64x128xf32> to vector<32x32xf32>
    %589 = vector.extract_strided_slice %587 {offsets = [32, 64], sizes = [32, 32], strides = [1, 1]} : vector<64x128xf32> to vector<32x32xf32>
    %590 = vector.extract_strided_slice %587 {offsets = [32, 96], sizes = [32, 32], strides = [1, 1]} : vector<64x128xf32> to vector<32x32xf32>
    %591 = arith.negf %571 : vector<32x32xf32>
    %592 = math.exp %591 : vector<32x32xf32>
    %cst_153 = arith.constant 1.000000e+00 : f32
    %593 = vector.broadcast %cst_153 : f32 to vector<32x32xf32>
    %594 = arith.addf %593, %592 : vector<32x32xf32>
    %595 = arith.divf %593, %594 : vector<32x32xf32>
    %596 = vector.broadcast %577 : vector<1x32xf32> to vector<32x32xf32>
    %597 = arith.addf %589, %596 : vector<32x32xf32>
    %598 = arith.mulf %595, %597 : vector<32x32xf32>
    %cst_154 = arith.constant dense<0.000000e+00> : vector<16x32xf32>
    %599 = tpu.matmul %1, %598, %cst_154 {dimension_numbers = #tpu.dot_dimension_numbers<[1], [0], [0], [1], [0, 0, 1, 1], [], []>} : vector<16x32xf32>, vector<32x32xf32>, vector<16x32xf32> -> vector<16x32xf32>
    %600 = vector.extract_strided_slice %584 {offsets = [0, 0], sizes = [16, 32], strides = [1, 1]} : vector<16x128xf32> to vector<16x32xf32>
    %601 = vector.broadcast %576 : vector<1x32xf32> to vector<16x32xf32>
    %602 = arith.addf %600, %601 : vector<16x32xf32>
    %603 = arith.addf %602, %599 : vector<16x32xf32>
    %cst_155 = arith.constant dense<0.000000e+00> : vector<1x32xf32>
    %604 = tpu.matmul %2, %603, %cst_155 {dimension_numbers = #tpu.dot_dimension_numbers<[1], [0], [0], [1], [0, 0, 1, 1], [], []>} : vector<1x16xf32>, vector<16x32xf32>, vector<1x32xf32> -> vector<1x32xf32>
    %605 = vector.broadcast %604 : vector<1x32xf32> to vector<16x32xf32>
    %606 = arith.subf %603, %605 : vector<16x32xf32>
    %607 = arith.mulf %606, %606 : vector<16x32xf32>
    %cst_156 = arith.constant dense<0.000000e+00> : vector<1x32xf32>
    %608 = tpu.matmul %2, %607, %cst_156 {dimension_numbers = #tpu.dot_dimension_numbers<[1], [0], [0], [1], [0, 0, 1, 1], [], []>} : vector<1x16xf32>, vector<16x32xf32>, vector<1x32xf32> -> vector<1x32xf32>
    %cst_157 = arith.constant 9.99999974E-6 : f32
    %609 = vector.broadcast %cst_157 : f32 to vector<1x32xf32>
    %610 = arith.addf %608, %609 : vector<1x32xf32>
    %611 = math.rsqrt %610 : vector<1x32xf32>
    %612 = arith.mulf %579, %611 : vector<1x32xf32>
    %613 = vector.broadcast %612 : vector<1x32xf32> to vector<16x32xf32>
    %614 = arith.mulf %606, %613 : vector<16x32xf32>
    %615 = vector.broadcast %580 : vector<1x32xf32> to vector<16x32xf32>
    %616 = arith.addf %614, %615 : vector<16x32xf32>
    %617 = arith.negf %616 : vector<16x32xf32>
    %618 = math.exp %617 : vector<16x32xf32>
    %cst_158 = arith.constant 1.000000e+00 : f32
    %619 = vector.broadcast %cst_158 : f32 to vector<16x32xf32>
    %620 = arith.addf %619, %618 : vector<16x32xf32>
    %621 = arith.divf %619, %620 : vector<16x32xf32>
    %622 = arith.mulf %616, %621 : vector<16x32xf32>
    %623 = arith.addf %547, %622 : vector<16x32xf32>
    %624 = arith.addf %586, %588 : vector<32x32xf32>
    %625 = arith.addf %624, %590 : vector<32x32xf32>
    %626 = vector.broadcast %578 : vector<1x32xf32> to vector<32x32xf32>
    %627 = arith.addf %625, %626 : vector<32x32xf32>
    %cst_159 = arith.constant dense<0.000000e+00> : vector<1x32xf32>
    %628 = tpu.matmul %3, %627, %cst_159 {dimension_numbers = #tpu.dot_dimension_numbers<[1], [0], [0], [1], [0, 0, 1, 1], [], []>} : vector<1x32xf32>, vector<32x32xf32>, vector<1x32xf32> -> vector<1x32xf32>
    %629 = vector.broadcast %628 : vector<1x32xf32> to vector<32x32xf32>
    %630 = arith.subf %627, %629 : vector<32x32xf32>
    %631 = arith.mulf %630, %630 : vector<32x32xf32>
    %cst_160 = arith.constant dense<0.000000e+00> : vector<1x32xf32>
    %632 = tpu.matmul %3, %631, %cst_160 {dimension_numbers = #tpu.dot_dimension_numbers<[1], [0], [0], [1], [0, 0, 1, 1], [], []>} : vector<1x32xf32>, vector<32x32xf32>, vector<1x32xf32> -> vector<1x32xf32>
    %cst_161 = arith.constant 9.99999974E-6 : f32
    %633 = vector.broadcast %cst_161 : f32 to vector<1x32xf32>
    %634 = arith.addf %632, %633 : vector<1x32xf32>
    %635 = math.rsqrt %634 : vector<1x32xf32>
    %636 = arith.mulf %581, %635 : vector<1x32xf32>
    %637 = vector.broadcast %636 : vector<1x32xf32> to vector<32x32xf32>
    %638 = arith.mulf %630, %637 : vector<32x32xf32>
    %639 = vector.broadcast %582 : vector<1x32xf32> to vector<32x32xf32>
    %640 = arith.addf %638, %639 : vector<32x32xf32>
    %641 = arith.negf %640 : vector<32x32xf32>
    %642 = math.exp %641 : vector<32x32xf32>
    %cst_162 = arith.constant 1.000000e+00 : f32
    %643 = vector.broadcast %cst_162 : f32 to vector<32x32xf32>
    %644 = arith.addf %643, %642 : vector<32x32xf32>
    %645 = arith.divf %643, %644 : vector<32x32xf32>
    %646 = arith.mulf %640, %645 : vector<32x32xf32>
    %647 = arith.addf %571, %646 : vector<32x32xf32>
    %c8 = arith.constant 8 : index
    %c0_163 = arith.constant 0 : index
    %c0_164 = arith.constant 0 : index
    %648 = vector.load %arg5[%c8, %c0_163, %c0_164] : memref<12x32x160xf32, #tpu.memory_space<vmem>>, vector<1x32x160xf32>
    %649 = vector.shape_cast %648 : vector<1x32x160xf32> to vector<32x160xf32>
    %c8_165 = arith.constant 8 : index
    %c0_166 = arith.constant 0 : index
    %c0_167 = arith.constant 0 : index
    %650 = vector.load %arg6[%c8_165, %c0_166, %c0_167] : memref<12x7x32xf32, #tpu.memory_space<vmem>>, vector<1x7x32xf32>
    %651 = vector.shape_cast %650 : vector<1x7x32xf32> to vector<7x32xf32>
    %652 = vector.extract_strided_slice %651 {offsets = [0, 0], sizes = [1, 32], strides = [1, 1]} : vector<7x32xf32> to vector<1x32xf32>
    %653 = vector.extract_strided_slice %651 {offsets = [1, 0], sizes = [1, 32], strides = [1, 1]} : vector<7x32xf32> to vector<1x32xf32>
    %654 = vector.extract_strided_slice %651 {offsets = [2, 0], sizes = [1, 32], strides = [1, 1]} : vector<7x32xf32> to vector<1x32xf32>
    %655 = vector.extract_strided_slice %651 {offsets = [3, 0], sizes = [1, 32], strides = [1, 1]} : vector<7x32xf32> to vector<1x32xf32>
    %656 = vector.extract_strided_slice %651 {offsets = [4, 0], sizes = [1, 32], strides = [1, 1]} : vector<7x32xf32> to vector<1x32xf32>
    %657 = vector.extract_strided_slice %651 {offsets = [5, 0], sizes = [1, 32], strides = [1, 1]} : vector<7x32xf32> to vector<1x32xf32>
    %658 = vector.extract_strided_slice %651 {offsets = [6, 0], sizes = [1, 32], strides = [1, 1]} : vector<7x32xf32> to vector<1x32xf32>
    %659 = vector.extract_strided_slice %649 {offsets = [0, 0], sizes = [32, 128], strides = [1, 1]} : vector<32x160xf32> to vector<32x128xf32>
    %cst_168 = arith.constant dense<0.000000e+00> : vector<16x128xf32>
    %660 = tpu.matmul %623, %659, %cst_168 {dimension_numbers = #tpu.dot_dimension_numbers<[1], [0], [0], [1], [0, 0, 1, 1], [], []>} : vector<16x32xf32>, vector<32x128xf32>, vector<16x128xf32> -> vector<16x128xf32>
    %661 = vector.extract_strided_slice %649 {offsets = [0, 128], sizes = [32, 32], strides = [1, 1]} : vector<32x160xf32> to vector<32x32xf32>
    %cst_169 = arith.constant dense<0.000000e+00> : vector<32x32xf32>
    %662 = tpu.matmul %647, %661, %cst_169 {dimension_numbers = #tpu.dot_dimension_numbers<[1], [0], [0], [1], [0, 0, 1, 1], [], []>} : vector<32x32xf32>, vector<32x32xf32>, vector<32x32xf32> -> vector<32x32xf32>
    %cst_170 = arith.constant dense<0.000000e+00> : vector<64x128xf32>
    %663 = tpu.matmul %0, %660, %cst_170 {dimension_numbers = #tpu.dot_dimension_numbers<[1], [0], [0], [1], [0, 0, 1, 1], [], []>} : vector<64x16xf32>, vector<16x128xf32>, vector<64x128xf32> -> vector<64x128xf32>
    %664 = vector.extract_strided_slice %663 {offsets = [0, 32], sizes = [32, 32], strides = [1, 1]} : vector<64x128xf32> to vector<32x32xf32>
    %665 = vector.extract_strided_slice %663 {offsets = [32, 64], sizes = [32, 32], strides = [1, 1]} : vector<64x128xf32> to vector<32x32xf32>
    %666 = vector.extract_strided_slice %663 {offsets = [32, 96], sizes = [32, 32], strides = [1, 1]} : vector<64x128xf32> to vector<32x32xf32>
    %667 = arith.negf %647 : vector<32x32xf32>
    %668 = math.exp %667 : vector<32x32xf32>
    %cst_171 = arith.constant 1.000000e+00 : f32
    %669 = vector.broadcast %cst_171 : f32 to vector<32x32xf32>
    %670 = arith.addf %669, %668 : vector<32x32xf32>
    %671 = arith.divf %669, %670 : vector<32x32xf32>
    %672 = vector.broadcast %653 : vector<1x32xf32> to vector<32x32xf32>
    %673 = arith.addf %665, %672 : vector<32x32xf32>
    %674 = arith.mulf %671, %673 : vector<32x32xf32>
    %cst_172 = arith.constant dense<0.000000e+00> : vector<16x32xf32>
    %675 = tpu.matmul %1, %674, %cst_172 {dimension_numbers = #tpu.dot_dimension_numbers<[1], [0], [0], [1], [0, 0, 1, 1], [], []>} : vector<16x32xf32>, vector<32x32xf32>, vector<16x32xf32> -> vector<16x32xf32>
    %676 = vector.extract_strided_slice %660 {offsets = [0, 0], sizes = [16, 32], strides = [1, 1]} : vector<16x128xf32> to vector<16x32xf32>
    %677 = vector.broadcast %652 : vector<1x32xf32> to vector<16x32xf32>
    %678 = arith.addf %676, %677 : vector<16x32xf32>
    %679 = arith.addf %678, %675 : vector<16x32xf32>
    %cst_173 = arith.constant dense<0.000000e+00> : vector<1x32xf32>
    %680 = tpu.matmul %2, %679, %cst_173 {dimension_numbers = #tpu.dot_dimension_numbers<[1], [0], [0], [1], [0, 0, 1, 1], [], []>} : vector<1x16xf32>, vector<16x32xf32>, vector<1x32xf32> -> vector<1x32xf32>
    %681 = vector.broadcast %680 : vector<1x32xf32> to vector<16x32xf32>
    %682 = arith.subf %679, %681 : vector<16x32xf32>
    %683 = arith.mulf %682, %682 : vector<16x32xf32>
    %cst_174 = arith.constant dense<0.000000e+00> : vector<1x32xf32>
    %684 = tpu.matmul %2, %683, %cst_174 {dimension_numbers = #tpu.dot_dimension_numbers<[1], [0], [0], [1], [0, 0, 1, 1], [], []>} : vector<1x16xf32>, vector<16x32xf32>, vector<1x32xf32> -> vector<1x32xf32>
    %cst_175 = arith.constant 9.99999974E-6 : f32
    %685 = vector.broadcast %cst_175 : f32 to vector<1x32xf32>
    %686 = arith.addf %684, %685 : vector<1x32xf32>
    %687 = math.rsqrt %686 : vector<1x32xf32>
    %688 = arith.mulf %655, %687 : vector<1x32xf32>
    %689 = vector.broadcast %688 : vector<1x32xf32> to vector<16x32xf32>
    %690 = arith.mulf %682, %689 : vector<16x32xf32>
    %691 = vector.broadcast %656 : vector<1x32xf32> to vector<16x32xf32>
    %692 = arith.addf %690, %691 : vector<16x32xf32>
    %693 = arith.negf %692 : vector<16x32xf32>
    %694 = math.exp %693 : vector<16x32xf32>
    %cst_176 = arith.constant 1.000000e+00 : f32
    %695 = vector.broadcast %cst_176 : f32 to vector<16x32xf32>
    %696 = arith.addf %695, %694 : vector<16x32xf32>
    %697 = arith.divf %695, %696 : vector<16x32xf32>
    %698 = arith.mulf %692, %697 : vector<16x32xf32>
    %699 = arith.addf %623, %698 : vector<16x32xf32>
    %700 = arith.addf %662, %664 : vector<32x32xf32>
    %701 = arith.addf %700, %666 : vector<32x32xf32>
    %702 = vector.broadcast %654 : vector<1x32xf32> to vector<32x32xf32>
    %703 = arith.addf %701, %702 : vector<32x32xf32>
    %cst_177 = arith.constant dense<0.000000e+00> : vector<1x32xf32>
    %704 = tpu.matmul %3, %703, %cst_177 {dimension_numbers = #tpu.dot_dimension_numbers<[1], [0], [0], [1], [0, 0, 1, 1], [], []>} : vector<1x32xf32>, vector<32x32xf32>, vector<1x32xf32> -> vector<1x32xf32>
    %705 = vector.broadcast %704 : vector<1x32xf32> to vector<32x32xf32>
    %706 = arith.subf %703, %705 : vector<32x32xf32>
    %707 = arith.mulf %706, %706 : vector<32x32xf32>
    %cst_178 = arith.constant dense<0.000000e+00> : vector<1x32xf32>
    %708 = tpu.matmul %3, %707, %cst_178 {dimension_numbers = #tpu.dot_dimension_numbers<[1], [0], [0], [1], [0, 0, 1, 1], [], []>} : vector<1x32xf32>, vector<32x32xf32>, vector<1x32xf32> -> vector<1x32xf32>
    %cst_179 = arith.constant 9.99999974E-6 : f32
    %709 = vector.broadcast %cst_179 : f32 to vector<1x32xf32>
    %710 = arith.addf %708, %709 : vector<1x32xf32>
    %711 = math.rsqrt %710 : vector<1x32xf32>
    %712 = arith.mulf %657, %711 : vector<1x32xf32>
    %713 = vector.broadcast %712 : vector<1x32xf32> to vector<32x32xf32>
    %714 = arith.mulf %706, %713 : vector<32x32xf32>
    %715 = vector.broadcast %658 : vector<1x32xf32> to vector<32x32xf32>
    %716 = arith.addf %714, %715 : vector<32x32xf32>
    %717 = arith.negf %716 : vector<32x32xf32>
    %718 = math.exp %717 : vector<32x32xf32>
    %cst_180 = arith.constant 1.000000e+00 : f32
    %719 = vector.broadcast %cst_180 : f32 to vector<32x32xf32>
    %720 = arith.addf %719, %718 : vector<32x32xf32>
    %721 = arith.divf %719, %720 : vector<32x32xf32>
    %722 = arith.mulf %716, %721 : vector<32x32xf32>
    %723 = arith.addf %647, %722 : vector<32x32xf32>
    %c9 = arith.constant 9 : index
    %c0_181 = arith.constant 0 : index
    %c0_182 = arith.constant 0 : index
    %724 = vector.load %arg5[%c9, %c0_181, %c0_182] : memref<12x32x160xf32, #tpu.memory_space<vmem>>, vector<1x32x160xf32>
    %725 = vector.shape_cast %724 : vector<1x32x160xf32> to vector<32x160xf32>
    %c9_183 = arith.constant 9 : index
    %c0_184 = arith.constant 0 : index
    %c0_185 = arith.constant 0 : index
    %726 = vector.load %arg6[%c9_183, %c0_184, %c0_185] : memref<12x7x32xf32, #tpu.memory_space<vmem>>, vector<1x7x32xf32>
    %727 = vector.shape_cast %726 : vector<1x7x32xf32> to vector<7x32xf32>
    %728 = vector.extract_strided_slice %727 {offsets = [0, 0], sizes = [1, 32], strides = [1, 1]} : vector<7x32xf32> to vector<1x32xf32>
    %729 = vector.extract_strided_slice %727 {offsets = [1, 0], sizes = [1, 32], strides = [1, 1]} : vector<7x32xf32> to vector<1x32xf32>
    %730 = vector.extract_strided_slice %727 {offsets = [2, 0], sizes = [1, 32], strides = [1, 1]} : vector<7x32xf32> to vector<1x32xf32>
    %731 = vector.extract_strided_slice %727 {offsets = [3, 0], sizes = [1, 32], strides = [1, 1]} : vector<7x32xf32> to vector<1x32xf32>
    %732 = vector.extract_strided_slice %727 {offsets = [4, 0], sizes = [1, 32], strides = [1, 1]} : vector<7x32xf32> to vector<1x32xf32>
    %733 = vector.extract_strided_slice %727 {offsets = [5, 0], sizes = [1, 32], strides = [1, 1]} : vector<7x32xf32> to vector<1x32xf32>
    %734 = vector.extract_strided_slice %727 {offsets = [6, 0], sizes = [1, 32], strides = [1, 1]} : vector<7x32xf32> to vector<1x32xf32>
    %735 = vector.extract_strided_slice %725 {offsets = [0, 0], sizes = [32, 128], strides = [1, 1]} : vector<32x160xf32> to vector<32x128xf32>
    %cst_186 = arith.constant dense<0.000000e+00> : vector<16x128xf32>
    %736 = tpu.matmul %699, %735, %cst_186 {dimension_numbers = #tpu.dot_dimension_numbers<[1], [0], [0], [1], [0, 0, 1, 1], [], []>} : vector<16x32xf32>, vector<32x128xf32>, vector<16x128xf32> -> vector<16x128xf32>
    %737 = vector.extract_strided_slice %725 {offsets = [0, 128], sizes = [32, 32], strides = [1, 1]} : vector<32x160xf32> to vector<32x32xf32>
    %cst_187 = arith.constant dense<0.000000e+00> : vector<32x32xf32>
    %738 = tpu.matmul %723, %737, %cst_187 {dimension_numbers = #tpu.dot_dimension_numbers<[1], [0], [0], [1], [0, 0, 1, 1], [], []>} : vector<32x32xf32>, vector<32x32xf32>, vector<32x32xf32> -> vector<32x32xf32>
    %cst_188 = arith.constant dense<0.000000e+00> : vector<64x128xf32>
    %739 = tpu.matmul %0, %736, %cst_188 {dimension_numbers = #tpu.dot_dimension_numbers<[1], [0], [0], [1], [0, 0, 1, 1], [], []>} : vector<64x16xf32>, vector<16x128xf32>, vector<64x128xf32> -> vector<64x128xf32>
    %740 = vector.extract_strided_slice %739 {offsets = [0, 32], sizes = [32, 32], strides = [1, 1]} : vector<64x128xf32> to vector<32x32xf32>
    %741 = vector.extract_strided_slice %739 {offsets = [32, 64], sizes = [32, 32], strides = [1, 1]} : vector<64x128xf32> to vector<32x32xf32>
    %742 = vector.extract_strided_slice %739 {offsets = [32, 96], sizes = [32, 32], strides = [1, 1]} : vector<64x128xf32> to vector<32x32xf32>
    %743 = arith.negf %723 : vector<32x32xf32>
    %744 = math.exp %743 : vector<32x32xf32>
    %cst_189 = arith.constant 1.000000e+00 : f32
    %745 = vector.broadcast %cst_189 : f32 to vector<32x32xf32>
    %746 = arith.addf %745, %744 : vector<32x32xf32>
    %747 = arith.divf %745, %746 : vector<32x32xf32>
    %748 = vector.broadcast %729 : vector<1x32xf32> to vector<32x32xf32>
    %749 = arith.addf %741, %748 : vector<32x32xf32>
    %750 = arith.mulf %747, %749 : vector<32x32xf32>
    %cst_190 = arith.constant dense<0.000000e+00> : vector<16x32xf32>
    %751 = tpu.matmul %1, %750, %cst_190 {dimension_numbers = #tpu.dot_dimension_numbers<[1], [0], [0], [1], [0, 0, 1, 1], [], []>} : vector<16x32xf32>, vector<32x32xf32>, vector<16x32xf32> -> vector<16x32xf32>
    %752 = vector.extract_strided_slice %736 {offsets = [0, 0], sizes = [16, 32], strides = [1, 1]} : vector<16x128xf32> to vector<16x32xf32>
    %753 = vector.broadcast %728 : vector<1x32xf32> to vector<16x32xf32>
    %754 = arith.addf %752, %753 : vector<16x32xf32>
    %755 = arith.addf %754, %751 : vector<16x32xf32>
    %cst_191 = arith.constant dense<0.000000e+00> : vector<1x32xf32>
    %756 = tpu.matmul %2, %755, %cst_191 {dimension_numbers = #tpu.dot_dimension_numbers<[1], [0], [0], [1], [0, 0, 1, 1], [], []>} : vector<1x16xf32>, vector<16x32xf32>, vector<1x32xf32> -> vector<1x32xf32>
    %757 = vector.broadcast %756 : vector<1x32xf32> to vector<16x32xf32>
    %758 = arith.subf %755, %757 : vector<16x32xf32>
    %759 = arith.mulf %758, %758 : vector<16x32xf32>
    %cst_192 = arith.constant dense<0.000000e+00> : vector<1x32xf32>
    %760 = tpu.matmul %2, %759, %cst_192 {dimension_numbers = #tpu.dot_dimension_numbers<[1], [0], [0], [1], [0, 0, 1, 1], [], []>} : vector<1x16xf32>, vector<16x32xf32>, vector<1x32xf32> -> vector<1x32xf32>
    %cst_193 = arith.constant 9.99999974E-6 : f32
    %761 = vector.broadcast %cst_193 : f32 to vector<1x32xf32>
    %762 = arith.addf %760, %761 : vector<1x32xf32>
    %763 = math.rsqrt %762 : vector<1x32xf32>
    %764 = arith.mulf %731, %763 : vector<1x32xf32>
    %765 = vector.broadcast %764 : vector<1x32xf32> to vector<16x32xf32>
    %766 = arith.mulf %758, %765 : vector<16x32xf32>
    %767 = vector.broadcast %732 : vector<1x32xf32> to vector<16x32xf32>
    %768 = arith.addf %766, %767 : vector<16x32xf32>
    %769 = arith.negf %768 : vector<16x32xf32>
    %770 = math.exp %769 : vector<16x32xf32>
    %cst_194 = arith.constant 1.000000e+00 : f32
    %771 = vector.broadcast %cst_194 : f32 to vector<16x32xf32>
    %772 = arith.addf %771, %770 : vector<16x32xf32>
    %773 = arith.divf %771, %772 : vector<16x32xf32>
    %774 = arith.mulf %768, %773 : vector<16x32xf32>
    %775 = arith.addf %699, %774 : vector<16x32xf32>
    %776 = arith.addf %738, %740 : vector<32x32xf32>
    %777 = arith.addf %776, %742 : vector<32x32xf32>
    %778 = vector.broadcast %730 : vector<1x32xf32> to vector<32x32xf32>
    %779 = arith.addf %777, %778 : vector<32x32xf32>
    %cst_195 = arith.constant dense<0.000000e+00> : vector<1x32xf32>
    %780 = tpu.matmul %3, %779, %cst_195 {dimension_numbers = #tpu.dot_dimension_numbers<[1], [0], [0], [1], [0, 0, 1, 1], [], []>} : vector<1x32xf32>, vector<32x32xf32>, vector<1x32xf32> -> vector<1x32xf32>
    %781 = vector.broadcast %780 : vector<1x32xf32> to vector<32x32xf32>
    %782 = arith.subf %779, %781 : vector<32x32xf32>
    %783 = arith.mulf %782, %782 : vector<32x32xf32>
    %cst_196 = arith.constant dense<0.000000e+00> : vector<1x32xf32>
    %784 = tpu.matmul %3, %783, %cst_196 {dimension_numbers = #tpu.dot_dimension_numbers<[1], [0], [0], [1], [0, 0, 1, 1], [], []>} : vector<1x32xf32>, vector<32x32xf32>, vector<1x32xf32> -> vector<1x32xf32>
    %cst_197 = arith.constant 9.99999974E-6 : f32
    %785 = vector.broadcast %cst_197 : f32 to vector<1x32xf32>
    %786 = arith.addf %784, %785 : vector<1x32xf32>
    %787 = math.rsqrt %786 : vector<1x32xf32>
    %788 = arith.mulf %733, %787 : vector<1x32xf32>
    %789 = vector.broadcast %788 : vector<1x32xf32> to vector<32x32xf32>
    %790 = arith.mulf %782, %789 : vector<32x32xf32>
    %791 = vector.broadcast %734 : vector<1x32xf32> to vector<32x32xf32>
    %792 = arith.addf %790, %791 : vector<32x32xf32>
    %793 = arith.negf %792 : vector<32x32xf32>
    %794 = math.exp %793 : vector<32x32xf32>
    %cst_198 = arith.constant 1.000000e+00 : f32
    %795 = vector.broadcast %cst_198 : f32 to vector<32x32xf32>
    %796 = arith.addf %795, %794 : vector<32x32xf32>
    %797 = arith.divf %795, %796 : vector<32x32xf32>
    %798 = arith.mulf %792, %797 : vector<32x32xf32>
    %799 = arith.addf %723, %798 : vector<32x32xf32>
    %c10 = arith.constant 10 : index
    %c0_199 = arith.constant 0 : index
    %c0_200 = arith.constant 0 : index
    %800 = vector.load %arg5[%c10, %c0_199, %c0_200] : memref<12x32x160xf32, #tpu.memory_space<vmem>>, vector<1x32x160xf32>
    %801 = vector.shape_cast %800 : vector<1x32x160xf32> to vector<32x160xf32>
    %c10_201 = arith.constant 10 : index
    %c0_202 = arith.constant 0 : index
    %c0_203 = arith.constant 0 : index
    %802 = vector.load %arg6[%c10_201, %c0_202, %c0_203] : memref<12x7x32xf32, #tpu.memory_space<vmem>>, vector<1x7x32xf32>
    %803 = vector.shape_cast %802 : vector<1x7x32xf32> to vector<7x32xf32>
    %804 = vector.extract_strided_slice %803 {offsets = [0, 0], sizes = [1, 32], strides = [1, 1]} : vector<7x32xf32> to vector<1x32xf32>
    %805 = vector.extract_strided_slice %803 {offsets = [1, 0], sizes = [1, 32], strides = [1, 1]} : vector<7x32xf32> to vector<1x32xf32>
    %806 = vector.extract_strided_slice %803 {offsets = [2, 0], sizes = [1, 32], strides = [1, 1]} : vector<7x32xf32> to vector<1x32xf32>
    %807 = vector.extract_strided_slice %803 {offsets = [3, 0], sizes = [1, 32], strides = [1, 1]} : vector<7x32xf32> to vector<1x32xf32>
    %808 = vector.extract_strided_slice %803 {offsets = [4, 0], sizes = [1, 32], strides = [1, 1]} : vector<7x32xf32> to vector<1x32xf32>
    %809 = vector.extract_strided_slice %803 {offsets = [5, 0], sizes = [1, 32], strides = [1, 1]} : vector<7x32xf32> to vector<1x32xf32>
    %810 = vector.extract_strided_slice %803 {offsets = [6, 0], sizes = [1, 32], strides = [1, 1]} : vector<7x32xf32> to vector<1x32xf32>
    %811 = vector.extract_strided_slice %801 {offsets = [0, 0], sizes = [32, 128], strides = [1, 1]} : vector<32x160xf32> to vector<32x128xf32>
    %cst_204 = arith.constant dense<0.000000e+00> : vector<16x128xf32>
    %812 = tpu.matmul %775, %811, %cst_204 {dimension_numbers = #tpu.dot_dimension_numbers<[1], [0], [0], [1], [0, 0, 1, 1], [], []>} : vector<16x32xf32>, vector<32x128xf32>, vector<16x128xf32> -> vector<16x128xf32>
    %813 = vector.extract_strided_slice %801 {offsets = [0, 128], sizes = [32, 32], strides = [1, 1]} : vector<32x160xf32> to vector<32x32xf32>
    %cst_205 = arith.constant dense<0.000000e+00> : vector<32x32xf32>
    %814 = tpu.matmul %799, %813, %cst_205 {dimension_numbers = #tpu.dot_dimension_numbers<[1], [0], [0], [1], [0, 0, 1, 1], [], []>} : vector<32x32xf32>, vector<32x32xf32>, vector<32x32xf32> -> vector<32x32xf32>
    %cst_206 = arith.constant dense<0.000000e+00> : vector<64x128xf32>
    %815 = tpu.matmul %0, %812, %cst_206 {dimension_numbers = #tpu.dot_dimension_numbers<[1], [0], [0], [1], [0, 0, 1, 1], [], []>} : vector<64x16xf32>, vector<16x128xf32>, vector<64x128xf32> -> vector<64x128xf32>
    %816 = vector.extract_strided_slice %815 {offsets = [0, 32], sizes = [32, 32], strides = [1, 1]} : vector<64x128xf32> to vector<32x32xf32>
    %817 = vector.extract_strided_slice %815 {offsets = [32, 64], sizes = [32, 32], strides = [1, 1]} : vector<64x128xf32> to vector<32x32xf32>
    %818 = vector.extract_strided_slice %815 {offsets = [32, 96], sizes = [32, 32], strides = [1, 1]} : vector<64x128xf32> to vector<32x32xf32>
    %819 = arith.negf %799 : vector<32x32xf32>
    %820 = math.exp %819 : vector<32x32xf32>
    %cst_207 = arith.constant 1.000000e+00 : f32
    %821 = vector.broadcast %cst_207 : f32 to vector<32x32xf32>
    %822 = arith.addf %821, %820 : vector<32x32xf32>
    %823 = arith.divf %821, %822 : vector<32x32xf32>
    %824 = vector.broadcast %805 : vector<1x32xf32> to vector<32x32xf32>
    %825 = arith.addf %817, %824 : vector<32x32xf32>
    %826 = arith.mulf %823, %825 : vector<32x32xf32>
    %cst_208 = arith.constant dense<0.000000e+00> : vector<16x32xf32>
    %827 = tpu.matmul %1, %826, %cst_208 {dimension_numbers = #tpu.dot_dimension_numbers<[1], [0], [0], [1], [0, 0, 1, 1], [], []>} : vector<16x32xf32>, vector<32x32xf32>, vector<16x32xf32> -> vector<16x32xf32>
    %828 = vector.extract_strided_slice %812 {offsets = [0, 0], sizes = [16, 32], strides = [1, 1]} : vector<16x128xf32> to vector<16x32xf32>
    %829 = vector.broadcast %804 : vector<1x32xf32> to vector<16x32xf32>
    %830 = arith.addf %828, %829 : vector<16x32xf32>
    %831 = arith.addf %830, %827 : vector<16x32xf32>
    %cst_209 = arith.constant dense<0.000000e+00> : vector<1x32xf32>
    %832 = tpu.matmul %2, %831, %cst_209 {dimension_numbers = #tpu.dot_dimension_numbers<[1], [0], [0], [1], [0, 0, 1, 1], [], []>} : vector<1x16xf32>, vector<16x32xf32>, vector<1x32xf32> -> vector<1x32xf32>
    %833 = vector.broadcast %832 : vector<1x32xf32> to vector<16x32xf32>
    %834 = arith.subf %831, %833 : vector<16x32xf32>
    %835 = arith.mulf %834, %834 : vector<16x32xf32>
    %cst_210 = arith.constant dense<0.000000e+00> : vector<1x32xf32>
    %836 = tpu.matmul %2, %835, %cst_210 {dimension_numbers = #tpu.dot_dimension_numbers<[1], [0], [0], [1], [0, 0, 1, 1], [], []>} : vector<1x16xf32>, vector<16x32xf32>, vector<1x32xf32> -> vector<1x32xf32>
    %cst_211 = arith.constant 9.99999974E-6 : f32
    %837 = vector.broadcast %cst_211 : f32 to vector<1x32xf32>
    %838 = arith.addf %836, %837 : vector<1x32xf32>
    %839 = math.rsqrt %838 : vector<1x32xf32>
    %840 = arith.mulf %807, %839 : vector<1x32xf32>
    %841 = vector.broadcast %840 : vector<1x32xf32> to vector<16x32xf32>
    %842 = arith.mulf %834, %841 : vector<16x32xf32>
    %843 = vector.broadcast %808 : vector<1x32xf32> to vector<16x32xf32>
    %844 = arith.addf %842, %843 : vector<16x32xf32>
    %845 = arith.negf %844 : vector<16x32xf32>
    %846 = math.exp %845 : vector<16x32xf32>
    %cst_212 = arith.constant 1.000000e+00 : f32
    %847 = vector.broadcast %cst_212 : f32 to vector<16x32xf32>
    %848 = arith.addf %847, %846 : vector<16x32xf32>
    %849 = arith.divf %847, %848 : vector<16x32xf32>
    %850 = arith.mulf %844, %849 : vector<16x32xf32>
    %851 = arith.addf %775, %850 : vector<16x32xf32>
    %852 = arith.addf %814, %816 : vector<32x32xf32>
    %853 = arith.addf %852, %818 : vector<32x32xf32>
    %854 = vector.broadcast %806 : vector<1x32xf32> to vector<32x32xf32>
    %855 = arith.addf %853, %854 : vector<32x32xf32>
    %cst_213 = arith.constant dense<0.000000e+00> : vector<1x32xf32>
    %856 = tpu.matmul %3, %855, %cst_213 {dimension_numbers = #tpu.dot_dimension_numbers<[1], [0], [0], [1], [0, 0, 1, 1], [], []>} : vector<1x32xf32>, vector<32x32xf32>, vector<1x32xf32> -> vector<1x32xf32>
    %857 = vector.broadcast %856 : vector<1x32xf32> to vector<32x32xf32>
    %858 = arith.subf %855, %857 : vector<32x32xf32>
    %859 = arith.mulf %858, %858 : vector<32x32xf32>
    %cst_214 = arith.constant dense<0.000000e+00> : vector<1x32xf32>
    %860 = tpu.matmul %3, %859, %cst_214 {dimension_numbers = #tpu.dot_dimension_numbers<[1], [0], [0], [1], [0, 0, 1, 1], [], []>} : vector<1x32xf32>, vector<32x32xf32>, vector<1x32xf32> -> vector<1x32xf32>
    %cst_215 = arith.constant 9.99999974E-6 : f32
    %861 = vector.broadcast %cst_215 : f32 to vector<1x32xf32>
    %862 = arith.addf %860, %861 : vector<1x32xf32>
    %863 = math.rsqrt %862 : vector<1x32xf32>
    %864 = arith.mulf %809, %863 : vector<1x32xf32>
    %865 = vector.broadcast %864 : vector<1x32xf32> to vector<32x32xf32>
    %866 = arith.mulf %858, %865 : vector<32x32xf32>
    %867 = vector.broadcast %810 : vector<1x32xf32> to vector<32x32xf32>
    %868 = arith.addf %866, %867 : vector<32x32xf32>
    %869 = arith.negf %868 : vector<32x32xf32>
    %870 = math.exp %869 : vector<32x32xf32>
    %cst_216 = arith.constant 1.000000e+00 : f32
    %871 = vector.broadcast %cst_216 : f32 to vector<32x32xf32>
    %872 = arith.addf %871, %870 : vector<32x32xf32>
    %873 = arith.divf %871, %872 : vector<32x32xf32>
    %874 = arith.mulf %868, %873 : vector<32x32xf32>
    %875 = arith.addf %799, %874 : vector<32x32xf32>
    %c11 = arith.constant 11 : index
    %c0_217 = arith.constant 0 : index
    %c0_218 = arith.constant 0 : index
    %876 = vector.load %arg5[%c11, %c0_217, %c0_218] : memref<12x32x160xf32, #tpu.memory_space<vmem>>, vector<1x32x160xf32>
    %877 = vector.shape_cast %876 : vector<1x32x160xf32> to vector<32x160xf32>
    %c11_219 = arith.constant 11 : index
    %c0_220 = arith.constant 0 : index
    %c0_221 = arith.constant 0 : index
    %878 = vector.load %arg6[%c11_219, %c0_220, %c0_221] : memref<12x7x32xf32, #tpu.memory_space<vmem>>, vector<1x7x32xf32>
    %879 = vector.shape_cast %878 : vector<1x7x32xf32> to vector<7x32xf32>
    %880 = vector.extract_strided_slice %879 {offsets = [0, 0], sizes = [1, 32], strides = [1, 1]} : vector<7x32xf32> to vector<1x32xf32>
    %881 = vector.extract_strided_slice %879 {offsets = [1, 0], sizes = [1, 32], strides = [1, 1]} : vector<7x32xf32> to vector<1x32xf32>
    %882 = vector.extract_strided_slice %879 {offsets = [3, 0], sizes = [1, 32], strides = [1, 1]} : vector<7x32xf32> to vector<1x32xf32>
    %883 = vector.extract_strided_slice %879 {offsets = [4, 0], sizes = [1, 32], strides = [1, 1]} : vector<7x32xf32> to vector<1x32xf32>
    %884 = vector.extract_strided_slice %877 {offsets = [0, 0], sizes = [32, 128], strides = [1, 1]} : vector<32x160xf32> to vector<32x128xf32>
    %cst_222 = arith.constant dense<0.000000e+00> : vector<16x128xf32>
    %885 = tpu.matmul %851, %884, %cst_222 {dimension_numbers = #tpu.dot_dimension_numbers<[1], [0], [0], [1], [0, 0, 1, 1], [], []>} : vector<16x32xf32>, vector<32x128xf32>, vector<16x128xf32> -> vector<16x128xf32>
    %cst_223 = arith.constant dense<0.000000e+00> : vector<64x128xf32>
    %886 = tpu.matmul %0, %885, %cst_223 {dimension_numbers = #tpu.dot_dimension_numbers<[1], [0], [0], [1], [0, 0, 1, 1], [], []>} : vector<64x16xf32>, vector<16x128xf32>, vector<64x128xf32> -> vector<64x128xf32>
    %887 = vector.extract_strided_slice %886 {offsets = [32, 64], sizes = [32, 32], strides = [1, 1]} : vector<64x128xf32> to vector<32x32xf32>
    %888 = arith.negf %875 : vector<32x32xf32>
    %889 = math.exp %888 : vector<32x32xf32>
    %cst_224 = arith.constant 1.000000e+00 : f32
    %890 = vector.broadcast %cst_224 : f32 to vector<32x32xf32>
    %891 = arith.addf %890, %889 : vector<32x32xf32>
    %892 = arith.divf %890, %891 : vector<32x32xf32>
    %893 = vector.broadcast %881 : vector<1x32xf32> to vector<32x32xf32>
    %894 = arith.addf %887, %893 : vector<32x32xf32>
    %895 = arith.mulf %892, %894 : vector<32x32xf32>
    %cst_225 = arith.constant dense<0.000000e+00> : vector<16x32xf32>
    %896 = tpu.matmul %1, %895, %cst_225 {dimension_numbers = #tpu.dot_dimension_numbers<[1], [0], [0], [1], [0, 0, 1, 1], [], []>} : vector<16x32xf32>, vector<32x32xf32>, vector<16x32xf32> -> vector<16x32xf32>
    %897 = vector.extract_strided_slice %885 {offsets = [0, 0], sizes = [16, 32], strides = [1, 1]} : vector<16x128xf32> to vector<16x32xf32>
    %898 = vector.broadcast %880 : vector<1x32xf32> to vector<16x32xf32>
    %899 = arith.addf %897, %898 : vector<16x32xf32>
    %900 = arith.addf %899, %896 : vector<16x32xf32>
    %cst_226 = arith.constant dense<0.000000e+00> : vector<1x32xf32>
    %901 = tpu.matmul %2, %900, %cst_226 {dimension_numbers = #tpu.dot_dimension_numbers<[1], [0], [0], [1], [0, 0, 1, 1], [], []>} : vector<1x16xf32>, vector<16x32xf32>, vector<1x32xf32> -> vector<1x32xf32>
    %902 = vector.broadcast %901 : vector<1x32xf32> to vector<16x32xf32>
    %903 = arith.subf %900, %902 : vector<16x32xf32>
    %904 = arith.mulf %903, %903 : vector<16x32xf32>
    %cst_227 = arith.constant dense<0.000000e+00> : vector<1x32xf32>
    %905 = tpu.matmul %2, %904, %cst_227 {dimension_numbers = #tpu.dot_dimension_numbers<[1], [0], [0], [1], [0, 0, 1, 1], [], []>} : vector<1x16xf32>, vector<16x32xf32>, vector<1x32xf32> -> vector<1x32xf32>
    %cst_228 = arith.constant 9.99999974E-6 : f32
    %906 = vector.broadcast %cst_228 : f32 to vector<1x32xf32>
    %907 = arith.addf %905, %906 : vector<1x32xf32>
    %908 = math.rsqrt %907 : vector<1x32xf32>
    %909 = arith.mulf %882, %908 : vector<1x32xf32>
    %910 = vector.broadcast %909 : vector<1x32xf32> to vector<16x32xf32>
    %911 = arith.mulf %903, %910 : vector<16x32xf32>
    %912 = vector.broadcast %883 : vector<1x32xf32> to vector<16x32xf32>
    %913 = arith.addf %911, %912 : vector<16x32xf32>
    %914 = arith.negf %913 : vector<16x32xf32>
    %915 = math.exp %914 : vector<16x32xf32>
    %cst_229 = arith.constant 1.000000e+00 : f32
    %916 = vector.broadcast %cst_229 : f32 to vector<16x32xf32>
    %917 = arith.addf %916, %915 : vector<16x32xf32>
    %918 = arith.divf %916, %917 : vector<16x32xf32>
    %919 = arith.mulf %913, %918 : vector<16x32xf32>
    %920 = arith.addf %851, %919 : vector<16x32xf32>
    %c0_230 = arith.constant 0 : index
    %c0_231 = arith.constant 0 : index
    %921 = vector.load %arg7[%c0_230, %c0_231] : memref<16x32xf32, #tpu.memory_space<vmem>>, vector<16x32xf32>
    tpu.vector_store %arg7[%c0_230, %c0_231], %920 {strides = array<i32>} : memref<16x32xf32, #tpu.memory_space<vmem>>, vector<16x32xf32>,
    return
  }
}

</mosaic_0001>

<bundles_post_ra>
// kernel: node_embed_gnn.1
= control target key start
LH: loop header
LB: loop body
LE: loop exit
PB: predicated region body
PF: predicated region fallthrough
CT: control target
= control target key end

     0   :  { %v13383_v1 = vmov 1   ;;  %v13384_v2 = vmov 0   ;;  %s15683_s0 = inlined_call_operand.vmem [shape: f32[16,2], index: 0, kind: input, shape index: {}]   ;;  %s15684_s1 = inlined_call_operand.vmem [shape: f32[32,1], index: 1, kind: input, shape index: {}]   ;;  %s15685_s2 = inlined_call_operand.vmem [shape: f32[64,16], index: 2, kind: input, shape index: {}]   ;;  %s15686_s3 = inlined_call_operand.vmem [shape: f32[16,32], index: 3, kind: input, shape index: {}]   ;;  %s15687_s4 = inlined_call_operand.vmem [shape: f32[5,32], index: 4, kind: input, shape index: {}]   ;;  %s15688_s5 = inlined_call_operand.vmem [shape: f32[12,32,160], index: 5, kind: input, shape index: {}]   ;;  %s15689_s6 = inlined_call_operand.vmem [shape: f32[12,7,32], index: 6, kind: input, shape index: {}]   ;;  %s15690_s7 = inlined_call_operand.hbm [shape: f32[16,32], index: 7, kind: output, shape index: {}]  }
   0x1   :  { %v37_v0 = vld [vmem:[%s15683_s0] sm:$0xff]  ;;  %12773 = vset.pattern.permute.xlu1 %v13383_v1  ;;  %12772 = vset.pattern.permute.xlu0 %v13384_v2 }
   0x2   :  { %12 = vsyncpa [#allocation3], 0  ;;  %64 = vperm.xlu1 %12773, %v37_v0   ;;  %42 = vperm.xlu0 %12772, %v37_v0   ;;  %v38_v3 = vld [vmem:[%s15683_s0 + $0x8] sm:$0xff]  ;;  %v93_v4 = vld [vmem:[%s15684_s1] sm:$0xff]  ;;  %v50_v12 = vlaneseq  ;;  %vm172_vm0 = vcmask 261120   ;;  %vm254_vm1 = vcmask 130048  }
   0x3   :  { %v95_v5 = vld [vmem:[%s15684_s1 + $0x10] sm:$0xff]  ;;  %v163_v6 = vld [vmem:[%s15688_s5] sm:$0xff]  ;;  %v94_v45 = vld [vmem:[%s15684_s1 + $0x8] sm:$0xff]  ;;  %s13385_s26 = smov 64   ;;  %s13386_s20 = smov 96   ;;  %vm13389_vm2 = vmmov 0  }
   0x4   :  { %v165_v7 = vld [vmem:[%s15688_s5 + $0x10] sm:$0xff]  ;;  %v167_v9 = vld [vmem:[%s15688_s5 + $0x20] sm:$0xff]  ;;  %v13460_v13 = vshrl.u32 %v50_v12, 7  ;;  %v96_v46 = vld [vmem:[%s15684_s1 + $0x18] sm:$0xff]  ;;  %s13387_s21 = smov 32  }
   0x5   :  { %v12227_v8 = vpack.c.bf16 %v165_v7, %v163_v6  ;;  %v169_v10 = vld [vmem:[%s15688_s5 + $0x30] sm:$0xff]  ;;  %v39_v16 = vld [vmem:[%s15687_s4] sm:$0x3]  ;;  %v10219_v20 = vld [vmem:[%s15687_s4 + $0x2] ss:$0 sm:$0xff] }
   0x6   :  { %68 = vperm.xlu1 %12773, %v38_v3   ;;  %47 = vperm.xlu0 %12772, %v38_v3   ;;  %v12231_v11 = vpack.c.bf16 %v169_v10, %v167_v9  ;;  %v13463_v14 = vsub.s32 0, %v13460_v13  ;;  %v13466_v15 = vsub.s32 1, %v13460_v13  ;;  %v13487_v42 = vld [vmem:[%s15685_s2] sm:$0xff]  ;;  %v13514_v50 = vld [vmem:[%s15685_s2 + $0x8] sm:$0xff]  ;;  %v13519_v51 = vld [vmem:[%s15685_s2 + $0x10] sm:$0xff] }
   0x7   :  { %12228 = vmatprep.subr.bf16.mxu0 %v12227_v8  ;;  %11222 = vmatprep.mubr.msk.f32.mxu1 %vm254_vm1, %v13487_v42  ;;  %v13494_v43 = vld [vmem:[%s15689_s6] sm:$0x7f]  ;;  %v13528_v52 = vld [vmem:[%s15685_s2 + $0x18] sm:$0xff]  ;;  %v13542_v54 = vld [vmem:[%s15685_s2 + $0x28] sm:$0xff] }
   0x8   :  { %12230 = vmatpush3.bf16.msra.mxu0 %v12227_v8  ;;  %v74_v17 = vrot.slane %v39_v16, %v13466_v15  ;;  %v53_v18 = vrot.slane %v39_v16, %v13463_v14  ;;  %v411_v44 = vrot.slane %v13494_v43, %v13466_v15  ;;  %v13533_v53 = vld [vmem:[%s15685_s2 + $0x20] sm:$0xff]  ;;  %v13547_v55 = vld [vmem:[%s15685_s2 + $0x30] sm:$0xff]  ;;  %v13556_v56 = vld [vmem:[%s15685_s2 + $0x38] sm:$0xff] }
   0x9   :  { %12232 = vmatprep.subr.bf16.mxu0 %v12231_v11  ;;  %v13563_v3 = vld [vmem:[%s15686_s3] sm:$0xff] }
   0xa   :  { %100 = vperm.xlu0 %12772, %v93_v4   ;;  %12774 = vset.pattern.permute.xlu1 %v13384_v2  ;;  %v10222_v10 = vld [vmem:[%s15687_s4 + $0x3] ss:$0 sm:$0xff] }
   0xb   :  { %105 = vperm.xlu1 %12774, %v94_v45  }
   0xc   :  { %12234 = vmatpush3.bf16.msra.mxu0 %v12231_v11 }
   0xe   :  { %110 = vperm.xlu0 %12772, %v95_v5  }
   0xf   :  { %115 = vperm.xlu1 %12774, %v96_v46  }
  0x12   :  { %413 = vrot.lane.b32.xlu0 %v411_v44, %s13385_s26 }
  0x81   :  { %v65_v19 = vpop.permute.xlu1 %64  ;;  %v43_v21 = vpop.permute.xlu0 %42 }
  0x82   :  { %v75_v22 = vmul.f32 %v74_v17, %v65_v19  ;;  %v54_v23 = vmul.f32 %v53_v18, %v43_v21 }
  0x84   :  { %v61_v24 = vadd.f32 %v10219_v20, %v54_v23 }
  0x85   :  { %v69_v25 = vpop.permute.xlu1 %68  ;;  %v48_v26 = vpop.permute.xlu0 %47 }
  0x86   :  { %v55_v27 = vmul.f32 %v53_v18, %v48_v26  ;;  %v77_v28 = vadd.f32 %v75_v22, %v61_v24  ;;  %v76_v29 = vmul.f32 %v74_v17, %v69_v25  ;;  %v10223_v17 = vld [vmem:[%s15687_s4 + $0x4] ss:$0 sm:$0xff] }
  0x88   :  { %v62_v30 = vadd.f32 %v10219_v20, %v55_v27  ;;  %v10220_v31 = vmul.f32 -1.442695, %v77_v28 }
  0x89   :  { %v101_v57 = vpop.permute.xlu0 %100 }
  0x8a   :  { %v78_v32 = vadd.f32 %v76_v29, %v62_v30  ;;  %12775 = vpow2.f32 %v10220_v31  ;;  %v106_v9 = vpop.permute.xlu1 %105  ;;  %v122_v12 = vmul.f32 %v10222_v10, %v101_v57 }
  0x8b   :  { %v123_v11 = vmul.f32 %v10222_v10, %v106_v9 }
  0x8c   :  { %v10221_v33 = vmul.f32 -1.442695, %v78_v32  ;;  %v131_v20 = vadd.f32 %v10223_v17, %v122_v12 }
  0x8d   :  { %v111_v60 = vpop.permute.xlu0 %110  ;;  %v132_v18 = vadd.f32 %v10223_v17, %v123_v11 }
  0x8e   :  { %12777 = vpow2.f32 %v10221_v33  ;;  %v116_v16 = vpop.permute.xlu1 %115  ;;  %v124_v21 = vmul.f32 %v10222_v10, %v111_v60  ;;  %v10224_v24 = vmul.f32 -1.442695, %v131_v20 }
  0x8f   :  { %v125_v19 = vmul.f32 %v10222_v10, %v116_v16  ;;  %v10225_v22 = vmul.f32 -1.442695, %v132_v18 }
  0x90   :  { %v133_v25 = vadd.f32 %v10223_v17, %v124_v21 }
  0x91   :  { %v414_v63 = vpop.permute.xlu0 %413  ;;  %v134_v23 = vadd.f32 %v10223_v17, %v125_v19 }
  0x92   :  { %v10226_v27 = vmul.f32 -1.442695, %v133_v25 }
  0x93   :  { %v10227_v26 = vmul.f32 -1.442695, %v134_v23 }
  0x94   :  { %v12776_v34 = vpop.eup %12775 }
  0x95   :  { %v85_v35 = vadd.f32 1.0, %v12776_v34 }
  0x97   :  { %12779 = vrcp.f32 %v85_v35 }
  0x98   :  { %v12778_v36 = vpop.eup %12777 }
  0x99   :  { %v86_v37 = vadd.f32 1.0, %v12778_v36 }
  0x9b   :  { %12781 = vrcp.f32 %v86_v37 }
  0x9c   :  { %12783 = vpow2.f32 %v10225_v22 }
  0x9d   :  { %12785 = vpow2.f32 %v10224_v24  ;;  %v13388_v24 = vmov 0.0|0.0  }
  0x9e   :  { %12787 = vpow2.f32 %v10227_v26  ;;  %v524_v26 = vrot.slane %v13494_v43, %v13463_v14 }
  0x9f   :  { %12789 = vpow2.f32 %v10226_v27 }
  0xa1   :  { %v12780_v38 = vpop.eup %12779 }
  0xa2   :  { %v13476_v39 = vmul.f32 %v12780_v38, %v77_v28 }
  0xa4   :  { %11215 = vmatprep.mubr.msk.f32.mxu0 %vm172_vm0, %v13476_v39 }
  0xa5   :  { %v12782_v40 = vpop.eup %12781 }
  0xa6   :  { %v13480_v41 = vmul.f32 %v12782_v40, %v78_v32  ;;  %v12784_v28 = vpop.eup %12783 }
  0xa7   :  { %v12786_v29 = vpop.eup %12785  ;;  %v148_v30 = vadd.f32 1.0, %v12784_v28 }
  0xa8   :  { %11216 = vmatmul.mubr.msk.f32.vlgmr.msra.gmra.mrb[0].mxu0 %vm172_vm0, %v13480_v41  ;;  %v12788_v31 = vpop.eup %12787  ;;  %v147_v32 = vadd.f32 1.0, %v12786_v29 }
  0xa9   :  { %11242 = vmatprep.mubr.msk.f32.mxu0 %vm172_vm0, %v13563_v3  ;;  %v12790_v33 = vpop.eup %12789  ;;  %12791 = vrcp.f32 %v148_v30  ;;  %v150_v34 = vadd.f32 1.0, %v12788_v31  ;;  %v164_v30 = vld [vmem:[%s15688_s5 + $0x8] sm:$0xff]  ;;  %v166_v31 = vld [vmem:[%s15688_s5 + $0x18] sm:$0xff] }
  0xaa   :  { %12793 = vrcp.f32 %v147_v32  ;;  %v149_v35 = vadd.f32 1.0, %v12790_v33 }
  0xab   :  { %12795 = vrcp.f32 %v150_v34 }
  0xac   :  { %12797 = vrcp.f32 %v149_v35  ;;  %v12253_v35 = vpack.c.bf16 %v166_v31, %v164_v30 }
  0xb3   :  { %v12792_v36 = vpop.eup %12791 }
  0xb4   :  { %v12794_v37 = vpop.eup %12793  ;;  %v13585_v38 = vmul.f32 %v12792_v36, %v132_v18 }
  0xb5   :  { %v12796_v40 = vpop.eup %12795  ;;  %v13587_v44 = vmul.f32 %v12794_v37, %v131_v20 }
  0xb6   :  { %v12798_v45 = vpop.eup %12797  ;;  %v10239_v46 = vmul.f32 -1.442695, %v13585_v38 }
  0xb7   :  { %v10238_v57 = vmul.f32 -1.442695, %v13587_v44 }
  0xb8   :  { %12799 = vpow2.f32 %v10239_v46 }
  0xb9   :  { %12801 = vpow2.f32 %v10238_v57 }
 0x17b   :  { %v13505_v47 = vpop.f32.mrb[0].mxu0 }
 0x17c   :  { %v13507_v48 = vpop.f32.mrb[1].mxu0  ;;  %v526_v27 = vadd.f32 %v13505_v47, %v524_v26 }
 0x17d   :  { %v12235_v49 = vpack.c.bf16 %v13505_v47, %v13507_v48  ;;  %v525_v28 = vadd.f32 %v524_v26, %v13507_v48  ;;  %v168_v47 = vld [vmem:[%s15688_s5 + $0x28] sm:$0xff]  ;;  %v170_v48 = vld [vmem:[%s15688_s5 + $0x38] sm:$0xff] }
 0x17e   :  { %v12257_v37 = vpack.c.bf16 %v170_v48, %v168_v47  ;;  %v10260_v47 = vld [vmem:[%s15688_s5 + $0x50] sm:$0xff] }
 0x17f   :  { %12236 = vmatprep.subr.bf16.mxu1 %v12235_v49 }
 0x180   :  { %12238 = vmatpush3.bf16.msra.mxu1 %v12235_v49  ;;  %v13590_v49 = vmul.f32 %v12796_v40, %v134_v23  ;;  %v13600_v23 = vld [vmem:[%s15686_s3 + $0x8] sm:$0xff]  ;;  %v13391_v40 = vmov 0.0625  }
 0x181   :  { %12250 = vmatprep.subr.bf16.mxu1 %v13388_v24 }
 0x183   :  { %11223 = vmatmul.mubr.msk.f32.vlgmr.msra.gmra.mrb[0].mxu1 %vm254_vm1, %v13514_v50 }
 0x184   :  { %11225 = vmatprep.mubr.msk.f32.mxu1 %vm254_vm1, %v13519_v51 }
 0x187   :  { %11226 = vmatmul.mubr.msk.f32.gmra.mrb[2].mxu1 %vm254_vm1, %v13528_v52 }
 0x188   :  { %11228 = vmatprep.mubr.msk.f32.mxu1 %vm254_vm1, %v13533_v53 }
 0x18b   :  { %11229 = vmatmul.mubr.msk.f32.gmra.mrb[4].mxu1 %vm254_vm1, %v13542_v54 }
 0x18c   :  { %11231 = vmatprep.mubr.msk.f32.mxu1 %vm254_vm1, %v13547_v55 }
 0x18f   :  { %11232 = vmatmul.mubr.msk.f32.gmra.mrb[6].mxu1 %vm254_vm1, %v13556_v56 }
 0x256   :  { %v11224_v58 = vpop.f32.mrb[0].mxu1 }
 0x257   :  { %v345_v59 = vpop.f32.mrb[1].mxu1 }
 0x25a   :  { %v11227_v61 = vpop.f32.mrb[2].mxu1 }
 0x25b   :  { %v355_v62 = vpop.f32.mrb[3].mxu1 }
 0x25e   :  { %v11230_v0 = vpop.f32.mrb[4].mxu1 }
 0x25f   :  { %v417_v1 = vadd.f32 %v11230_v0, %v414_v63  ;;  %v365_v2 = vpop.f32.mrb[5].mxu1 }
 0x260   :  { %v416_v4 = vadd.f32 %v414_v63, %v365_v2 }
 0x261   :  { %426 = vrot.lane.b32.xlu0 %v417_v1, %s13385_s26 }
 0x262   :  { %424 = vrot.lane.b32.xlu1 %v416_v4, %s13385_s26  ;;  %v11233_v5 = vpop.f32.mrb[6].mxu1 }
 0x263   :  { %v419_v6 = vadd.f32 %v11233_v5, %v414_v63  ;;  %v375_v7 = vpop.f32.mrb[7].mxu1 }
 0x264   :  { %v418_v8 = vadd.f32 %v414_v63, %v375_v7 }
 0x265   :  { %430 = vrot.lane.b32.xlu0 %v419_v6, %s13385_s26 }
 0x266   :  { %428 = vrot.lane.b32.xlu1 %v418_v8, %s13385_s26 }
 0x269   :  { %719 = vrot.lane.b32.xlu0 %v11224_v58, %s13386_s20  ;;  %v13593_v58 = vmul.f32 %v12798_v45, %v133_v25  ;;  %v13390_v25 = vmov 0.0  }
 0x26a   :  { %717 = vrot.lane.b32.xlu1 %v345_v59, %s13386_s20  ;;  %v10241_v59 = vmul.f32 -1.442695, %v13590_v49  ;;  %11256 = vmatprep.mubr.msk.f32.mxu1 %vm13389_vm2, %v13390_v25 }
 0x26b   :  { %v10240_v60 = vmul.f32 -1.442695, %v13593_v58 }
 0x26c   :  { %12803 = vpow2.f32 %v10241_v59 }
 0x26d   :  { %832 = vrot.lane.b32.xlu0 %v11230_v0, %s13387_s21  ;;  %12805 = vpow2.f32 %v10240_v60 }
 0x26e   :  { %830 = vrot.lane.b32.xlu1 %v365_v2, %s13387_s21 }
 0x271   :  { %723 = vrot.lane.b32.xlu0 %v11227_v61, %s13386_s20  ;;  %v12800_v61 = vpop.eup %12799 }
 0x272   :  { %721 = vrot.lane.b32.xlu1 %v355_v62, %s13386_s20  ;;  %v12802_v62 = vpop.eup %12801  ;;  %v397_v63 = vadd.f32 1.0, %v12800_v61 }
 0x273   :  { %v396_v1 = vadd.f32 1.0, %v12802_v62 }
 0x274   :  { %12807 = vrcp.f32 %v397_v63 }
 0x275   :  { %836 = vrot.lane.b32.xlu0 %v11233_v5, %s13387_s21  ;;  %12809 = vrcp.f32 %v396_v1 }
 0x276   :  { %834 = vrot.lane.b32.xlu1 %v375_v7, %s13387_s21  ;;  %v12804_v0 = vpop.eup %12803 }
 0x277   :  { %v12806_v2 = vpop.eup %12805  ;;  %v399_v4 = vadd.f32 1.0, %v12804_v0 }
 0x278   :  { %v398_v5 = vadd.f32 1.0, %v12806_v2 }
 0x279   :  { %12811 = vrcp.f32 %v399_v4  ;;  %v13649_v4 = vsub.s32 2, %v13460_v13 }
 0x27a   :  { %12813 = vrcp.f32 %v398_v5 }
 0x27e   :  { %v12808_v6 = vpop.eup %12807 }
 0x27f   :  { %v12810_v8 = vpop.eup %12809 }
 0x283   :  { %v12812_v12 = vpop.eup %12811 }
 0x284   :  { %v12814_v18 = vpop.eup %12813 }
 0x2d3   :  { %v427_v7 = vpop.permute.xlu0 %426 }
 0x2d4   :  { %v437_v9 = vmul.f32 %v12808_v6, %v427_v7  ;;  %v425_v10 = vpop.permute.xlu1 %424 }
 0x2d5   :  { %v436_v11 = vmul.f32 %v12810_v8, %v425_v10  ;;  %v849_v10 = vrot.slane %v13494_v43, %v13649_v4 }
 0x2d7   :  { %v12239_v16 = vpack.c.bf16 %v437_v9, %v436_v11  ;;  %v431_v17 = vpop.permute.xlu0 %430 }
 0x2d8   :  { %v439_v19 = vmul.f32 %v12812_v12, %v431_v17  ;;  %v429_v20 = vpop.permute.xlu1 %428 }
 0x2d9   :  { %v438_v21 = vmul.f32 %v12814_v18, %v429_v20  ;;  %12240 = vmatprep.subr.bf16.mxu0 %v12239_v16 }
 0x2da   :  { %12242 = vmatpush3.bf16.msra.mxu0 %v12239_v16 }
 0x2db   :  { %v12243_v22 = vpack.c.bf16 %v439_v19, %v438_v21  ;;  %v720_v45 = vpop.permute.xlu0 %719 }
 0x2dc   :  { %v718_v46 = vpop.permute.xlu1 %717 }
 0x2dd   :  { %12244 = vmatprep.subr.bf16.mxu0 %v12243_v22 }
 0x2de   :  { %12246 = vmatpush3.bf16.msra.mxu0 %v12243_v22 }
 0x2df   :  { %12247 = vmatprep.subr.bf16.mxu0 %v13388_v24  ;;  %v833_v61 = vpop.permute.xlu0 %832 }
 0x2e0   :  { %v831_v62 = vpop.permute.xlu1 %830 }
 0x2e1   :  { %11243 = vmatmul.mubr.msk.f32.vlgmr.msra.gmra.mrb[2].mxu0 %vm172_vm0, %v13600_v23 }
 0x2e2   :  { %11249 = vmatprep.mubr.msk.f32.mxu0 %vm13389_vm2, %v13390_v25 }
 0x2e3   :  { %v724_v6 = vpop.permute.xlu0 %723 }
 0x2e4   :  { %v722_v8 = vpop.permute.xlu1 %721 }
 0x2e7   :  { %v837_v22 = vpop.permute.xlu0 %836 }
 0x3b4   :  { %v11244_v29 = vpop.f32.mrb[2].mxu0 }
 0x3b5   :  { %v528_v32 = vadd.f32 %v11244_v29, %v526_v27  ;;  %v512_v33 = vpop.f32.mrb[3].mxu0 }
 0x3b6   :  { %v527_v34 = vadd.f32 %v525_v28, %v512_v33  ;;  %v835_v28 = vpop.permute.xlu1 %834 }
 0x3b8   :  { %v12248_v36 = vpack.c.bf16 %v528_v32, %v527_v34 }
 0x3ba   :  { %12249 = vmatpush3.bf16.msra.mxu0 %v12248_v36  ;;  %v10258_v36 = vld [vmem:[%s15688_s5 + $0x40] sm:$0xff] }
 0x3bb   :  { %12254 = vmatprep.subr.bf16.mxu0 %v12253_v35  ;;  %v12273_v48 = vpack.c.bf16 %v10260_v47, %v10258_v36 }
 0x3bd   :  { %11250 = vmatmul.mubr.msk.f32.vlgmr.msra.gmra.mrb[4].mxu0 %vm254_vm1, %v13391_v40 }
 0x3be   :  { %12256 = vmatpush3.bf16.msra.mxu0 %v12253_v35  ;;  %11267 = vmatprep.mubr.msk.f32.mxu0 %vm172_vm0, %v13587_v44  ;;  %v13392_v35 = vmov 0.03125  }
 0x3bf   :  { %12258 = vmatprep.subr.bf16.mxu0 %v12257_v37 }
 0x3c2   :  { %12260 = vmatpush3.bf16.msra.mxu0 %v12257_v37  ;;  %v10262_v37 = vld [vmem:[%s15688_s5 + $0x60] sm:$0xff] }
 0x3c3   :  { %12267 = vmatprep.subr.bf16.mxu0 %v13388_v24 }
 0x3c5   :  { %11268 = vmatmul.mubr.msk.f32.vlgmr.msra.gmra.mrb[6].mxu0 %vm172_vm0, %v13585_v38 }
 0x3c6   :  { %11270 = vmatprep.mubr.msk.f32.mxu0 %vm172_vm0, %v13593_v58 }
 0x3c9   :  { %11271 = vmatmul.mubr.msk.f32.gmra.mrb[8].mxu0 %vm172_vm0, %v13590_v49 }
 0x3ca   :  { %11292 = vmatprep.mubr.msk.f32.mxu0 %vm13389_vm2, %v13390_v25 }
 0x490   :  { %v598_v57 = vpop.f32.mrb[4].mxu0 }
 0x491   :  { %v605_v59 = vrot.slane %v598_v57, %v13463_v14  ;;  %v11251_v60 = vpop.f32.mrb[5].mxu0 }
 0x493   :  { %v13640_v63 = vsub.f32 %v527_v34, %v605_v59  ;;  %v13642_v0 = vsub.f32 %v528_v32, %v605_v59 }
 0x495   :  { %v608_v1 = vmul.f32 %v13640_v63, %v13640_v63  ;;  %v609_v2 = vmul.f32 %v13642_v0, %v13642_v0 }
 0x497   :  { %v12251_v5 = vpack.c.bf16 %v609_v2, %v608_v1  ;;  %v13674_v2 = vsub.s32 3, %v13460_v13 }
 0x498   :  { %v11269_v7 = vpop.f32.mrb[6].mxu0 }
 0x499   :  { %v813_v9 = vadd.f32 %v11269_v7, %v720_v45  ;;  %12252 = vmatpush3.bf16.msra.mxu1 %v12251_v5  ;;  %v807_v11 = vpop.f32.mrb[7].mxu0  ;;  %v10264_v45 = vld [vmem:[%s15688_s5 + $0x70] sm:$0xff]  ;;  %v13677_v5 = vsub.s32 4, %v13460_v13 }
 0x49a   :  { %v808_v12 = vadd.f32 %v807_v11, %v718_v46  ;;  %12261 = vmatprep.subr.bf16.mxu1 %v13388_v24  ;;  %v12277_v46 = vpack.c.bf16 %v10264_v45, %v10262_v37 }
 0x49b   :  { %v843_v16 = vadd.f32 %v833_v61, %v813_v9 }
 0x49c   :  { %v842_v17 = vadd.f32 %v831_v62, %v808_v12  ;;  %11257 = vmatmul.mubr.msk.f32.vlgmr.msra.gmra.mrb[8].mxu1 %vm254_vm1, %v13391_v40  ;;  %v11272_v18 = vpop.f32.mrb[8].mxu0 }
 0x49d   :  { %v851_v19 = vadd.f32 %v849_v10, %v843_v16  ;;  %v823_v20 = vadd.f32 %v11272_v18, %v724_v6  ;;  %v817_v21 = vpop.f32.mrb[9].mxu0  ;;  %11281 = vmatprep.mubr.msk.f32.mxu1 %vm13389_vm2, %v13390_v25 }
 0x49e   :  { %v850_v26 = vadd.f32 %v849_v10, %v842_v17  ;;  %v818_v27 = vadd.f32 %v817_v21, %v722_v8  ;;  %v694_v17 = vrot.slane %v13494_v43, %v13677_v5 }
 0x49f   :  { %v845_v29 = vadd.f32 %v837_v22, %v823_v20 }
 0x4a0   :  { %v12262_v30 = vpack.c.bf16 %v851_v19, %v850_v26  ;;  %v844_v31 = vadd.f32 %v835_v28, %v818_v27 }
 0x4a1   :  { %v853_v32 = vadd.f32 %v849_v10, %v845_v29 }
 0x4a2   :  { %v852_v33 = vadd.f32 %v849_v10, %v844_v31  ;;  %12263 = vmatpush3.bf16.msra.mxu1 %v12262_v30 }
 0x4a3   :  { %12264 = vmatprep.subr.bf16.mxu1 %v13388_v24 }
 0x4a4   :  { %v12265_v34 = vpack.c.bf16 %v853_v32, %v852_v33 }
 0x4a6   :  { %12266 = vmatpush3.bf16.msra.mxu1 %v12265_v34 }
 0x4a7   :  { %12274 = vmatprep.subr.bf16.mxu1 %v12273_v48 }
 0x4a9   :  { %11282 = vmatmul.mubr.msk.f32.vlgmr.msra.gmra.mrb[10].mxu1 %vm172_vm0, %v13392_v35 }
 0x4aa   :  { %12276 = vmatpush3.bf16.msra.mxu1 %v12273_v48 }
 0x4ab   :  { %12278 = vmatprep.subr.bf16.mxu1 %v12277_v46 }
 0x4ae   :  { %12280 = vmatpush3.bf16.msra.mxu1 %v12277_v46 }
 0x56f   :  { %v676_v57 = vpop.f32.mrb[8].mxu1 }
 0x570   :  { %v677_v59 = vadd.f32 1e-05, %v676_v57  ;;  %v11258_v60 = vpop.f32.mrb[9].mxu1 }
 0x572   :  { %12815 = vrsqrt.f32 %v677_v59 }
 0x57c   :  { %v12816_v61 = vpop.eup %12815  ;;  %v923_v62 = vpop.f32.mrb[10].mxu1 }
 0x57d   :  { %v682_v1 = vrot.slane %v12816_v61, 5  ;;  %v930_v6 = vrot.slane %v923_v62, %v13463_v14  ;;  %v11283_v7 = vpop.f32.mrb[11].mxu1  ;;  %v13712_v62 = vsub.s32 5, %v13460_v13 }
 0x57f   :  { %v684_v8 = vmul.f32 %v682_v1, %v13494_v43  ;;  %v931_v9 = vsub.f32 %v850_v26, %v930_v6  ;;  %v932_v10 = vsub.f32 %v851_v19, %v930_v6  ;;  %v933_v11 = vsub.f32 %v852_v33, %v930_v6 }
 0x580   :  { %v934_v12 = vsub.f32 %v853_v32, %v930_v6  ;;  %v13715_v1 = vsub.s32 6, %v13460_v13 }
 0x581   :  { %v688_v16 = vrot.slane %v684_v8, %v13674_v2  ;;  %v935_v18 = vmul.f32 %v931_v9, %v931_v9  ;;  %v936_v20 = vmul.f32 %v932_v10, %v932_v10  ;;  %v937_v21 = vmul.f32 %v933_v11, %v933_v11 }
 0x582   :  { %v938_v29 = vmul.f32 %v934_v12, %v934_v12  ;;  %v1025_v8 = vrot.slane %v13494_v43, %v13715_v1 }
 0x583   :  { %v689_v22 = vmul.f32 %v688_v16, %v13640_v63  ;;  %v690_v27 = vmul.f32 %v688_v16, %v13642_v0  ;;  %v12268_v28 = vpack.c.bf16 %v936_v20, %v935_v18 }
 0x584   :  { %v12271_v31 = vpack.c.bf16 %v938_v29, %v937_v21 }
 0x585   :  { %v696_v30 = vadd.f32 %v694_v17, %v690_v27  ;;  %12269 = vmatpush3.bf16.msra.mxu0 %v12268_v28  ;;  %v695_v26 = vadd.f32 %v694_v17, %v689_v22 }
 0x586   :  { %12270 = vmatprep.subr.bf16.mxu0 %v13388_v24 }
 0x587   :  { %v10247_v19 = vmul.f32 -1.442695, %v696_v30  ;;  %v10246_v32 = vmul.f32 -1.442695, %v695_v26 }
 0x589   :  { %12817 = vpow2.f32 %v10247_v19  ;;  %12272 = vmatpush3.bf16.msra.mxu0 %v12271_v31  ;;  %v10259_v19 = vld [vmem:[%s15688_s5 + $0x48] sm:$0xff] }
 0x58a   :  { %12819 = vpow2.f32 %v10246_v32  ;;  %v10263_v31 = vld [vmem:[%s15688_s5 + $0x68] sm:$0xff]  ;;  %v10265_v32 = vld [vmem:[%s15688_s5 + $0x78] sm:$0xff] }
 0x58c   :  { %11293 = vmatmul.mubr.msk.f32.vlgmr.msra.gmra.mrb[10].mxu0 %vm172_vm0, %v13392_v35 }
 0x58d   :  { %11310 = vmatprep.mubr.msk.f32.mxu0 %vm254_vm1, %v13487_v42  ;;  %v13706_v42 = vld [vmem:[%s15689_s6 + $0x8] sm:$0x7f] }
 0x593   :  { %v12818_v63 = vpop.eup %12817 }
 0x594   :  { %v12820_v0 = vpop.eup %12819  ;;  %v704_v33 = vadd.f32 1.0, %v12818_v63  ;;  %v12303_v63 = vpack.c.bf16 %v10265_v32, %v10263_v31 }
 0x595   :  { %v703_v34 = vadd.f32 1.0, %v12820_v0 }
 0x596   :  { %12821 = vrcp.f32 %v704_v33 }
 0x597   :  { %12823 = vrcp.f32 %v703_v34 }
 0x5a0   :  { %v12822_v36 = vpop.eup %12821 }
 0x5a1   :  { %v12824_v47 = vpop.eup %12823  ;;  %v710_v48 = vmul.f32 %v12822_v36, %v696_v30 }
 0x5a2   :  { %v709_v37 = vmul.f32 %v12824_v47, %v695_v26 }
 0x5a3   :  { %v13692_v45 = vadd.f32 %v710_v48, %v13480_v41  ;;  %v1286_v41 = vrot.slane %v13706_v42, %v13466_v15 }
 0x5a4   :  { %v13695_v46 = vadd.f32 %v709_v37, %v13476_v39 }
 0x5a5   :  { %1288 = vrot.lane.b32.xlu1 %v1286_v41, %s13385_s26 }
 0x5a6   :  { %11303 = vmatprep.mubr.msk.f32.mxu1 %vm172_vm0, %v13695_v46 }
 0x5a7   :  { %11304 = vmatmul.mubr.msk.f32.vlgmr.msra.gmra.mrb[12].mxu1 %vm172_vm0, %v13692_v45 }
 0x5a8   :  { %11330 = vmatprep.mubr.msk.f32.mxu1 %vm172_vm0, %v13563_v3 }
 0x65f   :  { %v1005_v39 = vpop.f32.mrb[10].mxu0 }
 0x660   :  { %v1006_v57 = vadd.f32 1e-05, %v1005_v39  ;;  %v11294_v59 = vpop.f32.mrb[11].mxu0 }
 0x662   :  { %12825 = vrsqrt.f32 %v1006_v57 }
 0x66c   :  { %v12826_v60 = vpop.eup %12825 }
 0x66d   :  { %v1011_v61 = vrot.slane %v12826_v60, 3 }
 0x66f   :  { %v1013_v6 = vmul.f32 %v1011_v61, %v13494_v43  ;;  %v10261_v43 = vld [vmem:[%s15688_s5 + $0x58] sm:$0xff] }
 0x671   :  { %v1017_v7 = vrot.slane %v1013_v6, %v13712_v62 }
 0x673   :  { %v1019_v16 = vmul.f32 %v1017_v7, %v932_v10  ;;  %v1018_v17 = vmul.f32 %v1017_v7, %v931_v9  ;;  %v1020_v18 = vmul.f32 %v1017_v7, %v933_v11  ;;  %v1021_v20 = vmul.f32 %v1017_v7, %v934_v12  ;;  %v1289_v7 = vpop.permute.xlu1 %1288 }
 0x674   :  { %v12299_v12 = vpack.c.bf16 %v10261_v43, %v10259_v19 }
 0x675   :  { %v1027_v21 = vadd.f32 %v1025_v8, %v1019_v16  ;;  %v1026_v22 = vadd.f32 %v1025_v8, %v1018_v17  ;;  %v1028_v27 = vadd.f32 %v1025_v8, %v1020_v18  ;;  %v1029_v28 = vadd.f32 %v1025_v8, %v1021_v20 }
 0x677   :  { %v10255_v29 = vmul.f32 -1.442695, %v1027_v21  ;;  %v10254_v30 = vmul.f32 -1.442695, %v1026_v22  ;;  %v10256_v26 = vmul.f32 -1.442695, %v1028_v27 }
 0x678   :  { %v10257_v13 = vmul.f32 -1.442695, %v1029_v28 }
 0x679   :  { %12827 = vpow2.f32 %v10255_v29 }
 0x67a   :  { %v13727_v9 = vpop.f32.mrb[12].mxu1  ;;  %12829 = vpow2.f32 %v10254_v30 }
 0x67b   :  { %v13729_v10 = vpop.f32.mrb[13].mxu1  ;;  %12831 = vpow2.f32 %v10256_v26 }
 0x67c   :  { %v12281_v11 = vpack.c.bf16 %v13727_v9, %v13729_v10  ;;  %12833 = vpow2.f32 %v10257_v13 }
 0x67e   :  { %12282 = vmatprep.subr.bf16.mxu0 %v12281_v11 }
 0x67f   :  { %12284 = vmatpush3.bf16.msra.mxu0 %v12281_v11 }
 0x680   :  { %12300 = vmatprep.subr.bf16.mxu0 %v12299_v12 }
 0x682   :  { %11311 = vmatmul.mubr.msk.f32.vlgmr.msra.gmra.mrb[12].mxu0 %vm254_vm1, %v13514_v50 }
 0x683   :  { %v12828_v0 = vpop.eup %12827  ;;  %11313 = vmatprep.mubr.msk.f32.mxu0 %vm254_vm1, %v13519_v51  ;;  %12302 = vmatpush3.bf16.msra.mxu0 %v12299_v12 }
 0x684   :  { %v12830_v33 = vpop.eup %12829  ;;  %v1043_v34 = vadd.f32 1.0, %v12828_v0  ;;  %12304 = vmatprep.subr.bf16.mxu0 %v12303_v63 }
 0x685   :  { %v12832_v36 = vpop.eup %12831  ;;  %v1042_v47 = vadd.f32 1.0, %v12830_v33 }
 0x686   :  { %v12834_v48 = vpop.eup %12833  ;;  %12835 = vrcp.f32 %v1043_v34  ;;  %11314 = vmatmul.mubr.msk.f32.gmra.mrb[14].mxu0 %vm254_vm1, %v13528_v52  ;;  %v1044_v37 = vadd.f32 1.0, %v12832_v36 }
 0x687   :  { %11316 = vmatprep.mubr.msk.f32.mxu0 %vm254_vm1, %v13533_v53  ;;  %12306 = vmatpush3.bf16.msra.mxu0 %v12303_v63  ;;  %12837 = vrcp.f32 %v1042_v47  ;;  %v1045_v50 = vadd.f32 1.0, %v12834_v48 }
 0x688   :  { %12839 = vrcp.f32 %v1044_v37  ;;  %12313 = vmatprep.subr.bf16.mxu0 %v13388_v24 }
 0x689   :  { %12841 = vrcp.f32 %v1045_v50 }
 0x68a   :  { %11317 = vmatmul.mubr.msk.f32.gmra.mrb[16].mxu0 %vm254_vm1, %v13542_v54 }
 0x68b   :  { %11319 = vmatprep.mubr.msk.f32.mxu0 %vm254_vm1, %v13547_v55 }
 0x68e   :  { %11320 = vmatmul.mubr.msk.f32.gmra.mrb[18].mxu0 %vm254_vm1, %v13556_v56 }
 0x690   :  { %v12836_v51 = vpop.eup %12835 }
 0x691   :  { %v12838_v52 = vpop.eup %12837  ;;  %v1055_v41 = vmul.f32 %v12836_v51, %v1027_v21 }
 0x692   :  { %v12840_v53 = vpop.eup %12839  ;;  %v1054_v39 = vmul.f32 %v12838_v52, %v1026_v22 }
 0x693   :  { %v12842_v57 = vpop.eup %12841  ;;  %v13755_v59 = vadd.f32 %v1055_v41, %v13585_v38  ;;  %v1056_v60 = vmul.f32 %v12840_v53, %v1028_v27 }
 0x694   :  { %v13758_v61 = vadd.f32 %v1054_v39, %v13587_v44  ;;  %v1057_v54 = vmul.f32 %v12842_v57, %v1029_v28 }
 0x695   :  { %v13763_v55 = vadd.f32 %v1056_v60, %v13593_v58  ;;  %v10278_v26 = vmul.f32 -1.442695, %v13755_v59 }
 0x696   :  { %11355 = vmatprep.mubr.msk.f32.mxu0 %vm172_vm0, %v13758_v61  ;;  %v13770_v56 = vadd.f32 %v1057_v54, %v13590_v49  ;;  %v10277_v13 = vmul.f32 -1.442695, %v13758_v61 }
 0x697   :  { %11356 = vmatmul.mubr.msk.f32.vlgmr.msra.gmra.mrb[20].mxu0 %vm172_vm0, %v13755_v59  ;;  %12843 = vpow2.f32 %v10278_v26  ;;  %v10279_v43 = vmul.f32 -1.442695, %v13763_v55 }
 0x698   :  { %11358 = vmatprep.mubr.msk.f32.mxu0 %vm172_vm0, %v13763_v55  ;;  %v10280_v19 = vmul.f32 -1.442695, %v13770_v56  ;;  %12845 = vpow2.f32 %v10277_v13 }
 0x69a   :  { %12847 = vpow2.f32 %v10280_v19 }
 0x69b   :  { %11359 = vmatmul.mubr.msk.f32.gmra.mrb[22].mxu0 %vm172_vm0, %v13770_v56  ;;  %12849 = vpow2.f32 %v10279_v43 }
 0x69c   :  { %11380 = vmatprep.mubr.msk.f32.mxu0 %vm13389_vm2, %v13390_v25 }
 0x6a1   :  { %v12844_v11 = vpop.eup %12843 }
 0x6a2   :  { %v12846_v12 = vpop.eup %12845  ;;  %v1272_v31 = vadd.f32 1.0, %v12844_v11  ;;  %v1715_v11 = vrot.slane %v13706_v42, %v13649_v4 }
 0x6a3   :  { %v1271_v63 = vadd.f32 1.0, %v12846_v12 }
 0x6a4   :  { %v12848_v32 = vpop.eup %12847  ;;  %12851 = vrcp.f32 %v1272_v31 }
 0x6a5   :  { %v12850_v0 = vpop.eup %12849  ;;  %v1274_v33 = vadd.f32 1.0, %v12848_v32  ;;  %12853 = vrcp.f32 %v1271_v63 }
 0x6a6   :  { %v1273_v34 = vadd.f32 1.0, %v12850_v0 }
 0x6a7   :  { %12855 = vrcp.f32 %v1274_v33 }
 0x6a8   :  { %12857 = vrcp.f32 %v1273_v34 }
 0x6ae   :  { %v12852_v36 = vpop.eup %12851 }
 0x6af   :  { %v12854_v48 = vpop.eup %12853 }
 0x6b1   :  { %v12856_v52 = vpop.eup %12855 }
 0x6b2   :  { %v12858_v39 = vpop.eup %12857 }
 0x755   :  { %v11312_v38 = vpop.f32.mrb[12].mxu0 }
 0x756   :  { %v1220_v44 = vpop.f32.mrb[13].mxu0 }
 0x759   :  { %v11315_v6 = vpop.f32.mrb[14].mxu0 }
 0x75a   :  { %v1230_v58 = vpop.f32.mrb[15].mxu0 }
 0x75d   :  { %v11318_v8 = vpop.f32.mrb[16].mxu0 }
 0x75e   :  { %v1240_v16 = vpop.f32.mrb[17].mxu0  ;;  %v1292_v17 = vadd.f32 %v11318_v8, %v1289_v7 }
 0x75f   :  { %v1291_v18 = vadd.f32 %v1289_v7, %v1240_v16 }
 0x760   :  { %1301 = vrot.lane.b32.xlu1 %v1292_v17, %s13385_s26 }
 0x761   :  { %v11321_v20 = vpop.f32.mrb[18].mxu0  ;;  %1299 = vrot.lane.b32.xlu0 %v1291_v18, %s13385_s26 }
 0x762   :  { %v1294_v49 = vadd.f32 %v11321_v20, %v1289_v7  ;;  %v1250_v21 = vpop.f32.mrb[19].mxu0 }
 0x763   :  { %v1293_v22 = vadd.f32 %v1289_v7, %v1250_v21 }
 0x764   :  { %1305 = vrot.lane.b32.xlu1 %v1294_v49, %s13385_s26 }
 0x765   :  { %1303 = vrot.lane.b32.xlu0 %v1293_v22, %s13385_s26 }
 0x768   :  { %1585 = vrot.lane.b32.xlu1 %v11312_v38, %s13386_s20 }
 0x769   :  { %1583 = vrot.lane.b32.xlu0 %v1220_v44, %s13386_s20  ;;  %v1393_v44 = vrot.slane %v13706_v42, %v13463_v14 }
 0x76a   :  { %v13782_v27 = vpop.f32.mrb[20].mxu0 }
 0x76b   :  { %v13784_v28 = vpop.f32.mrb[21].mxu0 }
 0x76c   :  { %1698 = vrot.lane.b32.xlu1 %v11318_v8, %s13387_s21 }
 0x76d   :  { %1696 = vrot.lane.b32.xlu0 %v1240_v16, %s13387_s21 }
 0x76e   :  { %v13788_v29 = vpop.f32.mrb[22].mxu0 }
 0x76f   :  { %v13790_v30 = vpop.f32.mrb[23].mxu0 }
 0x770   :  { %1589 = vrot.lane.b32.xlu1 %v11315_v6, %s13386_s20  ;;  %v1395_v6 = vadd.f32 %v13727_v9, %v1393_v44 }
 0x771   :  { %1587 = vrot.lane.b32.xlu0 %v1230_v58, %s13386_s20  ;;  %v1394_v58 = vadd.f32 %v1393_v44, %v13729_v10 }
 0x774   :  { %1702 = vrot.lane.b32.xlu1 %v11321_v20, %s13387_s21 }
 0x775   :  { %1700 = vrot.lane.b32.xlu0 %v1250_v21, %s13387_s21 }
 0x7d2   :  { %v1302_v47 = vpop.permute.xlu1 %1301 }
 0x7d3   :  { %v1312_v37 = vmul.f32 %v12852_v36, %v1302_v47  ;;  %v1300_v50 = vpop.permute.xlu0 %1299 }
 0x7d4   :  { %v1311_v51 = vmul.f32 %v12854_v48, %v1300_v50 }
 0x7d6   :  { %v12285_v41 = vpack.c.bf16 %v1312_v37, %v1311_v51  ;;  %v1306_v53 = vpop.permute.xlu1 %1305 }
 0x7d7   :  { %v1314_v57 = vmul.f32 %v12856_v52, %v1306_v53  ;;  %v1304_v60 = vpop.permute.xlu0 %1303 }
 0x7d8   :  { %v1313_v54 = vmul.f32 %v12858_v39, %v1304_v60  ;;  %12286 = vmatprep.subr.bf16.mxu1 %v12285_v41  ;;  %v10299_v39 = vld [vmem:[%s15688_s5 + $0x90] sm:$0xff]  ;;  %v10301_v60 = vld [vmem:[%s15688_s5 + $0xa0] sm:$0xff] }
 0x7d9   :  { %12288 = vmatpush3.bf16.msra.mxu1 %v12285_v41 }
 0x7da   :  { %v12289_v38 = vpack.c.bf16 %v1314_v57, %v1313_v54  ;;  %v10303_v54 = vld [vmem:[%s15688_s5 + $0xb0] sm:$0xff] }
 0x7db   :  { %v1584_v20 = vpop.permute.xlu0 %1583 }
 0x7dc   :  { %12290 = vmatprep.subr.bf16.mxu1 %v12289_v38  ;;  %v1674_v13 = vadd.f32 %v13784_v28, %v1584_v20 }
 0x7dd   :  { %12292 = vmatpush3.bf16.msra.mxu1 %v12289_v38  ;;  %v12323_v38 = vpack.c.bf16 %v10303_v54, %v10301_v60  ;;  %v13909_v54 = vld [vmem:[%s15685_s2 + $0x10] sm:$0xff] }
 0x7de   :  { %12293 = vmatprep.subr.bf16.mxu1 %v13388_v24 }
 0x7df   :  { %v1697_v9 = vpop.permute.xlu0 %1696 }
 0x7e0   :  { %11331 = vmatmul.mubr.msk.f32.vlgmr.msra.gmra.mrb[14].mxu1 %vm172_vm0, %v13600_v23  ;;  %v1586_v23 = vpop.permute.xlu1 %1585  ;;  %v1708_v31 = vadd.f32 %v1697_v9, %v1674_v13 }
 0x7e1   :  { %11337 = vmatprep.mubr.msk.f32.mxu1 %vm13389_vm2, %v13390_v25  ;;  %v1679_v22 = vadd.f32 %v13782_v27, %v1586_v23 }
 0x7e2   :  { %v1716_v28 = vadd.f32 %v1715_v11, %v1708_v31 }
 0x7e3   :  { %v1588_v10 = vpop.permute.xlu0 %1587 }
 0x7e4   :  { %v1699_v49 = vpop.permute.xlu1 %1698  ;;  %v1684_v36 = vadd.f32 %v13790_v30, %v1588_v10  ;;  %v10297_v30 = vld [vmem:[%s15688_s5 + $0x80] sm:$0xff] }
 0x7e5   :  { %v1709_v12 = vadd.f32 %v1699_v49, %v1679_v22  ;;  %v12319_v57 = vpack.c.bf16 %v10299_v39, %v10297_v30 }
 0x7e7   :  { %v1701_v33 = vpop.permute.xlu0 %1700  ;;  %v1717_v48 = vadd.f32 %v1715_v11, %v1709_v12 }
 0x7e8   :  { %v1590_v21 = vpop.permute.xlu1 %1589  ;;  %v1710_v50 = vadd.f32 %v1701_v33, %v1684_v36 }
 0x7e9   :  { %v1689_v34 = vadd.f32 %v13788_v29, %v1590_v21  ;;  %v12308_v52 = vpack.c.bf16 %v1717_v48, %v1716_v28 }
 0x7ea   :  { %v1718_v53 = vadd.f32 %v1715_v11, %v1710_v50 }
 0x7ec   :  { %v1703_v0 = vpop.permute.xlu1 %1702 }
 0x7ed   :  { %v1711_v37 = vadd.f32 %v1703_v0, %v1689_v34 }
 0x7ef   :  { %v1719_v41 = vadd.f32 %v1715_v11, %v1711_v37  ;;  %v1560_v11 = vrot.slane %v13706_v42, %v13677_v5 }
 0x7f1   :  { %v12311_v29 = vpack.c.bf16 %v1719_v41, %v1718_v53 }
 0x8b3   :  { %v11332_v7 = vpop.f32.mrb[14].mxu1 }
 0x8b4   :  { %v1397_v8 = vadd.f32 %v11332_v7, %v1395_v6  ;;  %v1381_v16 = vpop.f32.mrb[15].mxu1 }
 0x8b5   :  { %v1396_v17 = vadd.f32 %v1394_v58, %v1381_v16 }
 0x8b7   :  { %v12294_v18 = vpack.c.bf16 %v1397_v8, %v1396_v17 }
 0x8b9   :  { %12295 = vmatpush3.bf16.msra.mxu1 %v12294_v18 }
 0x8ba   :  { %12296 = vmatprep.subr.bf16.mxu1 %v13388_v24 }
 0x8bc   :  { %11338 = vmatmul.mubr.msk.f32.vlgmr.msra.gmra.mrb[16].mxu1 %vm254_vm1, %v13391_v40 }
 0x8bd   :  { %11344 = vmatprep.mubr.msk.f32.mxu1 %vm13389_vm2, %v13390_v25 }
 0x98f   :  { %v1464_v26 = vpop.f32.mrb[16].mxu1 }
 0x990   :  { %v1471_v19 = vrot.slane %v1464_v26, %v13463_v14  ;;  %v11339_v43 = vpop.f32.mrb[17].mxu1 }
 0x992   :  { %v1472_v32 = vsub.f32 %v1396_v17, %v1471_v19  ;;  %v1473_v63 = vsub.f32 %v1397_v8, %v1471_v19 }
 0x994   :  { %v1474_v27 = vmul.f32 %v1472_v32, %v1472_v32  ;;  %v1475_v47 = vmul.f32 %v1473_v63, %v1473_v63 }
 0x996   :  { %v12297_v51 = vpack.c.bf16 %v1475_v47, %v1474_v27  ;;  %v13868_v47 = vld [vmem:[%s15685_s2] sm:$0xff] }
 0x998   :  { %12298 = vmatpush3.bf16.msra.mxu1 %v12297_v51 }
 0x999   :  { %12307 = vmatprep.subr.bf16.mxu1 %v13388_v24 }
 0x99b   :  { %11345 = vmatmul.mubr.msk.f32.vlgmr.msra.gmra.mrb[18].mxu1 %vm254_vm1, %v13391_v40 }
 0x99c   :  { %12309 = vmatpush3.bf16.msra.mxu1 %v12308_v52  ;;  %11369 = vmatprep.mubr.msk.f32.mxu1 %vm13389_vm2, %v13390_v25 }
 0x99d   :  { %12310 = vmatprep.subr.bf16.mxu1 %v13388_v24 }
 0x9a0   :  { %12312 = vmatpush3.bf16.msra.mxu1 %v12311_v29  ;;  %v13887_v29 = vld [vmem:[%s15689_s6 + $0x10] sm:$0x7f] }
 0x9a1   :  { %12320 = vmatprep.subr.bf16.mxu1 %v12319_v57 }
 0x9a3   :  { %11370 = vmatmul.mubr.msk.f32.vlgmr.msra.gmra.mrb[20].mxu1 %vm172_vm0, %v13392_v35 }
 0x9a4   :  { %12322 = vmatpush3.bf16.msra.mxu1 %v12319_v57 }
 0x9a5   :  { %12324 = vmatprep.subr.bf16.mxu1 %v12323_v38 }
 0x9a8   :  { %12326 = vmatpush3.bf16.msra.mxu1 %v12323_v38  ;;  %v13916_v38 = vld [vmem:[%s15685_s2 + $0x18] sm:$0xff] }
 0xa6e   :  { %v1542_v44 = vpop.f32.mrb[18].mxu1 }
 0xa6f   :  { %v1543_v6 = vadd.f32 1e-05, %v1542_v44  ;;  %v11346_v58 = vpop.f32.mrb[19].mxu1  ;;  %v13923_v44 = vld [vmem:[%s15685_s2 + $0x20] sm:$0xff] }
 0xa70   :  { %v13937_v58 = vld [vmem:[%s15685_s2 + $0x30] sm:$0xff] }
 0xa71   :  { %12859 = vrsqrt.f32 %v1543_v6  ;;  %v13930_v6 = vld [vmem:[%s15685_s2 + $0x28] sm:$0xff] }
 0xa76   :  { %v1786_v7 = vpop.f32.mrb[20].mxu1 }
 0xa77   :  { %v1793_v8 = vrot.slane %v1786_v7, %v13463_v14  ;;  %v11371_v16 = vpop.f32.mrb[21].mxu1  ;;  %v13944_v7 = vld [vmem:[%s15685_s2 + $0x38] sm:$0xff] }
 0xa79   :  { %v13842_v17 = vsub.f32 %v1716_v28, %v1793_v8  ;;  %v13844_v18 = vsub.f32 %v1717_v48, %v1793_v8  ;;  %v13846_v23 = vsub.f32 %v1718_v53, %v1793_v8  ;;  %v13848_v20 = vsub.f32 %v1719_v41, %v1793_v8 }
 0xa7b   :  { %v12860_v49 = vpop.eup %12859  ;;  %v1798_v9 = vmul.f32 %v13842_v17, %v13842_v17  ;;  %v1799_v21 = vmul.f32 %v13844_v18, %v13844_v18  ;;  %v1800_v26 = vmul.f32 %v13846_v23, %v13846_v23  ;;  %v1801_v13 = vmul.f32 %v13848_v20, %v13848_v20 }
 0xa7c   :  { %v1548_v10 = vrot.slane %v12860_v49, 5 }
 0xa7d   :  { %v12314_v22 = vpack.c.bf16 %v1799_v21, %v1798_v9  ;;  %v12317_v12 = vpack.c.bf16 %v1801_v13, %v1800_v26 }
 0xa7e   :  { %v1550_v19 = vmul.f32 %v13706_v42, %v1548_v10 }
 0xa7f   :  { %12315 = vmatpush3.bf16.msra.mxu0 %v12314_v22 }
 0xa80   :  { %v1554_v43 = vrot.slane %v1550_v19, %v13674_v2  ;;  %12316 = vmatprep.subr.bf16.mxu0 %v13388_v24 }
 0xa82   :  { %v1555_v31 = vmul.f32 %v1554_v43, %v1472_v32  ;;  %v1556_v0 = vmul.f32 %v1554_v43, %v1473_v63 }
 0xa83   :  { %12318 = vmatpush3.bf16.msra.mxu0 %v12317_v12 }
 0xa84   :  { %v1562_v33 = vadd.f32 %v1560_v11, %v1556_v0  ;;  %v1561_v34 = vadd.f32 %v1560_v11, %v1555_v31 }
 0xa86   :  { %v10286_v36 = vmul.f32 -1.442695, %v1562_v33  ;;  %11381 = vmatmul.mubr.msk.f32.vlgmr.msra.gmra.mrb[24].mxu0 %vm172_vm0, %v13392_v35  ;;  %v10285_v27 = vmul.f32 -1.442695, %v1561_v34 }
 0xa87   :  { %11398 = vmatprep.mubr.msk.f32.mxu0 %vm254_vm1, %v13868_v47 }
 0xa88   :  { %12861 = vpow2.f32 %v10286_v36 }
 0xa89   :  { %12863 = vpow2.f32 %v10285_v27 }
 0xa92   :  { %v12862_v32 = vpop.eup %12861 }
 0xa93   :  { %v12864_v63 = vpop.eup %12863  ;;  %v1570_v48 = vadd.f32 1.0, %v12862_v32  ;;  %v1888_v32 = vrot.slane %v13706_v42, %v13715_v1 }
 0xa94   :  { %v1569_v28 = vadd.f32 1.0, %v12864_v63 }
 0xa95   :  { %12865 = vrcp.f32 %v1570_v48 }
 0xa96   :  { %12867 = vrcp.f32 %v1569_v28 }
 0xa9f   :  { %v12866_v37 = vpop.eup %12865 }
 0xaa0   :  { %v12868_v50 = vpop.eup %12867  ;;  %v1576_v51 = vmul.f32 %v12866_v37, %v1562_v33 }
 0xaa1   :  { %v1575_v52 = vmul.f32 %v12868_v50, %v1561_v34 }
 0xaa2   :  { %v13873_v41 = vadd.f32 %v1576_v51, %v13692_v45  ;;  %v2149_v45 = vrot.slane %v13887_v29, %v13466_v15 }
 0xaa3   :  { %v13876_v53 = vadd.f32 %v1575_v52, %v13695_v46 }
 0xaa4   :  { %2151 = vrot.lane.b32.xlu0 %v2149_v45, %s13385_s26 }
 0xaa5   :  { %11391 = vmatprep.mubr.msk.f32.mxu1 %vm172_vm0, %v13876_v53 }
 0xaa6   :  { %11392 = vmatmul.mubr.msk.f32.vlgmr.msra.gmra.mrb[22].mxu1 %vm172_vm0, %v13873_v41 }
 0xaa7   :  { %11418 = vmatprep.mubr.msk.f32.mxu1 %vm172_vm0, %v13563_v3  ;;  %v13902_v3 = vld [vmem:[%s15685_s2 + $0x8] sm:$0xff] }
 0xb16   :  { %v2152_v21 = vpop.permute.xlu0 %2151 }
 0xb59   :  { %v1868_v46 = vpop.f32.mrb[24].mxu0 }
 0xb5a   :  { %v11382_v30 = vpop.f32.mrb[25].mxu0  ;;  %v1869_v31 = vadd.f32 1e-05, %v1868_v46 }
 0xb5c   :  { %12869 = vrsqrt.f32 %v1869_v31 }
 0xb66   :  { %v12870_v0 = vpop.eup %12869 }
 0xb67   :  { %v1874_v33 = vrot.slane %v12870_v0, 3 }
 0xb69   :  { %v1876_v34 = vmul.f32 %v13706_v42, %v1874_v33 }
 0xb6b   :  { %v1880_v36 = vrot.slane %v1876_v34, %v13712_v62 }
 0xb6d   :  { %v1882_v27 = vmul.f32 %v1880_v36, %v13844_v18  ;;  %v1881_v63 = vmul.f32 %v1880_v36, %v13842_v17  ;;  %v1884_v48 = vmul.f32 %v1880_v36, %v13848_v20  ;;  %v1883_v37 = vmul.f32 %v1880_v36, %v13846_v23 }
 0xb6f   :  { %v1890_v28 = vadd.f32 %v1888_v32, %v1882_v27  ;;  %v1889_v50 = vadd.f32 %v1888_v32, %v1881_v63  ;;  %v1892_v51 = vadd.f32 %v1888_v32, %v1884_v48  ;;  %v1891_v45 = vadd.f32 %v1888_v32, %v1883_v37 }
 0xb71   :  { %v10294_v52 = vmul.f32 -1.442695, %v1890_v28  ;;  %v10293_v46 = vmul.f32 -1.442695, %v1889_v50  ;;  %v10296_v30 = vmul.f32 -1.442695, %v1892_v51 }
 0xb73   :  { %12871 = vpow2.f32 %v10294_v52 }
 0xb74   :  { %12873 = vpow2.f32 %v10293_v46 }
 0xb75   :  { %12875 = vpow2.f32 %v10296_v30 }
 0xb79   :  { %v13892_v39 = vpop.f32.mrb[22].mxu1 }
 0xb7a   :  { %v13894_v57 = vpop.f32.mrb[23].mxu1 }
 0xb7b   :  { %v12327_v60 = vpack.c.bf16 %v13892_v39, %v13894_v57 }
 0xb7d   :  { %12328 = vmatprep.subr.bf16.mxu0 %v12327_v60  ;;  %v12872_v18 = vpop.eup %12871 }
 0xb7e   :  { %12330 = vmatpush3.bf16.msra.mxu0 %v12327_v60  ;;  %v10295_v60 = vmul.f32 -1.442695, %v1891_v45  ;;  %v12874_v42 = vpop.eup %12873 }
 0xb7f   :  { %12342 = vmatprep.subr.bf16.mxu0 %v13388_v24  ;;  %v12876_v17 = vpop.eup %12875 }
 0xb80   :  { %12877 = vpow2.f32 %v10295_v60 }
 0xb81   :  { %11399 = vmatmul.mubr.msk.f32.vlgmr.msra.gmra.mrb[26].mxu0 %vm254_vm1, %v13902_v3 }
 0xb82   :  { %11401 = vmatprep.mubr.msk.f32.mxu0 %vm254_vm1, %v13909_v54 }
 0xb85   :  { %11402 = vmatmul.mubr.msk.f32.gmra.mrb[28].mxu0 %vm254_vm1, %v13916_v38 }
 0xb86   :  { %11404 = vmatprep.mubr.msk.f32.mxu0 %vm254_vm1, %v13923_v44 }
 0xb89   :  { %11405 = vmatmul.mubr.msk.f32.gmra.mrb[30].mxu0 %vm254_vm1, %v13930_v6 }
 0xb8a   :  { %11407 = vmatprep.mubr.msk.f32.mxu0 %vm254_vm1, %v13937_v58  ;;  %v12878_v20 = vpop.eup %12877 }
 0xb8b   :  { %v1907_v23 = vadd.f32 1.0, %v12878_v20 }
 0xb8d   :  { %11408 = vmatmul.mubr.msk.f32.gmra.mrb[32].mxu0 %vm254_vm1, %v13944_v7 }
 0xb8e   :  { %11432 = vmatprep.mubr.msk.f32.mxu0 %vm13389_vm2, %v13390_v25 }
 0xc54   :  { %v11400_v8 = vpop.f32.mrb[26].mxu0 }
 0xc55   :  { %v2083_v16 = vpop.f32.mrb[27].mxu0 }
 0xc58   :  { %v11403_v49 = vpop.f32.mrb[28].mxu0 }
 0xc59   :  { %v2093_v9 = vpop.f32.mrb[29].mxu0 }
 0xc5c   :  { %v11406_v10 = vpop.f32.mrb[30].mxu0 }
 0xc5d   :  { %v2103_v22 = vpop.f32.mrb[31].mxu0  ;;  %v2155_v26 = vadd.f32 %v11406_v10, %v2152_v21 }
 0xc5e   :  { %v2154_v13 = vadd.f32 %v2152_v21, %v2103_v22 }
 0xc5f   :  { %2164 = vrot.lane.b32.xlu0 %v2155_v26, %s13385_s26 }
 0xc60   :  { %v11409_v19 = vpop.f32.mrb[32].mxu0  ;;  %2162 = vrot.lane.b32.xlu1 %v2154_v13, %s13385_s26 }
 0xc61   :  { %v2157_v43 = vadd.f32 %v11409_v19, %v2152_v21  ;;  %v2113_v11 = vpop.f32.mrb[33].mxu0 }
 0xc62   :  { %v2156_v12 = vadd.f32 %v2152_v21, %v2113_v11 }
 0xc63   :  { %2168 = vrot.lane.b32.xlu0 %v2157_v43, %s13385_s26 }
 0xc64   :  { %2166 = vrot.lane.b32.xlu1 %v2156_v12, %s13385_s26 }
 0xc67   :  { %2448 = vrot.lane.b32.xlu0 %v11400_v8, %s13386_s20  ;;  %v1906_v8 = vadd.f32 1.0, %v12872_v18 }
 0xc68   :  { %2446 = vrot.lane.b32.xlu1 %v2083_v16, %s13386_s20  ;;  %v1905_v16 = vadd.f32 1.0, %v12874_v42 }
 0xc69   :  { %12879 = vrcp.f32 %v1906_v8 }
 0xc6a   :  { %12881 = vrcp.f32 %v1905_v16 }
 0xc6b   :  { %2561 = vrot.lane.b32.xlu0 %v11406_v10, %s13387_s21 }
 0xc6c   :  { %2559 = vrot.lane.b32.xlu1 %v2103_v22, %s13387_s21 }
 0xc6f   :  { %2452 = vrot.lane.b32.xlu0 %v11403_v49, %s13386_s20  ;;  %v1908_v49 = vadd.f32 1.0, %v12876_v17 }
 0xc70   :  { %2450 = vrot.lane.b32.xlu1 %v2093_v9, %s13386_s20 }
 0xc71   :  { %12883 = vrcp.f32 %v1908_v49  ;;  %v13990_v49 = vld [vmem:[%s15686_s3 + $0x8] sm:$0xff] }
 0xc72   :  { %12885 = vrcp.f32 %v1907_v23  ;;  %v2256_v23 = vrot.slane %v13887_v29, %v13463_v14 }
 0xc73   :  { %2565 = vrot.lane.b32.xlu0 %v11409_v19, %s13387_s21  ;;  %v12880_v9 = vpop.eup %12879 }
 0xc74   :  { %2563 = vrot.lane.b32.xlu1 %v2113_v11, %s13387_s21  ;;  %v12882_v21 = vpop.eup %12881  ;;  %v1918_v10 = vmul.f32 %v12880_v9, %v1890_v28  ;;  %v2258_v9 = vadd.f32 %v13892_v39, %v2256_v23  ;;  %v10302_v39 = vld [vmem:[%s15688_s5 + $0xa8] sm:$0xff] }
 0xc75   :  { %v1917_v26 = vmul.f32 %v12882_v21, %v1889_v50  ;;  %v2257_v21 = vadd.f32 %v2256_v23, %v13894_v57  ;;  %v10304_v57 = vld [vmem:[%s15688_s5 + $0xb8] sm:$0xff] }
 0xc76   :  { %v13971_v43 = vadd.f32 %v1918_v10, %v13755_v59 }
 0xc77   :  { %v13974_v12 = vadd.f32 %v1917_v26, %v13758_v61  ;;  %v10300_v26 = vld [vmem:[%s15688_s5 + $0x98] sm:$0xff] }
 0xc78   :  { %v10317_v31 = vmul.f32 -1.442695, %v13971_v43 }
 0xc79   :  { %v10316_v33 = vmul.f32 -1.442695, %v13974_v12 }
 0xc7a   :  { %12887 = vpow2.f32 %v10317_v31 }
 0xc7b   :  { %v12884_v22 = vpop.eup %12883  ;;  %12889 = vpow2.f32 %v10316_v33 }
 0xc7c   :  { %v12886_v13 = vpop.eup %12885  ;;  %v1920_v19 = vmul.f32 %v12884_v22, %v1892_v51  ;;  %v10298_v22 = vld [vmem:[%s15688_s5 + $0x88] sm:$0xff] }
 0xc7d   :  { %v1919_v11 = vmul.f32 %v12886_v13, %v1891_v45  ;;  %v12345_v31 = vpack.c.bf16 %v10300_v26, %v10298_v22 }
 0xc7e   :  { %v13978_v0 = vadd.f32 %v1920_v19, %v13770_v56 }
 0xc7f   :  { %v13982_v34 = vadd.f32 %v1919_v11, %v13763_v55 }
 0xc80   :  { %v10319_v36 = vmul.f32 -1.442695, %v13978_v0 }
 0xc81   :  { %v10318_v59 = vmul.f32 -1.442695, %v13982_v34 }
 0xc82   :  { %12891 = vpow2.f32 %v10319_v36  ;;  %v12349_v36 = vpack.c.bf16 %v10304_v57, %v10302_v39  ;;  %v10336_v57 = vld [vmem:[%s15688_s5 + $0xc0] sm:$0xff] }
 0xc83   :  { %12893 = vpow2.f32 %v10318_v59 }
 0xc84   :  { %v12888_v61 = vpop.eup %12887 }
 0xc85   :  { %v12890_v27 = vpop.eup %12889  ;;  %v2135_v32 = vadd.f32 1.0, %v12888_v61 }
 0xc86   :  { %v2134_v48 = vadd.f32 1.0, %v12890_v27 }
 0xc87   :  { %12895 = vrcp.f32 %v2135_v32 }
 0xc88   :  { %12897 = vrcp.f32 %v2134_v48 }
 0xc8c   :  { %v12892_v63 = vpop.eup %12891 }
 0xc8d   :  { %v12894_v56 = vpop.eup %12893  ;;  %v2137_v28 = vadd.f32 1.0, %v12892_v63 }
 0xc8e   :  { %v2136_v37 = vadd.f32 1.0, %v12894_v56 }
 0xc8f   :  { %12899 = vrcp.f32 %v2137_v28 }
 0xc90   :  { %12901 = vrcp.f32 %v2136_v37 }
 0xc91   :  { %v12896_v55 = vpop.eup %12895 }
 0xc92   :  { %v12898_v51 = vpop.eup %12897 }
 0xc99   :  { %v12900_v30 = vpop.eup %12899 }
 0xc9a   :  { %v12902_v42 = vpop.eup %12901 }
 0xcd1   :  { %v2165_v50 = vpop.permute.xlu0 %2164 }
 0xcd2   :  { %v2175_v52 = vmul.f32 %v12896_v55, %v2165_v50  ;;  %v2163_v45 = vpop.permute.xlu1 %2162 }
 0xcd3   :  { %v2174_v46 = vmul.f32 %v12898_v51, %v2163_v45 }
 0xcd5   :  { %v12331_v60 = vpack.c.bf16 %v2175_v52, %v2174_v46  ;;  %v2169_v18 = vpop.permute.xlu0 %2168 }
 0xcd6   :  { %v2177_v8 = vmul.f32 %v12900_v30, %v2169_v18  ;;  %v2167_v17 = vpop.permute.xlu1 %2166 }
 0xcd7   :  { %v2176_v16 = vmul.f32 %v12902_v42, %v2167_v17  ;;  %12332 = vmatprep.subr.bf16.mxu1 %v12331_v60 }
 0xcd8   :  { %12334 = vmatpush3.bf16.msra.mxu1 %v12331_v60  ;;  %v2578_v60 = vrot.slane %v13887_v29, %v13649_v4 }
 0xcd9   :  { %v12335_v20 = vpack.c.bf16 %v2177_v8, %v2176_v16  ;;  %v2449_v59 = vpop.permute.xlu0 %2448 }
 0xcda   :  { %v2447_v61 = vpop.permute.xlu1 %2446 }
 0xcdb   :  { %12336 = vmatprep.subr.bf16.mxu1 %v12335_v20 }
 0xcdc   :  { %12338 = vmatpush3.bf16.msra.mxu1 %v12335_v20 }
 0xcdd   :  { %12339 = vmatprep.subr.bf16.mxu1 %v13388_v24  ;;  %v2562_v48 = vpop.permute.xlu0 %2561 }
 0xcde   :  { %v2560_v56 = vpop.permute.xlu1 %2559 }
 0xcdf   :  { %11419 = vmatmul.mubr.msk.f32.vlgmr.msra.gmra.mrb[24].mxu1 %vm172_vm0, %v13990_v49 }
 0xce0   :  { %11425 = vmatprep.mubr.msk.f32.mxu1 %vm13389_vm2, %v13390_v25 }
 0xce1   :  { %v2453_v52 = vpop.permute.xlu0 %2452 }
 0xce2   :  { %v2451_v46 = vpop.permute.xlu1 %2450 }
 0xce6   :  { %v2564_v26 = vpop.permute.xlu1 %2563 }
 0xdb2   :  { %v11420_v10 = vpop.f32.mrb[24].mxu1 }
 0xdb3   :  { %v2260_v13 = vadd.f32 %v11420_v10, %v2258_v9  ;;  %v2244_v19 = vpop.f32.mrb[25].mxu1 }
 0xdb4   :  { %v2259_v11 = vadd.f32 %v2257_v21, %v2244_v19  ;;  %v2566_v21 = vpop.permute.xlu0 %2565 }
 0xdb6   :  { %v12340_v33 = vpack.c.bf16 %v2260_v13, %v2259_v11 }
 0xdb8   :  { %12341 = vmatpush3.bf16.msra.mxu1 %v12340_v33 }
 0xdb9   :  { %12346 = vmatprep.subr.bf16.mxu1 %v12345_v31 }
 0xdbb   :  { %11426 = vmatmul.mubr.msk.f32.vlgmr.msra.gmra.mrb[26].mxu1 %vm254_vm1, %v13391_v40 }
 0xdbc   :  { %12348 = vmatpush3.bf16.msra.mxu1 %v12345_v31  ;;  %11443 = vmatprep.mubr.msk.f32.mxu1 %vm172_vm0, %v13974_v12 }
 0xdbd   :  { %12350 = vmatprep.subr.bf16.mxu1 %v12349_v36 }
 0xdc0   :  { %12352 = vmatpush3.bf16.msra.mxu1 %v12349_v36  ;;  %v10338_v36 = vld [vmem:[%s15688_s5 + $0xd0] sm:$0xff] }
 0xdc1   :  { %12359 = vmatprep.subr.bf16.mxu1 %v13388_v24 }
 0xdc3   :  { %11444 = vmatmul.mubr.msk.f32.vlgmr.msra.gmra.mrb[28].mxu1 %vm172_vm0, %v13971_v43 }
 0xdc4   :  { %11446 = vmatprep.mubr.msk.f32.mxu1 %vm172_vm0, %v13982_v34 }
 0xdc7   :  { %11447 = vmatmul.mubr.msk.f32.gmra.mrb[30].mxu1 %vm172_vm0, %v13978_v0 }
 0xdc8   :  { %11468 = vmatprep.mubr.msk.f32.mxu1 %vm13389_vm2, %v13390_v25 }
 0xe8e   :  { %v2327_v27 = vpop.f32.mrb[26].mxu1 }
 0xe8f   :  { %v2334_v32 = vrot.slane %v2327_v27, %v13463_v14  ;;  %v11427_v63 = vpop.f32.mrb[27].mxu1  ;;  %v10342_v27 = vld [vmem:[%s15688_s5 + $0xf0] sm:$0xff] }
 0xe91   :  { %v14026_v28 = vsub.f32 %v2259_v11, %v2334_v32  ;;  %v14028_v37 = vsub.f32 %v2260_v13, %v2334_v32 }
 0xe93   :  { %v2337_v55 = vmul.f32 %v14026_v28, %v14026_v28  ;;  %v2338_v50 = vmul.f32 %v14028_v37, %v14028_v37 }
 0xe95   :  { %v12343_v51 = vpack.c.bf16 %v2338_v50, %v2337_v55 }
 0xe96   :  { %v11445_v45 = vpop.f32.mrb[28].mxu1 }
 0xe97   :  { %v2542_v30 = vadd.f32 %v11445_v45, %v2449_v59  ;;  %12344 = vmatpush3.bf16.msra.mxu0 %v12343_v51  ;;  %v2536_v18 = vpop.f32.mrb[29].mxu1  ;;  %v12365_v59 = vpack.c.bf16 %v10338_v36, %v10336_v57 }
 0xe98   :  { %v2537_v42 = vadd.f32 %v2536_v18, %v2447_v61  ;;  %12353 = vmatprep.subr.bf16.mxu0 %v13388_v24  ;;  %v10340_v61 = vld [vmem:[%s15688_s5 + $0xe0] sm:$0xff] }
 0xe99   :  { %v2572_v8 = vadd.f32 %v2562_v48, %v2542_v30  ;;  %v12369_v32 = vpack.c.bf16 %v10342_v27, %v10340_v61 }
 0xe9a   :  { %v2571_v17 = vadd.f32 %v2560_v56, %v2537_v42  ;;  %11433 = vmatmul.mubr.msk.f32.vlgmr.msra.gmra.mrb[34].mxu0 %vm254_vm1, %v13391_v40  ;;  %v11448_v16 = vpop.f32.mrb[30].mxu1 }
 0xe9b   :  { %v2580_v20 = vadd.f32 %v2578_v60, %v2572_v8  ;;  %v2552_v23 = vadd.f32 %v11448_v16, %v2453_v52  ;;  %v2546_v9 = vpop.f32.mrb[31].mxu1  ;;  %11457 = vmatprep.mubr.msk.f32.mxu0 %vm13389_vm2, %v13390_v25 }
 0xe9c   :  { %v2579_v10 = vadd.f32 %v2578_v60, %v2571_v17  ;;  %v2547_v22 = vadd.f32 %v2546_v9, %v2451_v46  ;;  %v2423_v17 = vrot.slane %v13887_v29, %v13677_v5 }
 0xe9d   :  { %v2574_v13 = vadd.f32 %v2566_v21, %v2552_v23 }
 0xe9e   :  { %v12354_v19 = vpack.c.bf16 %v2580_v20, %v2579_v10  ;;  %v2573_v11 = vadd.f32 %v2564_v26, %v2547_v22 }
 0xe9f   :  { %v2582_v31 = vadd.f32 %v2578_v60, %v2574_v13 }
 0xea0   :  { %v2581_v33 = vadd.f32 %v2578_v60, %v2573_v11  ;;  %12355 = vmatpush3.bf16.msra.mxu0 %v12354_v19 }
 0xea1   :  { %12356 = vmatprep.subr.bf16.mxu0 %v13388_v24 }
 0xea2   :  { %v12357_v39 = vpack.c.bf16 %v2582_v31, %v2581_v33 }
 0xea4   :  { %12358 = vmatpush3.bf16.msra.mxu0 %v12357_v39 }
 0xea5   :  { %12366 = vmatprep.subr.bf16.mxu0 %v12365_v59 }
 0xea7   :  { %11458 = vmatmul.mubr.msk.f32.vlgmr.msra.gmra.mrb[36].mxu0 %vm172_vm0, %v13392_v35 }
 0xea8   :  { %12368 = vmatpush3.bf16.msra.mxu0 %v12365_v59 }
 0xea9   :  { %12370 = vmatprep.subr.bf16.mxu0 %v12369_v32 }
 0xeac   :  { %12372 = vmatpush3.bf16.msra.mxu0 %v12369_v32 }
 0xf6d   :  { %v2405_v63 = vpop.f32.mrb[34].mxu0 }
 0xf6e   :  { %v2406_v48 = vadd.f32 1e-05, %v2405_v63  ;;  %v11434_v56 = vpop.f32.mrb[35].mxu0 }
 0xf70   :  { %12903 = vrsqrt.f32 %v2406_v48 }
 0xf7a   :  { %v12904_v55 = vpop.eup %12903  ;;  %v2649_v50 = vpop.f32.mrb[36].mxu0 }
 0xf7b   :  { %v2411_v51 = vrot.slane %v12904_v55, 5  ;;  %v2656_v52 = vrot.slane %v2649_v50, %v13463_v14  ;;  %v11459_v45 = vpop.f32.mrb[37].mxu0 }
 0xf7c   :  { %v2751_v45 = vrot.slane %v13887_v29, %v13715_v1 }
 0xf7d   :  { %v2413_v46 = vmul.f32 %v13887_v29, %v2411_v51  ;;  %v2657_v30 = vsub.f32 %v2579_v10, %v2656_v52  ;;  %v2658_v60 = vsub.f32 %v2580_v20, %v2656_v52  ;;  %v2659_v18 = vsub.f32 %v2581_v33, %v2656_v52 }
 0xf7e   :  { %v2660_v42 = vsub.f32 %v2582_v31, %v2656_v52 }
 0xf7f   :  { %v2417_v8 = vrot.slane %v2413_v46, %v13674_v2  ;;  %v2661_v16 = vmul.f32 %v2657_v30, %v2657_v30  ;;  %v2662_v23 = vmul.f32 %v2658_v60, %v2658_v60  ;;  %v2663_v9 = vmul.f32 %v2659_v18, %v2659_v18 }
 0xf80   :  { %v2664_v13 = vmul.f32 %v2660_v42, %v2660_v42 }
 0xf81   :  { %v2418_v21 = vmul.f32 %v2417_v8, %v14026_v28  ;;  %v2419_v22 = vmul.f32 %v2417_v8, %v14028_v37  ;;  %v12360_v26 = vpack.c.bf16 %v2662_v23, %v2661_v16 }
 0xf82   :  { %v12363_v11 = vpack.c.bf16 %v2664_v13, %v2663_v9 }
 0xf83   :  { %v2425_v19 = vadd.f32 %v2423_v17, %v2419_v22  ;;  %12361 = vmatpush3.bf16.msra.mxu1 %v12360_v26  ;;  %v2424_v10 = vadd.f32 %v2423_v17, %v2418_v21 }
 0xf84   :  { %12362 = vmatprep.subr.bf16.mxu1 %v13388_v24 }
 0xf85   :  { %v10325_v20 = vmul.f32 -1.442695, %v2425_v19  ;;  %v10324_v31 = vmul.f32 -1.442695, %v2424_v10 }
 0xf87   :  { %12905 = vpow2.f32 %v10325_v20  ;;  %12364 = vmatpush3.bf16.msra.mxu1 %v12363_v11  ;;  %v10337_v20 = vld [vmem:[%s15688_s5 + $0xc8] sm:$0xff] }
 0xf88   :  { %12907 = vpow2.f32 %v10324_v31  ;;  %v10341_v11 = vld [vmem:[%s15688_s5 + $0xe8] sm:$0xff]  ;;  %v10343_v31 = vld [vmem:[%s15688_s5 + $0xf8] sm:$0xff] }
 0xf8a   :  { %11469 = vmatmul.mubr.msk.f32.vlgmr.msra.gmra.mrb[32].mxu1 %vm172_vm0, %v13392_v35 }
 0xf8b   :  { %11486 = vmatprep.mubr.msk.f32.mxu1 %vm254_vm1, %v13868_v47  ;;  %v14081_v47 = vld [vmem:[%s15686_s3] sm:$0xff] }
 0xf91   :  { %v12906_v28 = vpop.eup %12905 }
 0xf92   :  { %v12908_v37 = vpop.eup %12907  ;;  %v2433_v33 = vadd.f32 1.0, %v12906_v28  ;;  %v12395_v28 = vpack.c.bf16 %v10343_v31, %v10341_v11 }
 0xf93   :  { %v2432_v39 = vadd.f32 1.0, %v12908_v37 }
 0xf94   :  { %12909 = vrcp.f32 %v2433_v33 }
 0xf95   :  { %12911 = vrcp.f32 %v2432_v39 }
 0xf9e   :  { %v12910_v57 = vpop.eup %12909 }
 0xf9f   :  { %v12912_v36 = vpop.eup %12911  ;;  %v2439_v59 = vmul.f32 %v12910_v57, %v2425_v19 }
 0xfa0   :  { %v2438_v61 = vmul.f32 %v12912_v36, %v2424_v10 }
 0xfa1   :  { %v14069_v27 = vadd.f32 %v2439_v59, %v13873_v41  ;;  %v14088_v41 = vld [vmem:[%s15689_s6 + $0x18] sm:$0x7f] }
 0xfa2   :  { %v14072_v32 = vadd.f32 %v2438_v61, %v13876_v53  ;;  %v3012_v53 = vrot.slane %v14088_v41, %v13466_v15 }
 0xfa4   :  { %11479 = vmatprep.mubr.msk.f32.mxu0 %vm172_vm0, %v14072_v32  ;;  %3014 = vrot.lane.b32.xlu1 %v3012_v53, %s13385_s26 }
 0xfa5   :  { %11480 = vmatmul.mubr.msk.f32.vlgmr.msra.gmra.mrb[38].mxu0 %vm172_vm0, %v14069_v27 }
 0xfa6   :  { %11506 = vmatprep.mubr.msk.f32.mxu0 %vm172_vm0, %v14081_v47 }
0x105d   :  { %v2731_v63 = vpop.f32.mrb[32].mxu1 }
0x105e   :  { %v2732_v48 = vadd.f32 1e-05, %v2731_v63  ;;  %v11470_v56 = vpop.f32.mrb[33].mxu1 }
0x1060   :  { %12913 = vrsqrt.f32 %v2732_v48 }
0x106a   :  { %v12914_v55 = vpop.eup %12913 }
0x106b   :  { %v2737_v50 = vrot.slane %v12914_v55, 3 }
0x106d   :  { %v2739_v51 = vmul.f32 %v13887_v29, %v2737_v50  ;;  %v10339_v29 = vld [vmem:[%s15688_s5 + $0xd8] sm:$0xff] }
0x106f   :  { %v2743_v52 = vrot.slane %v2739_v51, %v13712_v62 }
0x1071   :  { %v2745_v46 = vmul.f32 %v2743_v52, %v2658_v60  ;;  %v2744_v8 = vmul.f32 %v2743_v52, %v2657_v30  ;;  %v2746_v17 = vmul.f32 %v2743_v52, %v2659_v18  ;;  %v2747_v16 = vmul.f32 %v2743_v52, %v2660_v42  ;;  %v3015_v52 = vpop.permute.xlu1 %3014 }
0x1072   :  { %v12391_v42 = vpack.c.bf16 %v10339_v29, %v10337_v20 }
0x1073   :  { %v2753_v23 = vadd.f32 %v2751_v45, %v2745_v46  ;;  %v2752_v9 = vadd.f32 %v2751_v45, %v2744_v8  ;;  %v2754_v21 = vadd.f32 %v2751_v45, %v2746_v17  ;;  %v2755_v22 = vadd.f32 %v2751_v45, %v2747_v16 }
0x1075   :  { %v10333_v26 = vmul.f32 -1.442695, %v2753_v23  ;;  %v10332_v13 = vmul.f32 -1.442695, %v2752_v9  ;;  %v10334_v19 = vmul.f32 -1.442695, %v2754_v21 }
0x1076   :  { %v10335_v10 = vmul.f32 -1.442695, %v2755_v22 }
0x1077   :  { %12915 = vpow2.f32 %v10333_v26 }
0x1078   :  { %v14103_v30 = vpop.f32.mrb[38].mxu0  ;;  %12917 = vpow2.f32 %v10332_v13 }
0x1079   :  { %v14105_v60 = vpop.f32.mrb[39].mxu0  ;;  %12919 = vpow2.f32 %v10334_v19 }
0x107a   :  { %v12373_v18 = vpack.c.bf16 %v14103_v30, %v14105_v60  ;;  %12921 = vpow2.f32 %v10335_v10 }
0x107c   :  { %12374 = vmatprep.subr.bf16.mxu1 %v12373_v18 }
0x107d   :  { %12376 = vmatpush3.bf16.msra.mxu1 %v12373_v18 }
0x107e   :  { %12392 = vmatprep.subr.bf16.mxu1 %v12391_v42 }
0x1080   :  { %11487 = vmatmul.mubr.msk.f32.vlgmr.msra.gmra.mrb[34].mxu1 %vm254_vm1, %v13902_v3 }
0x1081   :  { %v12916_v37 = vpop.eup %12915  ;;  %11489 = vmatprep.mubr.msk.f32.mxu1 %vm254_vm1, %v13909_v54  ;;  %12394 = vmatpush3.bf16.msra.mxu1 %v12391_v42 }
0x1082   :  { %v12918_v33 = vpop.eup %12917  ;;  %v2769_v39 = vadd.f32 1.0, %v12916_v37  ;;  %12396 = vmatprep.subr.bf16.mxu1 %v12395_v28 }
0x1083   :  { %v12920_v57 = vpop.eup %12919  ;;  %v2768_v36 = vadd.f32 1.0, %v12918_v33 }
0x1084   :  { %v12922_v59 = vpop.eup %12921  ;;  %12923 = vrcp.f32 %v2769_v39  ;;  %11490 = vmatmul.mubr.msk.f32.gmra.mrb[36].mxu1 %vm254_vm1, %v13916_v38  ;;  %v2770_v61 = vadd.f32 1.0, %v12920_v57 }
0x1085   :  { %11492 = vmatprep.mubr.msk.f32.mxu1 %vm254_vm1, %v13923_v44  ;;  %12398 = vmatpush3.bf16.msra.mxu1 %v12395_v28  ;;  %12925 = vrcp.f32 %v2768_v36  ;;  %v2771_v3 = vadd.f32 1.0, %v12922_v59 }
0x1086   :  { %12927 = vrcp.f32 %v2770_v61  ;;  %12405 = vmatprep.subr.bf16.mxu1 %v13388_v24 }
0x1087   :  { %12929 = vrcp.f32 %v2771_v3 }
0x1088   :  { %11493 = vmatmul.mubr.msk.f32.gmra.mrb[38].mxu1 %vm254_vm1, %v13930_v6 }
0x1089   :  { %11495 = vmatprep.mubr.msk.f32.mxu1 %vm254_vm1, %v13937_v58 }
0x108c   :  { %11496 = vmatmul.mubr.msk.f32.gmra.mrb[40].mxu1 %vm254_vm1, %v13944_v7 }
0x108e   :  { %v12924_v54 = vpop.eup %12923 }
0x108f   :  { %v12926_v38 = vpop.eup %12925  ;;  %v2781_v53 = vmul.f32 %v12924_v54, %v2753_v23 }
0x1090   :  { %v12928_v44 = vpop.eup %12927  ;;  %v2780_v63 = vmul.f32 %v12926_v38, %v2752_v9 }
0x1091   :  { %v12930_v48 = vpop.eup %12929  ;;  %v14131_v56 = vadd.f32 %v2781_v53, %v13971_v43  ;;  %v2782_v55 = vmul.f32 %v12928_v44, %v2754_v21 }
0x1092   :  { %v14134_v50 = vadd.f32 %v2780_v63, %v13974_v12  ;;  %v2783_v6 = vmul.f32 %v12930_v48, %v2755_v22 }
0x1093   :  { %v14139_v58 = vadd.f32 %v2782_v55, %v13982_v34  ;;  %v10356_v19 = vmul.f32 -1.442695, %v14131_v56 }
0x1094   :  { %11531 = vmatprep.mubr.msk.f32.mxu1 %vm172_vm0, %v14134_v50  ;;  %v14146_v7 = vadd.f32 %v2783_v6, %v13978_v0  ;;  %v10355_v10 = vmul.f32 -1.442695, %v14134_v50 }
0x1095   :  { %11532 = vmatmul.mubr.msk.f32.vlgmr.msra.gmra.mrb[42].mxu1 %vm172_vm0, %v14131_v56  ;;  %12931 = vpow2.f32 %v10356_v19  ;;  %v10357_v29 = vmul.f32 -1.442695, %v14139_v58 }
0x1096   :  { %11534 = vmatprep.mubr.msk.f32.mxu1 %vm172_vm0, %v14139_v58  ;;  %v10358_v20 = vmul.f32 -1.442695, %v14146_v7  ;;  %12933 = vpow2.f32 %v10355_v10 }
0x1098   :  { %12935 = vpow2.f32 %v10358_v20 }
0x1099   :  { %11535 = vmatmul.mubr.msk.f32.gmra.mrb[44].mxu1 %vm172_vm0, %v14146_v7  ;;  %12937 = vpow2.f32 %v10357_v29 }
0x109a   :  { %11556 = vmatprep.mubr.msk.f32.mxu1 %vm13389_vm2, %v13390_v25 }
0x109f   :  { %v12932_v18 = vpop.eup %12931 }
0x10a0   :  { %v12934_v42 = vpop.eup %12933  ;;  %v2998_v11 = vadd.f32 1.0, %v12932_v18  ;;  %v3441_v18 = vrot.slane %v14088_v41, %v13649_v4 }
0x10a1   :  { %v2997_v28 = vadd.f32 1.0, %v12934_v42 }
0x10a2   :  { %v12936_v31 = vpop.eup %12935  ;;  %12939 = vrcp.f32 %v2998_v11 }
0x10a3   :  { %v12938_v37 = vpop.eup %12937  ;;  %v3000_v33 = vadd.f32 1.0, %v12936_v31  ;;  %12941 = vrcp.f32 %v2997_v28 }
0x10a4   :  { %v2999_v39 = vadd.f32 1.0, %v12938_v37 }
0x10a5   :  { %12943 = vrcp.f32 %v3000_v33 }
0x10a6   :  { %12945 = vrcp.f32 %v2999_v39 }
0x10ac   :  { %v12940_v57 = vpop.eup %12939 }
0x10ad   :  { %v12942_v59 = vpop.eup %12941 }
0x10af   :  { %v12944_v38 = vpop.eup %12943 }
0x10b0   :  { %v12946_v63 = vpop.eup %12945 }
0x1153   :  { %v11488_v43 = vpop.f32.mrb[34].mxu1 }
0x1154   :  { %v2946_v12 = vpop.f32.mrb[35].mxu1 }
0x1157   :  { %v11491_v51 = vpop.f32.mrb[36].mxu1 }
0x1158   :  { %v2956_v34 = vpop.f32.mrb[37].mxu1 }
0x115b   :  { %v11494_v45 = vpop.f32.mrb[38].mxu1 }
0x115c   :  { %v2966_v46 = vpop.f32.mrb[39].mxu1  ;;  %v3018_v8 = vadd.f32 %v11494_v45, %v3015_v52 }
0x115d   :  { %v3017_v17 = vadd.f32 %v3015_v52, %v2966_v46 }
0x115e   :  { %3027 = vrot.lane.b32.xlu1 %v3018_v8, %s13385_s26 }
0x115f   :  { %v11497_v16 = vpop.f32.mrb[40].mxu1  ;;  %3025 = vrot.lane.b32.xlu0 %v3017_v17, %s13385_s26 }
0x1160   :  { %v3020_v0 = vadd.f32 %v11497_v16, %v3015_v52  ;;  %v2976_v23 = vpop.f32.mrb[41].mxu1 }
0x1161   :  { %v3019_v9 = vadd.f32 %v3015_v52, %v2976_v23 }
0x1162   :  { %3031 = vrot.lane.b32.xlu1 %v3020_v0, %s13385_s26 }
0x1163   :  { %3029 = vrot.lane.b32.xlu0 %v3019_v9, %s13385_s26 }
0x1166   :  { %3311 = vrot.lane.b32.xlu1 %v11488_v43, %s13386_s20 }
0x1167   :  { %3309 = vrot.lane.b32.xlu0 %v2946_v12, %s13386_s20  ;;  %v3119_v12 = vrot.slane %v14088_v41, %v13463_v14 }
0x1168   :  { %v14158_v21 = vpop.f32.mrb[42].mxu1 }
0x1169   :  { %v14160_v22 = vpop.f32.mrb[43].mxu1 }
0x116a   :  { %3424 = vrot.lane.b32.xlu1 %v11494_v45, %s13387_s21 }
0x116b   :  { %3422 = vrot.lane.b32.xlu0 %v2966_v46, %s13387_s21 }
0x116c   :  { %v14164_v26 = vpop.f32.mrb[44].mxu1 }
0x116d   :  { %v14166_v13 = vpop.f32.mrb[45].mxu1 }
0x116e   :  { %3315 = vrot.lane.b32.xlu1 %v11491_v51, %s13386_s20  ;;  %v3121_v51 = vadd.f32 %v14103_v30, %v3119_v12 }
0x116f   :  { %3313 = vrot.lane.b32.xlu0 %v2956_v34, %s13386_s20  ;;  %v3120_v34 = vadd.f32 %v3119_v12, %v14105_v60 }
0x1172   :  { %3428 = vrot.lane.b32.xlu1 %v11497_v16, %s13387_s21 }
0x1173   :  { %3426 = vrot.lane.b32.xlu0 %v2976_v23, %s13387_s21 }
0x11d0   :  { %v3028_v36 = vpop.permute.xlu1 %3027 }
0x11d1   :  { %v3038_v61 = vmul.f32 %v12940_v57, %v3028_v36  ;;  %v3026_v3 = vpop.permute.xlu0 %3025 }
0x11d2   :  { %v3037_v54 = vmul.f32 %v12942_v59, %v3026_v3 }
0x11d4   :  { %v12377_v53 = vpack.c.bf16 %v3038_v61, %v3037_v54  ;;  %v3032_v44 = vpop.permute.xlu1 %3031 }
0x11d5   :  { %v3040_v48 = vmul.f32 %v12944_v38, %v3032_v44  ;;  %v3030_v55 = vpop.permute.xlu0 %3029 }
0x11d6   :  { %v3039_v6 = vmul.f32 %v12946_v63, %v3030_v55  ;;  %12378 = vmatprep.subr.bf16.mxu0 %v12377_v53  ;;  %v10377_v63 = vld [vmem:[%s15688_s5 + $0x110] sm:$0xff]  ;;  %v10379_v55 = vld [vmem:[%s15688_s5 + $0x120] sm:$0xff] }
0x11d7   :  { %12380 = vmatpush3.bf16.msra.mxu0 %v12377_v53 }
0x11d8   :  { %v12381_v43 = vpack.c.bf16 %v3040_v48, %v3039_v6  ;;  %v10381_v6 = vld [vmem:[%s15688_s5 + $0x130] sm:$0xff] }
0x11d9   :  { %v3310_v16 = vpop.permute.xlu0 %3309 }
0x11da   :  { %12382 = vmatprep.subr.bf16.mxu0 %v12381_v43  ;;  %v3400_v10 = vadd.f32 %v14160_v22, %v3310_v16 }
0x11db   :  { %12384 = vmatpush3.bf16.msra.mxu0 %v12381_v43  ;;  %v12415_v43 = vpack.c.bf16 %v10381_v6, %v10379_v55  ;;  %v14285_v6 = vld [vmem:[%s15685_s2 + $0x10] sm:$0xff] }
0x11dc   :  { %12385 = vmatprep.subr.bf16.mxu0 %v13388_v24 }
0x11dd   :  { %v3423_v30 = vpop.permute.xlu0 %3422 }
0x11de   :  { %11507 = vmatmul.mubr.msk.f32.vlgmr.msra.gmra.mrb[40].mxu0 %vm172_vm0, %v13990_v49  ;;  %v3312_v49 = vpop.permute.xlu1 %3311  ;;  %v3434_v11 = vadd.f32 %v3423_v30, %v3400_v10 }
0x11df   :  { %11513 = vmatprep.mubr.msk.f32.mxu0 %vm13389_vm2, %v13390_v25  ;;  %v3405_v9 = vadd.f32 %v14158_v21, %v3312_v49 }
0x11e0   :  { %v3442_v22 = vadd.f32 %v3441_v18, %v3434_v11 }
0x11e1   :  { %v3314_v60 = vpop.permute.xlu0 %3313 }
0x11e2   :  { %v3425_v0 = vpop.permute.xlu1 %3424  ;;  %v3410_v57 = vadd.f32 %v14166_v13, %v3314_v60  ;;  %v10375_v13 = vld [vmem:[%s15688_s5 + $0x100] sm:$0xff] }
0x11e3   :  { %v3435_v42 = vadd.f32 %v3425_v0, %v3405_v9  ;;  %v12411_v48 = vpack.c.bf16 %v10377_v63, %v10375_v13 }
0x11e5   :  { %v3427_v33 = vpop.permute.xlu0 %3426  ;;  %v3443_v59 = vadd.f32 %v3441_v18, %v3435_v42 }
0x11e6   :  { %v3316_v23 = vpop.permute.xlu1 %3315  ;;  %v3436_v3 = vadd.f32 %v3427_v33, %v3410_v57 }
0x11e7   :  { %v3415_v39 = vadd.f32 %v14164_v26, %v3316_v23  ;;  %v12400_v38 = vpack.c.bf16 %v3443_v59, %v3442_v22 }
0x11e8   :  { %v3444_v44 = vadd.f32 %v3441_v18, %v3436_v3 }
0x11ea   :  { %v3429_v37 = vpop.permute.xlu1 %3428 }
0x11eb   :  { %v3437_v61 = vadd.f32 %v3429_v37, %v3415_v39 }
0x11ed   :  { %v3445_v53 = vadd.f32 %v3441_v18, %v3437_v61  ;;  %v3286_v18 = vrot.slane %v14088_v41, %v13677_v5 }
0x11ef   :  { %v12403_v26 = vpack.c.bf16 %v3445_v53, %v3444_v44 }
0x12b1   :  { %v11508_v52 = vpop.f32.mrb[40].mxu0 }
0x12b2   :  { %v3123_v45 = vadd.f32 %v11508_v52, %v3121_v51  ;;  %v3107_v46 = vpop.f32.mrb[41].mxu0 }
0x12b3   :  { %v3122_v8 = vadd.f32 %v3120_v34, %v3107_v46 }
0x12b5   :  { %v12386_v17 = vpack.c.bf16 %v3123_v45, %v3122_v8 }
0x12b7   :  { %12387 = vmatpush3.bf16.msra.mxu0 %v12386_v17 }
0x12b8   :  { %12388 = vmatprep.subr.bf16.mxu0 %v13388_v24 }
0x12ba   :  { %11514 = vmatmul.mubr.msk.f32.vlgmr.msra.gmra.mrb[42].mxu0 %vm254_vm1, %v13391_v40 }
0x12bb   :  { %11520 = vmatprep.mubr.msk.f32.mxu0 %vm13389_vm2, %v13390_v25 }
0x138d   :  { %v3190_v19 = vpop.f32.mrb[42].mxu0 }
0x138e   :  { %v3197_v20 = vrot.slane %v3190_v19, %v13463_v14  ;;  %v11515_v29 = vpop.f32.mrb[43].mxu0 }
0x1390   :  { %v3198_v31 = vsub.f32 %v3122_v8, %v3197_v20  ;;  %v3199_v28 = vsub.f32 %v3123_v45, %v3197_v20 }
0x1392   :  { %v3200_v21 = vmul.f32 %v3198_v31, %v3198_v31  ;;  %v3201_v36 = vmul.f32 %v3199_v28, %v3199_v28 }
0x1394   :  { %v12389_v54 = vpack.c.bf16 %v3201_v36, %v3200_v21  ;;  %v14244_v36 = vld [vmem:[%s15685_s2] sm:$0xff] }
0x1396   :  { %12390 = vmatpush3.bf16.msra.mxu0 %v12389_v54 }
0x1397   :  { %12399 = vmatprep.subr.bf16.mxu0 %v13388_v24 }
0x1399   :  { %11521 = vmatmul.mubr.msk.f32.vlgmr.msra.gmra.mrb[44].mxu0 %vm254_vm1, %v13391_v40 }
0x139a   :  { %12401 = vmatpush3.bf16.msra.mxu0 %v12400_v38  ;;  %11545 = vmatprep.mubr.msk.f32.mxu0 %vm13389_vm2, %v13390_v25 }
0x139b   :  { %12402 = vmatprep.subr.bf16.mxu0 %v13388_v24 }
0x139e   :  { %12404 = vmatpush3.bf16.msra.mxu0 %v12403_v26  ;;  %v14263_v26 = vld [vmem:[%s15689_s6 + $0x20] sm:$0x7f] }
0x139f   :  { %12412 = vmatprep.subr.bf16.mxu0 %v12411_v48 }
0x13a1   :  { %11546 = vmatmul.mubr.msk.f32.vlgmr.msra.gmra.mrb[46].mxu0 %vm172_vm0, %v13392_v35 }
0x13a2   :  { %12414 = vmatpush3.bf16.msra.mxu0 %v12411_v48 }
0x13a3   :  { %12416 = vmatprep.subr.bf16.mxu0 %v12415_v43 }
0x13a6   :  { %12418 = vmatpush3.bf16.msra.mxu0 %v12415_v43  ;;  %v14292_v43 = vld [vmem:[%s15685_s2 + $0x18] sm:$0xff] }
0x146c   :  { %v3268_v12 = vpop.f32.mrb[44].mxu0 }
0x146d   :  { %v3269_v51 = vadd.f32 1e-05, %v3268_v12  ;;  %v11522_v34 = vpop.f32.mrb[45].mxu0  ;;  %v14299_v12 = vld [vmem:[%s15685_s2 + $0x20] sm:$0xff] }
0x146e   :  { %v14313_v34 = vld [vmem:[%s15685_s2 + $0x30] sm:$0xff] }
0x146f   :  { %12947 = vrsqrt.f32 %v3269_v51  ;;  %v14306_v51 = vld [vmem:[%s15685_s2 + $0x28] sm:$0xff] }
0x1474   :  { %v3512_v52 = vpop.f32.mrb[46].mxu0 }
0x1475   :  { %v3519_v45 = vrot.slane %v3512_v52, %v13463_v14  ;;  %v11547_v46 = vpop.f32.mrb[47].mxu0  ;;  %v14320_v52 = vld [vmem:[%s15685_s2 + $0x38] sm:$0xff] }
0x1477   :  { %v14218_v8 = vsub.f32 %v3442_v22, %v3519_v45  ;;  %v14220_v17 = vsub.f32 %v3443_v59, %v3519_v45  ;;  %v14222_v49 = vsub.f32 %v3444_v44, %v3519_v45  ;;  %v14224_v16 = vsub.f32 %v3445_v53, %v3519_v45 }
0x1479   :  { %v12948_v0 = vpop.eup %12947  ;;  %v3524_v30 = vmul.f32 %v14218_v8, %v14218_v8  ;;  %v3525_v23 = vmul.f32 %v14220_v17, %v14220_v17  ;;  %v3526_v19 = vmul.f32 %v14222_v49, %v14222_v49  ;;  %v3527_v10 = vmul.f32 %v14224_v16, %v14224_v16 }
0x147a   :  { %v3274_v60 = vrot.slane %v12948_v0, 5 }
0x147b   :  { %v12406_v9 = vpack.c.bf16 %v3525_v23, %v3524_v30  ;;  %v12409_v42 = vpack.c.bf16 %v3527_v10, %v3526_v19 }
0x147c   :  { %v3276_v20 = vmul.f32 %v14088_v41, %v3274_v60 }
0x147d   :  { %12407 = vmatpush3.bf16.msra.mxu1 %v12406_v9 }
0x147e   :  { %v3280_v29 = vrot.slane %v3276_v20, %v13674_v2  ;;  %12408 = vmatprep.subr.bf16.mxu1 %v13388_v24 }
0x1480   :  { %v3281_v11 = vmul.f32 %v3280_v29, %v3198_v31  ;;  %v3282_v37 = vmul.f32 %v3280_v29, %v3199_v28 }
0x1481   :  { %12410 = vmatpush3.bf16.msra.mxu1 %v12409_v42 }
0x1482   :  { %v3288_v33 = vadd.f32 %v3286_v18, %v3282_v37  ;;  %v3287_v39 = vadd.f32 %v3286_v18, %v3281_v11 }
0x1484   :  { %v10364_v57 = vmul.f32 -1.442695, %v3288_v33  ;;  %11557 = vmatmul.mubr.msk.f32.vlgmr.msra.gmra.mrb[46].mxu1 %vm172_vm0, %v13392_v35  ;;  %v10363_v21 = vmul.f32 -1.442695, %v3287_v39 }
0x1485   :  { %11574 = vmatprep.mubr.msk.f32.mxu1 %vm254_vm1, %v14244_v36 }
0x1486   :  { %12949 = vpow2.f32 %v10364_v57 }
0x1487   :  { %12951 = vpow2.f32 %v10363_v21 }
0x1490   :  { %v12950_v31 = vpop.eup %12949 }
0x1491   :  { %v12952_v28 = vpop.eup %12951  ;;  %v3296_v59 = vadd.f32 1.0, %v12950_v31  ;;  %v3614_v31 = vrot.slane %v14088_v41, %v13715_v1 }
0x1492   :  { %v3295_v22 = vadd.f32 1.0, %v12952_v28 }
0x1493   :  { %12953 = vrcp.f32 %v3296_v59 }
0x1494   :  { %12955 = vrcp.f32 %v3295_v22 }
0x149d   :  { %v12954_v61 = vpop.eup %12953 }
0x149e   :  { %v12956_v3 = vpop.eup %12955  ;;  %v3302_v54 = vmul.f32 %v12954_v61, %v3288_v33 }
0x149f   :  { %v3301_v38 = vmul.f32 %v12956_v3, %v3287_v39 }
0x14a0   :  { %v14249_v53 = vadd.f32 %v3302_v54, %v14069_v27  ;;  %v3875_v27 = vrot.slane %v14263_v26, %v13466_v15 }
0x14a1   :  { %v14252_v44 = vadd.f32 %v3301_v38, %v14072_v32 }
0x14a2   :  { %3877 = vrot.lane.b32.xlu0 %v3875_v27, %s13385_s26 }
0x14a3   :  { %11567 = vmatprep.mubr.msk.f32.mxu0 %vm172_vm0, %v14252_v44 }
0x14a4   :  { %11568 = vmatmul.mubr.msk.f32.vlgmr.msra.gmra.mrb[48].mxu0 %vm172_vm0, %v14249_v53 }
0x14a5   :  { %11594 = vmatprep.mubr.msk.f32.mxu0 %vm172_vm0, %v14081_v47  ;;  %v14278_v47 = vld [vmem:[%s15685_s2 + $0x8] sm:$0xff] }
0x1514   :  { %v3878_v23 = vpop.permute.xlu0 %3877 }
0x1557   :  { %v3594_v32 = vpop.f32.mrb[46].mxu1 }
0x1558   :  { %v11558_v13 = vpop.f32.mrb[47].mxu1  ;;  %v3595_v11 = vadd.f32 1e-05, %v3594_v32 }
0x155a   :  { %12957 = vrsqrt.f32 %v3595_v11 }
0x1564   :  { %v12958_v37 = vpop.eup %12957 }
0x1565   :  { %v3600_v33 = vrot.slane %v12958_v37, 3 }
0x1567   :  { %v3602_v39 = vmul.f32 %v14088_v41, %v3600_v33 }
0x1569   :  { %v3606_v57 = vrot.slane %v3602_v39, %v13712_v62 }
0x156b   :  { %v3608_v21 = vmul.f32 %v3606_v57, %v14220_v17  ;;  %v3607_v28 = vmul.f32 %v3606_v57, %v14218_v8  ;;  %v3610_v59 = vmul.f32 %v3606_v57, %v14224_v16  ;;  %v3609_v61 = vmul.f32 %v3606_v57, %v14222_v49 }
0x156d   :  { %v3616_v22 = vadd.f32 %v3614_v31, %v3608_v21  ;;  %v3615_v3 = vadd.f32 %v3614_v31, %v3607_v28  ;;  %v3618_v54 = vadd.f32 %v3614_v31, %v3610_v59  ;;  %v3617_v27 = vadd.f32 %v3614_v31, %v3609_v61 }
0x156f   :  { %v10372_v38 = vmul.f32 -1.442695, %v3616_v22  ;;  %v10371_v32 = vmul.f32 -1.442695, %v3615_v3  ;;  %v10374_v13 = vmul.f32 -1.442695, %v3618_v54 }
0x1571   :  { %12959 = vpow2.f32 %v10372_v38 }
0x1572   :  { %12961 = vpow2.f32 %v10371_v32 }
0x1573   :  { %12963 = vpow2.f32 %v10374_v13 }
0x1577   :  { %v14268_v63 = vpop.f32.mrb[48].mxu0 }
0x1578   :  { %v14270_v48 = vpop.f32.mrb[49].mxu0 }
0x1579   :  { %v12419_v55 = vpack.c.bf16 %v14268_v63, %v14270_v48 }
0x157b   :  { %12420 = vmatprep.subr.bf16.mxu1 %v12419_v55  ;;  %v12960_v17 = vpop.eup %12959 }
0x157c   :  { %12422 = vmatpush3.bf16.msra.mxu1 %v12419_v55  ;;  %v10373_v55 = vmul.f32 -1.442695, %v3617_v27  ;;  %v12962_v41 = vpop.eup %12961 }
0x157d   :  { %12434 = vmatprep.subr.bf16.mxu1 %v13388_v24  ;;  %v12964_v8 = vpop.eup %12963 }
0x157e   :  { %12965 = vpow2.f32 %v10373_v55 }
0x157f   :  { %11575 = vmatmul.mubr.msk.f32.vlgmr.msra.gmra.mrb[48].mxu1 %vm254_vm1, %v14278_v47 }
0x1580   :  { %11577 = vmatprep.mubr.msk.f32.mxu1 %vm254_vm1, %v14285_v6 }
0x1583   :  { %11578 = vmatmul.mubr.msk.f32.gmra.mrb[50].mxu1 %vm254_vm1, %v14292_v43 }
0x1584   :  { %11580 = vmatprep.mubr.msk.f32.mxu1 %vm254_vm1, %v14299_v12 }
0x1587   :  { %11581 = vmatmul.mubr.msk.f32.gmra.mrb[52].mxu1 %vm254_vm1, %v14306_v51 }
0x1588   :  { %11583 = vmatprep.mubr.msk.f32.mxu1 %vm254_vm1, %v14313_v34  ;;  %v12966_v16 = vpop.eup %12965 }
0x1589   :  { %v3633_v49 = vadd.f32 1.0, %v12966_v16 }
0x158b   :  { %11584 = vmatmul.mubr.msk.f32.gmra.mrb[54].mxu1 %vm254_vm1, %v14320_v52 }
0x158c   :  { %11608 = vmatprep.mubr.msk.f32.mxu1 %vm13389_vm2, %v13390_v25 }
0x1652   :  { %v11576_v45 = vpop.f32.mrb[48].mxu1 }
0x1653   :  { %v3809_v46 = vpop.f32.mrb[49].mxu1 }
0x1656   :  { %v11579_v0 = vpop.f32.mrb[50].mxu1 }
0x1657   :  { %v3819_v30 = vpop.f32.mrb[51].mxu1 }
0x165a   :  { %v11582_v60 = vpop.f32.mrb[52].mxu1 }
0x165b   :  { %v3829_v9 = vpop.f32.mrb[53].mxu1  ;;  %v3881_v19 = vadd.f32 %v11582_v60, %v3878_v23 }
0x165c   :  { %v3880_v10 = vadd.f32 %v3878_v23, %v3829_v9 }
0x165d   :  { %3890 = vrot.lane.b32.xlu0 %v3881_v19, %s13385_s26 }
0x165e   :  { %v11585_v20 = vpop.f32.mrb[54].mxu1  ;;  %3888 = vrot.lane.b32.xlu1 %v3880_v10, %s13385_s26 }
0x165f   :  { %v3883_v29 = vadd.f32 %v11585_v20, %v3878_v23  ;;  %v3839_v18 = vpop.f32.mrb[55].mxu1 }
0x1660   :  { %v3882_v42 = vadd.f32 %v3878_v23, %v3839_v18 }
0x1661   :  { %3894 = vrot.lane.b32.xlu0 %v3883_v29, %s13385_s26 }
0x1662   :  { %3892 = vrot.lane.b32.xlu1 %v3882_v42, %s13385_s26 }
0x1665   :  { %4174 = vrot.lane.b32.xlu0 %v11576_v45, %s13386_s20  ;;  %v3632_v45 = vadd.f32 1.0, %v12960_v17 }
0x1666   :  { %4172 = vrot.lane.b32.xlu1 %v3809_v46, %s13386_s20  ;;  %v3631_v46 = vadd.f32 1.0, %v12962_v41 }
0x1667   :  { %12967 = vrcp.f32 %v3632_v45 }
0x1668   :  { %12969 = vrcp.f32 %v3631_v46 }
0x1669   :  { %4287 = vrot.lane.b32.xlu0 %v11582_v60, %s13387_s21 }
0x166a   :  { %4285 = vrot.lane.b32.xlu1 %v3829_v9, %s13387_s21 }
0x166d   :  { %4178 = vrot.lane.b32.xlu0 %v11579_v0, %s13386_s20  ;;  %v3634_v0 = vadd.f32 1.0, %v12964_v8 }
0x166e   :  { %4176 = vrot.lane.b32.xlu1 %v3819_v30, %s13386_s20 }
0x166f   :  { %12971 = vrcp.f32 %v3634_v0  ;;  %v14366_v0 = vld [vmem:[%s15686_s3 + $0x8] sm:$0xff] }
0x1670   :  { %12973 = vrcp.f32 %v3633_v49  ;;  %v3982_v49 = vrot.slane %v14263_v26, %v13463_v14 }
0x1671   :  { %4291 = vrot.lane.b32.xlu0 %v11585_v20, %s13387_s21  ;;  %v12968_v30 = vpop.eup %12967 }
0x1672   :  { %4289 = vrot.lane.b32.xlu1 %v3839_v18, %s13387_s21  ;;  %v12970_v23 = vpop.eup %12969  ;;  %v3644_v60 = vmul.f32 %v12968_v30, %v3616_v22  ;;  %v3984_v30 = vadd.f32 %v14268_v63, %v3982_v49  ;;  %v10380_v63 = vld [vmem:[%s15688_s5 + $0x128] sm:$0xff] }
0x1673   :  { %v3643_v19 = vmul.f32 %v12970_v23, %v3615_v3  ;;  %v3983_v23 = vadd.f32 %v3982_v49, %v14270_v48  ;;  %v10382_v48 = vld [vmem:[%s15688_s5 + $0x138] sm:$0xff] }
0x1674   :  { %v14347_v29 = vadd.f32 %v3644_v60, %v14131_v56 }
0x1675   :  { %v14350_v42 = vadd.f32 %v3643_v19, %v14134_v50  ;;  %v10378_v19 = vld [vmem:[%s15688_s5 + $0x118] sm:$0xff] }
0x1676   :  { %v10395_v11 = vmul.f32 -1.442695, %v14347_v29 }
0x1677   :  { %v10394_v33 = vmul.f32 -1.442695, %v14350_v42 }
0x1678   :  { %12975 = vpow2.f32 %v10395_v11 }
0x1679   :  { %v12972_v9 = vpop.eup %12971  ;;  %12977 = vpow2.f32 %v10394_v33 }
0x167a   :  { %v12974_v10 = vpop.eup %12973  ;;  %v3646_v20 = vmul.f32 %v12972_v9, %v3618_v54  ;;  %v10376_v9 = vld [vmem:[%s15688_s5 + $0x108] sm:$0xff] }
0x167b   :  { %v3645_v18 = vmul.f32 %v12974_v10, %v3617_v27  ;;  %v12437_v11 = vpack.c.bf16 %v10378_v19, %v10376_v9 }
0x167c   :  { %v14354_v37 = vadd.f32 %v3646_v20, %v14146_v7 }
0x167d   :  { %v14358_v39 = vadd.f32 %v3645_v18, %v14139_v58 }
0x167e   :  { %v10397_v57 = vmul.f32 -1.442695, %v14354_v37 }
0x167f   :  { %v10396_v56 = vmul.f32 -1.442695, %v14358_v39 }
0x1680   :  { %12979 = vpow2.f32 %v10397_v57  ;;  %v12441_v57 = vpack.c.bf16 %v10382_v48, %v10380_v63  ;;  %v10414_v48 = vld [vmem:[%s15688_s5 + $0x140] sm:$0xff] }
0x1681   :  { %12981 = vpow2.f32 %v10396_v56 }
0x1682   :  { %v12976_v50 = vpop.eup %12975 }
0x1683   :  { %v12978_v21 = vpop.eup %12977  ;;  %v3861_v31 = vadd.f32 1.0, %v12976_v50 }
0x1684   :  { %v3860_v59 = vadd.f32 1.0, %v12978_v21 }
0x1685   :  { %12983 = vrcp.f32 %v3861_v31 }
0x1686   :  { %12985 = vrcp.f32 %v3860_v59 }
0x168a   :  { %v12980_v28 = vpop.eup %12979 }
0x168b   :  { %v12982_v7 = vpop.eup %12981  ;;  %v3863_v22 = vadd.f32 1.0, %v12980_v28 }
0x168c   :  { %v3862_v61 = vadd.f32 1.0, %v12982_v7 }
0x168d   :  { %12987 = vrcp.f32 %v3863_v22 }
0x168e   :  { %12989 = vrcp.f32 %v3862_v61 }
0x168f   :  { %v12984_v58 = vpop.eup %12983 }
0x1690   :  { %v12986_v54 = vpop.eup %12985 }
0x1697   :  { %v12988_v13 = vpop.eup %12987 }
0x1698   :  { %v12990_v41 = vpop.eup %12989 }
0x16cf   :  { %v3891_v3 = vpop.permute.xlu0 %3890 }
0x16d0   :  { %v3901_v38 = vmul.f32 %v12984_v58, %v3891_v3  ;;  %v3889_v27 = vpop.permute.xlu1 %3888 }
0x16d1   :  { %v3900_v32 = vmul.f32 %v12986_v54, %v3889_v27 }
0x16d3   :  { %v12423_v55 = vpack.c.bf16 %v3901_v38, %v3900_v32  ;;  %v3895_v17 = vpop.permute.xlu0 %3894 }
0x16d4   :  { %v3903_v45 = vmul.f32 %v12988_v13, %v3895_v17  ;;  %v3893_v8 = vpop.permute.xlu1 %3892 }
0x16d5   :  { %v3902_v46 = vmul.f32 %v12990_v41, %v3893_v8  ;;  %12424 = vmatprep.subr.bf16.mxu0 %v12423_v55 }
0x16d6   :  { %12426 = vmatpush3.bf16.msra.mxu0 %v12423_v55  ;;  %v4304_v55 = vrot.slane %v14263_v26, %v13649_v4 }
0x16d7   :  { %v12427_v16 = vpack.c.bf16 %v3903_v45, %v3902_v46  ;;  %v4175_v56 = vpop.permute.xlu0 %4174 }
0x16d8   :  { %v4173_v50 = vpop.permute.xlu1 %4172 }
0x16d9   :  { %12428 = vmatprep.subr.bf16.mxu0 %v12427_v16 }
0x16da   :  { %12430 = vmatpush3.bf16.msra.mxu0 %v12427_v16 }
0x16db   :  { %12431 = vmatprep.subr.bf16.mxu0 %v13388_v24  ;;  %v4288_v59 = vpop.permute.xlu0 %4287 }
0x16dc   :  { %v4286_v7 = vpop.permute.xlu1 %4285 }
0x16dd   :  { %11595 = vmatmul.mubr.msk.f32.vlgmr.msra.gmra.mrb[50].mxu0 %vm172_vm0, %v14366_v0 }
0x16de   :  { %11601 = vmatprep.mubr.msk.f32.mxu0 %vm13389_vm2, %v13390_v25 }
0x16df   :  { %v4179_v38 = vpop.permute.xlu0 %4178 }
0x16e0   :  { %v4177_v32 = vpop.permute.xlu1 %4176 }
0x16e4   :  { %v4290_v19 = vpop.permute.xlu1 %4289 }
0x17b0   :  { %v11596_v60 = vpop.f32.mrb[50].mxu0 }
0x17b1   :  { %v3986_v10 = vadd.f32 %v11596_v60, %v3984_v30  ;;  %v3970_v20 = vpop.f32.mrb[51].mxu0 }
0x17b2   :  { %v3985_v18 = vadd.f32 %v3983_v23, %v3970_v20  ;;  %v4292_v23 = vpop.permute.xlu0 %4291 }
0x17b4   :  { %v12432_v33 = vpack.c.bf16 %v3986_v10, %v3985_v18 }
0x17b6   :  { %12433 = vmatpush3.bf16.msra.mxu0 %v12432_v33 }
0x17b7   :  { %12438 = vmatprep.subr.bf16.mxu0 %v12437_v11 }
0x17b9   :  { %11602 = vmatmul.mubr.msk.f32.vlgmr.msra.gmra.mrb[52].mxu0 %vm254_vm1, %v13391_v40 }
0x17ba   :  { %12440 = vmatpush3.bf16.msra.mxu0 %v12437_v11  ;;  %11619 = vmatprep.mubr.msk.f32.mxu0 %vm172_vm0, %v14350_v42 }
0x17bb   :  { %12442 = vmatprep.subr.bf16.mxu0 %v12441_v57 }
0x17be   :  { %12444 = vmatpush3.bf16.msra.mxu0 %v12441_v57  ;;  %v10416_v57 = vld [vmem:[%s15688_s5 + $0x150] sm:$0xff] }
0x17bf   :  { %12451 = vmatprep.subr.bf16.mxu0 %v13388_v24 }
0x17c1   :  { %11620 = vmatmul.mubr.msk.f32.vlgmr.msra.gmra.mrb[54].mxu0 %vm172_vm0, %v14347_v29 }
0x17c2   :  { %11622 = vmatprep.mubr.msk.f32.mxu0 %vm172_vm0, %v14358_v39 }
0x17c5   :  { %11623 = vmatmul.mubr.msk.f32.gmra.mrb[56].mxu0 %vm172_vm0, %v14354_v37 }
0x17c6   :  { %11644 = vmatprep.mubr.msk.f32.mxu0 %vm13389_vm2, %v13390_v25 }
0x188c   :  { %v4053_v21 = vpop.f32.mrb[52].mxu0 }
0x188d   :  { %v4060_v31 = vrot.slane %v4053_v21, %v13463_v14  ;;  %v11603_v28 = vpop.f32.mrb[53].mxu0  ;;  %v10420_v21 = vld [vmem:[%s15688_s5 + $0x170] sm:$0xff] }
0x188f   :  { %v14402_v22 = vsub.f32 %v3985_v18, %v4060_v31  ;;  %v14404_v61 = vsub.f32 %v3986_v10, %v4060_v31 }
0x1891   :  { %v4063_v58 = vmul.f32 %v14402_v22, %v14402_v22  ;;  %v4064_v3 = vmul.f32 %v14404_v61, %v14404_v61 }
0x1893   :  { %v12435_v54 = vpack.c.bf16 %v4064_v3, %v4063_v58 }
0x1894   :  { %v11621_v27 = vpop.f32.mrb[54].mxu0 }
0x1895   :  { %v4268_v13 = vadd.f32 %v11621_v27, %v4175_v56  ;;  %12436 = vmatpush3.bf16.msra.mxu1 %v12435_v54  ;;  %v4262_v17 = vpop.f32.mrb[55].mxu0  ;;  %v12457_v56 = vpack.c.bf16 %v10416_v57, %v10414_v48 }
0x1896   :  { %v4263_v41 = vadd.f32 %v4262_v17, %v4173_v50  ;;  %12445 = vmatprep.subr.bf16.mxu1 %v13388_v24  ;;  %v10418_v50 = vld [vmem:[%s15688_s5 + $0x160] sm:$0xff] }
0x1897   :  { %v4298_v45 = vadd.f32 %v4288_v59, %v4268_v13  ;;  %v12461_v31 = vpack.c.bf16 %v10420_v21, %v10418_v50 }
0x1898   :  { %v4297_v8 = vadd.f32 %v4286_v7, %v4263_v41  ;;  %11609 = vmatmul.mubr.msk.f32.vlgmr.msra.gmra.mrb[56].mxu1 %vm254_vm1, %v13391_v40  ;;  %v11624_v46 = vpop.f32.mrb[56].mxu0 }
0x1899   :  { %v4306_v16 = vadd.f32 %v4304_v55, %v4298_v45  ;;  %v4278_v49 = vadd.f32 %v11624_v46, %v4179_v38  ;;  %v4272_v30 = vpop.f32.mrb[57].mxu0  ;;  %11633 = vmatprep.mubr.msk.f32.mxu1 %vm13389_vm2, %v13390_v25 }
0x189a   :  { %v4305_v60 = vadd.f32 %v4304_v55, %v4297_v8  ;;  %v4273_v9 = vadd.f32 %v4272_v30, %v4177_v32  ;;  %v4149_v8 = vrot.slane %v14263_v26, %v13677_v5 }
0x189b   :  { %v4300_v10 = vadd.f32 %v4292_v23, %v4278_v49 }
0x189c   :  { %v12446_v20 = vpack.c.bf16 %v4306_v16, %v4305_v60  ;;  %v4299_v18 = vadd.f32 %v4290_v19, %v4273_v9 }
0x189d   :  { %v4308_v11 = vadd.f32 %v4304_v55, %v4300_v10 }
0x189e   :  { %v4307_v33 = vadd.f32 %v4304_v55, %v4299_v18  ;;  %12447 = vmatpush3.bf16.msra.mxu1 %v12446_v20 }
0x189f   :  { %12448 = vmatprep.subr.bf16.mxu1 %v13388_v24 }
0x18a0   :  { %v12449_v63 = vpack.c.bf16 %v4308_v11, %v4307_v33 }
0x18a2   :  { %12450 = vmatpush3.bf16.msra.mxu1 %v12449_v63 }
0x18a3   :  { %12458 = vmatprep.subr.bf16.mxu1 %v12457_v56 }
0x18a5   :  { %11634 = vmatmul.mubr.msk.f32.vlgmr.msra.gmra.mrb[58].mxu1 %vm172_vm0, %v13392_v35 }
0x18a6   :  { %12460 = vmatpush3.bf16.msra.mxu1 %v12457_v56 }
0x18a7   :  { %12462 = vmatprep.subr.bf16.mxu1 %v12461_v31 }
0x18aa   :  { %12464 = vmatpush3.bf16.msra.mxu1 %v12461_v31 }
0x196b   :  { %v4131_v28 = vpop.f32.mrb[56].mxu1 }
0x196c   :  { %v4132_v59 = vadd.f32 1e-05, %v4131_v28  ;;  %v11610_v7 = vpop.f32.mrb[57].mxu1 }
0x196e   :  { %12991 = vrsqrt.f32 %v4132_v59 }
0x1978   :  { %v12992_v58 = vpop.eup %12991  ;;  %v4375_v3 = vpop.f32.mrb[58].mxu1 }
0x1979   :  { %v4137_v54 = vrot.slane %v12992_v58, 5  ;;  %v4382_v38 = vrot.slane %v4375_v3, %v13463_v14  ;;  %v11635_v27 = vpop.f32.mrb[59].mxu1 }
0x197a   :  { %v4477_v27 = vrot.slane %v14263_v26, %v13715_v1 }
0x197b   :  { %v4139_v32 = vmul.f32 %v14263_v26, %v4137_v54  ;;  %v4383_v13 = vsub.f32 %v4305_v60, %v4382_v38  ;;  %v4384_v55 = vsub.f32 %v4306_v16, %v4382_v38  ;;  %v4385_v17 = vsub.f32 %v4307_v33, %v4382_v38 }
0x197c   :  { %v4386_v41 = vsub.f32 %v4308_v11, %v4382_v38 }
0x197d   :  { %v4143_v45 = vrot.slane %v4139_v32, %v13674_v2  ;;  %v4387_v46 = vmul.f32 %v4383_v13, %v4383_v13  ;;  %v4388_v49 = vmul.f32 %v4384_v55, %v4384_v55  ;;  %v4389_v30 = vmul.f32 %v4385_v17, %v4385_v17 }
0x197e   :  { %v4390_v10 = vmul.f32 %v4386_v41, %v4386_v41 }
0x197f   :  { %v4144_v23 = vmul.f32 %v4143_v45, %v14402_v22  ;;  %v4145_v9 = vmul.f32 %v4143_v45, %v14404_v61  ;;  %v12452_v19 = vpack.c.bf16 %v4388_v49, %v4387_v46 }
0x1980   :  { %v12455_v18 = vpack.c.bf16 %v4390_v10, %v4389_v30 }
0x1981   :  { %v4151_v20 = vadd.f32 %v4149_v8, %v4145_v9  ;;  %12453 = vmatpush3.bf16.msra.mxu0 %v12452_v19  ;;  %v4150_v60 = vadd.f32 %v4149_v8, %v4144_v23 }
0x1982   :  { %12454 = vmatprep.subr.bf16.mxu0 %v13388_v24 }
0x1983   :  { %v10403_v16 = vmul.f32 -1.442695, %v4151_v20  ;;  %v10402_v11 = vmul.f32 -1.442695, %v4150_v60 }
0x1985   :  { %12993 = vpow2.f32 %v10403_v16  ;;  %12456 = vmatpush3.bf16.msra.mxu0 %v12455_v18  ;;  %v10415_v16 = vld [vmem:[%s15688_s5 + $0x148] sm:$0xff] }
0x1986   :  { %12995 = vpow2.f32 %v10402_v11  ;;  %v10419_v18 = vld [vmem:[%s15688_s5 + $0x168] sm:$0xff]  ;;  %v10421_v11 = vld [vmem:[%s15688_s5 + $0x178] sm:$0xff] }
0x1988   :  { %11645 = vmatmul.mubr.msk.f32.vlgmr.msra.gmra.mrb[58].mxu0 %vm172_vm0, %v13392_v35 }
0x1989   :  { %11662 = vmatprep.mubr.msk.f32.mxu0 %vm254_vm1, %v14244_v36  ;;  %v14457_v36 = vld [vmem:[%s15686_s3] sm:$0xff] }
0x198f   :  { %v12994_v22 = vpop.eup %12993 }
0x1990   :  { %v12996_v61 = vpop.eup %12995  ;;  %v4159_v33 = vadd.f32 1.0, %v12994_v22  ;;  %v12487_v22 = vpack.c.bf16 %v10421_v11, %v10419_v18 }
0x1991   :  { %v4158_v63 = vadd.f32 1.0, %v12996_v61 }
0x1992   :  { %12997 = vrcp.f32 %v4159_v33 }
0x1993   :  { %12999 = vrcp.f32 %v4158_v63 }
0x199c   :  { %v12998_v48 = vpop.eup %12997 }
0x199d   :  { %v13000_v57 = vpop.eup %12999  ;;  %v4165_v56 = vmul.f32 %v12998_v48, %v4151_v20 }
0x199e   :  { %v4164_v50 = vmul.f32 %v13000_v57, %v4150_v60 }
0x199f   :  { %v14445_v21 = vadd.f32 %v4165_v56, %v14249_v53  ;;  %v14464_v53 = vld [vmem:[%s15689_s6 + $0x28] sm:$0x7f] }
0x19a0   :  { %v14448_v31 = vadd.f32 %v4164_v50, %v14252_v44  ;;  %v4738_v44 = vrot.slane %v14464_v53, %v13466_v15 }
0x19a2   :  { %11655 = vmatprep.mubr.msk.f32.mxu1 %vm172_vm0, %v14448_v31  ;;  %4740 = vrot.lane.b32.xlu1 %v4738_v44, %s13385_s26 }
0x19a3   :  { %11656 = vmatmul.mubr.msk.f32.vlgmr.msra.gmra.mrb[60].mxu1 %vm172_vm0, %v14445_v21 }
0x19a4   :  { %11682 = vmatprep.mubr.msk.f32.mxu1 %vm172_vm0, %v14457_v36 }
0x1a5b   :  { %v4457_v28 = vpop.f32.mrb[58].mxu0 }
0x1a5c   :  { %v4458_v59 = vadd.f32 1e-05, %v4457_v28  ;;  %v11646_v7 = vpop.f32.mrb[59].mxu0 }
0x1a5e   :  { %13001 = vrsqrt.f32 %v4458_v59 }
0x1a68   :  { %v13002_v58 = vpop.eup %13001 }
0x1a69   :  { %v4463_v3 = vrot.slane %v13002_v58, 3 }
0x1a6b   :  { %v4465_v54 = vmul.f32 %v14263_v26, %v4463_v3  ;;  %v10417_v26 = vld [vmem:[%s15688_s5 + $0x158] sm:$0xff] }
0x1a6d   :  { %v4469_v38 = vrot.slane %v4465_v54, %v13712_v62 }
0x1a6f   :  { %v4471_v32 = vmul.f32 %v4469_v38, %v4384_v55  ;;  %v4470_v45 = vmul.f32 %v4469_v38, %v4383_v13  ;;  %v4472_v8 = vmul.f32 %v4469_v38, %v4385_v17  ;;  %v4473_v46 = vmul.f32 %v4469_v38, %v4386_v41  ;;  %v4741_v38 = vpop.permute.xlu1 %4740 }
0x1a70   :  { %v12483_v41 = vpack.c.bf16 %v10417_v26, %v10415_v16 }
0x1a71   :  { %v4479_v49 = vadd.f32 %v4477_v27, %v4471_v32  ;;  %v4478_v30 = vadd.f32 %v4477_v27, %v4470_v45  ;;  %v4480_v23 = vadd.f32 %v4477_v27, %v4472_v8  ;;  %v4481_v9 = vadd.f32 %v4477_v27, %v4473_v46 }
0x1a73   :  { %v10411_v19 = vmul.f32 -1.442695, %v4479_v49  ;;  %v10410_v10 = vmul.f32 -1.442695, %v4478_v30  ;;  %v10412_v20 = vmul.f32 -1.442695, %v4480_v23 }
0x1a74   :  { %v10413_v60 = vmul.f32 -1.442695, %v4481_v9 }
0x1a75   :  { %13003 = vpow2.f32 %v10411_v19 }
0x1a76   :  { %v14479_v13 = vpop.f32.mrb[60].mxu1  ;;  %13005 = vpow2.f32 %v10410_v10 }
0x1a77   :  { %v14481_v55 = vpop.f32.mrb[61].mxu1  ;;  %13007 = vpow2.f32 %v10412_v20 }
0x1a78   :  { %v12465_v17 = vpack.c.bf16 %v14479_v13, %v14481_v55  ;;  %13009 = vpow2.f32 %v10413_v60 }
0x1a7a   :  { %12466 = vmatprep.subr.bf16.mxu0 %v12465_v17 }
0x1a7b   :  { %12468 = vmatpush3.bf16.msra.mxu0 %v12465_v17 }
0x1a7c   :  { %12484 = vmatprep.subr.bf16.mxu0 %v12483_v41 }
0x1a7e   :  { %11663 = vmatmul.mubr.msk.f32.vlgmr.msra.gmra.mrb[60].mxu0 %vm254_vm1, %v14278_v47 }
0x1a7f   :  { %v13004_v61 = vpop.eup %13003  ;;  %11665 = vmatprep.mubr.msk.f32.mxu0 %vm254_vm1, %v14285_v6  ;;  %12486 = vmatpush3.bf16.msra.mxu0 %v12483_v41 }
0x1a80   :  { %v13006_v33 = vpop.eup %13005  ;;  %v4495_v63 = vadd.f32 1.0, %v13004_v61  ;;  %12488 = vmatprep.subr.bf16.mxu0 %v12487_v22 }
0x1a81   :  { %v13008_v48 = vpop.eup %13007  ;;  %v4494_v57 = vadd.f32 1.0, %v13006_v33 }
0x1a82   :  { %v13010_v56 = vpop.eup %13009  ;;  %13011 = vrcp.f32 %v4495_v63  ;;  %11666 = vmatmul.mubr.msk.f32.gmra.mrb[62].mxu0 %vm254_vm1, %v14292_v43  ;;  %v4496_v50 = vadd.f32 1.0, %v13008_v48 }
0x1a83   :  { %11668 = vmatprep.mubr.msk.f32.mxu0 %vm254_vm1, %v14299_v12  ;;  %12490 = vmatpush3.bf16.msra.mxu0 %v12487_v22  ;;  %13013 = vrcp.f32 %v4494_v57  ;;  %v4497_v47 = vadd.f32 1.0, %v13010_v56 }
0x1a84   :  { %13015 = vrcp.f32 %v4496_v50  ;;  %12497 = vmatprep.subr.bf16.mxu0 %v13388_v24 }
0x1a85   :  { %13017 = vrcp.f32 %v4497_v47 }
0x1a86   :  { %11669 = vmatmul.mubr.msk.f32.gmra.mrb[64].mxu0 %vm254_vm1, %v14306_v51 }
0x1a87   :  { %11671 = vmatprep.mubr.msk.f32.mxu0 %vm254_vm1, %v14313_v34 }
0x1a8a   :  { %11672 = vmatmul.mubr.msk.f32.gmra.mrb[66].mxu0 %vm254_vm1, %v14320_v52 }
0x1a8c   :  { %v13012_v6 = vpop.eup %13011 }
0x1a8d   :  { %v13014_v43 = vpop.eup %13013  ;;  %v4507_v44 = vmul.f32 %v13012_v6, %v4479_v49 }
0x1a8e   :  { %v13016_v12 = vpop.eup %13015  ;;  %v4506_v28 = vmul.f32 %v13014_v43, %v4478_v30 }
0x1a8f   :  { %v13018_v59 = vpop.eup %13017  ;;  %v14507_v7 = vadd.f32 %v4507_v44, %v14347_v29  ;;  %v4508_v58 = vmul.f32 %v13016_v12, %v4480_v23 }
0x1a90   :  { %v14510_v3 = vadd.f32 %v4506_v28, %v14350_v42  ;;  %v4509_v51 = vmul.f32 %v13018_v59, %v4481_v9 }
0x1a91   :  { %v14515_v34 = vadd.f32 %v4508_v58, %v14358_v39  ;;  %v10434_v20 = vmul.f32 -1.442695, %v14507_v7 }
0x1a92   :  { %11707 = vmatprep.mubr.msk.f32.mxu0 %vm172_vm0, %v14510_v3  ;;  %v14522_v52 = vadd.f32 %v4509_v51, %v14354_v37  ;;  %v10433_v60 = vmul.f32 -1.442695, %v14510_v3 }
0x1a93   :  { %11708 = vmatmul.mubr.msk.f32.vlgmr.msra.gmra.mrb[68].mxu0 %vm172_vm0, %v14507_v7  ;;  %13019 = vpow2.f32 %v10434_v20  ;;  %v10435_v26 = vmul.f32 -1.442695, %v14515_v34 }
0x1a94   :  { %11710 = vmatprep.mubr.msk.f32.mxu0 %vm172_vm0, %v14515_v34  ;;  %v10436_v16 = vmul.f32 -1.442695, %v14522_v52  ;;  %13021 = vpow2.f32 %v10433_v60 }
0x1a96   :  { %13023 = vpow2.f32 %v10436_v16 }
0x1a97   :  { %11711 = vmatmul.mubr.msk.f32.gmra.mrb[70].mxu0 %vm172_vm0, %v14522_v52  ;;  %13025 = vpow2.f32 %v10435_v26 }
0x1a98   :  { %11732 = vmatprep.mubr.msk.f32.mxu0 %vm13389_vm2, %v13390_v25 }
0x1a9d   :  { %v13020_v17 = vpop.eup %13019 }
0x1a9e   :  { %v13022_v41 = vpop.eup %13021  ;;  %v4724_v18 = vadd.f32 1.0, %v13020_v17  ;;  %v5167_v17 = vrot.slane %v14464_v53, %v13649_v4 }
0x1a9f   :  { %v4723_v22 = vadd.f32 1.0, %v13022_v41 }
0x1aa0   :  { %v13024_v11 = vpop.eup %13023  ;;  %13027 = vrcp.f32 %v4724_v18 }
0x1aa1   :  { %v13026_v61 = vpop.eup %13025  ;;  %v4726_v33 = vadd.f32 1.0, %v13024_v11  ;;  %13029 = vrcp.f32 %v4723_v22 }
0x1aa2   :  { %v4725_v63 = vadd.f32 1.0, %v13026_v61 }
0x1aa3   :  { %13031 = vrcp.f32 %v4726_v33 }
0x1aa4   :  { %13033 = vrcp.f32 %v4725_v63 }
0x1aaa   :  { %v13028_v48 = vpop.eup %13027 }
0x1aab   :  { %v13030_v56 = vpop.eup %13029 }
0x1aad   :  { %v13032_v43 = vpop.eup %13031 }
0x1aae   :  { %v13034_v28 = vpop.eup %13033 }
0x1b51   :  { %v11664_v29 = vpop.f32.mrb[60].mxu0 }
0x1b52   :  { %v4672_v42 = vpop.f32.mrb[61].mxu0 }
0x1b55   :  { %v11667_v54 = vpop.f32.mrb[62].mxu0 }
0x1b56   :  { %v4682_v39 = vpop.f32.mrb[63].mxu0 }
0x1b59   :  { %v11670_v27 = vpop.f32.mrb[64].mxu0 }
0x1b5a   :  { %v4692_v32 = vpop.f32.mrb[65].mxu0  ;;  %v4744_v45 = vadd.f32 %v11670_v27, %v4741_v38 }
0x1b5b   :  { %v4743_v8 = vadd.f32 %v4741_v38, %v4692_v32 }
0x1b5c   :  { %4753 = vrot.lane.b32.xlu1 %v4744_v45, %s13385_s26 }
0x1b5d   :  { %v11673_v46 = vpop.f32.mrb[66].mxu0  ;;  %4751 = vrot.lane.b32.xlu0 %v4743_v8, %s13385_s26 }
0x1b5e   :  { %v4746_v37 = vadd.f32 %v11673_v46, %v4741_v38  ;;  %v4702_v49 = vpop.f32.mrb[67].mxu0 }
0x1b5f   :  { %v4745_v30 = vadd.f32 %v4741_v38, %v4702_v49 }
0x1b60   :  { %4757 = vrot.lane.b32.xlu1 %v4746_v37, %s13385_s26 }
0x1b61   :  { %4755 = vrot.lane.b32.xlu0 %v4745_v30, %s13385_s26 }
0x1b64   :  { %5037 = vrot.lane.b32.xlu1 %v11664_v29, %s13386_s20 }
0x1b65   :  { %5035 = vrot.lane.b32.xlu0 %v4672_v42, %s13386_s20  ;;  %v4845_v42 = vrot.slane %v14464_v53, %v13463_v14 }
0x1b66   :  { %v14534_v23 = vpop.f32.mrb[68].mxu0 }
0x1b67   :  { %v14536_v9 = vpop.f32.mrb[69].mxu0 }
0x1b68   :  { %5150 = vrot.lane.b32.xlu1 %v11670_v27, %s13387_s21 }
0x1b69   :  { %5148 = vrot.lane.b32.xlu0 %v4692_v32, %s13387_s21 }
0x1b6a   :  { %v14540_v19 = vpop.f32.mrb[70].mxu0 }
0x1b6b   :  { %v14542_v10 = vpop.f32.mrb[71].mxu0 }
0x1b6c   :  { %5041 = vrot.lane.b32.xlu1 %v11667_v54, %s13386_s20  ;;  %v4847_v54 = vadd.f32 %v14479_v13, %v4845_v42 }
0x1b6d   :  { %5039 = vrot.lane.b32.xlu0 %v4682_v39, %s13386_s20  ;;  %v4846_v39 = vadd.f32 %v4845_v42, %v14481_v55 }
0x1b70   :  { %5154 = vrot.lane.b32.xlu1 %v11673_v46, %s13387_s21 }
0x1b71   :  { %5152 = vrot.lane.b32.xlu0 %v4702_v49, %s13387_s21 }
0x1bce   :  { %v4754_v57 = vpop.permute.xlu1 %4753 }
0x1bcf   :  { %v4764_v50 = vmul.f32 %v13028_v48, %v4754_v57  ;;  %v4752_v47 = vpop.permute.xlu0 %4751 }
0x1bd0   :  { %v4763_v6 = vmul.f32 %v13030_v56, %v4752_v47 }
0x1bd2   :  { %v12469_v44 = vpack.c.bf16 %v4764_v50, %v4763_v6  ;;  %v4758_v12 = vpop.permute.xlu1 %4757 }
0x1bd3   :  { %v4766_v59 = vmul.f32 %v13032_v43, %v4758_v12  ;;  %v4756_v58 = vpop.permute.xlu0 %4755 }
0x1bd4   :  { %v4765_v51 = vmul.f32 %v13034_v28, %v4756_v58  ;;  %12470 = vmatprep.subr.bf16.mxu1 %v12469_v44  ;;  %v10455_v28 = vld [vmem:[%s15688_s5 + $0x190] sm:$0xff]  ;;  %v10457_v58 = vld [vmem:[%s15688_s5 + $0x1a0] sm:$0xff] }
0x1bd5   :  { %12472 = vmatpush3.bf16.msra.mxu1 %v12469_v44 }
0x1bd6   :  { %v12473_v29 = vpack.c.bf16 %v4766_v59, %v4765_v51  ;;  %v10459_v51 = vld [vmem:[%s15688_s5 + $0x1b0] sm:$0xff] }
0x1bd7   :  { %v5036_v46 = vpop.permute.xlu0 %5035 }
0x1bd8   :  { %12474 = vmatprep.subr.bf16.mxu1 %v12473_v29  ;;  %v5126_v60 = vadd.f32 %v14536_v9, %v5036_v46 }
0x1bd9   :  { %12476 = vmatpush3.bf16.msra.mxu1 %v12473_v29  ;;  %v12507_v29 = vpack.c.bf16 %v10459_v51, %v10457_v58  ;;  %v14661_v51 = vld [vmem:[%s15685_s2 + $0x10] sm:$0xff] }
0x1bda   :  { %12477 = vmatprep.subr.bf16.mxu1 %v13388_v24 }
0x1bdb   :  { %v5149_v13 = vpop.permute.xlu0 %5148 }
0x1bdc   :  { %11683 = vmatmul.mubr.msk.f32.vlgmr.msra.gmra.mrb[62].mxu1 %vm172_vm0, %v14366_v0  ;;  %v5038_v0 = vpop.permute.xlu1 %5037  ;;  %v5160_v18 = vadd.f32 %v5149_v13, %v5126_v60 }
0x1bdd   :  { %11689 = vmatprep.mubr.msk.f32.mxu1 %vm13389_vm2, %v13390_v25  ;;  %v5131_v30 = vadd.f32 %v14534_v23, %v5038_v0 }
0x1bde   :  { %v5168_v9 = vadd.f32 %v5167_v17, %v5160_v18 }
0x1bdf   :  { %v5040_v55 = vpop.permute.xlu0 %5039 }
0x1be0   :  { %v5151_v37 = vpop.permute.xlu1 %5150  ;;  %v5136_v48 = vadd.f32 %v14542_v10, %v5040_v55  ;;  %v10453_v10 = vld [vmem:[%s15688_s5 + $0x180] sm:$0xff] }
0x1be1   :  { %v5161_v41 = vadd.f32 %v5151_v37, %v5131_v30  ;;  %v12503_v59 = vpack.c.bf16 %v10455_v28, %v10453_v10 }
0x1be3   :  { %v5153_v33 = vpop.permute.xlu0 %5152  ;;  %v5169_v56 = vadd.f32 %v5167_v17, %v5161_v41 }
0x1be4   :  { %v5042_v49 = vpop.permute.xlu1 %5041  ;;  %v5162_v47 = vadd.f32 %v5153_v33, %v5136_v48 }
0x1be5   :  { %v5141_v63 = vadd.f32 %v14540_v19, %v5042_v49  ;;  %v12492_v43 = vpack.c.bf16 %v5169_v56, %v5168_v9 }
0x1be6   :  { %v5170_v12 = vadd.f32 %v5167_v17, %v5162_v47 }
0x1be8   :  { %v5155_v61 = vpop.permute.xlu1 %5154 }
0x1be9   :  { %v5163_v50 = vadd.f32 %v5155_v61, %v5141_v63 }
0x1beb   :  { %v5171_v44 = vadd.f32 %v5167_v17, %v5163_v50  ;;  %v5012_v17 = vrot.slane %v14464_v53, %v13677_v5 }
0x1bed   :  { %v12495_v19 = vpack.c.bf16 %v5171_v44, %v5170_v12 }
0x1caf   :  { %v11684_v38 = vpop.f32.mrb[62].mxu1 }
0x1cb0   :  { %v4849_v27 = vadd.f32 %v11684_v38, %v4847_v54  ;;  %v4833_v32 = vpop.f32.mrb[63].mxu1 }
0x1cb1   :  { %v4848_v45 = vadd.f32 %v4846_v39, %v4833_v32 }
0x1cb3   :  { %v12478_v8 = vpack.c.bf16 %v4849_v27, %v4848_v45 }
0x1cb5   :  { %12479 = vmatpush3.bf16.msra.mxu1 %v12478_v8 }
0x1cb6   :  { %12480 = vmatprep.subr.bf16.mxu1 %v13388_v24 }
0x1cb8   :  { %11690 = vmatmul.mubr.msk.f32.vlgmr.msra.gmra.mrb[64].mxu1 %vm254_vm1, %v13391_v40 }
0x1cb9   :  { %11696 = vmatprep.mubr.msk.f32.mxu1 %vm13389_vm2, %v13390_v25 }
0x1d8b   :  { %v4916_v20 = vpop.f32.mrb[64].mxu1 }
0x1d8c   :  { %v4923_v16 = vrot.slane %v4916_v20, %v13463_v14  ;;  %v11691_v26 = vpop.f32.mrb[65].mxu1 }
0x1d8e   :  { %v4924_v11 = vsub.f32 %v4848_v45, %v4923_v16  ;;  %v4925_v22 = vsub.f32 %v4849_v27, %v4923_v16 }
0x1d90   :  { %v4926_v23 = vmul.f32 %v4924_v11, %v4924_v11  ;;  %v4927_v57 = vmul.f32 %v4925_v22, %v4925_v22 }
0x1d92   :  { %v12481_v6 = vpack.c.bf16 %v4927_v57, %v4926_v23  ;;  %v14620_v57 = vld [vmem:[%s15685_s2] sm:$0xff] }
0x1d94   :  { %12482 = vmatpush3.bf16.msra.mxu1 %v12481_v6 }
0x1d95   :  { %12491 = vmatprep.subr.bf16.mxu1 %v13388_v24 }
0x1d97   :  { %11697 = vmatmul.mubr.msk.f32.vlgmr.msra.gmra.mrb[66].mxu1 %vm254_vm1, %v13391_v40 }
0x1d98   :  { %12493 = vmatpush3.bf16.msra.mxu1 %v12492_v43  ;;  %11721 = vmatprep.mubr.msk.f32.mxu1 %vm13389_vm2, %v13390_v25 }
0x1d99   :  { %12494 = vmatprep.subr.bf16.mxu1 %v13388_v24 }
0x1d9c   :  { %12496 = vmatpush3.bf16.msra.mxu1 %v12495_v19  ;;  %v14639_v19 = vld [vmem:[%s15689_s6 + $0x30] sm:$0x7f] }
0x1d9d   :  { %12504 = vmatprep.subr.bf16.mxu1 %v12503_v59 }
0x1d9f   :  { %11722 = vmatmul.mubr.msk.f32.vlgmr.msra.gmra.mrb[68].mxu1 %vm172_vm0, %v13392_v35 }
0x1da0   :  { %12506 = vmatpush3.bf16.msra.mxu1 %v12503_v59 }
0x1da1   :  { %12508 = vmatprep.subr.bf16.mxu1 %v12507_v29 }
0x1da4   :  { %12510 = vmatpush3.bf16.msra.mxu1 %v12507_v29  ;;  %v14668_v29 = vld [vmem:[%s15685_s2 + $0x18] sm:$0xff] }
0x1e6a   :  { %v4994_v42 = vpop.f32.mrb[66].mxu1 }
0x1e6b   :  { %v4995_v54 = vadd.f32 1e-05, %v4994_v42  ;;  %v11698_v39 = vpop.f32.mrb[67].mxu1  ;;  %v14675_v42 = vld [vmem:[%s15685_s2 + $0x20] sm:$0xff] }
0x1e6c   :  { %v14689_v39 = vld [vmem:[%s15685_s2 + $0x30] sm:$0xff] }
0x1e6d   :  { %13035 = vrsqrt.f32 %v4995_v54  ;;  %v14682_v54 = vld [vmem:[%s15685_s2 + $0x28] sm:$0xff] }
0x1e72   :  { %v5238_v38 = vpop.f32.mrb[68].mxu1 }
0x1e73   :  { %v5245_v27 = vrot.slane %v5238_v38, %v13463_v14  ;;  %v11723_v32 = vpop.f32.mrb[69].mxu1  ;;  %v14696_v38 = vld [vmem:[%s15685_s2 + $0x38] sm:$0xff] }
0x1e75   :  { %v14594_v45 = vsub.f32 %v5168_v9, %v5245_v27  ;;  %v14596_v8 = vsub.f32 %v5169_v56, %v5245_v27  ;;  %v14598_v0 = vsub.f32 %v5170_v12, %v5245_v27  ;;  %v14600_v46 = vsub.f32 %v5171_v44, %v5245_v27 }
0x1e77   :  { %v13036_v37 = vpop.eup %13035  ;;  %v5250_v13 = vmul.f32 %v14594_v45, %v14594_v45  ;;  %v5251_v49 = vmul.f32 %v14596_v8, %v14596_v8  ;;  %v5252_v20 = vmul.f32 %v14598_v0, %v14598_v0  ;;  %v5253_v60 = vmul.f32 %v14600_v46, %v14600_v46 }
0x1e78   :  { %v5000_v55 = vrot.slane %v13036_v37, 5 }
0x1e79   :  { %v12498_v30 = vpack.c.bf16 %v5251_v49, %v5250_v13  ;;  %v12501_v41 = vpack.c.bf16 %v5253_v60, %v5252_v20 }
0x1e7a   :  { %v5002_v16 = vmul.f32 %v14464_v53, %v5000_v55 }
0x1e7b   :  { %12499 = vmatpush3.bf16.msra.mxu0 %v12498_v30 }
0x1e7c   :  { %v5006_v26 = vrot.slane %v5002_v16, %v13674_v2  ;;  %12500 = vmatprep.subr.bf16.mxu0 %v13388_v24 }
0x1e7e   :  { %v5007_v18 = vmul.f32 %v5006_v26, %v4924_v11  ;;  %v5008_v61 = vmul.f32 %v5006_v26, %v4925_v22 }
0x1e7f   :  { %12502 = vmatpush3.bf16.msra.mxu0 %v12501_v41 }
0x1e80   :  { %v5014_v33 = vadd.f32 %v5012_v17, %v5008_v61  ;;  %v5013_v63 = vadd.f32 %v5012_v17, %v5007_v18 }
0x1e82   :  { %v10442_v48 = vmul.f32 -1.442695, %v5014_v33  ;;  %11733 = vmatmul.mubr.msk.f32.vlgmr.msra.gmra.mrb[72].mxu0 %vm172_vm0, %v13392_v35  ;;  %v10441_v23 = vmul.f32 -1.442695, %v5013_v63 }
0x1e83   :  { %11750 = vmatprep.mubr.msk.f32.mxu0 %vm254_vm1, %v14620_v57 }
0x1e84   :  { %13037 = vpow2.f32 %v10442_v48 }
0x1e85   :  { %13039 = vpow2.f32 %v10441_v23 }
0x1e8e   :  { %v13038_v11 = vpop.eup %13037 }
0x1e8f   :  { %v13040_v22 = vpop.eup %13039  ;;  %v5022_v56 = vadd.f32 1.0, %v13038_v11  ;;  %v5340_v11 = vrot.slane %v14464_v53, %v13715_v1 }
0x1e90   :  { %v5021_v9 = vadd.f32 1.0, %v13040_v22 }
0x1e91   :  { %13041 = vrcp.f32 %v5022_v56 }
0x1e92   :  { %13043 = vrcp.f32 %v5021_v9 }
0x1e9b   :  { %v13042_v50 = vpop.eup %13041 }
0x1e9c   :  { %v13044_v47 = vpop.eup %13043  ;;  %v5028_v6 = vmul.f32 %v13042_v50, %v5014_v33 }
0x1e9d   :  { %v5027_v43 = vmul.f32 %v13044_v47, %v5013_v63 }
0x1e9e   :  { %v14625_v44 = vadd.f32 %v5028_v6, %v14445_v21  ;;  %v5601_v21 = vrot.slane %v14639_v19, %v13466_v15 }
0x1e9f   :  { %v14628_v12 = vadd.f32 %v5027_v43, %v14448_v31 }
0x1ea0   :  { %5603 = vrot.lane.b32.xlu0 %v5601_v21, %s13385_s26 }
0x1ea1   :  { %11743 = vmatprep.mubr.msk.f32.mxu1 %vm172_vm0, %v14628_v12 }
0x1ea2   :  { %11744 = vmatmul.mubr.msk.f32.vlgmr.msra.gmra.mrb[70].mxu1 %vm172_vm0, %v14625_v44 }
0x1ea3   :  { %11770 = vmatprep.mubr.msk.f32.mxu1 %vm172_vm0, %v14457_v36  ;;  %v14654_v36 = vld [vmem:[%s15685_s2 + $0x8] sm:$0xff] }
0x1f12   :  { %v5604_v49 = vpop.permute.xlu0 %5603 }
0x1f55   :  { %v5320_v31 = vpop.f32.mrb[72].mxu0 }
0x1f56   :  { %v11734_v10 = vpop.f32.mrb[73].mxu0  ;;  %v5321_v18 = vadd.f32 1e-05, %v5320_v31 }
0x1f58   :  { %13045 = vrsqrt.f32 %v5321_v18 }
0x1f62   :  { %v13046_v61 = vpop.eup %13045 }
0x1f63   :  { %v5326_v33 = vrot.slane %v13046_v61, 3 }
0x1f65   :  { %v5328_v63 = vmul.f32 %v14464_v53, %v5326_v33 }
0x1f67   :  { %v5332_v48 = vrot.slane %v5328_v63, %v13712_v62 }
0x1f69   :  { %v5334_v23 = vmul.f32 %v5332_v48, %v14596_v8  ;;  %v5333_v22 = vmul.f32 %v5332_v48, %v14594_v45  ;;  %v5336_v56 = vmul.f32 %v5332_v48, %v14600_v46  ;;  %v5335_v50 = vmul.f32 %v5332_v48, %v14598_v0 }
0x1f6b   :  { %v5342_v9 = vadd.f32 %v5340_v11, %v5334_v23  ;;  %v5341_v47 = vadd.f32 %v5340_v11, %v5333_v22  ;;  %v5344_v6 = vadd.f32 %v5340_v11, %v5336_v56  ;;  %v5343_v21 = vadd.f32 %v5340_v11, %v5335_v50 }
0x1f6d   :  { %v10450_v43 = vmul.f32 -1.442695, %v5342_v9  ;;  %v10449_v31 = vmul.f32 -1.442695, %v5341_v47  ;;  %v10452_v10 = vmul.f32 -1.442695, %v5344_v6 }
0x1f6f   :  { %13047 = vpow2.f32 %v10450_v43 }
0x1f70   :  { %13049 = vpow2.f32 %v10449_v31 }
0x1f71   :  { %13051 = vpow2.f32 %v10452_v10 }
0x1f75   :  { %v14644_v28 = vpop.f32.mrb[70].mxu1 }
0x1f76   :  { %v14646_v59 = vpop.f32.mrb[71].mxu1 }
0x1f77   :  { %v12511_v58 = vpack.c.bf16 %v14644_v28, %v14646_v59 }
0x1f79   :  { %12512 = vmatprep.subr.bf16.mxu0 %v12511_v58  ;;  %v13048_v8 = vpop.eup %13047 }
0x1f7a   :  { %12514 = vmatpush3.bf16.msra.mxu0 %v12511_v58  ;;  %v10451_v58 = vmul.f32 -1.442695, %v5343_v21  ;;  %v13050_v53 = vpop.eup %13049 }
0x1f7b   :  { %12526 = vmatprep.subr.bf16.mxu0 %v13388_v24  ;;  %v13052_v45 = vpop.eup %13051 }
0x1f7c   :  { %13053 = vpow2.f32 %v10451_v58 }
0x1f7d   :  { %11751 = vmatmul.mubr.msk.f32.vlgmr.msra.gmra.mrb[74].mxu0 %vm254_vm1, %v14654_v36 }
0x1f7e   :  { %11753 = vmatprep.mubr.msk.f32.mxu0 %vm254_vm1, %v14661_v51 }
0x1f81   :  { %11754 = vmatmul.mubr.msk.f32.gmra.mrb[76].mxu0 %vm254_vm1, %v14668_v29 }
0x1f82   :  { %11756 = vmatprep.mubr.msk.f32.mxu0 %vm254_vm1, %v14675_v42 }
0x1f85   :  { %11757 = vmatmul.mubr.msk.f32.gmra.mrb[78].mxu0 %vm254_vm1, %v14682_v54 }
0x1f86   :  { %11759 = vmatprep.mubr.msk.f32.mxu0 %vm254_vm1, %v14689_v39  ;;  %v13054_v46 = vpop.eup %13053 }
0x1f87   :  { %v5359_v0 = vadd.f32 1.0, %v13054_v46 }
0x1f89   :  { %11760 = vmatmul.mubr.msk.f32.gmra.mrb[80].mxu0 %vm254_vm1, %v14696_v38 }
0x1f8a   :  { %11784 = vmatprep.mubr.msk.f32.mxu0 %vm13389_vm2, %v13390_v25 }
0x2050   :  { %v11752_v27 = vpop.f32.mrb[74].mxu0 }
0x2051   :  { %v5535_v32 = vpop.f32.mrb[75].mxu0 }
0x2054   :  { %v11755_v37 = vpop.f32.mrb[76].mxu0 }
0x2055   :  { %v5545_v13 = vpop.f32.mrb[77].mxu0 }
0x2058   :  { %v11758_v55 = vpop.f32.mrb[78].mxu0 }
0x2059   :  { %v5555_v30 = vpop.f32.mrb[79].mxu0  ;;  %v5607_v20 = vadd.f32 %v11758_v55, %v5604_v49 }
0x205a   :  { %v5606_v60 = vadd.f32 %v5604_v49, %v5555_v30 }
0x205b   :  { %5616 = vrot.lane.b32.xlu0 %v5607_v20, %s13385_s26 }
0x205c   :  { %v11761_v16 = vpop.f32.mrb[80].mxu0  ;;  %5614 = vrot.lane.b32.xlu1 %v5606_v60, %s13385_s26 }
0x205d   :  { %v5609_v26 = vadd.f32 %v11761_v16, %v5604_v49  ;;  %v5565_v17 = vpop.f32.mrb[81].mxu0 }
0x205e   :  { %v5608_v41 = vadd.f32 %v5604_v49, %v5565_v17 }
0x205f   :  { %5620 = vrot.lane.b32.xlu0 %v5609_v26, %s13385_s26 }
0x2060   :  { %5618 = vrot.lane.b32.xlu1 %v5608_v41, %s13385_s26 }
0x2063   :  { %5900 = vrot.lane.b32.xlu0 %v11752_v27, %s13386_s20  ;;  %v5358_v27 = vadd.f32 1.0, %v13048_v8 }
0x2064   :  { %5898 = vrot.lane.b32.xlu1 %v5535_v32, %s13386_s20  ;;  %v5357_v32 = vadd.f32 1.0, %v13050_v53 }
0x2065   :  { %13055 = vrcp.f32 %v5358_v27 }
0x2066   :  { %13057 = vrcp.f32 %v5357_v32 }
0x2067   :  { %6013 = vrot.lane.b32.xlu0 %v11758_v55, %s13387_s21 }
0x2068   :  { %6011 = vrot.lane.b32.xlu1 %v5555_v30, %s13387_s21 }
0x206b   :  { %5904 = vrot.lane.b32.xlu0 %v11755_v37, %s13386_s20  ;;  %v5360_v37 = vadd.f32 1.0, %v13052_v45 }
0x206c   :  { %5902 = vrot.lane.b32.xlu1 %v5545_v13, %s13386_s20 }
0x206d   :  { %13059 = vrcp.f32 %v5360_v37  ;;  %v14742_v37 = vld [vmem:[%s15686_s3 + $0x8] sm:$0xff] }
0x206e   :  { %13061 = vrcp.f32 %v5359_v0  ;;  %v5708_v0 = vrot.slane %v14639_v19, %v13463_v14 }
0x206f   :  { %6017 = vrot.lane.b32.xlu0 %v11761_v16, %s13387_s21  ;;  %v13056_v13 = vpop.eup %13055 }
0x2070   :  { %6015 = vrot.lane.b32.xlu1 %v5565_v17, %s13387_s21  ;;  %v13058_v49 = vpop.eup %13057  ;;  %v5370_v55 = vmul.f32 %v13056_v13, %v5342_v9  ;;  %v5710_v13 = vadd.f32 %v14644_v28, %v5708_v0  ;;  %v10458_v28 = vld [vmem:[%s15688_s5 + $0x1a8] sm:$0xff] }
0x2071   :  { %v5369_v20 = vmul.f32 %v13058_v49, %v5341_v47  ;;  %v5709_v49 = vadd.f32 %v5708_v0, %v14646_v59  ;;  %v10460_v59 = vld [vmem:[%s15688_s5 + $0x1b8] sm:$0xff] }
0x2072   :  { %v14723_v26 = vadd.f32 %v5370_v55, %v14507_v7 }
0x2073   :  { %v14726_v41 = vadd.f32 %v5369_v20, %v14510_v3  ;;  %v10456_v20 = vld [vmem:[%s15688_s5 + $0x198] sm:$0xff] }
0x2074   :  { %v10473_v18 = vmul.f32 -1.442695, %v14723_v26 }
0x2075   :  { %v10472_v33 = vmul.f32 -1.442695, %v14726_v41 }
0x2076   :  { %13063 = vpow2.f32 %v10473_v18 }
0x2077   :  { %v13060_v30 = vpop.eup %13059  ;;  %13065 = vpow2.f32 %v10472_v33 }
0x2078   :  { %v13062_v60 = vpop.eup %13061  ;;  %v5372_v16 = vmul.f32 %v13060_v30, %v5344_v6  ;;  %v10454_v30 = vld [vmem:[%s15688_s5 + $0x188] sm:$0xff] }
0x2079   :  { %v5371_v17 = vmul.f32 %v13062_v60, %v5343_v21  ;;  %v12529_v18 = vpack.c.bf16 %v10456_v20, %v10454_v30 }
0x207a   :  { %v14730_v61 = vadd.f32 %v5372_v16, %v14522_v52 }
0x207b   :  { %v14734_v63 = vadd.f32 %v5371_v17, %v14515_v34 }
0x207c   :  { %v10475_v48 = vmul.f32 -1.442695, %v14730_v61 }
0x207d   :  { %v10474_v7 = vmul.f32 -1.442695, %v14734_v63 }
0x207e   :  { %13067 = vpow2.f32 %v10475_v48  ;;  %v12533_v48 = vpack.c.bf16 %v10460_v59, %v10458_v28  ;;  %v10492_v59 = vld [vmem:[%s15688_s5 + $0x1c0] sm:$0xff] }
0x207f   :  { %13069 = vpow2.f32 %v10474_v7 }
0x2080   :  { %v13064_v3 = vpop.eup %13063 }
0x2081   :  { %v13066_v23 = vpop.eup %13065  ;;  %v5587_v11 = vadd.f32 1.0, %v13064_v3 }
0x2082   :  { %v5586_v56 = vadd.f32 1.0, %v13066_v23 }
0x2083   :  { %13071 = vrcp.f32 %v5587_v11 }
0x2084   :  { %13073 = vrcp.f32 %v5586_v56 }
0x2088   :  { %v13068_v22 = vpop.eup %13067 }
0x2089   :  { %v13070_v52 = vpop.eup %13069  ;;  %v5589_v9 = vadd.f32 1.0, %v13068_v22 }
0x208a   :  { %v5588_v50 = vadd.f32 1.0, %v13070_v52 }
0x208b   :  { %13075 = vrcp.f32 %v5589_v9 }
0x208c   :  { %13077 = vrcp.f32 %v5588_v50 }
0x208d   :  { %v13072_v34 = vpop.eup %13071 }
0x208e   :  { %v13074_v6 = vpop.eup %13073 }
0x2095   :  { %v13076_v10 = vpop.eup %13075 }
0x2096   :  { %v13078_v53 = vpop.eup %13077 }
0x20cd   :  { %v5617_v47 = vpop.permute.xlu0 %5616 }
0x20ce   :  { %v5627_v43 = vmul.f32 %v13072_v34, %v5617_v47  ;;  %v5615_v21 = vpop.permute.xlu1 %5614 }
0x20cf   :  { %v5626_v31 = vmul.f32 %v13074_v6, %v5615_v21 }
0x20d1   :  { %v12515_v58 = vpack.c.bf16 %v5627_v43, %v5626_v31  ;;  %v5621_v8 = vpop.permute.xlu0 %5620 }
0x20d2   :  { %v5629_v27 = vmul.f32 %v13076_v10, %v5621_v8  ;;  %v5619_v45 = vpop.permute.xlu1 %5618 }
0x20d3   :  { %v5628_v32 = vmul.f32 %v13078_v53, %v5619_v45  ;;  %12516 = vmatprep.subr.bf16.mxu1 %v12515_v58 }
0x20d4   :  { %12518 = vmatpush3.bf16.msra.mxu1 %v12515_v58  ;;  %v6030_v58 = vrot.slane %v14639_v19, %v13649_v4 }
0x20d5   :  { %v12519_v46 = vpack.c.bf16 %v5629_v27, %v5628_v32  ;;  %v5901_v7 = vpop.permute.xlu0 %5900 }
0x20d6   :  { %v5899_v3 = vpop.permute.xlu1 %5898 }
0x20d7   :  { %12520 = vmatprep.subr.bf16.mxu1 %v12519_v46 }
0x20d8   :  { %12522 = vmatpush3.bf16.msra.mxu1 %v12519_v46 }
0x20d9   :  { %12523 = vmatprep.subr.bf16.mxu1 %v13388_v24  ;;  %v6014_v56 = vpop.permute.xlu0 %6013 }
0x20da   :  { %v6012_v52 = vpop.permute.xlu1 %6011 }
0x20db   :  { %11771 = vmatmul.mubr.msk.f32.vlgmr.msra.gmra.mrb[72].mxu1 %vm172_vm0, %v14742_v37 }
0x20dc   :  { %11777 = vmatprep.mubr.msk.f32.mxu1 %vm13389_vm2, %v13390_v25 }
0x20dd   :  { %v5905_v43 = vpop.permute.xlu0 %5904 }
0x20de   :  { %v5903_v31 = vpop.permute.xlu1 %5902 }
0x20e2   :  { %v6016_v20 = vpop.permute.xlu1 %6015 }
0x21ae   :  { %v11772_v55 = vpop.f32.mrb[72].mxu1 }
0x21af   :  { %v5712_v60 = vadd.f32 %v11772_v55, %v5710_v13  ;;  %v5696_v16 = vpop.f32.mrb[73].mxu1 }
0x21b0   :  { %v5711_v17 = vadd.f32 %v5709_v49, %v5696_v16  ;;  %v6018_v49 = vpop.permute.xlu0 %6017 }
0x21b2   :  { %v12524_v33 = vpack.c.bf16 %v5712_v60, %v5711_v17 }
0x21b4   :  { %12525 = vmatpush3.bf16.msra.mxu1 %v12524_v33 }
0x21b5   :  { %12530 = vmatprep.subr.bf16.mxu1 %v12529_v18 }
0x21b7   :  { %11778 = vmatmul.mubr.msk.f32.vlgmr.msra.gmra.mrb[74].mxu1 %vm254_vm1, %v13391_v40 }
0x21b8   :  { %12532 = vmatpush3.bf16.msra.mxu1 %v12529_v18  ;;  %11795 = vmatprep.mubr.msk.f32.mxu1 %vm172_vm0, %v14726_v41 }
0x21b9   :  { %12534 = vmatprep.subr.bf16.mxu1 %v12533_v48 }
0x21bc   :  { %12536 = vmatpush3.bf16.msra.mxu1 %v12533_v48  ;;  %v10494_v48 = vld [vmem:[%s15688_s5 + $0x1d0] sm:$0xff] }
0x21bd   :  { %12543 = vmatprep.subr.bf16.mxu1 %v13388_v24 }
0x21bf   :  { %11796 = vmatmul.mubr.msk.f32.vlgmr.msra.gmra.mrb[76].mxu1 %vm172_vm0, %v14723_v26 }
0x21c0   :  { %11798 = vmatprep.mubr.msk.f32.mxu1 %vm172_vm0, %v14734_v63 }
0x21c3   :  { %11799 = vmatmul.mubr.msk.f32.gmra.mrb[78].mxu1 %vm172_vm0, %v14730_v61 }
0x21c4   :  { %11820 = vmatprep.mubr.msk.f32.mxu1 %vm13389_vm2, %v13390_v25 }
0x228a   :  { %v5779_v23 = vpop.f32.mrb[74].mxu1 }
0x228b   :  { %v5786_v11 = vrot.slane %v5779_v23, %v13463_v14  ;;  %v11779_v22 = vpop.f32.mrb[75].mxu1  ;;  %v10498_v23 = vld [vmem:[%s15688_s5 + $0x1f0] sm:$0xff] }
0x228d   :  { %v14778_v9 = vsub.f32 %v5711_v17, %v5786_v11  ;;  %v14780_v50 = vsub.f32 %v5712_v60, %v5786_v11 }
0x228f   :  { %v5789_v34 = vmul.f32 %v14778_v9, %v14778_v9  ;;  %v5790_v47 = vmul.f32 %v14780_v50, %v14780_v50 }
0x2291   :  { %v12527_v6 = vpack.c.bf16 %v5790_v47, %v5789_v34 }
0x2292   :  { %v11797_v21 = vpop.f32.mrb[76].mxu1 }
0x2293   :  { %v5994_v10 = vadd.f32 %v11797_v21, %v5901_v7  ;;  %12528 = vmatpush3.bf16.msra.mxu0 %v12527_v6  ;;  %v5988_v8 = vpop.f32.mrb[77].mxu1  ;;  %v12549_v7 = vpack.c.bf16 %v10494_v48, %v10492_v59 }
0x2294   :  { %v5989_v53 = vadd.f32 %v5988_v8, %v5899_v3  ;;  %12537 = vmatprep.subr.bf16.mxu0 %v13388_v24  ;;  %v10496_v3 = vld [vmem:[%s15688_s5 + $0x1e0] sm:$0xff] }
0x2295   :  { %v6024_v27 = vadd.f32 %v6014_v56, %v5994_v10  ;;  %v12553_v11 = vpack.c.bf16 %v10498_v23, %v10496_v3 }
0x2296   :  { %v6023_v45 = vadd.f32 %v6012_v52, %v5989_v53  ;;  %11785 = vmatmul.mubr.msk.f32.vlgmr.msra.gmra.mrb[82].mxu0 %vm254_vm1, %v13391_v40  ;;  %v11800_v32 = vpop.f32.mrb[78].mxu1 }
0x2297   :  { %v6032_v46 = vadd.f32 %v6030_v58, %v6024_v27  ;;  %v6004_v0 = vadd.f32 %v11800_v32, %v5905_v43  ;;  %v5998_v13 = vpop.f32.mrb[79].mxu1  ;;  %11809 = vmatprep.mubr.msk.f32.mxu0 %vm13389_vm2, %v13390_v25 }
0x2298   :  { %v6031_v55 = vadd.f32 %v6030_v58, %v6023_v45  ;;  %v5999_v30 = vadd.f32 %v5998_v13, %v5903_v31  ;;  %v5875_v45 = vrot.slane %v14639_v19, %v13677_v5 }
0x2299   :  { %v6026_v60 = vadd.f32 %v6018_v49, %v6004_v0 }
0x229a   :  { %v12538_v16 = vpack.c.bf16 %v6032_v46, %v6031_v55  ;;  %v6025_v17 = vadd.f32 %v6016_v20, %v5999_v30 }
0x229b   :  { %v6034_v18 = vadd.f32 %v6030_v58, %v6026_v60 }
0x229c   :  { %v6033_v33 = vadd.f32 %v6030_v58, %v6025_v17  ;;  %12539 = vmatpush3.bf16.msra.mxu0 %v12538_v16 }
0x229d   :  { %12540 = vmatprep.subr.bf16.mxu0 %v13388_v24 }
0x229e   :  { %v12541_v28 = vpack.c.bf16 %v6034_v18, %v6033_v33 }
0x22a0   :  { %12542 = vmatpush3.bf16.msra.mxu0 %v12541_v28 }
0x22a1   :  { %12550 = vmatprep.subr.bf16.mxu0 %v12549_v7 }
0x22a3   :  { %11810 = vmatmul.mubr.msk.f32.vlgmr.msra.gmra.mrb[84].mxu0 %vm172_vm0, %v13392_v35 }
0x22a4   :  { %12552 = vmatpush3.bf16.msra.mxu0 %v12549_v7 }
0x22a5   :  { %12554 = vmatprep.subr.bf16.mxu0 %v12553_v11 }
0x22a8   :  { %12556 = vmatpush3.bf16.msra.mxu0 %v12553_v11 }
0x2369   :  { %v5857_v22 = vpop.f32.mrb[82].mxu0 }
0x236a   :  { %v5858_v56 = vadd.f32 1e-05, %v5857_v22  ;;  %v11786_v52 = vpop.f32.mrb[83].mxu0 }
0x236c   :  { %13079 = vrsqrt.f32 %v5858_v56 }
0x2376   :  { %v13080_v34 = vpop.eup %13079  ;;  %v6101_v47 = vpop.f32.mrb[84].mxu0 }
0x2377   :  { %v5863_v6 = vrot.slane %v13080_v34, 5  ;;  %v6108_v43 = vrot.slane %v6101_v47, %v13463_v14  ;;  %v11811_v21 = vpop.f32.mrb[85].mxu0 }
0x2378   :  { %v6203_v21 = vrot.slane %v14639_v19, %v13715_v1 }
0x2379   :  { %v5865_v31 = vmul.f32 %v14639_v19, %v5863_v6  ;;  %v6109_v10 = vsub.f32 %v6031_v55, %v6108_v43  ;;  %v6110_v58 = vsub.f32 %v6032_v46, %v6108_v43  ;;  %v6111_v8 = vsub.f32 %v6033_v33, %v6108_v43 }
0x237a   :  { %v6112_v53 = vsub.f32 %v6034_v18, %v6108_v43 }
0x237b   :  { %v5869_v27 = vrot.slane %v5865_v31, %v13674_v2  ;;  %v6113_v32 = vmul.f32 %v6109_v10, %v6109_v10  ;;  %v6114_v0 = vmul.f32 %v6110_v58, %v6110_v58  ;;  %v6115_v13 = vmul.f32 %v6111_v8, %v6111_v8 }
0x237c   :  { %v6116_v60 = vmul.f32 %v6112_v53, %v6112_v53 }
0x237d   :  { %v5870_v49 = vmul.f32 %v5869_v27, %v14778_v9  ;;  %v5871_v30 = vmul.f32 %v5869_v27, %v14780_v50  ;;  %v12544_v20 = vpack.c.bf16 %v6114_v0, %v6113_v32 }
0x237e   :  { %v12547_v17 = vpack.c.bf16 %v6116_v60, %v6115_v13 }
0x237f   :  { %v5877_v16 = vadd.f32 %v5875_v45, %v5871_v30  ;;  %12545 = vmatpush3.bf16.msra.mxu1 %v12544_v20  ;;  %v5876_v55 = vadd.f32 %v5875_v45, %v5870_v49 }
0x2380   :  { %12546 = vmatprep.subr.bf16.mxu1 %v13388_v24 }
0x2381   :  { %v10481_v46 = vmul.f32 -1.442695, %v5877_v16  ;;  %v10480_v18 = vmul.f32 -1.442695, %v5876_v55 }
0x2383   :  { %13081 = vpow2.f32 %v10481_v46  ;;  %12548 = vmatpush3.bf16.msra.mxu1 %v12547_v17  ;;  %v10493_v46 = vld [vmem:[%s15688_s5 + $0x1c8] sm:$0xff] }
0x2384   :  { %13083 = vpow2.f32 %v10480_v18  ;;  %v10497_v17 = vld [vmem:[%s15688_s5 + $0x1e8] sm:$0xff]  ;;  %v10499_v18 = vld [vmem:[%s15688_s5 + $0x1f8] sm:$0xff] }
0x2386   :  { %11821 = vmatmul.mubr.msk.f32.vlgmr.msra.gmra.mrb[80].mxu1 %vm172_vm0, %v13392_v35 }
0x2387   :  { %11838 = vmatprep.mubr.msk.f32.mxu1 %vm254_vm1, %v14620_v57  ;;  %v14833_v57 = vld [vmem:[%s15686_s3] sm:$0xff] }
0x238d   :  { %v13082_v9 = vpop.eup %13081 }
0x238e   :  { %v13084_v50 = vpop.eup %13083  ;;  %v5885_v33 = vadd.f32 1.0, %v13082_v9  ;;  %v12579_v9 = vpack.c.bf16 %v10499_v18, %v10497_v17 }
0x238f   :  { %v5884_v28 = vadd.f32 1.0, %v13084_v50 }
0x2390   :  { %13085 = vrcp.f32 %v5885_v33 }
0x2391   :  { %13087 = vrcp.f32 %v5884_v28 }
0x239a   :  { %v13086_v59 = vpop.eup %13085 }
0x239b   :  { %v13088_v48 = vpop.eup %13087  ;;  %v5891_v7 = vmul.f32 %v13086_v59, %v5877_v16 }
0x239c   :  { %v5890_v3 = vmul.f32 %v13088_v48, %v5876_v55 }
0x239d   :  { %v14821_v23 = vadd.f32 %v5891_v7, %v14625_v44  ;;  %v14840_v44 = vld [vmem:[%s15689_s6 + $0x38] sm:$0x7f] }
0x239e   :  { %v14824_v11 = vadd.f32 %v5890_v3, %v14628_v12  ;;  %v6464_v12 = vrot.slane %v14840_v44, %v13466_v15 }
0x23a0   :  { %11831 = vmatprep.mubr.msk.f32.mxu0 %vm172_vm0, %v14824_v11  ;;  %6466 = vrot.lane.b32.xlu1 %v6464_v12, %s13385_s26 }
0x23a1   :  { %11832 = vmatmul.mubr.msk.f32.vlgmr.msra.gmra.mrb[86].mxu0 %vm172_vm0, %v14821_v23 }
0x23a2   :  { %11858 = vmatprep.mubr.msk.f32.mxu0 %vm172_vm0, %v14833_v57 }
0x2459   :  { %v6183_v22 = vpop.f32.mrb[80].mxu1 }
0x245a   :  { %v6184_v56 = vadd.f32 1e-05, %v6183_v22  ;;  %v11822_v52 = vpop.f32.mrb[81].mxu1 }
0x245c   :  { %13089 = vrsqrt.f32 %v6184_v56 }
0x2466   :  { %v13090_v34 = vpop.eup %13089 }
0x2467   :  { %v6189_v47 = vrot.slane %v13090_v34, 3 }
0x2469   :  { %v6191_v6 = vmul.f32 %v14639_v19, %v6189_v47  ;;  %v10495_v19 = vld [vmem:[%s15688_s5 + $0x1d8] sm:$0xff] }
0x246b   :  { %v6195_v43 = vrot.slane %v6191_v6, %v13712_v62 }
0x246d   :  { %v6197_v31 = vmul.f32 %v6195_v43, %v6110_v58  ;;  %v6196_v27 = vmul.f32 %v6195_v43, %v6109_v10  ;;  %v6198_v45 = vmul.f32 %v6195_v43, %v6111_v8  ;;  %v6199_v32 = vmul.f32 %v6195_v43, %v6112_v53  ;;  %v6467_v43 = vpop.permute.xlu1 %6466 }
0x246e   :  { %v12575_v53 = vpack.c.bf16 %v10495_v19, %v10493_v46 }
0x246f   :  { %v6205_v0 = vadd.f32 %v6203_v21, %v6197_v31  ;;  %v6204_v13 = vadd.f32 %v6203_v21, %v6196_v27  ;;  %v6206_v49 = vadd.f32 %v6203_v21, %v6198_v45  ;;  %v6207_v30 = vadd.f32 %v6203_v21, %v6199_v32 }
0x2471   :  { %v10489_v20 = vmul.f32 -1.442695, %v6205_v0  ;;  %v10488_v60 = vmul.f32 -1.442695, %v6204_v13  ;;  %v10490_v16 = vmul.f32 -1.442695, %v6206_v49 }
0x2472   :  { %v10491_v55 = vmul.f32 -1.442695, %v6207_v30 }
0x2473   :  { %13091 = vpow2.f32 %v10489_v20 }
0x2474   :  { %v14855_v10 = vpop.f32.mrb[86].mxu0  ;;  %13093 = vpow2.f32 %v10488_v60 }
0x2475   :  { %v14857_v58 = vpop.f32.mrb[87].mxu0  ;;  %13095 = vpow2.f32 %v10490_v16 }
0x2476   :  { %v12557_v8 = vpack.c.bf16 %v14855_v10, %v14857_v58  ;;  %13097 = vpow2.f32 %v10491_v55 }
0x2478   :  { %12558 = vmatprep.subr.bf16.mxu1 %v12557_v8 }
0x2479   :  { %12560 = vmatpush3.bf16.msra.mxu1 %v12557_v8 }
0x247a   :  { %12576 = vmatprep.subr.bf16.mxu1 %v12575_v53 }
0x247c   :  { %11839 = vmatmul.mubr.msk.f32.vlgmr.msra.gmra.mrb[82].mxu1 %vm254_vm1, %v14654_v36 }
0x247d   :  { %v13092_v50 = vpop.eup %13091  ;;  %11841 = vmatprep.mubr.msk.f32.mxu1 %vm254_vm1, %v14661_v51  ;;  %12578 = vmatpush3.bf16.msra.mxu1 %v12575_v53 }
0x247e   :  { %v13094_v33 = vpop.eup %13093  ;;  %v6221_v28 = vadd.f32 1.0, %v13092_v50  ;;  %12580 = vmatprep.subr.bf16.mxu1 %v12579_v9 }
0x247f   :  { %v13096_v59 = vpop.eup %13095  ;;  %v6220_v48 = vadd.f32 1.0, %v13094_v33 }
0x2480   :  { %v13098_v7 = vpop.eup %13097  ;;  %13099 = vrcp.f32 %v6221_v28  ;;  %11842 = vmatmul.mubr.msk.f32.gmra.mrb[84].mxu1 %vm254_vm1, %v14668_v29  ;;  %v6222_v3 = vadd.f32 1.0, %v13096_v59 }
0x2481   :  { %11844 = vmatprep.mubr.msk.f32.mxu1 %vm254_vm1, %v14675_v42  ;;  %12582 = vmatpush3.bf16.msra.mxu1 %v12579_v9  ;;  %13101 = vrcp.f32 %v6220_v48  ;;  %v6223_v36 = vadd.f32 1.0, %v13098_v7 }
0x2482   :  { %13103 = vrcp.f32 %v6222_v3  ;;  %12589 = vmatprep.subr.bf16.mxu1 %v13388_v24 }
0x2483   :  { %13105 = vrcp.f32 %v6223_v36 }
0x2484   :  { %11845 = vmatmul.mubr.msk.f32.gmra.mrb[86].mxu1 %vm254_vm1, %v14682_v54 }
0x2485   :  { %11847 = vmatprep.mubr.msk.f32.mxu1 %vm254_vm1, %v14689_v39 }
0x2488   :  { %11848 = vmatmul.mubr.msk.f32.gmra.mrb[88].mxu1 %vm254_vm1, %v14696_v38 }
0x248a   :  { %v13100_v51 = vpop.eup %13099 }
0x248b   :  { %v13102_v29 = vpop.eup %13101  ;;  %v6233_v12 = vmul.f32 %v13100_v51, %v6205_v0 }
0x248c   :  { %v13104_v42 = vpop.eup %13103  ;;  %v6232_v22 = vmul.f32 %v13102_v29, %v6204_v13 }
0x248d   :  { %v13106_v56 = vpop.eup %13105  ;;  %v14883_v52 = vadd.f32 %v6233_v12, %v14723_v26  ;;  %v6234_v34 = vmul.f32 %v13104_v42, %v6206_v49 }
0x248e   :  { %v14886_v47 = vadd.f32 %v6232_v22, %v14726_v41  ;;  %v6235_v54 = vmul.f32 %v13106_v56, %v6207_v30 }
0x248f   :  { %v14891_v39 = vadd.f32 %v6234_v34, %v14734_v63  ;;  %v10512_v16 = vmul.f32 -1.442695, %v14883_v52 }
0x2490   :  { %11883 = vmatprep.mubr.msk.f32.mxu1 %vm172_vm0, %v14886_v47  ;;  %v14898_v38 = vadd.f32 %v6235_v54, %v14730_v61  ;;  %v10511_v55 = vmul.f32 -1.442695, %v14886_v47 }
0x2491   :  { %11884 = vmatmul.mubr.msk.f32.vlgmr.msra.gmra.mrb[90].mxu1 %vm172_vm0, %v14883_v52  ;;  %13107 = vpow2.f32 %v10512_v16  ;;  %v10513_v19 = vmul.f32 -1.442695, %v14891_v39 }
0x2492   :  { %11886 = vmatprep.mubr.msk.f32.mxu1 %vm172_vm0, %v14891_v39  ;;  %v10514_v46 = vmul.f32 -1.442695, %v14898_v38  ;;  %13109 = vpow2.f32 %v10511_v55 }
0x2494   :  { %13111 = vpow2.f32 %v10514_v46 }
0x2495   :  { %11887 = vmatmul.mubr.msk.f32.gmra.mrb[92].mxu1 %vm172_vm0, %v14898_v38  ;;  %13113 = vpow2.f32 %v10513_v19 }
0x2496   :  { %11908 = vmatprep.mubr.msk.f32.mxu1 %vm13389_vm2, %v13390_v25 }
0x249b   :  { %v13108_v8 = vpop.eup %13107 }
0x249c   :  { %v13110_v53 = vpop.eup %13109  ;;  %v6450_v17 = vadd.f32 1.0, %v13108_v8  ;;  %v6893_v8 = vrot.slane %v14840_v44, %v13649_v4 }
0x249d   :  { %v6449_v9 = vadd.f32 1.0, %v13110_v53 }
0x249e   :  { %v13112_v18 = vpop.eup %13111  ;;  %13115 = vrcp.f32 %v6450_v17 }
0x249f   :  { %v13114_v50 = vpop.eup %13113  ;;  %v6452_v33 = vadd.f32 1.0, %v13112_v18  ;;  %13117 = vrcp.f32 %v6449_v9 }
0x24a0   :  { %v6451_v28 = vadd.f32 1.0, %v13114_v50 }
0x24a1   :  { %13119 = vrcp.f32 %v6452_v33 }
0x24a2   :  { %13121 = vrcp.f32 %v6451_v28 }
0x24a8   :  { %v13116_v59 = vpop.eup %13115 }
0x24a9   :  { %v13118_v7 = vpop.eup %13117 }
0x24ab   :  { %v13120_v29 = vpop.eup %13119 }
0x24ac   :  { %v13122_v22 = vpop.eup %13121 }
0x254f   :  { %v11840_v26 = vpop.f32.mrb[82].mxu1 }
0x2550   :  { %v6398_v41 = vpop.f32.mrb[83].mxu1 }
0x2553   :  { %v11843_v6 = vpop.f32.mrb[84].mxu1 }
0x2554   :  { %v6408_v63 = vpop.f32.mrb[85].mxu1 }
0x2557   :  { %v11846_v21 = vpop.f32.mrb[86].mxu1 }
0x2558   :  { %v6470_v31 = vadd.f32 %v11846_v21, %v6467_v43  ;;  %v6418_v27 = vpop.f32.mrb[87].mxu1 }
0x2559   :  { %v6469_v45 = vadd.f32 %v6467_v43, %v6418_v27 }
0x255a   :  { %6479 = vrot.lane.b32.xlu1 %v6470_v31, %s13385_s26 }
0x255b   :  { %v11849_v32 = vpop.f32.mrb[88].mxu1  ;;  %6477 = vrot.lane.b32.xlu0 %v6469_v45, %s13385_s26 }
0x255c   :  { %v6472_v61 = vadd.f32 %v11849_v32, %v6467_v43  ;;  %v6428_v0 = vpop.f32.mrb[89].mxu1 }
0x255d   :  { %v6471_v13 = vadd.f32 %v6467_v43, %v6428_v0 }
0x255e   :  { %6483 = vrot.lane.b32.xlu1 %v6472_v61, %s13385_s26 }
0x255f   :  { %6481 = vrot.lane.b32.xlu0 %v6471_v13, %s13385_s26 }
0x2562   :  { %6763 = vrot.lane.b32.xlu1 %v11840_v26, %s13386_s20 }
0x2563   :  { %6761 = vrot.lane.b32.xlu0 %v6398_v41, %s13386_s20  ;;  %v6571_v41 = vrot.slane %v14840_v44, %v13463_v14 }
0x2564   :  { %v14910_v49 = vpop.f32.mrb[90].mxu1 }
0x2565   :  { %v14912_v30 = vpop.f32.mrb[91].mxu1 }
0x2566   :  { %6876 = vrot.lane.b32.xlu1 %v11846_v21, %s13387_s21 }
0x2567   :  { %6874 = vrot.lane.b32.xlu0 %v6418_v27, %s13387_s21 }
0x2568   :  { %v14916_v20 = vpop.f32.mrb[92].mxu1 }
0x2569   :  { %v14918_v60 = vpop.f32.mrb[93].mxu1 }
0x256a   :  { %6767 = vrot.lane.b32.xlu1 %v11843_v6, %s13386_s20  ;;  %v6573_v6 = vadd.f32 %v14855_v10, %v6571_v41 }
0x256b   :  { %6765 = vrot.lane.b32.xlu0 %v6408_v63, %s13386_s20  ;;  %v6572_v63 = vadd.f32 %v6571_v41, %v14857_v58 }
0x256e   :  { %6880 = vrot.lane.b32.xlu1 %v11849_v32, %s13387_s21 }
0x256f   :  { %6878 = vrot.lane.b32.xlu0 %v6428_v0, %s13387_s21 }
0x25cc   :  { %v6480_v48 = vpop.permute.xlu1 %6479 }
0x25cd   :  { %v6490_v3 = vmul.f32 %v13116_v59, %v6480_v48  ;;  %v6478_v36 = vpop.permute.xlu0 %6477 }
0x25ce   :  { %v6489_v51 = vmul.f32 %v13118_v7, %v6478_v36 }
0x25d0   :  { %v12561_v12 = vpack.c.bf16 %v6490_v3, %v6489_v51  ;;  %v6484_v42 = vpop.permute.xlu1 %6483 }
0x25d1   :  { %v6492_v56 = vmul.f32 %v13120_v29, %v6484_v42  ;;  %v6482_v34 = vpop.permute.xlu0 %6481 }
0x25d2   :  { %v6491_v54 = vmul.f32 %v13122_v22, %v6482_v34  ;;  %12562 = vmatprep.subr.bf16.mxu0 %v12561_v12  ;;  %v10533_v22 = vld [vmem:[%s15688_s5 + $0x210] sm:$0xff]  ;;  %v10535_v34 = vld [vmem:[%s15688_s5 + $0x220] sm:$0xff] }
0x25d3   :  { %12564 = vmatpush3.bf16.msra.mxu0 %v12561_v12 }
0x25d4   :  { %v12565_v26 = vpack.c.bf16 %v6492_v56, %v6491_v54  ;;  %v10537_v54 = vld [vmem:[%s15688_s5 + $0x230] sm:$0xff] }
0x25d5   :  { %v6762_v32 = vpop.permute.xlu0 %6761 }
0x25d6   :  { %12566 = vmatprep.subr.bf16.mxu0 %v12565_v26  ;;  %v6852_v55 = vadd.f32 %v14912_v30, %v6762_v32 }
0x25d7   :  { %12568 = vmatpush3.bf16.msra.mxu0 %v12565_v26  ;;  %v12599_v26 = vpack.c.bf16 %v10537_v54, %v10535_v34  ;;  %v15037_v54 = vld [vmem:[%s15685_s2 + $0x10] sm:$0xff] }
0x25d8   :  { %12569 = vmatprep.subr.bf16.mxu0 %v13388_v24 }
0x25d9   :  { %v6875_v10 = vpop.permute.xlu0 %6874 }
0x25da   :  { %11859 = vmatmul.mubr.msk.f32.vlgmr.msra.gmra.mrb[88].mxu0 %vm172_vm0, %v14742_v37  ;;  %v6764_v37 = vpop.permute.xlu1 %6763  ;;  %v6886_v17 = vadd.f32 %v6875_v10, %v6852_v55 }
0x25db   :  { %11865 = vmatprep.mubr.msk.f32.mxu0 %vm13389_vm2, %v13390_v25  ;;  %v6857_v13 = vadd.f32 %v14910_v49, %v6764_v37 }
0x25dc   :  { %v6894_v30 = vadd.f32 %v6893_v8, %v6886_v17 }
0x25dd   :  { %v6766_v58 = vpop.permute.xlu0 %6765 }
0x25de   :  { %v6877_v61 = vpop.permute.xlu1 %6876  ;;  %v6862_v59 = vadd.f32 %v14918_v60, %v6766_v58  ;;  %v10531_v60 = vld [vmem:[%s15688_s5 + $0x200] sm:$0xff] }
0x25df   :  { %v6887_v53 = vadd.f32 %v6877_v61, %v6857_v13  ;;  %v12595_v56 = vpack.c.bf16 %v10533_v22, %v10531_v60 }
0x25e1   :  { %v6879_v33 = vpop.permute.xlu0 %6878  ;;  %v6895_v7 = vadd.f32 %v6893_v8, %v6887_v53 }
0x25e2   :  { %v6768_v0 = vpop.permute.xlu1 %6767  ;;  %v6888_v36 = vadd.f32 %v6879_v33, %v6862_v59 }
0x25e3   :  { %v6867_v28 = vadd.f32 %v14916_v20, %v6768_v0  ;;  %v12584_v29 = vpack.c.bf16 %v6895_v7, %v6894_v30 }
0x25e4   :  { %v6896_v42 = vadd.f32 %v6893_v8, %v6888_v36 }
0x25e6   :  { %v6881_v50 = vpop.permute.xlu1 %6880 }
0x25e7   :  { %v6889_v3 = vadd.f32 %v6881_v50, %v6867_v28 }
0x25e9   :  { %v6897_v12 = vadd.f32 %v6893_v8, %v6889_v3  ;;  %v6738_v8 = vrot.slane %v14840_v44, %v13677_v5 }
0x25eb   :  { %v12587_v20 = vpack.c.bf16 %v6897_v12, %v6896_v42 }
0x26ad   :  { %v11860_v43 = vpop.f32.mrb[88].mxu0 }
0x26ae   :  { %v6575_v21 = vadd.f32 %v11860_v43, %v6573_v6  ;;  %v6559_v31 = vpop.f32.mrb[89].mxu0 }
0x26af   :  { %v6574_v27 = vadd.f32 %v6572_v63, %v6559_v31 }
0x26b1   :  { %v12570_v45 = vpack.c.bf16 %v6575_v21, %v6574_v27 }
0x26b3   :  { %12571 = vmatpush3.bf16.msra.mxu0 %v12570_v45 }
0x26b4   :  { %12572 = vmatprep.subr.bf16.mxu0 %v13388_v24 }
0x26b6   :  { %11866 = vmatmul.mubr.msk.f32.vlgmr.msra.gmra.mrb[90].mxu0 %vm254_vm1, %v13391_v40 }
0x26b7   :  { %11872 = vmatprep.mubr.msk.f32.mxu0 %vm13389_vm2, %v13390_v25 }
0x2789   :  { %v6642_v16 = vpop.f32.mrb[90].mxu0 }
0x278a   :  { %v6649_v46 = vrot.slane %v6642_v16, %v13463_v14  ;;  %v11867_v19 = vpop.f32.mrb[91].mxu0 }
0x278c   :  { %v6650_v18 = vsub.f32 %v6574_v27, %v6649_v46  ;;  %v6651_v9 = vsub.f32 %v6575_v21, %v6649_v46 }
0x278e   :  { %v6652_v49 = vmul.f32 %v6650_v18, %v6650_v18  ;;  %v6653_v48 = vmul.f32 %v6651_v9, %v6651_v9 }
0x2790   :  { %v12573_v51 = vpack.c.bf16 %v6653_v48, %v6652_v49  ;;  %v14996_v48 = vld [vmem:[%s15685_s2] sm:$0xff] }
0x2792   :  { %12574 = vmatpush3.bf16.msra.mxu0 %v12573_v51 }
0x2793   :  { %12583 = vmatprep.subr.bf16.mxu0 %v13388_v24 }
0x2795   :  { %11873 = vmatmul.mubr.msk.f32.vlgmr.msra.gmra.mrb[92].mxu0 %vm254_vm1, %v13391_v40 }
0x2796   :  { %12585 = vmatpush3.bf16.msra.mxu0 %v12584_v29  ;;  %11897 = vmatprep.mubr.msk.f32.mxu0 %vm13389_vm2, %v13390_v25 }
0x2797   :  { %12586 = vmatprep.subr.bf16.mxu0 %v13388_v24 }
0x279a   :  { %12588 = vmatpush3.bf16.msra.mxu0 %v12587_v20  ;;  %v15015_v20 = vld [vmem:[%s15689_s6 + $0x40] sm:$0x7f] }
0x279b   :  { %12596 = vmatprep.subr.bf16.mxu0 %v12595_v56 }
0x279d   :  { %11898 = vmatmul.mubr.msk.f32.vlgmr.msra.gmra.mrb[94].mxu0 %vm172_vm0, %v13392_v35 }
0x279e   :  { %12598 = vmatpush3.bf16.msra.mxu0 %v12595_v56 }
0x279f   :  { %12600 = vmatprep.subr.bf16.mxu0 %v12599_v26 }
0x27a2   :  { %12602 = vmatpush3.bf16.msra.mxu0 %v12599_v26  ;;  %v15044_v26 = vld [vmem:[%s15685_s2 + $0x18] sm:$0xff] }
0x2868   :  { %v6720_v41 = vpop.f32.mrb[92].mxu0 }
0x2869   :  { %v6721_v6 = vadd.f32 1e-05, %v6720_v41  ;;  %v11874_v63 = vpop.f32.mrb[93].mxu0  ;;  %v15051_v41 = vld [vmem:[%s15685_s2 + $0x20] sm:$0xff] }
0x286a   :  { %v15065_v63 = vld [vmem:[%s15685_s2 + $0x30] sm:$0xff] }
0x286b   :  { %13123 = vrsqrt.f32 %v6721_v6  ;;  %v15058_v6 = vld [vmem:[%s15685_s2 + $0x28] sm:$0xff] }
0x2870   :  { %v6964_v43 = vpop.f32.mrb[94].mxu0 }
0x2871   :  { %v6971_v21 = vrot.slane %v6964_v43, %v13463_v14  ;;  %v11899_v31 = vpop.f32.mrb[95].mxu0  ;;  %v15072_v43 = vld [vmem:[%s15685_s2 + $0x38] sm:$0xff] }
0x2873   :  { %v14970_v27 = vsub.f32 %v6894_v30, %v6971_v21  ;;  %v14972_v45 = vsub.f32 %v6895_v7, %v6971_v21  ;;  %v14974_v37 = vsub.f32 %v6896_v42, %v6971_v21  ;;  %v14976_v32 = vsub.f32 %v6897_v12, %v6971_v21 }
0x2875   :  { %v13124_v61 = vpop.eup %13123  ;;  %v6976_v10 = vmul.f32 %v14970_v27, %v14970_v27  ;;  %v6977_v0 = vmul.f32 %v14972_v45, %v14972_v45  ;;  %v6978_v16 = vmul.f32 %v14974_v37, %v14974_v37  ;;  %v6979_v55 = vmul.f32 %v14976_v32, %v14976_v32 }
0x2876   :  { %v6726_v58 = vrot.slane %v13124_v61, 5 }
0x2877   :  { %v12590_v13 = vpack.c.bf16 %v6977_v0, %v6976_v10  ;;  %v12593_v53 = vpack.c.bf16 %v6979_v55, %v6978_v16 }
0x2878   :  { %v6728_v46 = vmul.f32 %v14840_v44, %v6726_v58 }
0x2879   :  { %12591 = vmatpush3.bf16.msra.mxu1 %v12590_v13 }
0x287a   :  { %v6732_v19 = vrot.slane %v6728_v46, %v13674_v2  ;;  %12592 = vmatprep.subr.bf16.mxu1 %v13388_v24 }
0x287c   :  { %v6733_v17 = vmul.f32 %v6732_v19, %v6650_v18  ;;  %v6734_v50 = vmul.f32 %v6732_v19, %v6651_v9 }
0x287d   :  { %12594 = vmatpush3.bf16.msra.mxu1 %v12593_v53 }
0x287e   :  { %v6740_v33 = vadd.f32 %v6738_v8, %v6734_v50  ;;  %v6739_v28 = vadd.f32 %v6738_v8, %v6733_v17 }
0x2880   :  { %v10520_v59 = vmul.f32 -1.442695, %v6740_v33  ;;  %11909 = vmatmul.mubr.msk.f32.vlgmr.msra.gmra.mrb[94].mxu1 %vm172_vm0, %v13392_v35  ;;  %v10519_v49 = vmul.f32 -1.442695, %v6739_v28 }
0x2881   :  { %11926 = vmatprep.mubr.msk.f32.mxu1 %vm254_vm1, %v14996_v48 }
0x2882   :  { %13125 = vpow2.f32 %v10520_v59 }
0x2883   :  { %13127 = vpow2.f32 %v10519_v49 }
0x288c   :  { %v13126_v18 = vpop.eup %13125 }
0x288d   :  { %v13128_v9 = vpop.eup %13127  ;;  %v6748_v7 = vadd.f32 1.0, %v13126_v18  ;;  %v7066_v18 = vrot.slane %v14840_v44, %v13715_v1 }
0x288e   :  { %v6747_v30 = vadd.f32 1.0, %v13128_v9 }
0x288f   :  { %13129 = vrcp.f32 %v6748_v7 }
0x2890   :  { %13131 = vrcp.f32 %v6747_v30 }
0x2899   :  { %v13130_v3 = vpop.eup %13129 }
0x289a   :  { %v13132_v36 = vpop.eup %13131  ;;  %v6754_v51 = vmul.f32 %v13130_v3, %v6740_v33 }
0x289b   :  { %v6753_v29 = vmul.f32 %v13132_v36, %v6739_v28 }
0x289c   :  { %v15001_v12 = vadd.f32 %v6754_v51, %v14821_v23  ;;  %v7327_v23 = vrot.slane %v15015_v20, %v13466_v15 }
0x289d   :  { %v15004_v42 = vadd.f32 %v6753_v29, %v14824_v11 }
0x289e   :  { %7329 = vrot.lane.b32.xlu0 %v7327_v23, %s13385_s26 }
0x289f   :  { %11919 = vmatprep.mubr.msk.f32.mxu0 %vm172_vm0, %v15004_v42 }
0x28a0   :  { %11920 = vmatmul.mubr.msk.f32.vlgmr.msra.gmra.mrb[96].mxu0 %vm172_vm0, %v15001_v12 }
0x28a1   :  { %11946 = vmatprep.mubr.msk.f32.mxu0 %vm172_vm0, %v14833_v57  ;;  %v15030_v57 = vld [vmem:[%s15685_s2 + $0x8] sm:$0xff] }
0x2910   :  { %v7330_v0 = vpop.permute.xlu0 %7329 }
0x2953   :  { %v7046_v11 = vpop.f32.mrb[94].mxu1 }
0x2954   :  { %v11910_v60 = vpop.f32.mrb[95].mxu1  ;;  %v7047_v17 = vadd.f32 1e-05, %v7046_v11 }
0x2956   :  { %13133 = vrsqrt.f32 %v7047_v17 }
0x2960   :  { %v13134_v50 = vpop.eup %13133 }
0x2961   :  { %v7052_v33 = vrot.slane %v13134_v50, 3 }
0x2963   :  { %v7054_v28 = vmul.f32 %v14840_v44, %v7052_v33 }
0x2965   :  { %v7058_v59 = vrot.slane %v7054_v28, %v13712_v62 }
0x2967   :  { %v7060_v49 = vmul.f32 %v7058_v59, %v14972_v45  ;;  %v7059_v9 = vmul.f32 %v7058_v59, %v14970_v27  ;;  %v7062_v7 = vmul.f32 %v7058_v59, %v14976_v32  ;;  %v7061_v3 = vmul.f32 %v7058_v59, %v14974_v37 }
0x2969   :  { %v7068_v30 = vadd.f32 %v7066_v18, %v7060_v49  ;;  %v7067_v36 = vadd.f32 %v7066_v18, %v7059_v9  ;;  %v7070_v51 = vadd.f32 %v7066_v18, %v7062_v7  ;;  %v7069_v23 = vadd.f32 %v7066_v18, %v7061_v3 }
0x296b   :  { %v10528_v29 = vmul.f32 -1.442695, %v7068_v30  ;;  %v10527_v11 = vmul.f32 -1.442695, %v7067_v36  ;;  %v10530_v60 = vmul.f32 -1.442695, %v7070_v51 }
0x296d   :  { %13135 = vpow2.f32 %v10528_v29 }
0x296e   :  { %13137 = vpow2.f32 %v10527_v11 }
0x296f   :  { %13139 = vpow2.f32 %v10530_v60 }
0x2973   :  { %v15020_v22 = vpop.f32.mrb[96].mxu0 }
0x2974   :  { %v15022_v56 = vpop.f32.mrb[97].mxu0 }
0x2975   :  { %v12603_v34 = vpack.c.bf16 %v15020_v22, %v15022_v56 }
0x2977   :  { %12604 = vmatprep.subr.bf16.mxu1 %v12603_v34  ;;  %v13136_v45 = vpop.eup %13135 }
0x2978   :  { %12606 = vmatpush3.bf16.msra.mxu1 %v12603_v34  ;;  %v10529_v34 = vmul.f32 -1.442695, %v7069_v23  ;;  %v13138_v44 = vpop.eup %13137 }
0x2979   :  { %12618 = vmatprep.subr.bf16.mxu1 %v13388_v24  ;;  %v13140_v27 = vpop.eup %13139 }
0x297a   :  { %13141 = vpow2.f32 %v10529_v34 }
0x297b   :  { %11927 = vmatmul.mubr.msk.f32.vlgmr.msra.gmra.mrb[96].mxu1 %vm254_vm1, %v15030_v57 }
0x297c   :  { %11929 = vmatprep.mubr.msk.f32.mxu1 %vm254_vm1, %v15037_v54 }
0x297f   :  { %11930 = vmatmul.mubr.msk.f32.gmra.mrb[98].mxu1 %vm254_vm1, %v15044_v26 }
0x2980   :  { %11932 = vmatprep.mubr.msk.f32.mxu1 %vm254_vm1, %v15051_v41 }
0x2983   :  { %11933 = vmatmul.mubr.msk.f32.gmra.mrb[100].mxu1 %vm254_vm1, %v15058_v6 }
0x2984   :  { %11935 = vmatprep.mubr.msk.f32.mxu1 %vm254_vm1, %v15065_v63  ;;  %v13142_v32 = vpop.eup %13141 }
0x2985   :  { %v7085_v37 = vadd.f32 1.0, %v13142_v32 }
0x2987   :  { %11936 = vmatmul.mubr.msk.f32.gmra.mrb[102].mxu1 %vm254_vm1, %v15072_v43 }
0x2988   :  { %11960 = vmatprep.mubr.msk.f32.mxu1 %vm13389_vm2, %v13390_v25 }
0x2a4e   :  { %v11928_v21 = vpop.f32.mrb[96].mxu1 }
0x2a4f   :  { %v7261_v31 = vpop.f32.mrb[97].mxu1 }
0x2a52   :  { %v11931_v61 = vpop.f32.mrb[98].mxu1 }
0x2a53   :  { %v7271_v10 = vpop.f32.mrb[99].mxu1 }
0x2a56   :  { %v11934_v58 = vpop.f32.mrb[100].mxu1 }
0x2a57   :  { %v7333_v13 = vadd.f32 %v11934_v58, %v7330_v0  ;;  %v7281_v16 = vpop.f32.mrb[101].mxu1 }
0x2a58   :  { %v7332_v55 = vadd.f32 %v7330_v0, %v7281_v16 }
0x2a59   :  { %7342 = vrot.lane.b32.xlu0 %v7333_v13, %s13385_s26 }
0x2a5a   :  { %v11937_v46 = vpop.f32.mrb[102].mxu1  ;;  %7340 = vrot.lane.b32.xlu1 %v7332_v55, %s13385_s26 }
0x2a5b   :  { %v7335_v19 = vadd.f32 %v11937_v46, %v7330_v0  ;;  %v7291_v8 = vpop.f32.mrb[103].mxu1 }
0x2a5c   :  { %v7334_v53 = vadd.f32 %v7330_v0, %v7291_v8 }
0x2a5d   :  { %7346 = vrot.lane.b32.xlu0 %v7335_v19, %s13385_s26 }
0x2a5e   :  { %7344 = vrot.lane.b32.xlu1 %v7334_v53, %s13385_s26 }
0x2a61   :  { %7626 = vrot.lane.b32.xlu0 %v11928_v21, %s13386_s20  ;;  %v7084_v21 = vadd.f32 1.0, %v13136_v45 }
0x2a62   :  { %7624 = vrot.lane.b32.xlu1 %v7261_v31, %s13386_s20  ;;  %v7083_v31 = vadd.f32 1.0, %v13138_v44 }
0x2a63   :  { %13143 = vrcp.f32 %v7084_v21 }
0x2a64   :  { %13145 = vrcp.f32 %v7083_v31 }
0x2a65   :  { %7739 = vrot.lane.b32.xlu0 %v11934_v58, %s13387_s21 }
0x2a66   :  { %7737 = vrot.lane.b32.xlu1 %v7281_v16, %s13387_s21 }
0x2a69   :  { %7630 = vrot.lane.b32.xlu0 %v11931_v61, %s13386_s20  ;;  %v7086_v61 = vadd.f32 1.0, %v13140_v27 }
0x2a6a   :  { %7628 = vrot.lane.b32.xlu1 %v7271_v10, %s13386_s20 }
0x2a6b   :  { %13147 = vrcp.f32 %v7086_v61  ;;  %v15118_v61 = vld [vmem:[%s15686_s3 + $0x8] sm:$0xff] }
0x2a6c   :  { %13149 = vrcp.f32 %v7085_v37  ;;  %v7434_v37 = vrot.slane %v15015_v20, %v13463_v14 }
0x2a6d   :  { %7743 = vrot.lane.b32.xlu0 %v11937_v46, %s13387_s21  ;;  %v13144_v10 = vpop.eup %13143 }
0x2a6e   :  { %7741 = vrot.lane.b32.xlu1 %v7291_v8, %s13387_s21  ;;  %v13146_v0 = vpop.eup %13145  ;;  %v7096_v58 = vmul.f32 %v13144_v10, %v7068_v30  ;;  %v7436_v10 = vadd.f32 %v15020_v22, %v7434_v37  ;;  %v10536_v22 = vld [vmem:[%s15688_s5 + $0x228] sm:$0xff] }
0x2a6f   :  { %v7095_v16 = vmul.f32 %v13146_v0, %v7067_v36  ;;  %v7435_v0 = vadd.f32 %v7434_v37, %v15022_v56  ;;  %v10538_v56 = vld [vmem:[%s15688_s5 + $0x238] sm:$0xff] }
0x2a70   :  { %v15099_v19 = vadd.f32 %v7096_v58, %v14883_v52 }
0x2a71   :  { %v15102_v53 = vadd.f32 %v7095_v16, %v14886_v47  ;;  %v10534_v16 = vld [vmem:[%s15688_s5 + $0x218] sm:$0xff] }
0x2a72   :  { %v10551_v17 = vmul.f32 -1.442695, %v15099_v19 }
0x2a73   :  { %v10550_v33 = vmul.f32 -1.442695, %v15102_v53 }
0x2a74   :  { %13151 = vpow2.f32 %v10551_v17 }
0x2a75   :  { %v13148_v13 = vpop.eup %13147  ;;  %13153 = vpow2.f32 %v10550_v33 }
0x2a76   :  { %v13150_v55 = vpop.eup %13149  ;;  %v7098_v46 = vmul.f32 %v13148_v13, %v7070_v51  ;;  %v10532_v13 = vld [vmem:[%s15688_s5 + $0x208] sm:$0xff] }
0x2a77   :  { %v7097_v8 = vmul.f32 %v13150_v55, %v7069_v23  ;;  %v12621_v17 = vpack.c.bf16 %v10534_v16, %v10532_v13 }
0x2a78   :  { %v15106_v50 = vadd.f32 %v7098_v46, %v14898_v38 }
0x2a79   :  { %v15110_v28 = vadd.f32 %v7097_v8, %v14891_v39 }
0x2a7a   :  { %v10553_v59 = vmul.f32 -1.442695, %v15106_v50 }
0x2a7b   :  { %v10552_v52 = vmul.f32 -1.442695, %v15110_v28 }
0x2a7c   :  { %13155 = vpow2.f32 %v10553_v59  ;;  %v12625_v59 = vpack.c.bf16 %v10538_v56, %v10536_v22  ;;  %v10570_v56 = vld [vmem:[%s15688_s5 + $0x240] sm:$0xff] }
0x2a7d   :  { %13157 = vpow2.f32 %v10552_v52 }
0x2a7e   :  { %v13152_v47 = vpop.eup %13151 }
0x2a7f   :  { %v13154_v49 = vpop.eup %13153  ;;  %v7313_v18 = vadd.f32 1.0, %v13152_v47 }
0x2a80   :  { %v7312_v7 = vadd.f32 1.0, %v13154_v49 }
0x2a81   :  { %13159 = vrcp.f32 %v7313_v18 }
0x2a82   :  { %13161 = vrcp.f32 %v7312_v7 }
0x2a86   :  { %v13156_v9 = vpop.eup %13155 }
0x2a87   :  { %v13158_v38 = vpop.eup %13157  ;;  %v7315_v30 = vadd.f32 1.0, %v13156_v9 }
0x2a88   :  { %v7314_v3 = vadd.f32 1.0, %v13158_v38 }
0x2a89   :  { %13163 = vrcp.f32 %v7315_v30 }
0x2a8a   :  { %13165 = vrcp.f32 %v7314_v3 }
0x2a8b   :  { %v13160_v39 = vpop.eup %13159 }
0x2a8c   :  { %v13162_v51 = vpop.eup %13161 }
0x2a93   :  { %v13164_v60 = vpop.eup %13163 }
0x2a94   :  { %v13166_v44 = vpop.eup %13165 }
0x2acb   :  { %v7343_v36 = vpop.permute.xlu0 %7342 }
0x2acc   :  { %v7353_v29 = vmul.f32 %v13160_v39, %v7343_v36  ;;  %v7341_v23 = vpop.permute.xlu1 %7340 }
0x2acd   :  { %v7352_v11 = vmul.f32 %v13162_v51, %v7341_v23 }
0x2acf   :  { %v12607_v34 = vpack.c.bf16 %v7353_v29, %v7352_v11  ;;  %v7347_v45 = vpop.permute.xlu0 %7346 }
0x2ad0   :  { %v7355_v21 = vmul.f32 %v13164_v60, %v7347_v45  ;;  %v7345_v27 = vpop.permute.xlu1 %7344 }
0x2ad1   :  { %v7354_v31 = vmul.f32 %v13166_v44, %v7345_v27  ;;  %12608 = vmatprep.subr.bf16.mxu0 %v12607_v34 }
0x2ad2   :  { %12610 = vmatpush3.bf16.msra.mxu0 %v12607_v34  ;;  %v7756_v34 = vrot.slane %v15015_v20, %v13649_v4 }
0x2ad3   :  { %v12611_v32 = vpack.c.bf16 %v7355_v21, %v7354_v31  ;;  %v7627_v52 = vpop.permute.xlu0 %7626 }
0x2ad4   :  { %v7625_v47 = vpop.permute.xlu1 %7624 }
0x2ad5   :  { %12612 = vmatprep.subr.bf16.mxu0 %v12611_v32 }
0x2ad6   :  { %12614 = vmatpush3.bf16.msra.mxu0 %v12611_v32 }
0x2ad7   :  { %12615 = vmatprep.subr.bf16.mxu0 %v13388_v24  ;;  %v7740_v7 = vpop.permute.xlu0 %7739 }
0x2ad8   :  { %v7738_v38 = vpop.permute.xlu1 %7737 }
0x2ad9   :  { %11947 = vmatmul.mubr.msk.f32.vlgmr.msra.gmra.mrb[98].mxu0 %vm172_vm0, %v15118_v61 }
0x2ada   :  { %11953 = vmatprep.mubr.msk.f32.mxu0 %vm13389_vm2, %v13390_v25 }
0x2adb   :  { %v7631_v29 = vpop.permute.xlu0 %7630 }
0x2adc   :  { %v7629_v11 = vpop.permute.xlu1 %7628 }
0x2ae0   :  { %v7742_v16 = vpop.permute.xlu1 %7741 }
0x2bac   :  { %v11948_v58 = vpop.f32.mrb[98].mxu0 }
0x2bad   :  { %v7438_v55 = vadd.f32 %v11948_v58, %v7436_v10  ;;  %v7422_v46 = vpop.f32.mrb[99].mxu0 }
0x2bae   :  { %v7437_v8 = vadd.f32 %v7435_v0, %v7422_v46  ;;  %v7744_v0 = vpop.permute.xlu0 %7743 }
0x2bb0   :  { %v12616_v33 = vpack.c.bf16 %v7438_v55, %v7437_v8 }
0x2bb2   :  { %12617 = vmatpush3.bf16.msra.mxu0 %v12616_v33 }
0x2bb3   :  { %12622 = vmatprep.subr.bf16.mxu0 %v12621_v17 }
0x2bb5   :  { %11954 = vmatmul.mubr.msk.f32.vlgmr.msra.gmra.mrb[100].mxu0 %vm254_vm1, %v13391_v40 }
0x2bb6   :  { %12624 = vmatpush3.bf16.msra.mxu0 %v12621_v17  ;;  %11971 = vmatprep.mubr.msk.f32.mxu0 %vm172_vm0, %v15102_v53 }
0x2bb7   :  { %12626 = vmatprep.subr.bf16.mxu0 %v12625_v59 }
0x2bba   :  { %12628 = vmatpush3.bf16.msra.mxu0 %v12625_v59  ;;  %v10572_v59 = vld [vmem:[%s15688_s5 + $0x250] sm:$0xff] }
0x2bbb   :  { %12635 = vmatprep.subr.bf16.mxu0 %v13388_v24 }
0x2bbd   :  { %11972 = vmatmul.mubr.msk.f32.vlgmr.msra.gmra.mrb[102].mxu0 %vm172_vm0, %v15099_v19 }
0x2bbe   :  { %11974 = vmatprep.mubr.msk.f32.mxu0 %vm172_vm0, %v15110_v28 }
0x2bc1   :  { %11975 = vmatmul.mubr.msk.f32.gmra.mrb[104].mxu0 %vm172_vm0, %v15106_v50 }
0x2bc2   :  { %11996 = vmatprep.mubr.msk.f32.mxu0 %vm13389_vm2, %v13390_v25 }
0x2c88   :  { %v7505_v49 = vpop.f32.mrb[100].mxu0 }
0x2c89   :  { %v7512_v18 = vrot.slane %v7505_v49, %v13463_v14  ;;  %v11955_v9 = vpop.f32.mrb[101].mxu0  ;;  %v10576_v49 = vld [vmem:[%s15688_s5 + $0x270] sm:$0xff] }
0x2c8b   :  { %v15154_v30 = vsub.f32 %v7437_v8, %v7512_v18  ;;  %v15156_v3 = vsub.f32 %v7438_v55, %v7512_v18 }
0x2c8d   :  { %v7515_v39 = vmul.f32 %v15154_v30, %v15154_v30  ;;  %v7516_v36 = vmul.f32 %v15156_v3, %v15156_v3 }
0x2c8f   :  { %v12619_v51 = vpack.c.bf16 %v7516_v36, %v7515_v39 }
0x2c90   :  { %v11973_v23 = vpop.f32.mrb[102].mxu0 }
0x2c91   :  { %v7720_v60 = vadd.f32 %v11973_v23, %v7627_v52  ;;  %12620 = vmatpush3.bf16.msra.mxu1 %v12619_v51  ;;  %v7714_v45 = vpop.f32.mrb[103].mxu0  ;;  %v12641_v52 = vpack.c.bf16 %v10572_v59, %v10570_v56 }
0x2c92   :  { %v7715_v44 = vadd.f32 %v7714_v45, %v7625_v47  ;;  %12629 = vmatprep.subr.bf16.mxu1 %v13388_v24  ;;  %v10574_v47 = vld [vmem:[%s15688_s5 + $0x260] sm:$0xff] }
0x2c93   :  { %v7750_v21 = vadd.f32 %v7740_v7, %v7720_v60  ;;  %v12645_v18 = vpack.c.bf16 %v10576_v49, %v10574_v47 }
0x2c94   :  { %v7749_v27 = vadd.f32 %v7738_v38, %v7715_v44  ;;  %11961 = vmatmul.mubr.msk.f32.vlgmr.msra.gmra.mrb[104].mxu1 %vm254_vm1, %v13391_v40  ;;  %v11976_v31 = vpop.f32.mrb[104].mxu0 }
0x2c95   :  { %v7758_v32 = vadd.f32 %v7756_v34, %v7750_v21  ;;  %v7730_v37 = vadd.f32 %v11976_v31, %v7631_v29  ;;  %v7724_v10 = vpop.f32.mrb[105].mxu0  ;;  %11985 = vmatprep.mubr.msk.f32.mxu1 %vm13389_vm2, %v13390_v25 }
0x2c96   :  { %v7757_v58 = vadd.f32 %v7756_v34, %v7749_v27  ;;  %v7725_v13 = vadd.f32 %v7724_v10, %v7629_v11  ;;  %v7601_v27 = vrot.slane %v15015_v20, %v13677_v5 }
0x2c97   :  { %v7752_v55 = vadd.f32 %v7744_v0, %v7730_v37 }
0x2c98   :  { %v12630_v46 = vpack.c.bf16 %v7758_v32, %v7757_v58  ;;  %v7751_v8 = vadd.f32 %v7742_v16, %v7725_v13 }
0x2c99   :  { %v7760_v17 = vadd.f32 %v7756_v34, %v7752_v55 }
0x2c9a   :  { %v7759_v33 = vadd.f32 %v7756_v34, %v7751_v8  ;;  %12631 = vmatpush3.bf16.msra.mxu1 %v12630_v46 }
0x2c9b   :  { %12632 = vmatprep.subr.bf16.mxu1 %v13388_v24 }
0x2c9c   :  { %v12633_v22 = vpack.c.bf16 %v7760_v17, %v7759_v33 }
0x2c9e   :  { %12634 = vmatpush3.bf16.msra.mxu1 %v12633_v22 }
0x2c9f   :  { %12642 = vmatprep.subr.bf16.mxu1 %v12641_v52 }
0x2ca1   :  { %11986 = vmatmul.mubr.msk.f32.vlgmr.msra.gmra.mrb[106].mxu1 %vm172_vm0, %v13392_v35 }
0x2ca2   :  { %12644 = vmatpush3.bf16.msra.mxu1 %v12641_v52 }
0x2ca3   :  { %12646 = vmatprep.subr.bf16.mxu1 %v12645_v18 }
0x2ca6   :  { %12648 = vmatpush3.bf16.msra.mxu1 %v12645_v18 }
0x2d67   :  { %v7583_v9 = vpop.f32.mrb[104].mxu1 }
0x2d68   :  { %v7584_v7 = vadd.f32 1e-05, %v7583_v9  ;;  %v11962_v38 = vpop.f32.mrb[105].mxu1 }
0x2d6a   :  { %13167 = vrsqrt.f32 %v7584_v7 }
0x2d74   :  { %v13168_v39 = vpop.eup %13167  ;;  %v7827_v36 = vpop.f32.mrb[106].mxu1 }
0x2d75   :  { %v7589_v51 = vrot.slane %v13168_v39, 5  ;;  %v7834_v29 = vrot.slane %v7827_v36, %v13463_v14  ;;  %v11987_v23 = vpop.f32.mrb[107].mxu1 }
0x2d76   :  { %v7929_v23 = vrot.slane %v15015_v20, %v13715_v1 }
0x2d77   :  { %v7591_v11 = vmul.f32 %v15015_v20, %v7589_v51  ;;  %v7835_v60 = vsub.f32 %v7757_v58, %v7834_v29  ;;  %v7836_v34 = vsub.f32 %v7758_v32, %v7834_v29  ;;  %v7837_v45 = vsub.f32 %v7759_v33, %v7834_v29 }
0x2d78   :  { %v7838_v44 = vsub.f32 %v7760_v17, %v7834_v29 }
0x2d79   :  { %v7595_v21 = vrot.slane %v7591_v11, %v13674_v2  ;;  %v7839_v31 = vmul.f32 %v7835_v60, %v7835_v60  ;;  %v7840_v37 = vmul.f32 %v7836_v34, %v7836_v34  ;;  %v7841_v10 = vmul.f32 %v7837_v45, %v7837_v45 }
0x2d7a   :  { %v7842_v55 = vmul.f32 %v7838_v44, %v7838_v44 }
0x2d7b   :  { %v7596_v0 = vmul.f32 %v7595_v21, %v15154_v30  ;;  %v7597_v13 = vmul.f32 %v7595_v21, %v15156_v3  ;;  %v12636_v16 = vpack.c.bf16 %v7840_v37, %v7839_v31 }
0x2d7c   :  { %v12639_v8 = vpack.c.bf16 %v7842_v55, %v7841_v10 }
0x2d7d   :  { %v7603_v46 = vadd.f32 %v7601_v27, %v7597_v13  ;;  %12637 = vmatpush3.bf16.msra.mxu0 %v12636_v16  ;;  %v7602_v58 = vadd.f32 %v7601_v27, %v7596_v0 }
0x2d7e   :  { %12638 = vmatprep.subr.bf16.mxu0 %v13388_v24 }
0x2d7f   :  { %v10559_v32 = vmul.f32 -1.442695, %v7603_v46  ;;  %v10558_v17 = vmul.f32 -1.442695, %v7602_v58 }
0x2d81   :  { %13169 = vpow2.f32 %v10559_v32  ;;  %12640 = vmatpush3.bf16.msra.mxu0 %v12639_v8  ;;  %v10571_v32 = vld [vmem:[%s15688_s5 + $0x248] sm:$0xff] }
0x2d82   :  { %13171 = vpow2.f32 %v10558_v17  ;;  %v10575_v8 = vld [vmem:[%s15688_s5 + $0x268] sm:$0xff]  ;;  %v10577_v17 = vld [vmem:[%s15688_s5 + $0x278] sm:$0xff] }
0x2d84   :  { %11997 = vmatmul.mubr.msk.f32.vlgmr.msra.gmra.mrb[106].mxu0 %vm172_vm0, %v13392_v35 }
0x2d85   :  { %12014 = vmatprep.mubr.msk.f32.mxu0 %vm254_vm1, %v14996_v48  ;;  %v15209_v48 = vld [vmem:[%s15686_s3] sm:$0xff] }
0x2d8b   :  { %v13170_v30 = vpop.eup %13169 }
0x2d8c   :  { %v13172_v3 = vpop.eup %13171  ;;  %v7611_v33 = vadd.f32 1.0, %v13170_v30  ;;  %v12671_v30 = vpack.c.bf16 %v10577_v17, %v10575_v8 }
0x2d8d   :  { %v7610_v22 = vadd.f32 1.0, %v13172_v3 }
0x2d8e   :  { %13173 = vrcp.f32 %v7611_v33 }
0x2d8f   :  { %13175 = vrcp.f32 %v7610_v22 }
0x2d98   :  { %v13174_v56 = vpop.eup %13173 }
0x2d99   :  { %v13176_v59 = vpop.eup %13175  ;;  %v7617_v52 = vmul.f32 %v13174_v56, %v7603_v46 }
0x2d9a   :  { %v7616_v47 = vmul.f32 %v13176_v59, %v7602_v58 }
0x2d9b   :  { %v15197_v49 = vadd.f32 %v7617_v52, %v15001_v12  ;;  %v15216_v12 = vld [vmem:[%s15689_s6 + $0x48] sm:$0x7f] }
0x2d9c   :  { %v15200_v18 = vadd.f32 %v7616_v47, %v15004_v42  ;;  %v8190_v42 = vrot.slane %v15216_v12, %v13466_v15 }
0x2d9e   :  { %12007 = vmatprep.mubr.msk.f32.mxu1 %vm172_vm0, %v15200_v18  ;;  %8192 = vrot.lane.b32.xlu1 %v8190_v42, %s13385_s26 }
0x2d9f   :  { %12008 = vmatmul.mubr.msk.f32.vlgmr.msra.gmra.mrb[108].mxu1 %vm172_vm0, %v15197_v49 }
0x2da0   :  { %12034 = vmatprep.mubr.msk.f32.mxu1 %vm172_vm0, %v15209_v48 }
0x2e57   :  { %v7909_v9 = vpop.f32.mrb[106].mxu0 }
0x2e58   :  { %v7910_v7 = vadd.f32 1e-05, %v7909_v9  ;;  %v11998_v38 = vpop.f32.mrb[107].mxu0 }
0x2e5a   :  { %13177 = vrsqrt.f32 %v7910_v7 }
0x2e64   :  { %v13178_v39 = vpop.eup %13177 }
0x2e65   :  { %v7915_v36 = vrot.slane %v13178_v39, 3 }
0x2e67   :  { %v7917_v51 = vmul.f32 %v15015_v20, %v7915_v36  ;;  %v10573_v20 = vld [vmem:[%s15688_s5 + $0x258] sm:$0xff] }
0x2e69   :  { %v7921_v29 = vrot.slane %v7917_v51, %v13712_v62 }
0x2e6b   :  { %v7923_v11 = vmul.f32 %v7921_v29, %v7836_v34  ;;  %v7922_v21 = vmul.f32 %v7921_v29, %v7835_v60  ;;  %v7924_v27 = vmul.f32 %v7921_v29, %v7837_v45  ;;  %v7925_v31 = vmul.f32 %v7921_v29, %v7838_v44  ;;  %v8193_v29 = vpop.permute.xlu1 %8192 }
0x2e6c   :  { %v12667_v44 = vpack.c.bf16 %v10573_v20, %v10571_v32 }
0x2e6d   :  { %v7931_v37 = vadd.f32 %v7929_v23, %v7923_v11  ;;  %v7930_v10 = vadd.f32 %v7929_v23, %v7922_v21  ;;  %v7932_v0 = vadd.f32 %v7929_v23, %v7924_v27  ;;  %v7933_v13 = vadd.f32 %v7929_v23, %v7925_v31 }
0x2e6f   :  { %v10567_v16 = vmul.f32 -1.442695, %v7931_v37  ;;  %v10566_v55 = vmul.f32 -1.442695, %v7930_v10  ;;  %v10568_v46 = vmul.f32 -1.442695, %v7932_v0 }
0x2e70   :  { %v10569_v58 = vmul.f32 -1.442695, %v7933_v13 }
0x2e71   :  { %13179 = vpow2.f32 %v10567_v16 }
0x2e72   :  { %v15231_v60 = vpop.f32.mrb[108].mxu1  ;;  %13181 = vpow2.f32 %v10566_v55 }
0x2e73   :  { %v15233_v34 = vpop.f32.mrb[109].mxu1  ;;  %13183 = vpow2.f32 %v10568_v46 }
0x2e74   :  { %v12649_v45 = vpack.c.bf16 %v15231_v60, %v15233_v34  ;;  %13185 = vpow2.f32 %v10569_v58 }
0x2e76   :  { %12650 = vmatprep.subr.bf16.mxu0 %v12649_v45 }
0x2e77   :  { %12652 = vmatpush3.bf16.msra.mxu0 %v12649_v45 }
0x2e78   :  { %12668 = vmatprep.subr.bf16.mxu0 %v12667_v44 }
0x2e7a   :  { %12015 = vmatmul.mubr.msk.f32.vlgmr.msra.gmra.mrb[108].mxu0 %vm254_vm1, %v15030_v57 }
0x2e7b   :  { %v13180_v3 = vpop.eup %13179  ;;  %12017 = vmatprep.mubr.msk.f32.mxu0 %vm254_vm1, %v15037_v54  ;;  %12670 = vmatpush3.bf16.msra.mxu0 %v12667_v44 }
0x2e7c   :  { %v13182_v33 = vpop.eup %13181  ;;  %v7947_v22 = vadd.f32 1.0, %v13180_v3  ;;  %12672 = vmatprep.subr.bf16.mxu0 %v12671_v30 }
0x2e7d   :  { %v13184_v56 = vpop.eup %13183  ;;  %v7946_v59 = vadd.f32 1.0, %v13182_v33 }
0x2e7e   :  { %v13186_v52 = vpop.eup %13185  ;;  %13187 = vrcp.f32 %v7947_v22  ;;  %12018 = vmatmul.mubr.msk.f32.gmra.mrb[110].mxu0 %vm254_vm1, %v15044_v26  ;;  %v7948_v47 = vadd.f32 1.0, %v13184_v56 }
0x2e7f   :  { %12020 = vmatprep.mubr.msk.f32.mxu0 %vm254_vm1, %v15051_v41  ;;  %12674 = vmatpush3.bf16.msra.mxu0 %v12671_v30  ;;  %13189 = vrcp.f32 %v7946_v59  ;;  %v7949_v57 = vadd.f32 1.0, %v13186_v52 }
0x2e80   :  { %13191 = vrcp.f32 %v7948_v47  ;;  %12681 = vmatprep.subr.bf16.mxu0 %v13388_v24 }
0x2e81   :  { %13193 = vrcp.f32 %v7949_v57 }
0x2e82   :  { %12021 = vmatmul.mubr.msk.f32.gmra.mrb[112].mxu0 %vm254_vm1, %v15058_v6 }
0x2e83   :  { %12023 = vmatprep.mubr.msk.f32.mxu0 %vm254_vm1, %v15065_v63 }
0x2e86   :  { %12024 = vmatmul.mubr.msk.f32.gmra.mrb[114].mxu0 %vm254_vm1, %v15072_v43 }
0x2e88   :  { %v13188_v54 = vpop.eup %13187 }
0x2e89   :  { %v13190_v26 = vpop.eup %13189  ;;  %v7959_v42 = vmul.f32 %v13188_v54, %v7931_v37 }
0x2e8a   :  { %v13192_v41 = vpop.eup %13191  ;;  %v7958_v9 = vmul.f32 %v13190_v26, %v7930_v10 }
0x2e8b   :  { %v13194_v7 = vpop.eup %13193  ;;  %v15259_v38 = vadd.f32 %v7959_v42, %v15099_v19  ;;  %v7960_v39 = vmul.f32 %v13192_v41, %v7932_v0 }
0x2e8c   :  { %v15262_v36 = vadd.f32 %v7958_v9, %v15102_v53  ;;  %v7961_v6 = vmul.f32 %v13194_v7, %v7933_v13 }
0x2e8d   :  { %v15267_v63 = vadd.f32 %v7960_v39, %v15110_v28  ;;  %v10590_v46 = vmul.f32 -1.442695, %v15259_v38 }
0x2e8e   :  { %12059 = vmatprep.mubr.msk.f32.mxu0 %vm172_vm0, %v15262_v36  ;;  %v15274_v43 = vadd.f32 %v7961_v6, %v15106_v50  ;;  %v10589_v58 = vmul.f32 -1.442695, %v15262_v36 }
0x2e8f   :  { %12060 = vmatmul.mubr.msk.f32.vlgmr.msra.gmra.mrb[116].mxu0 %vm172_vm0, %v15259_v38  ;;  %13195 = vpow2.f32 %v10590_v46  ;;  %v10591_v20 = vmul.f32 -1.442695, %v15267_v63 }
0x2e90   :  { %12062 = vmatprep.mubr.msk.f32.mxu0 %vm172_vm0, %v15267_v63  ;;  %v10592_v32 = vmul.f32 -1.442695, %v15274_v43  ;;  %13197 = vpow2.f32 %v10589_v58 }
0x2e92   :  { %13199 = vpow2.f32 %v10592_v32 }
0x2e93   :  { %12063 = vmatmul.mubr.msk.f32.gmra.mrb[118].mxu0 %vm172_vm0, %v15274_v43  ;;  %13201 = vpow2.f32 %v10591_v20 }
0x2e94   :  { %12084 = vmatprep.mubr.msk.f32.mxu0 %vm13389_vm2, %v13390_v25 }
0x2e99   :  { %v13196_v45 = vpop.eup %13195 }
0x2e9a   :  { %v13198_v44 = vpop.eup %13197  ;;  %v8176_v8 = vadd.f32 1.0, %v13196_v45  ;;  %v8619_v45 = vrot.slane %v15216_v12, %v13649_v4 }
0x2e9b   :  { %v8175_v30 = vadd.f32 1.0, %v13198_v44 }
0x2e9c   :  { %v13200_v17 = vpop.eup %13199  ;;  %13203 = vrcp.f32 %v8176_v8 }
0x2e9d   :  { %v13202_v3 = vpop.eup %13201  ;;  %v8178_v33 = vadd.f32 1.0, %v13200_v17  ;;  %13205 = vrcp.f32 %v8175_v30 }
0x2e9e   :  { %v8177_v22 = vadd.f32 1.0, %v13202_v3 }
0x2e9f   :  { %13207 = vrcp.f32 %v8178_v33 }
0x2ea0   :  { %13209 = vrcp.f32 %v8177_v22 }
0x2ea6   :  { %v13204_v56 = vpop.eup %13203 }
0x2ea7   :  { %v13206_v52 = vpop.eup %13205 }
0x2ea9   :  { %v13208_v26 = vpop.eup %13207 }
0x2eaa   :  { %v13210_v9 = vpop.eup %13209 }
0x2f4d   :  { %v12016_v19 = vpop.f32.mrb[108].mxu0 }
0x2f4e   :  { %v8124_v53 = vpop.f32.mrb[109].mxu0 }
0x2f51   :  { %v12019_v51 = vpop.f32.mrb[110].mxu0 }
0x2f52   :  { %v8134_v28 = vpop.f32.mrb[111].mxu0 }
0x2f55   :  { %v12022_v23 = vpop.f32.mrb[112].mxu0 }
0x2f56   :  { %v8196_v11 = vadd.f32 %v12022_v23, %v8193_v29  ;;  %v8144_v21 = vpop.f32.mrb[113].mxu0 }
0x2f57   :  { %v8195_v27 = vadd.f32 %v8193_v29, %v8144_v21 }
0x2f58   :  { %8205 = vrot.lane.b32.xlu1 %v8196_v11, %s13385_s26 }
0x2f59   :  { %v12025_v31 = vpop.f32.mrb[114].mxu0  ;;  %8203 = vrot.lane.b32.xlu0 %v8195_v27, %s13385_s26 }
0x2f5a   :  { %v8198_v50 = vadd.f32 %v12025_v31, %v8193_v29  ;;  %v8154_v37 = vpop.f32.mrb[115].mxu0 }
0x2f5b   :  { %v8197_v10 = vadd.f32 %v8193_v29, %v8154_v37 }
0x2f5c   :  { %8209 = vrot.lane.b32.xlu1 %v8198_v50, %s13385_s26 }
0x2f5d   :  { %8207 = vrot.lane.b32.xlu0 %v8197_v10, %s13385_s26 }
0x2f60   :  { %8489 = vrot.lane.b32.xlu1 %v12016_v19, %s13386_s20 }
0x2f61   :  { %8487 = vrot.lane.b32.xlu0 %v8124_v53, %s13386_s20  ;;  %v8297_v53 = vrot.slane %v15216_v12, %v13463_v14 }
0x2f62   :  { %v15286_v0 = vpop.f32.mrb[116].mxu0 }
0x2f63   :  { %v15288_v13 = vpop.f32.mrb[117].mxu0 }
0x2f64   :  { %8602 = vrot.lane.b32.xlu1 %v12022_v23, %s13387_s21 }
0x2f65   :  { %8600 = vrot.lane.b32.xlu0 %v8144_v21, %s13387_s21 }
0x2f66   :  { %v15292_v16 = vpop.f32.mrb[118].mxu0 }
0x2f67   :  { %v15294_v55 = vpop.f32.mrb[119].mxu0 }
0x2f68   :  { %8493 = vrot.lane.b32.xlu1 %v12019_v51, %s13386_s20  ;;  %v8299_v51 = vadd.f32 %v15231_v60, %v8297_v53 }
0x2f69   :  { %8491 = vrot.lane.b32.xlu0 %v8134_v28, %s13386_s20  ;;  %v8298_v28 = vadd.f32 %v8297_v53, %v15233_v34 }
0x2f6c   :  { %8606 = vrot.lane.b32.xlu1 %v12025_v31, %s13387_s21 }
0x2f6d   :  { %8604 = vrot.lane.b32.xlu0 %v8154_v37, %s13387_s21 }
0x2fca   :  { %v8206_v59 = vpop.permute.xlu1 %8205 }
0x2fcb   :  { %v8216_v47 = vmul.f32 %v13204_v56, %v8206_v59  ;;  %v8204_v57 = vpop.permute.xlu0 %8203 }
0x2fcc   :  { %v8215_v54 = vmul.f32 %v13206_v52, %v8204_v57 }
0x2fce   :  { %v12653_v42 = vpack.c.bf16 %v8216_v47, %v8215_v54  ;;  %v8210_v41 = vpop.permute.xlu1 %8209 }
0x2fcf   :  { %v8218_v7 = vmul.f32 %v13208_v26, %v8210_v41  ;;  %v8208_v39 = vpop.permute.xlu0 %8207 }
0x2fd0   :  { %v8217_v6 = vmul.f32 %v13210_v9, %v8208_v39  ;;  %12654 = vmatprep.subr.bf16.mxu1 %v12653_v42  ;;  %v10611_v9 = vld [vmem:[%s15688_s5 + $0x290] sm:$0xff]  ;;  %v10613_v39 = vld [vmem:[%s15688_s5 + $0x2a0] sm:$0xff] }
0x2fd1   :  { %12656 = vmatpush3.bf16.msra.mxu1 %v12653_v42 }
0x2fd2   :  { %v12657_v19 = vpack.c.bf16 %v8218_v7, %v8217_v6  ;;  %v10615_v6 = vld [vmem:[%s15688_s5 + $0x2b0] sm:$0xff] }
0x2fd3   :  { %v8488_v31 = vpop.permute.xlu0 %8487 }
0x2fd4   :  { %12658 = vmatprep.subr.bf16.mxu1 %v12657_v19  ;;  %v8578_v58 = vadd.f32 %v15288_v13, %v8488_v31 }
0x2fd5   :  { %12660 = vmatpush3.bf16.msra.mxu1 %v12657_v19  ;;  %v12691_v19 = vpack.c.bf16 %v10615_v6, %v10613_v39  ;;  %v15413_v6 = vld [vmem:[%s15685_s2 + $0x10] sm:$0xff] }
0x2fd6   :  { %12661 = vmatprep.subr.bf16.mxu1 %v13388_v24 }
0x2fd7   :  { %v8601_v60 = vpop.permute.xlu0 %8600 }
0x2fd8   :  { %12035 = vmatmul.mubr.msk.f32.vlgmr.msra.gmra.mrb[110].mxu1 %vm172_vm0, %v15118_v61  ;;  %v8490_v61 = vpop.permute.xlu1 %8489  ;;  %v8612_v8 = vadd.f32 %v8601_v60, %v8578_v58 }
0x2fd9   :  { %12041 = vmatprep.mubr.msk.f32.mxu1 %vm13389_vm2, %v13390_v25  ;;  %v8583_v10 = vadd.f32 %v15286_v0, %v8490_v61 }
0x2fda   :  { %v8620_v13 = vadd.f32 %v8619_v45, %v8612_v8 }
0x2fdb   :  { %v8492_v34 = vpop.permute.xlu0 %8491 }
0x2fdc   :  { %v8603_v50 = vpop.permute.xlu1 %8602  ;;  %v8588_v56 = vadd.f32 %v15294_v55, %v8492_v34  ;;  %v10609_v55 = vld [vmem:[%s15688_s5 + $0x280] sm:$0xff] }
0x2fdd   :  { %v8613_v44 = vadd.f32 %v8603_v50, %v8583_v10  ;;  %v12687_v7 = vpack.c.bf16 %v10611_v9, %v10609_v55 }
0x2fdf   :  { %v8605_v33 = vpop.permute.xlu0 %8604  ;;  %v8621_v52 = vadd.f32 %v8619_v45, %v8613_v44 }
0x2fe0   :  { %v8494_v37 = vpop.permute.xlu1 %8493  ;;  %v8614_v57 = vadd.f32 %v8605_v33, %v8588_v56 }
0x2fe1   :  { %v8593_v22 = vadd.f32 %v15292_v16, %v8494_v37  ;;  %v12676_v26 = vpack.c.bf16 %v8621_v52, %v8620_v13 }
0x2fe2   :  { %v8622_v41 = vadd.f32 %v8619_v45, %v8614_v57 }
0x2fe4   :  { %v8607_v3 = vpop.permute.xlu1 %8606 }
0x2fe5   :  { %v8615_v47 = vadd.f32 %v8607_v3, %v8593_v22 }
0x2fe7   :  { %v8623_v42 = vadd.f32 %v8619_v45, %v8615_v47  ;;  %v8464_v45 = vrot.slane %v15216_v12, %v13677_v5 }
0x2fe9   :  { %v12679_v16 = vpack.c.bf16 %v8623_v42, %v8622_v41 }
0x30ab   :  { %v12036_v29 = vpop.f32.mrb[110].mxu1 }
0x30ac   :  { %v8301_v23 = vadd.f32 %v12036_v29, %v8299_v51  ;;  %v8285_v11 = vpop.f32.mrb[111].mxu1 }
0x30ad   :  { %v8300_v21 = vadd.f32 %v8298_v28, %v8285_v11 }
0x30af   :  { %v12662_v27 = vpack.c.bf16 %v8301_v23, %v8300_v21 }
0x30b1   :  { %12663 = vmatpush3.bf16.msra.mxu1 %v12662_v27 }
0x30b2   :  { %12664 = vmatprep.subr.bf16.mxu1 %v13388_v24 }
0x30b4   :  { %12042 = vmatmul.mubr.msk.f32.vlgmr.msra.gmra.mrb[112].mxu1 %vm254_vm1, %v13391_v40 }
0x30b5   :  { %12048 = vmatprep.mubr.msk.f32.mxu1 %vm13389_vm2, %v13390_v25 }
0x3187   :  { %v8368_v46 = vpop.f32.mrb[112].mxu1 }
0x3188   :  { %v8375_v32 = vrot.slane %v8368_v46, %v13463_v14  ;;  %v12043_v20 = vpop.f32.mrb[113].mxu1 }
0x318a   :  { %v8376_v17 = vsub.f32 %v8300_v21, %v8375_v32  ;;  %v8377_v30 = vsub.f32 %v8301_v23, %v8375_v32 }
0x318c   :  { %v8378_v0 = vmul.f32 %v8376_v17, %v8376_v17  ;;  %v8379_v59 = vmul.f32 %v8377_v30, %v8377_v30 }
0x318e   :  { %v12665_v54 = vpack.c.bf16 %v8379_v59, %v8378_v0  ;;  %v15372_v59 = vld [vmem:[%s15685_s2] sm:$0xff] }
0x3190   :  { %12666 = vmatpush3.bf16.msra.mxu1 %v12665_v54 }
0x3191   :  { %12675 = vmatprep.subr.bf16.mxu1 %v13388_v24 }
0x3193   :  { %12049 = vmatmul.mubr.msk.f32.vlgmr.msra.gmra.mrb[114].mxu1 %vm254_vm1, %v13391_v40 }
0x3194   :  { %12677 = vmatpush3.bf16.msra.mxu1 %v12676_v26  ;;  %12073 = vmatprep.mubr.msk.f32.mxu1 %vm13389_vm2, %v13390_v25 }
0x3195   :  { %12678 = vmatprep.subr.bf16.mxu1 %v13388_v24 }
0x3198   :  { %12680 = vmatpush3.bf16.msra.mxu1 %v12679_v16  ;;  %v15391_v16 = vld [vmem:[%s15689_s6 + $0x50] sm:$0x7f] }
0x3199   :  { %12688 = vmatprep.subr.bf16.mxu1 %v12687_v7 }
0x319b   :  { %12074 = vmatmul.mubr.msk.f32.vlgmr.msra.gmra.mrb[116].mxu1 %vm172_vm0, %v13392_v35 }
0x319c   :  { %12690 = vmatpush3.bf16.msra.mxu1 %v12687_v7 }
0x319d   :  { %12692 = vmatprep.subr.bf16.mxu1 %v12691_v19 }
0x31a0   :  { %12694 = vmatpush3.bf16.msra.mxu1 %v12691_v19  ;;  %v15420_v19 = vld [vmem:[%s15685_s2 + $0x18] sm:$0xff] }
0x3266   :  { %v8446_v53 = vpop.f32.mrb[114].mxu1 }
0x3267   :  { %v8447_v51 = vadd.f32 1e-05, %v8446_v53  ;;  %v12050_v28 = vpop.f32.mrb[115].mxu1  ;;  %v15427_v53 = vld [vmem:[%s15685_s2 + $0x20] sm:$0xff] }
0x3268   :  { %v15441_v28 = vld [vmem:[%s15685_s2 + $0x30] sm:$0xff] }
0x3269   :  { %13211 = vrsqrt.f32 %v8447_v51  ;;  %v15434_v51 = vld [vmem:[%s15685_s2 + $0x28] sm:$0xff] }
0x326e   :  { %v8690_v29 = vpop.f32.mrb[116].mxu1 }
0x326f   :  { %v8697_v23 = vrot.slane %v8690_v29, %v13463_v14  ;;  %v12075_v11 = vpop.f32.mrb[117].mxu1  ;;  %v15448_v29 = vld [vmem:[%s15685_s2 + $0x38] sm:$0xff] }
0x3271   :  { %v15346_v21 = vsub.f32 %v8620_v13, %v8697_v23  ;;  %v15348_v27 = vsub.f32 %v8621_v52, %v8697_v23  ;;  %v15350_v61 = vsub.f32 %v8622_v41, %v8697_v23  ;;  %v15352_v31 = vsub.f32 %v8623_v42, %v8697_v23 }
0x3273   :  { %v13212_v50 = vpop.eup %13211  ;;  %v8702_v60 = vmul.f32 %v15346_v21, %v15346_v21  ;;  %v8703_v37 = vmul.f32 %v15348_v27, %v15348_v27  ;;  %v8704_v46 = vmul.f32 %v15350_v61, %v15350_v61  ;;  %v8705_v58 = vmul.f32 %v15352_v31, %v15352_v31 }
0x3274   :  { %v8452_v34 = vrot.slane %v13212_v50, 5 }
0x3275   :  { %v12682_v10 = vpack.c.bf16 %v8703_v37, %v8702_v60  ;;  %v12685_v44 = vpack.c.bf16 %v8705_v58, %v8704_v46 }
0x3276   :  { %v8454_v32 = vmul.f32 %v15216_v12, %v8452_v34 }
0x3277   :  { %12683 = vmatpush3.bf16.msra.mxu0 %v12682_v10 }
0x3278   :  { %v8458_v20 = vrot.slane %v8454_v32, %v13674_v2  ;;  %12684 = vmatprep.subr.bf16.mxu0 %v13388_v24 }
0x327a   :  { %v8459_v8 = vmul.f32 %v8458_v20, %v8376_v17  ;;  %v8460_v3 = vmul.f32 %v8458_v20, %v8377_v30 }
0x327b   :  { %12686 = vmatpush3.bf16.msra.mxu0 %v12685_v44 }
0x327c   :  { %v8466_v33 = vadd.f32 %v8464_v45, %v8460_v3  ;;  %v8465_v22 = vadd.f32 %v8464_v45, %v8459_v8 }
0x327e   :  { %v10598_v56 = vmul.f32 -1.442695, %v8466_v33  ;;  %12085 = vmatmul.mubr.msk.f32.vlgmr.msra.gmra.mrb[120].mxu0 %vm172_vm0, %v13392_v35  ;;  %v10597_v0 = vmul.f32 -1.442695, %v8465_v22 }
0x327f   :  { %12102 = vmatprep.mubr.msk.f32.mxu0 %vm254_vm1, %v15372_v59 }
0x3280   :  { %13213 = vpow2.f32 %v10598_v56 }
0x3281   :  { %13215 = vpow2.f32 %v10597_v0 }
0x328a   :  { %v13214_v17 = vpop.eup %13213 }
0x328b   :  { %v13216_v30 = vpop.eup %13215  ;;  %v8474_v52 = vadd.f32 1.0, %v13214_v17  ;;  %v8792_v17 = vrot.slane %v15216_v12, %v13715_v1 }
0x328c   :  { %v8473_v13 = vadd.f32 1.0, %v13216_v30 }
0x328d   :  { %13217 = vrcp.f32 %v8474_v52 }
0x328e   :  { %13219 = vrcp.f32 %v8473_v13 }
0x3297   :  { %v13218_v47 = vpop.eup %13217 }
0x3298   :  { %v13220_v57 = vpop.eup %13219  ;;  %v8480_v54 = vmul.f32 %v13218_v47, %v8466_v33 }
0x3299   :  { %v8479_v26 = vmul.f32 %v13220_v57, %v8465_v22 }
0x329a   :  { %v15377_v42 = vadd.f32 %v8480_v54, %v15197_v49  ;;  %v9053_v49 = vrot.slane %v15391_v16, %v13466_v15 }
0x329b   :  { %v15380_v41 = vadd.f32 %v8479_v26, %v15200_v18 }
0x329c   :  { %9055 = vrot.lane.b32.xlu0 %v9053_v49, %s13385_s26 }
0x329d   :  { %12095 = vmatprep.mubr.msk.f32.mxu1 %vm172_vm0, %v15380_v41 }
0x329e   :  { %12096 = vmatmul.mubr.msk.f32.vlgmr.msra.gmra.mrb[118].mxu1 %vm172_vm0, %v15377_v42 }
0x329f   :  { %12122 = vmatprep.mubr.msk.f32.mxu1 %vm172_vm0, %v15209_v48  ;;  %v15406_v48 = vld [vmem:[%s15685_s2 + $0x8] sm:$0xff] }
0x330e   :  { %v9056_v37 = vpop.permute.xlu0 %9055 }
0x3351   :  { %v8772_v18 = vpop.f32.mrb[120].mxu0 }
0x3352   :  { %v12086_v55 = vpop.f32.mrb[121].mxu0  ;;  %v8773_v8 = vadd.f32 1e-05, %v8772_v18 }
0x3354   :  { %13221 = vrsqrt.f32 %v8773_v8 }
0x335e   :  { %v13222_v3 = vpop.eup %13221 }
0x335f   :  { %v8778_v33 = vrot.slane %v13222_v3, 3 }
0x3361   :  { %v8780_v22 = vmul.f32 %v15216_v12, %v8778_v33 }
0x3363   :  { %v8784_v56 = vrot.slane %v8780_v22, %v13712_v62 }
0x3365   :  { %v8786_v0 = vmul.f32 %v8784_v56, %v15348_v27  ;;  %v8785_v30 = vmul.f32 %v8784_v56, %v15346_v21  ;;  %v8788_v52 = vmul.f32 %v8784_v56, %v15352_v31  ;;  %v8787_v47 = vmul.f32 %v8784_v56, %v15350_v61 }
0x3367   :  { %v8794_v13 = vadd.f32 %v8792_v17, %v8786_v0  ;;  %v8793_v57 = vadd.f32 %v8792_v17, %v8785_v30  ;;  %v8796_v54 = vadd.f32 %v8792_v17, %v8788_v52  ;;  %v8795_v49 = vadd.f32 %v8792_v17, %v8787_v47 }
0x3369   :  { %v10606_v26 = vmul.f32 -1.442695, %v8794_v13  ;;  %v10605_v18 = vmul.f32 -1.442695, %v8793_v57  ;;  %v10608_v55 = vmul.f32 -1.442695, %v8796_v54 }
0x336b   :  { %13223 = vpow2.f32 %v10606_v26 }
0x336c   :  { %13225 = vpow2.f32 %v10605_v18 }
0x336d   :  { %13227 = vpow2.f32 %v10608_v55 }
0x3371   :  { %v15396_v9 = vpop.f32.mrb[118].mxu1 }
0x3372   :  { %v15398_v7 = vpop.f32.mrb[119].mxu1 }
0x3373   :  { %v12695_v39 = vpack.c.bf16 %v15396_v9, %v15398_v7 }
0x3375   :  { %12696 = vmatprep.subr.bf16.mxu0 %v12695_v39  ;;  %v13224_v27 = vpop.eup %13223 }
0x3376   :  { %12698 = vmatpush3.bf16.msra.mxu0 %v12695_v39  ;;  %v10607_v39 = vmul.f32 -1.442695, %v8795_v49  ;;  %v13226_v12 = vpop.eup %13225 }
0x3377   :  { %12710 = vmatprep.subr.bf16.mxu0 %v13388_v24  ;;  %v13228_v21 = vpop.eup %13227 }
0x3378   :  { %13229 = vpow2.f32 %v10607_v39 }
0x3379   :  { %12103 = vmatmul.mubr.msk.f32.vlgmr.msra.gmra.mrb[122].mxu0 %vm254_vm1, %v15406_v48 }
0x337a   :  { %12105 = vmatprep.mubr.msk.f32.mxu0 %vm254_vm1, %v15413_v6 }
0x337d   :  { %12106 = vmatmul.mubr.msk.f32.gmra.mrb[124].mxu0 %vm254_vm1, %v15420_v19 }
0x337e   :  { %12108 = vmatprep.mubr.msk.f32.mxu0 %vm254_vm1, %v15427_v53 }
0x3381   :  { %12109 = vmatmul.mubr.msk.f32.gmra.mrb[126].mxu0 %vm254_vm1, %v15434_v51 }
0x3382   :  { %12111 = vmatprep.mubr.msk.f32.mxu0 %vm254_vm1, %v15441_v28  ;;  %v13230_v31 = vpop.eup %13229 }
0x3383   :  { %v8811_v61 = vadd.f32 1.0, %v13230_v31 }
0x3385   :  { %12112 = vmatmul.mubr.msk.f32.gmra.mrb[128].mxu0 %vm254_vm1, %v15448_v29 }
0x3386   :  { %12136 = vmatprep.mubr.msk.f32.mxu0 %vm13389_vm2, %v13390_v25 }
0x344c   :  { %v12104_v23 = vpop.f32.mrb[122].mxu0 }
0x344d   :  { %v8987_v11 = vpop.f32.mrb[123].mxu0 }
0x3450   :  { %v12107_v50 = vpop.f32.mrb[124].mxu0 }
0x3451   :  { %v8997_v60 = vpop.f32.mrb[125].mxu0 }
0x3454   :  { %v12110_v34 = vpop.f32.mrb[126].mxu0 }
0x3455   :  { %v9059_v10 = vadd.f32 %v12110_v34, %v9056_v37  ;;  %v9007_v46 = vpop.f32.mrb[127].mxu0 }
0x3456   :  { %v9058_v58 = vadd.f32 %v9056_v37, %v9007_v46 }
0x3457   :  { %9068 = vrot.lane.b32.xlu0 %v9059_v10, %s13385_s26 }
0x3458   :  { %v12113_v32 = vpop.f32.mrb[128].mxu0  ;;  %9066 = vrot.lane.b32.xlu1 %v9058_v58, %s13385_s26 }
0x3459   :  { %v9061_v20 = vadd.f32 %v12113_v32, %v9056_v37  ;;  %v9017_v45 = vpop.f32.mrb[129].mxu0 }
0x345a   :  { %v9060_v44 = vadd.f32 %v9056_v37, %v9017_v45 }
0x345b   :  { %9072 = vrot.lane.b32.xlu0 %v9061_v20, %s13385_s26 }
0x345c   :  { %9070 = vrot.lane.b32.xlu1 %v9060_v44, %s13385_s26 }
0x345f   :  { %9352 = vrot.lane.b32.xlu0 %v12104_v23, %s13386_s20  ;;  %v8810_v23 = vadd.f32 1.0, %v13224_v27 }
0x3460   :  { %9350 = vrot.lane.b32.xlu1 %v8987_v11, %s13386_s20  ;;  %v8809_v11 = vadd.f32 1.0, %v13226_v12 }
0x3461   :  { %13231 = vrcp.f32 %v8810_v23 }
0x3462   :  { %13233 = vrcp.f32 %v8809_v11 }
0x3463   :  { %9465 = vrot.lane.b32.xlu0 %v12110_v34, %s13387_s21 }
0x3464   :  { %9463 = vrot.lane.b32.xlu1 %v9007_v46, %s13387_s21 }
0x3467   :  { %9356 = vrot.lane.b32.xlu0 %v12107_v50, %s13386_s20  ;;  %v8812_v50 = vadd.f32 1.0, %v13228_v21 }
0x3468   :  { %9354 = vrot.lane.b32.xlu1 %v8997_v60, %s13386_s20 }
0x3469   :  { %13235 = vrcp.f32 %v8812_v50  ;;  %v15494_v50 = vld [vmem:[%s15686_s3 + $0x8] sm:$0xff] }
0x346a   :  { %13237 = vrcp.f32 %v8811_v61  ;;  %v9160_v61 = vrot.slane %v15391_v16, %v13463_v14 }
0x346b   :  { %9469 = vrot.lane.b32.xlu0 %v12113_v32, %s13387_s21  ;;  %v13232_v60 = vpop.eup %13231 }
0x346c   :  { %9467 = vrot.lane.b32.xlu1 %v9017_v45, %s13387_s21  ;;  %v13234_v37 = vpop.eup %13233  ;;  %v8822_v34 = vmul.f32 %v13232_v60, %v8794_v13  ;;  %v9162_v60 = vadd.f32 %v15396_v9, %v9160_v61  ;;  %v10614_v9 = vld [vmem:[%s15688_s5 + $0x2a8] sm:$0xff] }
0x346d   :  { %v8821_v46 = vmul.f32 %v13234_v37, %v8793_v57  ;;  %v9161_v37 = vadd.f32 %v9160_v61, %v15398_v7  ;;  %v10616_v7 = vld [vmem:[%s15688_s5 + $0x2b8] sm:$0xff] }
0x346e   :  { %v15475_v20 = vadd.f32 %v8822_v34, %v15259_v38 }
0x346f   :  { %v15478_v44 = vadd.f32 %v8821_v46, %v15262_v36  ;;  %v10612_v46 = vld [vmem:[%s15688_s5 + $0x298] sm:$0xff] }
0x3470   :  { %v10629_v8 = vmul.f32 -1.442695, %v15475_v20 }
0x3471   :  { %v10628_v33 = vmul.f32 -1.442695, %v15478_v44 }
0x3472   :  { %13239 = vpow2.f32 %v10629_v8 }
0x3473   :  { %v13236_v10 = vpop.eup %13235  ;;  %13241 = vpow2.f32 %v10628_v33 }
0x3474   :  { %v13238_v58 = vpop.eup %13237  ;;  %v8824_v32 = vmul.f32 %v13236_v10, %v8796_v54  ;;  %v10610_v10 = vld [vmem:[%s15688_s5 + $0x288] sm:$0xff] }
0x3475   :  { %v8823_v45 = vmul.f32 %v13238_v58, %v8795_v49  ;;  %v12713_v8 = vpack.c.bf16 %v10612_v46, %v10610_v10 }
0x3476   :  { %v15482_v3 = vadd.f32 %v8824_v32, %v15274_v43 }
0x3477   :  { %v15486_v22 = vadd.f32 %v8823_v45, %v15267_v63 }
0x3478   :  { %v10631_v56 = vmul.f32 -1.442695, %v15482_v3 }
0x3479   :  { %v10630_v38 = vmul.f32 -1.442695, %v15486_v22 }
0x347a   :  { %13243 = vpow2.f32 %v10631_v56  ;;  %v12717_v56 = vpack.c.bf16 %v10616_v7, %v10614_v9  ;;  %v10648_v9 = vld [vmem:[%s15688_s5 + $0x2c0] sm:$0xff]  ;;  %v10649_v7 = vld [vmem:[%s15688_s5 + $0x2d0] sm:$0xff] }
0x347b   :  { %13245 = vpow2.f32 %v10630_v38 }
0x347c   :  { %v13240_v36 = vpop.eup %13239 }
0x347d   :  { %v13242_v0 = vpop.eup %13241  ;;  %v9039_v17 = vadd.f32 1.0, %v13240_v36 }
0x347e   :  { %v9038_v52 = vadd.f32 1.0, %v13242_v0 }
0x347f   :  { %13247 = vrcp.f32 %v9039_v17 }
0x3480   :  { %13249 = vrcp.f32 %v9038_v52 }
0x3484   :  { %v13244_v30 = vpop.eup %13243 }
0x3485   :  { %v13246_v43 = vpop.eup %13245  ;;  %v9041_v13 = vadd.f32 1.0, %v13244_v30 }
0x3486   :  { %v9040_v47 = vadd.f32 1.0, %v13246_v43 }
0x3487   :  { %13251 = vrcp.f32 %v9041_v13 }
0x3488   :  { %13253 = vrcp.f32 %v9040_v47 }
0x3489   :  { %v13248_v63 = vpop.eup %13247 }
0x348a   :  { %v13250_v54 = vpop.eup %13249 }
0x3491   :  { %v13252_v55 = vpop.eup %13251 }
0x3492   :  { %v13254_v12 = vpop.eup %13253 }
0x34c9   :  { %v9069_v57 = vpop.permute.xlu0 %9068 }
0x34ca   :  { %v9079_v26 = vmul.f32 %v13248_v63, %v9069_v57  ;;  %v9067_v49 = vpop.permute.xlu1 %9066 }
0x34cb   :  { %v9078_v18 = vmul.f32 %v13250_v54, %v9067_v49 }
0x34cd   :  { %v12699_v39 = vpack.c.bf16 %v9079_v26, %v9078_v18  ;;  %v9073_v27 = vpop.permute.xlu0 %9072 }
0x34ce   :  { %v9081_v23 = vmul.f32 %v13252_v55, %v9073_v27  ;;  %v9071_v21 = vpop.permute.xlu1 %9070 }
0x34cf   :  { %v9080_v11 = vmul.f32 %v13254_v12, %v9071_v21  ;;  %12700 = vmatprep.subr.bf16.mxu1 %v12699_v39 }
0x34d0   :  { %12702 = vmatpush3.bf16.msra.mxu1 %v12699_v39  ;;  %v9482_v39 = vrot.slane %v15391_v16, %v13649_v4 }
0x34d1   :  { %v12703_v31 = vpack.c.bf16 %v9081_v23, %v9080_v11  ;;  %v9353_v38 = vpop.permute.xlu0 %9352 }
0x34d2   :  { %v9351_v36 = vpop.permute.xlu1 %9350 }
0x34d3   :  { %12704 = vmatprep.subr.bf16.mxu1 %v12703_v31 }
0x34d4   :  { %12706 = vmatpush3.bf16.msra.mxu1 %v12703_v31 }
0x34d5   :  { %12707 = vmatprep.subr.bf16.mxu1 %v13388_v24  ;;  %v9466_v52 = vpop.permute.xlu0 %9465 }
0x34d6   :  { %v9464_v43 = vpop.permute.xlu1 %9463 }
0x34d7   :  { %12123 = vmatmul.mubr.msk.f32.vlgmr.msra.gmra.mrb[120].mxu1 %vm172_vm0, %v15494_v50 }
0x34d8   :  { %12129 = vmatprep.mubr.msk.f32.mxu1 %vm13389_vm2, %v13390_v25 }
0x34d9   :  { %v9357_v26 = vpop.permute.xlu0 %9356 }
0x34da   :  { %v9355_v18 = vpop.permute.xlu1 %9354 }
0x34de   :  { %v9468_v10 = vpop.permute.xlu1 %9467 }
0x35aa   :  { %v12124_v34 = vpop.f32.mrb[120].mxu1 }
0x35ab   :  { %v9164_v58 = vadd.f32 %v12124_v34, %v9162_v60  ;;  %v9148_v32 = vpop.f32.mrb[121].mxu1 }
0x35ac   :  { %v9163_v45 = vadd.f32 %v9161_v37, %v9148_v32  ;;  %v9470_v37 = vpop.permute.xlu0 %9469 }
0x35ae   :  { %v12708_v33 = vpack.c.bf16 %v9164_v58, %v9163_v45 }
0x35b0   :  { %12709 = vmatpush3.bf16.msra.mxu1 %v12708_v33 }
0x35b1   :  { %12714 = vmatprep.subr.bf16.mxu1 %v12713_v8 }
0x35b3   :  { %12130 = vmatmul.mubr.msk.f32.vlgmr.msra.gmra.mrb[122].mxu1 %vm254_vm1, %v13391_v40 }
0x35b4   :  { %12716 = vmatpush3.bf16.msra.mxu1 %v12713_v8  ;;  %12147 = vmatprep.mubr.msk.f32.mxu1 %vm172_vm0, %v15478_v44 }
0x35b5   :  { %12718 = vmatprep.subr.bf16.mxu1 %v12717_v56 }
0x35b8   :  { %12720 = vmatpush3.bf16.msra.mxu1 %v12717_v56  ;;  %v12733_v56 = vpack.c.bf16 %v10649_v7, %v10648_v9 }
0x35b9   :  { %12727 = vmatprep.subr.bf16.mxu1 %v13388_v24 }
0x35bb   :  { %12148 = vmatmul.mubr.msk.f32.vlgmr.msra.gmra.mrb[124].mxu1 %vm172_vm0, %v15475_v20 }
0x35bc   :  { %12150 = vmatprep.mubr.msk.f32.mxu1 %vm172_vm0, %v15486_v22 }
0x35bf   :  { %12151 = vmatmul.mubr.msk.f32.gmra.mrb[126].mxu1 %vm172_vm0, %v15482_v3 }
0x35c0   :  { %12172 = vmatprep.mubr.msk.f32.mxu1 %vm13389_vm2, %v13390_v25 }
0x3686   :  { %v9231_v0 = vpop.f32.mrb[122].mxu1 }
0x3687   :  { %v9238_v17 = vrot.slane %v9231_v0, %v13463_v14  ;;  %v12131_v30 = vpop.f32.mrb[123].mxu1 }
0x3689   :  { %v15530_v13 = vsub.f32 %v9163_v45, %v9238_v17  ;;  %v15532_v47 = vsub.f32 %v9164_v58, %v9238_v17 }
0x368b   :  { %v9241_v63 = vmul.f32 %v15530_v13, %v15530_v13  ;;  %v9242_v57 = vmul.f32 %v15532_v47, %v15532_v47 }
0x368d   :  { %v12711_v54 = vpack.c.bf16 %v9242_v57, %v9241_v63 }
0x368e   :  { %v12149_v49 = vpop.f32.mrb[124].mxu1 }
0x368f   :  { %v9446_v55 = vadd.f32 %v12149_v49, %v9353_v38  ;;  %12712 = vmatpush3.bf16.msra.mxu0 %v12711_v54  ;;  %v9440_v27 = vpop.f32.mrb[125].mxu1  ;;  %v10650_v38 = vld [vmem:[%s15688_s5 + $0x2e0] sm:$0xff] }
0x3690   :  { %v9441_v12 = vadd.f32 %v9440_v27, %v9351_v36  ;;  %12721 = vmatprep.subr.bf16.mxu0 %v13388_v24  ;;  %v10651_v36 = vld [vmem:[%s15688_s5 + $0x2f0] sm:$0xff] }
0x3691   :  { %v9476_v23 = vadd.f32 %v9466_v52, %v9446_v55  ;;  %v12737_v0 = vpack.c.bf16 %v10651_v36, %v10650_v38 }
0x3692   :  { %v9475_v21 = vadd.f32 %v9464_v43, %v9441_v12  ;;  %12137 = vmatmul.mubr.msk.f32.vlgmr.msra.gmra.mrb[130].mxu0 %vm254_vm1, %v13391_v40  ;;  %v12152_v11 = vpop.f32.mrb[126].mxu1 }
0x3693   :  { %v9484_v31 = vadd.f32 %v9482_v39, %v9476_v23  ;;  %v9456_v61 = vadd.f32 %v12152_v11, %v9357_v26  ;;  %v9450_v60 = vpop.f32.mrb[127].mxu1  ;;  %12161 = vmatprep.mubr.msk.f32.mxu0 %vm13389_vm2, %v13390_v25  ;;  %v9327_v23 = vrot.slane %v15391_v16, %v13677_v5 }
0x3694   :  { %v9483_v34 = vadd.f32 %v9482_v39, %v9475_v21  ;;  %v9451_v4 = vadd.f32 %v9450_v60, %v9355_v18 }
0x3695   :  { %v9478_v46 = vadd.f32 %v9470_v37, %v9456_v61 }
0x3696   :  { %v12722_v58 = vpack.c.bf16 %v9484_v31, %v9483_v34  ;;  %v9477_v32 = vadd.f32 %v9468_v10, %v9451_v4 }
0x3697   :  { %v9486_v45 = vadd.f32 %v9482_v39, %v9478_v46 }
0x3698   :  { %v9485_v8 = vadd.f32 %v9482_v39, %v9477_v32  ;;  %12723 = vmatpush3.bf16.msra.mxu0 %v12722_v58 }
0x3699   :  { %12724 = vmatprep.subr.bf16.mxu0 %v13388_v24 }
0x369a   :  { %v12725_v33 = vpack.c.bf16 %v9486_v45, %v9485_v8 }
0x369c   :  { %12726 = vmatpush3.bf16.msra.mxu0 %v12725_v33 }
0x369d   :  { %12734 = vmatprep.subr.bf16.mxu0 %v12733_v56 }
0x369f   :  { %12162 = vmatmul.mubr.msk.f32.vlgmr.msra.gmra.mrb[132].mxu0 %vm172_vm0, %v13392_v35 }
0x36a0   :  { %12736 = vmatpush3.bf16.msra.mxu0 %v12733_v56 }
0x36a1   :  { %12738 = vmatprep.subr.bf16.mxu0 %v12737_v0 }
0x36a4   :  { %12740 = vmatpush3.bf16.msra.mxu0 %v12737_v0 }
0x3765   :  { %v9309_v17 = vpop.f32.mrb[130].mxu0 }
0x3766   :  { %v9310_v30 = vadd.f32 1e-05, %v9309_v17  ;;  %v12138_v52 = vpop.f32.mrb[131].mxu0 }
0x3768   :  { %13255 = vrsqrt.f32 %v9310_v30 }
0x3772   :  { %v13256_v43 = vpop.eup %13255  ;;  %v9553_v63 = vpop.f32.mrb[132].mxu0 }
0x3773   :  { %v9315_v57 = vrot.slane %v13256_v43, 5  ;;  %v9560_v54 = vrot.slane %v9553_v63, %v13463_v14  ;;  %v12163_v26 = vpop.f32.mrb[133].mxu0 }
0x3775   :  { %v9317_v49 = vmul.f32 %v15391_v16, %v9315_v57  ;;  %v15562_v18 = vsub.f32 %v9483_v34, %v9560_v54  ;;  %v15564_v55 = vsub.f32 %v9484_v31, %v9560_v54  ;;  %v15566_v39 = vsub.f32 %v9485_v8, %v9560_v54 }
0x3776   :  { %v15568_v27 = vsub.f32 %v9486_v45, %v9560_v54 }
0x3777   :  { %v9321_v12 = vrot.slane %v9317_v49, %v13674_v2  ;;  %v9565_v21 = vmul.f32 %v15562_v18, %v15562_v18  ;;  %v9566_v11 = vmul.f32 %v15564_v55, %v15564_v55  ;;  %v9567_v61 = vmul.f32 %v15566_v39, %v15566_v39 }
0x3778   :  { %v9568_v34 = vmul.f32 %v15568_v27, %v15568_v27 }
0x3779   :  { %v9322_v31 = vmul.f32 %v9321_v12, %v15530_v13  ;;  %v9323_v60 = vmul.f32 %v9321_v12, %v15532_v47  ;;  %v12728_v37 = vpack.c.bf16 %v9566_v11, %v9565_v21 }
0x377a   :  { %v12731_v58 = vpack.c.bf16 %v9568_v34, %v9567_v61 }
0x377b   :  { %v9329_v4 = vadd.f32 %v9327_v23, %v9323_v60  ;;  %12729 = vmatpush3.bf16.msra.mxu1 %v12728_v37  ;;  %v9328_v10 = vadd.f32 %v9327_v23, %v9322_v31  ;;  %v9655_v31 = vrot.slane %v15391_v16, %v13715_v1 }
0x377c   :  { %12730 = vmatprep.subr.bf16.mxu1 %v13388_v24 }
0x377d   :  { %v10637_v46 = vmul.f32 -1.442695, %v9329_v4  ;;  %v10636_v32 = vmul.f32 -1.442695, %v9328_v10 }
0x377f   :  { %13257 = vpow2.f32 %v10637_v46  ;;  %12732 = vmatpush3.bf16.msra.mxu1 %v12731_v58 }
0x3780   :  { %13259 = vpow2.f32 %v10636_v32 }
0x3782   :  { %12173 = vmatmul.mubr.msk.f32.vlgmr.msra.gmra.mrb[128].mxu1 %vm172_vm0, %v13392_v35  ;;  %v13358_v35 = vld [vmem:[%s15686_s3] sm:$0xff]  ;;  %s13393_s3 = smov [#allocation2]  }
0x3783   :  { %12190 = vmatprep.mubr.msk.f32.mxu1 %vm254_vm1, %v15372_v59  ;;  %v15605_v59 = vld [vmem:[%s15689_s6 + $0x58] sm:$0x7f]  ;;  %s10208_s6 = sshll.u32 %s13393_s3, 4  ;;  %s10209_s6 = int_to_ptr.vmem [resolvable:$true] %s10208_s6 }
0x3784   :  { %p13364_p1 = scmp.lt.s32.totalorder %s10209_s6, %s10209_s6 }
0x3789   :  { %v13258_v13 = vpop.eup %13257 }
0x378a   :  { %v13260_v47 = vpop.eup %13259  ;;  %v9337_v45 = vadd.f32 1.0, %v13258_v13 }
0x378b   :  { %v9336_v8 = vadd.f32 1.0, %v13260_v47 }
0x378c   :  { %13261 = vrcp.f32 %v9337_v45 }
0x378d   :  { %13263 = vrcp.f32 %v9336_v8 }
0x3796   :  { %v13262_v33 = vpop.eup %13261 }
0x3797   :  { %v13264_v9 = vpop.eup %13263  ;;  %v9343_v7 = vmul.f32 %v13262_v33, %v9329_v4 }
0x3798   :  { %v9342_v56 = vmul.f32 %v13264_v9, %v9328_v10 }
0x3799   :  { %v15589_v38 = vadd.f32 %v9343_v7, %v15377_v42  ;;  %v9908_v42 = vrot.slane %v15605_v59, %v13466_v15 }
0x379a   :  { %v15592_v36 = vadd.f32 %v9342_v56, %v15380_v41 }
0x379b   :  { %9910 = vrot.lane.b32.xlu1 %v9908_v42, %s13385_s26 }
0x379c   :  { %12183 = vmatprep.mubr.msk.f32.mxu0 %vm172_vm0, %v15592_v36 }
0x379d   :  { %12184 = vmatmul.mubr.msk.f32.vlgmr.msra.gmra.mrb[134].mxu0 %vm172_vm0, %v15589_v38 }
0x379e   :  { %12210 = vmatprep.mubr.msk.f32.mxu0 %vm172_vm0, %v13358_v35 }
0x3855   :  { %v9635_v41 = vpop.f32.mrb[128].mxu1 }
0x3856   :  { %v12174_v0 = vpop.f32.mrb[129].mxu1  ;;  %v9636_v12 = vadd.f32 1e-05, %v9635_v41 }
0x3858   :  { %13265 = vrsqrt.f32 %v9636_v12 }
0x3870   :  { %v15610_v17 = vpop.f32.mrb[134].mxu0 }
0x3871   :  { %v15612_v30 = vpop.f32.mrb[135].mxu0 }
0x3872   :  { %v12741_v52 = vpack.c.bf16 %v15610_v17, %v15612_v30 }
0x3874   :  { %12742 = vmatprep.subr.bf16.mxu1 %v12741_v52 }
0x3875   :  { %12744 = vmatpush3.bf16.msra.mxu1 %v12741_v52 }
0x3878   :  { %12191 = vmatmul.mubr.msk.f32.vlgmr.msra.gmra.mrb[130].mxu1 %vm254_vm1, %v15406_v48 }
0x3879   :  { %12193 = vmatprep.mubr.msk.f32.mxu1 %vm254_vm1, %v15413_v6  ;;  %v9911_v6 = vpop.permute.xlu1 %9910 }
0x387c   :  { %12194 = vmatmul.mubr.msk.f32.gmra.mrb[132].mxu1 %vm254_vm1, %v15420_v19 }
0x387d   :  { %12196 = vmatprep.mubr.msk.f32.mxu1 %vm254_vm1, %v15427_v53 }
0x3880   :  { %12197 = vmatmul.mubr.msk.f32.gmra.mrb[134].mxu1 %vm254_vm1, %v15434_v51 }
0x3881   :  { %12199 = vmatprep.mubr.msk.f32.mxu1 %vm254_vm1, %v15441_v28 }
0x3884   :  { %12200 = vmatmul.mubr.msk.f32.gmra.mrb[136].mxu1 %vm254_vm1, %v15448_v29  ;;  %v13266_v29 = vpop.eup %13265 }
0x3885   :  { %v9641_v23 = vrot.slane %v13266_v29, 3 }
0x3887   :  { %v9643_v21 = vmul.f32 %v15391_v16, %v9641_v23 }
0x3889   :  { %v9647_v11 = vrot.slane %v9643_v21, %v13712_v62 }
0x388b   :  { %v9649_v61 = vmul.f32 %v9647_v11, %v15564_v55  ;;  %v9648_v60 = vmul.f32 %v9647_v11, %v15562_v18  ;;  %v9651_v37 = vmul.f32 %v9647_v11, %v15568_v27  ;;  %v9650_v4 = vmul.f32 %v9647_v11, %v15566_v39 }
0x388d   :  { %v9657_v34 = vadd.f32 %v9655_v31, %v9649_v61  ;;  %v9656_v10 = vadd.f32 %v9655_v31, %v9648_v60  ;;  %v9659_v46 = vadd.f32 %v9655_v31, %v9651_v37  ;;  %v9658_v32 = vadd.f32 %v9655_v31, %v9650_v4 }
0x388f   :  { %v10645_v58 = vmul.f32 -1.442695, %v9657_v34  ;;  %v10644_v13 = vmul.f32 -1.442695, %v9656_v10  ;;  %v10647_v47 = vmul.f32 -1.442695, %v9659_v46 }
0x3890   :  { %v10646_v62 = vmul.f32 -1.442695, %v9658_v32 }
0x3891   :  { %13267 = vpow2.f32 %v10645_v58 }
0x3892   :  { %13269 = vpow2.f32 %v10644_v13 }
0x3893   :  { %13271 = vpow2.f32 %v10647_v47 }
0x3894   :  { %13273 = vpow2.f32 %v10646_v62 }
0x389b   :  { %v13268_v55 = vpop.eup %13267 }
0x389c   :  { %v13270_v1 = vpop.eup %13269  ;;  %v9673_v16 = vadd.f32 1.0, %v13268_v55 }
0x389d   :  { %v13272_v18 = vpop.eup %13271  ;;  %v9672_v45 = vadd.f32 1.0, %v13270_v1 }
0x389e   :  { %v13274_v27 = vpop.eup %13273  ;;  %v9675_v8 = vadd.f32 1.0, %v13272_v18  ;;  %13275 = vrcp.f32 %v9673_v16 }
0x389f   :  { %v9674_v39 = vadd.f32 1.0, %v13274_v27  ;;  %13277 = vrcp.f32 %v9672_v45 }
0x38a0   :  { %13279 = vrcp.f32 %v9675_v8 }
0x38a1   :  { %13281 = vrcp.f32 %v9674_v39 }
0x38a8   :  { %v13276_v33 = vpop.eup %13275 }
0x38a9   :  { %v13278_v9 = vpop.eup %13277  ;;  %v9685_v7 = vmul.f32 %v13276_v33, %v9657_v34 }
0x38aa   :  { %v13280_v56 = vpop.eup %13279  ;;  %v9684_v35 = vmul.f32 %v13278_v9, %v9656_v10 }
0x38ab   :  { %v13282_v42 = vpop.eup %13281  ;;  %v9689_v41 = vadd.f32 %v9685_v7, %v15475_v20  ;;  %v9687_v0 = vmul.f32 %v13280_v56, %v9659_v46  ;;  %v10015_v46 = vrot.slane %v15605_v59, %v13463_v14 }
0x38ac   :  { %v9688_v52 = vadd.f32 %v9684_v35, %v15478_v44 }
0x38ad   :  { %v10017_v58 = vadd.f32 %v15610_v17, %v10015_v46 }
0x394b   :  { %v12192_v15 = vpop.f32.mrb[130].mxu1 }
0x394c   :  { %v9846_v48 = vpop.f32.mrb[131].mxu1  ;;  %v9686_v15 = vmul.f32 %v13282_v42, %v9658_v32  ;;  %v10016_v32 = vadd.f32 %v10015_v46, %v15612_v30 }
0x394d   :  { %v10664_v48 = vmul.f32 -1.442695, %v9689_v41 }
0x394f   :  { %v12195_v43 = vpop.f32.mrb[132].mxu1  ;;  %13283 = vpow2.f32 %v10664_v48 }
0x3950   :  { %v9854_v63 = vpop.f32.mrb[133].mxu1  ;;  %v9691_v43 = vadd.f32 %v9687_v0, %v15482_v3 }
0x3951   :  { %v10663_v63 = vmul.f32 -1.442695, %v9688_v52 }
0x3953   :  { %v12198_v57 = vpop.f32.mrb[134].mxu1  ;;  %13285 = vpow2.f32 %v10663_v63 }
0x3954   :  { %v9914_v54 = vadd.f32 %v12198_v57, %v9911_v6  ;;  %v9862_v19 = vpop.f32.mrb[135].mxu1  ;;  %v10666_v57 = vmul.f32 -1.442695, %v9691_v43 }
0x3955   :  { %v9913_v26 = vadd.f32 %v9911_v6, %v9862_v19 }
0x3956   :  { %9923 = vrot.lane.b32.xlu1 %v9914_v54, %s13385_s26  ;;  %13287 = vpow2.f32 %v10666_v57 }
0x3957   :  { %v12201_v53 = vpop.f32.mrb[136].mxu1  ;;  %9921 = vrot.lane.b32.xlu0 %v9913_v26, %s13385_s26 }
0x3958   :  { %v9916_v51 = vadd.f32 %v12201_v53, %v9911_v6  ;;  %v9872_v49 = vpop.f32.mrb[137].mxu1 }
0x3959   :  { %v9915_v28 = vadd.f32 %v9911_v6, %v9872_v49  ;;  %v9690_v6 = vadd.f32 %v9686_v15, %v15486_v22  ;;  %v13284_v19 = vpop.eup %13283 }
0x395a   :  { %9927 = vrot.lane.b32.xlu1 %v9916_v51, %s13385_s26  ;;  %v9894_v53 = vadd.f32 1.0, %v13284_v19 }
0x395b   :  { %9925 = vrot.lane.b32.xlu0 %v9915_v28, %s13385_s26  ;;  %v10665_v54 = vmul.f32 -1.442695, %v9690_v6  ;;  %s13359_s26 = scalar_lea.vmem %s10209_s6, 256 }
0x395c   :  { %p13360_p0 = scmp.ne.s32.totalorder %s10209_s6, %s13359_s26  ;;  %p13365_p2 = scmp.lt.s32.totalorder %s13359_s26, %s13359_s26 }
0x395d   :  { %13289 = vpow2.f32 %v10665_v54  ;;  %v13286_v26 = vpop.eup %13285 }
0x395e   :  { %v9893_v51 = vadd.f32 1.0, %v13286_v26  ;;  %13291 = vrcp.f32 %v9894_v53  ;;  %p13366_p3 = por %p13365_p2, %p13364_p1 }
0x3960   :  { %v13288_v20 = vpop.eup %13287  ;;  %13293 = vrcp.f32 %v9893_v51  ;;  %p13367_p4 = pnand %p13366_p3, %p13360_p0 }
0x3961   :  { %v9896_v44 = vadd.f32 1.0, %v13288_v20 }
0x3963   :  { %13295 = vrcp.f32 %v9896_v44 }
0x3967   :  { %v13290_v49 = vpop.eup %13289 }
0x3968   :  { %v9895_v28 = vadd.f32 1.0, %v13290_v49  ;;  %v13292_v3 = vpop.eup %13291 }
0x396a   :  { %13297 = vrcp.f32 %v9895_v28  ;;  %v13294_v12 = vpop.eup %13293 }
0x396d   :  { %v13296_v11 = vpop.eup %13295 }
0x3974   :  { %v13298_v60 = vpop.eup %13297 }
0x39c8   :  { %v9924_v22 = vpop.permute.xlu1 %9923 }
0x39c9   :  { %v9934_v29 = vmul.f32 %v13292_v3, %v9924_v22  ;;  %v9922_v23 = vpop.permute.xlu0 %9921 }
0x39ca   :  { %v9933_v21 = vmul.f32 %v13294_v12, %v9922_v23 }
0x39cc   :  { %v12745_v61 = vpack.c.bf16 %v9934_v29, %v9933_v21  ;;  %v9928_v31 = vpop.permute.xlu1 %9927 }
0x39cd   :  { %v9936_v37 = vmul.f32 %v13296_v11, %v9928_v31  ;;  %v9926_v34 = vpop.permute.xlu0 %9925 }
0x39ce   :  { %v9935_v4 = vmul.f32 %v13298_v60, %v9926_v34  ;;  %12746 = vmatprep.subr.bf16.mxu0 %v12745_v61 }
0x39cf   :  { %12748 = vmatpush3.bf16.msra.mxu0 %v12745_v61 }
0x39d0   :  { %v12749_v10 = vpack.c.bf16 %v9936_v37, %v9935_v4 }
0x39d2   :  { %12750 = vmatprep.subr.bf16.mxu0 %v12749_v10 }
0x39d3   :  { %12752 = vmatpush3.bf16.msra.mxu0 %v12749_v10 }
0x39d4   :  { %12753 = vmatprep.subr.bf16.mxu0 %v13388_v24 }
0x39d6   :  { %12211 = vmatmul.mubr.msk.f32.vlgmr.msra.gmra.mrb[136].mxu0 %vm172_vm0, %v15494_v50 }
0x39d7   :  { %12217 = vmatprep.mubr.msk.f32.mxu0 %vm13389_vm2, %v13390_v25 }
0x3aa9   :  { %v12212_v13 = vpop.f32.mrb[136].mxu0 }
0x3aaa   :  { %v10019_v47 = vadd.f32 %v12212_v13, %v10017_v58  ;;  %v10003_v62 = vpop.f32.mrb[137].mxu0 }
0x3aab   :  { %v10018_v55 = vadd.f32 %v10016_v32, %v10003_v62 }
0x3aad   :  { %v12754_v1 = vpack.c.bf16 %v10019_v47, %v10018_v55 }
0x3aaf   :  { %12755 = vmatpush3.bf16.msra.mxu0 %v12754_v1 }
0x3ab0   :  { %12756 = vmatprep.subr.bf16.mxu0 %v13388_v24 }
0x3ab2   :  { %12218 = vmatmul.mubr.msk.f32.vlgmr.msra.gmra.mrb[138].mxu0 %vm254_vm1, %v13391_v40 }
0x3ab3   :  { %12224 = vmatprep.mubr.msk.f32.mxu0 %vm13389_vm2, %v13390_v25 }
0x3b85   :  { %v10086_v50 = vpop.f32.mrb[138].mxu0 }
0x3b86   :  { %v10093_v16 = vrot.slane %v10086_v50, %v13463_v14  ;;  %v12219_v17 = vpop.f32.mrb[139].mxu0  ;;  %v10182_v14 = vrot.slane %v15605_v59, %v13677_v5 }
0x3b88   :  { %v10094_v18 = vsub.f32 %v10018_v55, %v10093_v16  ;;  %v10095_v30 = vsub.f32 %v10019_v47, %v10093_v16 }
0x3b8a   :  { %v10096_v45 = vmul.f32 %v10094_v18, %v10094_v18  ;;  %v10097_v27 = vmul.f32 %v10095_v30, %v10095_v30 }
0x3b8c   :  { %v12757_v8 = vpack.c.bf16 %v10097_v27, %v10096_v45 }
0x3b8e   :  { %12758 = vmatpush3.bf16.msra.mxu0 %v12757_v8 }
0x3b91   :  { %12225 = vmatmul.mubr.msk.f32.vlgmr.msra.gmra.mrb[140].mxu0 %vm254_vm1, %v13391_v40 }
0x3c64   :  { %v10164_v24 = vpop.f32.mrb[140].mxu0 }
0x3c65   :  { %v10165_v39 = vadd.f32 1e-05, %v10164_v24  ;;  %v12226_v33 = vpop.f32.mrb[141].mxu0 }
0x3c67   :  { %13299 = vrsqrt.f32 %v10165_v39 }
0x3c71   :  { %v13300_v9 = vpop.eup %13299 }
0x3c72   :  { %v10170_v7 = vrot.slane %v13300_v9, 5 }
0x3c74   :  { %v10172_v25 = vmul.f32 %v15605_v59, %v10170_v7 }
0x3c76   :  { %v10176_v56 = vrot.slane %v10172_v25, %v13674_v2 }
0x3c78   :  { %v10177_v35 = vmul.f32 %v10176_v56, %v10094_v18  ;;  %v10178_v42 = vmul.f32 %v10176_v56, %v10095_v30 }
0x3c7a   :  { %v10183_v41 = vadd.f32 %v10182_v14, %v10177_v35  ;;  %v10184_v0 = vadd.f32 %v10182_v14, %v10178_v42 }
0x3c7c   :  { %v10671_v52 = vmul.f32 -1.442695, %v10183_v41  ;;  %v10672_v15 = vmul.f32 -1.442695, %v10184_v0 }
0x3c7e   :  { %13301 = vpow2.f32 %v10671_v52 }
0x3c7f   :  { %13303 = vpow2.f32 %v10672_v15 }
0x3c88   :  { %v13302_v40 = vpop.eup %13301 }
0x3c89   :  { %v13304_v48 = vpop.eup %13303  ;;  %v10191_v43 = vadd.f32 1.0, %v13302_v40 }
0x3c8a   :  { %v10192_v63 = vadd.f32 1.0, %v13304_v48 }
0x3c8b   :  { %13305 = vrcp.f32 %v10191_v43 }
0x3c8c   :  { %13307 = vrcp.f32 %v10192_v63 }
0x3c95   :  { %v13306_v6 = vpop.eup %13305 }
0x3c96   :  { %v13308_v57 = vpop.eup %13307  ;;  %v10197_v54 = vmul.f32 %v13306_v6, %v10183_v41 }
0x3c97   :  { %v10198_v2 = vmul.f32 %v13308_v57, %v10184_v0 }
0x3c98   :  { %v10199_v5 = vadd.f32 %v10197_v54, %v15592_v36 }
0x3c99   :  { %v10200_v59 = vadd.f32 %v10198_v2, %v15589_v38 }
0x3c9a   :  { %10201 = vst.msk [vmem:[#allocation2] sm:$0xff] %vm172_vm0, %v10199_v5 }
0x3c9b   :  { %10202 = vst.msk [vmem:[#allocation2 + $0x8] sm:$0xff] %vm172_vm0, %v10200_v59 }
0x3c9c   :  { %13370 = shalt.err (!%p13367_p4)
}
0x3c9d   :  { %s13371_s25 = scalar_lea.hbm %s15690_s7, 256 }
0x3c9e   :  { %p13372_p5 = scmp.ne.s32.totalorder %s15690_s7, %s13371_s25  ;;  %p13375_p6 = scmp.lt.u32.totalorder %s13371_s25, %s15690_s7 }
0x3ca0   :  { %p13377_p7 = pnand %p13375_p6, %p13372_p5 }
0x3ca2   :  { %13380 = shalt.err (!%p13377_p7)
}
0x3ca3   :  { %s13394_s21 = smov 128   ;;  %s13395_s28 = smov 8  }
0x3ca4   :  { %10214 = dma.vmem_to_hbm [thread:$0]  %s10209_s6, 256, %s15690_s7, [#allocation3], %s13394_s21, %s13394_s21, %s13395_s28  }
0x3ca5   :  { %13381 = dma.done.wait [#allocation3], 256  }
0x3ca6   :  { %13382 = vsyncadd [#allocation3], 4294967040 }
0x3ca7   :  { %10218 = vsyncpa [#allocation3], 1 }

</bundles_post_ra>
